<compile_context>
chip_gen: v5e
topology: v5e:2x2
jax: 0.10.0
libtpu: 0.0.40
codegen_flags: <defaults>
</compile_context>

<pallas_src>
import functools

import jax
import jax.numpy as jnp
from jax.experimental import pallas as pl
from jax.experimental.pallas import tpu as pltpu


def _round_up(x, m):
    return (x + m - 1) // m * m


def _pick_tile_h(H, Wp, target_rows=512):
    """Largest divisor of H whose row-tile (TH * Wp rows) stays near target_rows."""
    th = 1
    for cand in range(1, H + 1):
        if H % cand == 0 and cand * Wp <= max(target_rows, Wp):
            th = cand
    return th


# --------------------------- pass 1: conv (+bias) + partial BN stats ---------------------------

def _conv_stats_kernel(mask_ref, w_ref, b_ref, body_ref, h0_ref, h1_ref,
                       y_ref, stats_ref, *, tile_h, w_pad, cin):
    m0 = tile_h * w_pad
    # Padded rows [t*TH, t*TH + TH + 2) of this image, flattened to (rows*Wp, Cin),
    # plus 2 zero rows so every shifted window below stays in bounds.
    x_loc = jnp.concatenate(
        [body_ref[0], h0_ref[0], h1_ref[0],
         jnp.zeros((2, cin), dtype=body_ref.dtype)], axis=0)

    # Fold all 9 taps into the contraction dimension:
    #   xk[q, (ki*3+kj)*Cin + ci] = xpad[i+ki, j+kj, ci]  with  q = r*Wp + j.
    pieces = [x_loc[ki * w_pad + kj: ki * w_pad + kj + m0, :]
              for ki in range(3) for kj in range(3)]
    xk = jnp.concatenate(pieces, axis=1)                       # (m0, 9*Cin), bf16

    acc = jnp.dot(xk, w_ref[...], preferred_element_type=jnp.float32)
    acc = acc + b_ref[...]                                     # conv bias (f32)
    y_ref[0] = acc

    # Per-tile BatchNorm partials; mask excludes the width-alignment garbage columns.
    m = mask_ref[...]
    s1 = jnp.sum(acc * m, axis=0, keepdims=True)
    s2 = jnp.sum(acc * acc * m, axis=0, keepdims=True)
    stats_ref[0, 0] = jnp.concatenate([s1, s2], axis=0)        # (2, Cp)


# --------------------------- pass 2: BN affine + LeakyReLU --------------------------------------

def _bn_act_kernel(scale_ref, shift_ref, y_ref, o_ref, *, slope):
    z = y_ref[0] * scale_ref[...] + shift_ref[...]
    o_ref[0] = jnp.where(z >= 0, z, slope * z)


def conv_bn_lrelu(x_nhwc, w_oihw, bias, gamma, beta, *,
                  eps=1e-5, slope=0.01, target_rows=512):
    """One Conv2d(3x3, pad=1) + BatchNorm2d(batch stats) + LeakyReLU(0.01) block (NHWC)."""
    N, H, W, Cin = x_nhwc.shape
    Cout = w_oihw.shape[0]

    Wp = _round_up(W + 2, 8)                 # padded row length, sublane aligned
    Cp = _round_up(max(Cout, 128), 128)      # lane-dense output channels
    TH = _pick_tile_h(H, Wp, target_rows)
    n_t = H // TH
    M0 = TH * Wp

    # Zero-padded input (conv padding + width alignment), bf16 for the MXU, flattened
    # per image so row-tiles are contiguous blocks (no im2col copy in HBM).
    xp = jnp.pad(x_nhwc.astype(jnp.bfloat16),
                 ((0, 0), (1, 1), (1, Wp - W - 1), (0, 0)))
    xp = xp.reshape(N, (H + 2) * Wp, Cin)

    # OIHW -> (ki, kj, ci, co) -> (9*Cin, Cout), zero-pad channels to Cp, bf16.
    w9 = jnp.transpose(w_oihw, (2, 3, 1, 0)).reshape(9 * Cin, Cout)
    w9 = jnp.pad(w9, ((0, 0), (0, Cp - Cout))).astype(jnp.bfloat16)
    b_p = jnp.pad(bias.astype(jnp.float32), (0, Cp - Cout)).reshape(1, Cp)

    # Valid-column mask: position q inside a tile is a real pixel iff (q % Wp) < W.
    mask = (jnp.arange(M0) % Wp < W).astype(jnp.float32).reshape(M0, 1)

    kernel1 = functools.partial(_conv_stats_kernel, tile_h=TH, w_pad=Wp, cin=Cin)
    y, stats = pl.pallas_call(
        kernel1,
        out_shape=(jax.ShapeDtypeStruct((N, H * Wp, Cp), jnp.float32),
                   jax.ShapeDtypeStruct((N, n_t, 2, Cp), jnp.float32)),
        grid_spec=pltpu.PrefetchScalarGridSpec(
            num_scalar_prefetch=0,
            grid=(N, n_t),
            in_specs=[
                pl.BlockSpec((M0, 1), lambda n, t: (0, 0)),              # mask (resident)
                pl.BlockSpec((9 * Cin, Cp), lambda n, t: (0, 0)),        # weights (resident)
                pl.BlockSpec((1, Cp), lambda n, t: (0, 0)),              # bias (resident)
                pl.BlockSpec((1, M0, Cin), lambda n, t: (n, t, 0)),      # body rows
                pl.BlockSpec((1, Wp, Cin),
                             lambda n, t: (n, t * TH + TH, 0)),          # halo row 0
                pl.BlockSpec((1, Wp, Cin),
                             lambda n, t: (n, t * TH + TH + 1, 0)),      # halo row 1
            ],
            out_specs=(
                pl.BlockSpec((1, M0, Cp), lambda n, t: (n, t, 0)),       # conv output tile
                pl.BlockSpec((1, 1, 2, Cp), lambda n, t: (n, t, 0, 0)),  # BN partial sums
            ),
        ),
        compiler_params=pltpu.CompilerParams(
            dimension_semantics=("parallel", "parallel")),
    )(mask, w9, b_p, xp, xp, xp)

    # Global BatchNorm statistics (training mode, biased variance) from the partials.
    # NOTE: E[y^2] - mean^2 in f32; fine at these magnitudes (see review caveat).
    cnt = jnp.float32(N * H * W)
    s = jnp.sum(stats, axis=(0, 1))                        # (2, Cp)
    mean = s[0] / cnt
    var = jnp.maximum(s[1] / cnt - mean * mean, 0.0)
    inv = jax.lax.rsqrt(var + eps)
    g_p = jnp.pad(gamma.astype(jnp.float32), (0, Cp - Cout))
    bt_p = jnp.pad(beta.astype(jnp.float32), (0, Cp - Cout))
    scale = (g_p * inv).reshape(1, Cp)
    shift = (bt_p - mean * g_p * inv).reshape(1, Cp)

    kernel2 = functools.partial(_bn_act_kernel, slope=slope)
    out = pl.pallas_call(
        kernel2,
        out_shape=jax.ShapeDtypeStruct((N, H * Wp, Cp), jnp.float32),
        grid_spec=pltpu.PrefetchScalarGridSpec(
            num_scalar_prefetch=0,
            grid=(N, n_t),
            in_specs=[
                pl.BlockSpec((1, Cp), lambda n, t: (0, 0)),
                pl.BlockSpec((1, Cp), lambda n, t: (0, 0)),
                pl.BlockSpec((1, M0, Cp), lambda n, t: (n, t, 0)),
            ],
            out_specs=pl.BlockSpec((1, M0, Cp), lambda n, t: (n, t, 0)),
        ),
        compiler_params=pltpu.CompilerParams(
            dimension_semantics=("parallel", "parallel")),
    )(scale, shift, y)

    return out.reshape(N, H, Wp, Cp)[:, :, :W, :Cout]


def double_conv_forward(x_nchw, params):
    """DoubleConv.forward. Input/output are NCHW like PyTorch."""
    x = jnp.transpose(x_nchw, (0, 2, 3, 1))   # NCHW -> NHWC
    x = conv_bn_lrelu(x, params["w1"], params["b1"], params["g1"], params["bt1"])
    x = conv_bn_lrelu(x, params["w2"], params["b2"], params["g2"], params["bt2"])
    return jnp.transpose(x, (0, 3, 1, 2))     # NHWC -> NCHW


# --------------------------- pure-JAX reference (same bf16-input convention) --------------------

def _ref_block(x_nhwc, w_oihw, bias, gamma, beta, eps=1e-5, slope=0.01):
    y = jax.lax.conv_general_dilated(
        x_nhwc.astype(jnp.bfloat16),
        jnp.transpose(w_oihw, (2, 3, 1, 0)).astype(jnp.bfloat16),
        window_strides=(1, 1), padding="SAME",
        dimension_numbers=("NHWC", "HWIO", "NHWC"),
        preferred_element_type=jnp.float32) + bias
    mean = y.mean(axis=(0, 1, 2))
    var = ((y - mean) ** 2).mean(axis=(0, 1, 2))
    z = (y - mean) * jax.lax.rsqrt(var + eps) * gamma + beta
    return jnp.where(z >= 0, z, slope * z)


def _ref_forward(x_nchw, p):
    x = jnp.transpose(x_nchw, (0, 2, 3, 1))
    x = _ref_block(x, p["w1"], p["b1"], p["g1"], p["bt1"])
    x = _ref_block(x, p["w2"], p["b2"], p["g2"], p["bt2"])
    return jnp.transpose(x, (0, 3, 1, 2))


if __name__ == "__main__":
    N, Cin, Cout, H, W = 2, 4, 8, 16, 16

    key = jax.random.PRNGKey(0)
    kx, kw1, kb1, kw2, kb2 = jax.random.split(key, 5)

    x = jax.random.normal(kx, (N, Cin, H, W), dtype=jnp.float32)

    params = {
        # conv1: Conv2d(Cin, Cout, k=3, pad=1) + BatchNorm2d(Cout) defaults
        "w1": 0.1 * jax.random.normal(kw1, (Cout, Cin, 3, 3), dtype=jnp.float32),
        "b1": 0.05 * jax.random.normal(kb1, (Cout,), dtype=jnp.float32),
        "g1": jnp.ones((Cout,), dtype=jnp.float32),
        "bt1": jnp.zeros((Cout,), dtype=jnp.float32),
        # conv2: Conv2d(Cout, Cout, k=3, pad=1) + BatchNorm2d(Cout) defaults
        "w2": 0.1 * jax.random.normal(kw2, (Cout, Cout, 3, 3), dtype=jnp.float32),
        "b2": 0.05 * jax.random.normal(kb2, (Cout,), dtype=jnp.float32),
        "g2": jnp.ones((Cout,), dtype=jnp.float32),
        "bt2": jnp.zeros((Cout,), dtype=jnp.float32),
    }

    fwd = jax.jit(double_conv_forward)
    out = jax.block_until_ready(fwd(x, params))
    ref = jax.block_until_ready(_ref_forward(x, params))

    assert out.shape == (N, Cout, H, W), out.shape
    err = float(jnp.max(jnp.abs(out - ref)))
    assert err < 2e-2, f"max abs err {err}"

    print("KERNEL_OK")
</pallas_src>

<mosaic_0001>
module attributes {stable_mosaic.version = 11 : i64} {
  func.func @_bn_act_kernel(%arg0: i32, %arg1: i32, %arg2: memref<1x128xf32, #tpu.memory_space<vmem>>, %arg3: memref<1x128xf32, #tpu.memory_space<vmem>>, %arg4: memref<1x384x128xf32, #tpu.memory_space<vmem>>, %arg5: memref<1x384x128xf32, #tpu.memory_space<vmem>>) attributes {dimension_semantics = [#tpu.dimension_semantics<parallel>, #tpu.dimension_semantics<parallel>], iteration_bounds = array<i64: 2, 1>, scalar_prefetch = 0 : i64, scratch_operands = 0 : i64, tpu.core_type = #tpu.core_type<tc>, window_params = [{pipeline_mode = #tpu.pipeline_mode<synchronous>, transform_indices = @transform_0, window_bounds = array<i64: 1, 128>}, {pipeline_mode = #tpu.pipeline_mode<synchronous>, transform_indices = @transform_1, window_bounds = array<i64: 1, 128>}, {transform_indices = @transform_2, window_bounds = array<i64: 1, 384, 128>}, {transform_indices = @transform_3, window_bounds = array<i64: 1, 384, 128>}]} {
    %c0 = arith.constant 0 : index
    %c0_0 = arith.constant 0 : index
    %c0_1 = arith.constant 0 : index
    %0 = vector.load %arg4[%c0, %c0_0, %c0_1] : memref<1x384x128xf32, #tpu.memory_space<vmem>>, vector<1x384x128xf32>
    %1 = vector.shape_cast %0 : vector<1x384x128xf32> to vector<384x128xf32>
    %c0_2 = arith.constant 0 : index
    %c0_3 = arith.constant 0 : index
    %2 = vector.load %arg2[%c0_2, %c0_3] : memref<1x128xf32, #tpu.memory_space<vmem>>, vector<1x128xf32>
    %3 = vector.broadcast %2 : vector<1x128xf32> to vector<384x128xf32>
    %4 = arith.mulf %1, %3 : vector<384x128xf32>
    %c0_4 = arith.constant 0 : index
    %c0_5 = arith.constant 0 : index
    %5 = vector.load %arg3[%c0_4, %c0_5] : memref<1x128xf32, #tpu.memory_space<vmem>>, vector<1x128xf32>
    %6 = vector.broadcast %5 : vector<1x128xf32> to vector<384x128xf32>
    %7 = arith.addf %4, %6 : vector<384x128xf32>
    %cst = arith.constant 0.000000e+00 : f32
    %8 = vector.broadcast %cst : f32 to vector<384x128xf32>
    %9 = arith.cmpf oge, %7, %8 : vector<384x128xf32>
    %cst_6 = arith.constant 0.00999999977 : f32
    %10 = vector.broadcast %cst_6 : f32 to vector<384x128xf32>
    %11 = arith.mulf %10, %7 : vector<384x128xf32>
    %12 = arith.select %9, %7, %11 : vector<384x128xi1>, vector<384x128xf32>
    %c0_7 = arith.constant 0 : index
    %c0_8 = arith.constant 0 : index
    %c0_9 = arith.constant 0 : index
    %13 = vector.load %arg5[%c0_7, %c0_8, %c0_9] : memref<1x384x128xf32, #tpu.memory_space<vmem>>, vector<1x384x128xf32>
    %14 = vector.shape_cast %13 : vector<1x384x128xf32> to vector<384x128xf32>
    %15 = vector.shape_cast %12 : vector<384x128xf32> to vector<1x384x128xf32>
    tpu.vector_store %arg5[%c0_7, %c0_8, %c0_9], %15 {strides = array<i32>} : memref<1x384x128xf32, #tpu.memory_space<vmem>>, vector<1x384x128xf32>,
    return
  }
  func.func @transform_0(%arg0: i32, %arg1: i32) -> (i32, i32) {
    %c0_i32 = arith.constant 0 : i32
    %c0_i32_0 = arith.constant 0 : i32
    %c0_i32_1 = arith.constant 0 : i32
    return %c0_i32, %c0_i32_0 : i32, i32
  }
  func.func @transform_1(%arg0: i32, %arg1: i32) -> (i32, i32) {
    %c0_i32 = arith.constant 0 : i32
    %c0_i32_0 = arith.constant 0 : i32
    %c0_i32_1 = arith.constant 0 : i32
    return %c0_i32, %c0_i32_0 : i32, i32
  }
  func.func @transform_2(%arg0: i32, %arg1: i32) -> (i32, i32, i32) {
    %c0_i32 = arith.constant 0 : i32
    %c0_i32_0 = arith.constant 0 : i32
    return %arg0, %arg1, %c0_i32 : i32, i32, i32
  }
  func.func @transform_3(%arg0: i32, %arg1: i32) -> (i32, i32, i32) {
    %c0_i32 = arith.constant 0 : i32
    %c0_i32_0 = arith.constant 0 : i32
    return %arg0, %arg1, %c0_i32 : i32, i32, i32
  }
}

module attributes {stable_mosaic.version = 11 : i64} {
  func.func @_conv_stats_kernel(%arg0: i32, %arg1: i32, %arg2: memref<384x1xf32, #tpu.memory_space<vmem>>, %arg3: memref<36x128xbf16, #tpu.memory_space<vmem>>, %arg4: memref<1x128xf32, #tpu.memory_space<vmem>>, %arg5: memref<1x384x4xbf16, #tpu.memory_space<vmem>>, %arg6: memref<1x24x4xbf16, #tpu.memory_space<vmem>>, %arg7: memref<1x24x4xbf16, #tpu.memory_space<vmem>>, %arg8: memref<1x384x128xf32, #tpu.memory_space<vmem>>, %arg9: memref<1x1x2x128xf32, #tpu.memory_space<vmem>>) attributes {dimension_semantics = [#tpu.dimension_semantics<parallel>, #tpu.dimension_semantics<parallel>], iteration_bounds = array<i64: 2, 1>, scalar_prefetch = 0 : i64, scratch_operands = 0 : i64, tpu.core_type = #tpu.core_type<tc>, window_params = [{pipeline_mode = #tpu.pipeline_mode<synchronous>, transform_indices = @transform_0, window_bounds = array<i64: 384, 1>}, {pipeline_mode = #tpu.pipeline_mode<synchronous>, transform_indices = @transform_1, window_bounds = array<i64: 36, 128>}, {pipeline_mode = #tpu.pipeline_mode<synchronous>, transform_indices = @transform_2, window_bounds = array<i64: 1, 128>}, {transform_indices = @transform_3, window_bounds = array<i64: 1, 384, 4>}, {transform_indices = @transform_4, window_bounds = array<i64: 1, 24, 4>}, {transform_indices = @transform_5, window_bounds = array<i64: 1, 24, 4>}, {transform_indices = @transform_6, window_bounds = array<i64: 1, 384, 128>}, {transform_indices = @transform_7, window_bounds = array<i64: 1, 1, 2, 128>}]} {
    %c0 = arith.constant 0 : index
    %c0_0 = arith.constant 0 : index
    %c0_1 = arith.constant 0 : index
    %0 = vector.load %arg5[%c0, %c0_0, %c0_1] : memref<1x384x4xbf16, #tpu.memory_space<vmem>>, vector<1x384x4xbf16>
    %1 = vector.shape_cast %0 : vector<1x384x4xbf16> to vector<384x4xbf16>
    %c0_2 = arith.constant 0 : index
    %c0_3 = arith.constant 0 : index
    %c0_4 = arith.constant 0 : index
    %2 = vector.load %arg6[%c0_2, %c0_3, %c0_4] : memref<1x24x4xbf16, #tpu.memory_space<vmem>>, vector<1x24x4xbf16>
    %3 = vector.shape_cast %2 : vector<1x24x4xbf16> to vector<24x4xbf16>
    %c0_5 = arith.constant 0 : index
    %c0_6 = arith.constant 0 : index
    %c0_7 = arith.constant 0 : index
    %4 = vector.load %arg7[%c0_5, %c0_6, %c0_7] : memref<1x24x4xbf16, #tpu.memory_space<vmem>>, vector<1x24x4xbf16>
    %5 = vector.shape_cast %4 : vector<1x24x4xbf16> to vector<24x4xbf16>
    %cst = arith.constant 0.000000e+00 : bf16
    %6 = vector.broadcast %cst : bf16 to vector<2x4xbf16>
    %7 = tpu.concatenate %1, %3, %5, %6 in 0 : vector<384x4xbf16>, vector<24x4xbf16>, vector<24x4xbf16>, vector<2x4xbf16> -> vector<434x4xbf16>
    %8 = vector.extract_strided_slice %7 {offsets = [0, 0], sizes = [384, 4], strides = [1, 1]} : vector<434x4xbf16> to vector<384x4xbf16>
    %9 = vector.extract_strided_slice %7 {offsets = [1, 0], sizes = [384, 4], strides = [1, 1]} : vector<434x4xbf16> to vector<384x4xbf16>
    %10 = vector.extract_strided_slice %7 {offsets = [2, 0], sizes = [384, 4], strides = [1, 1]} : vector<434x4xbf16> to vector<384x4xbf16>
    %11 = vector.extract_strided_slice %7 {offsets = [24, 0], sizes = [384, 4], strides = [1, 1]} : vector<434x4xbf16> to vector<384x4xbf16>
    %12 = vector.extract_strided_slice %7 {offsets = [25, 0], sizes = [384, 4], strides = [1, 1]} : vector<434x4xbf16> to vector<384x4xbf16>
    %13 = vector.extract_strided_slice %7 {offsets = [26, 0], sizes = [384, 4], strides = [1, 1]} : vector<434x4xbf16> to vector<384x4xbf16>
    %14 = vector.extract_strided_slice %7 {offsets = [48, 0], sizes = [384, 4], strides = [1, 1]} : vector<434x4xbf16> to vector<384x4xbf16>
    %15 = vector.extract_strided_slice %7 {offsets = [49, 0], sizes = [384, 4], strides = [1, 1]} : vector<434x4xbf16> to vector<384x4xbf16>
    %16 = vector.extract_strided_slice %7 {offsets = [50, 0], sizes = [384, 4], strides = [1, 1]} : vector<434x4xbf16> to vector<384x4xbf16>
    %17 = tpu.concatenate %8, %9, %10, %11, %12, %13, %14, %15, %16 in 1 : vector<384x4xbf16>, vector<384x4xbf16>, vector<384x4xbf16>, vector<384x4xbf16>, vector<384x4xbf16>, vector<384x4xbf16>, vector<384x4xbf16>, vector<384x4xbf16>, vector<384x4xbf16> -> vector<384x36xbf16>
    %c0_8 = arith.constant 0 : index
    %c0_9 = arith.constant 0 : index
    %18 = vector.load %arg3[%c0_8, %c0_9] : memref<36x128xbf16, #tpu.memory_space<vmem>>, vector<36x128xbf16>
    %cst_10 = arith.constant dense<0.000000e+00> : vector<384x128xf32>
    %19 = tpu.matmul %17, %18, %cst_10 {dimension_numbers = #tpu.dot_dimension_numbers<[1], [0], [0], [1], [0, 0, 1, 1], [], []>} : vector<384x36xbf16>, vector<36x128xbf16>, vector<384x128xf32> -> vector<384x128xf32>
    %c0_11 = arith.constant 0 : index
    %c0_12 = arith.constant 0 : index
    %20 = vector.load %arg4[%c0_11, %c0_12] : memref<1x128xf32, #tpu.memory_space<vmem>>, vector<1x128xf32>
    %21 = vector.broadcast %20 : vector<1x128xf32> to vector<384x128xf32>
    %22 = arith.addf %19, %21 : vector<384x128xf32>
    %c0_13 = arith.constant 0 : index
    %c0_14 = arith.constant 0 : index
    %c0_15 = arith.constant 0 : index
    %23 = vector.load %arg8[%c0_13, %c0_14, %c0_15] : memref<1x384x128xf32, #tpu.memory_space<vmem>>, vector<1x384x128xf32>
    %24 = vector.shape_cast %23 : vector<1x384x128xf32> to vector<384x128xf32>
    %25 = vector.shape_cast %22 : vector<384x128xf32> to vector<1x384x128xf32>
    tpu.vector_store %arg8[%c0_13, %c0_14, %c0_15], %25 {strides = array<i32>} : memref<1x384x128xf32, #tpu.memory_space<vmem>>, vector<1x384x128xf32>,
    %c0_16 = arith.constant 0 : index
    %c0_17 = arith.constant 0 : index
    %26 = vector.load %arg2[%c0_16, %c0_17] : memref<384x1xf32, #tpu.memory_space<vmem>>, vector<384x1xf32>
    %27 = vector.broadcast %26 : vector<384x1xf32> to vector<384x128xf32>
    %28 = arith.mulf %22, %27 : vector<384x128xf32>
    %cst_18 = arith.constant dense<0.000000e+00> : vector<128xf32>
    %29 = vector.multi_reduction <add>, %28, %cst_18 [0] : vector<384x128xf32> to vector<128xf32>
    %30 = vector.shape_cast %29 : vector<128xf32> to vector<1x128xf32>
    %31 = arith.mulf %22, %22 : vector<384x128xf32>
    %32 = vector.broadcast %26 : vector<384x1xf32> to vector<384x128xf32>
    %33 = arith.mulf %31, %32 : vector<384x128xf32>
    %cst_19 = arith.constant dense<0.000000e+00> : vector<128xf32>
    %34 = vector.multi_reduction <add>, %33, %cst_19 [0] : vector<384x128xf32> to vector<128xf32>
    %35 = vector.shape_cast %34 : vector<128xf32> to vector<1x128xf32>
    %36 = tpu.concatenate %30, %35 in 0 : vector<1x128xf32>, vector<1x128xf32> -> vector<2x128xf32>
    %c0_20 = arith.constant 0 : index
    %c0_21 = arith.constant 0 : index
    %c0_22 = arith.constant 0 : index
    %c0_23 = arith.constant 0 : index
    %37 = vector.load %arg9[%c0_20, %c0_21, %c0_22, %c0_23] : memref<1x1x2x128xf32, #tpu.memory_space<vmem>>, vector<1x1x2x128xf32>
    %38 = vector.shape_cast %37 : vector<1x1x2x128xf32> to vector<2x128xf32>
    %39 = vector.shape_cast %36 : vector<2x128xf32> to vector<1x1x2x128xf32>
    tpu.vector_store %arg9[%c0_20, %c0_21, %c0_22, %c0_23], %39 {strides = array<i32>} : memref<1x1x2x128xf32, #tpu.memory_space<vmem>>, vector<1x1x2x128xf32>,
    return
  }
  func.func @transform_0(%arg0: i32, %arg1: i32) -> (i32, i32) {
    %c0_i32 = arith.constant 0 : i32
    %c0_i32_0 = arith.constant 0 : i32
    %c0_i32_1 = arith.constant 0 : i32
    return %c0_i32, %c0_i32_0 : i32, i32
  }
  func.func @transform_1(%arg0: i32, %arg1: i32) -> (i32, i32) {
    %c0_i32 = arith.constant 0 : i32
    %c0_i32_0 = arith.constant 0 : i32
    %c0_i32_1 = arith.constant 0 : i32
    return %c0_i32, %c0_i32_0 : i32, i32
  }
  func.func @transform_2(%arg0: i32, %arg1: i32) -> (i32, i32) {
    %c0_i32 = arith.constant 0 : i32
    %c0_i32_0 = arith.constant 0 : i32
    %c0_i32_1 = arith.constant 0 : i32
    return %c0_i32, %c0_i32_0 : i32, i32
  }
  func.func @transform_3(%arg0: i32, %arg1: i32) -> (i32, i32, i32) {
    %c0_i32 = arith.constant 0 : i32
    %c0_i32_0 = arith.constant 0 : i32
    return %arg0, %arg1, %c0_i32 : i32, i32, i32
  }
  func.func @transform_4(%arg0: i32, %arg1: i32) -> (i32, i32, i32) {
    %c16_i32 = arith.constant 16 : i32
    %0 = arith.muli %arg1, %c16_i32 : i32
    %c16_i32_0 = arith.constant 16 : i32
    %1 = arith.addi %0, %c16_i32_0 : i32
    %c0_i32 = arith.constant 0 : i32
    %c0_i32_1 = arith.constant 0 : i32
    return %arg0, %1, %c0_i32 : i32, i32, i32
  }
  func.func @transform_5(%arg0: i32, %arg1: i32) -> (i32, i32, i32) {
    %c16_i32 = arith.constant 16 : i32
    %0 = arith.muli %arg1, %c16_i32 : i32
    %c16_i32_0 = arith.constant 16 : i32
    %1 = arith.addi %0, %c16_i32_0 : i32
    %c1_i32 = arith.constant 1 : i32
    %2 = arith.addi %1, %c1_i32 : i32
    %c0_i32 = arith.constant 0 : i32
    %c0_i32_1 = arith.constant 0 : i32
    return %arg0, %2, %c0_i32 : i32, i32, i32
  }
  func.func @transform_6(%arg0: i32, %arg1: i32) -> (i32, i32, i32) {
    %c0_i32 = arith.constant 0 : i32
    %c0_i32_0 = arith.constant 0 : i32
    return %arg0, %arg1, %c0_i32 : i32, i32, i32
  }
  func.func @transform_7(%arg0: i32, %arg1: i32) -> (i32, i32, i32, i32) {
    %c0_i32 = arith.constant 0 : i32
    %c0_i32_0 = arith.constant 0 : i32
    %c0_i32_1 = arith.constant 0 : i32
    return %arg0, %arg1, %c0_i32, %c0_i32_0 : i32, i32, i32, i32
  }
}

module attributes {stable_mosaic.version = 11 : i64} {
  func.func @_conv_stats_kernel(%arg0: i32, %arg1: i32, %arg2: memref<384x1xf32, #tpu.memory_space<vmem>>, %arg3: memref<72x128xbf16, #tpu.memory_space<vmem>>, %arg4: memref<1x128xf32, #tpu.memory_space<vmem>>, %arg5: memref<1x384x8xbf16, #tpu.memory_space<vmem>>, %arg6: memref<1x24x8xbf16, #tpu.memory_space<vmem>>, %arg7: memref<1x24x8xbf16, #tpu.memory_space<vmem>>, %arg8: memref<1x384x128xf32, #tpu.memory_space<vmem>>, %arg9: memref<1x1x2x128xf32, #tpu.memory_space<vmem>>) attributes {dimension_semantics = [#tpu.dimension_semantics<parallel>, #tpu.dimension_semantics<parallel>], iteration_bounds = array<i64: 2, 1>, scalar_prefetch = 0 : i64, scratch_operands = 0 : i64, tpu.core_type = #tpu.core_type<tc>, window_params = [{pipeline_mode = #tpu.pipeline_mode<synchronous>, transform_indices = @transform_0, window_bounds = array<i64: 384, 1>}, {pipeline_mode = #tpu.pipeline_mode<synchronous>, transform_indices = @transform_1, window_bounds = array<i64: 72, 128>}, {pipeline_mode = #tpu.pipeline_mode<synchronous>, transform_indices = @transform_2, window_bounds = array<i64: 1, 128>}, {transform_indices = @transform_3, window_bounds = array<i64: 1, 384, 8>}, {transform_indices = @transform_4, window_bounds = array<i64: 1, 24, 8>}, {transform_indices = @transform_5, window_bounds = array<i64: 1, 24, 8>}, {transform_indices = @transform_6, window_bounds = array<i64: 1, 384, 128>}, {transform_indices = @transform_7, window_bounds = array<i64: 1, 1, 2, 128>}]} {
    %c0 = arith.constant 0 : index
    %c0_0 = arith.constant 0 : index
    %c0_1 = arith.constant 0 : index
    %0 = vector.load %arg5[%c0, %c0_0, %c0_1] : memref<1x384x8xbf16, #tpu.memory_space<vmem>>, vector<1x384x8xbf16>
    %1 = vector.shape_cast %0 : vector<1x384x8xbf16> to vector<384x8xbf16>
    %c0_2 = arith.constant 0 : index
    %c0_3 = arith.constant 0 : index
    %c0_4 = arith.constant 0 : index
    %2 = vector.load %arg6[%c0_2, %c0_3, %c0_4] : memref<1x24x8xbf16, #tpu.memory_space<vmem>>, vector<1x24x8xbf16>
    %3 = vector.shape_cast %2 : vector<1x24x8xbf16> to vector<24x8xbf16>
    %c0_5 = arith.constant 0 : index
    %c0_6 = arith.constant 0 : index
    %c0_7 = arith.constant 0 : index
    %4 = vector.load %arg7[%c0_5, %c0_6, %c0_7] : memref<1x24x8xbf16, #tpu.memory_space<vmem>>, vector<1x24x8xbf16>
    %5 = vector.shape_cast %4 : vector<1x24x8xbf16> to vector<24x8xbf16>
    %cst = arith.constant 0.000000e+00 : bf16
    %6 = vector.broadcast %cst : bf16 to vector<2x8xbf16>
    %7 = tpu.concatenate %1, %3, %5, %6 in 0 : vector<384x8xbf16>, vector<24x8xbf16>, vector<24x8xbf16>, vector<2x8xbf16> -> vector<434x8xbf16>
    %8 = vector.extract_strided_slice %7 {offsets = [0, 0], sizes = [384, 8], strides = [1, 1]} : vector<434x8xbf16> to vector<384x8xbf16>
    %9 = vector.extract_strided_slice %7 {offsets = [1, 0], sizes = [384, 8], strides = [1, 1]} : vector<434x8xbf16> to vector<384x8xbf16>
    %10 = vector.extract_strided_slice %7 {offsets = [2, 0], sizes = [384, 8], strides = [1, 1]} : vector<434x8xbf16> to vector<384x8xbf16>
    %11 = vector.extract_strided_slice %7 {offsets = [24, 0], sizes = [384, 8], strides = [1, 1]} : vector<434x8xbf16> to vector<384x8xbf16>
    %12 = vector.extract_strided_slice %7 {offsets = [25, 0], sizes = [384, 8], strides = [1, 1]} : vector<434x8xbf16> to vector<384x8xbf16>
    %13 = vector.extract_strided_slice %7 {offsets = [26, 0], sizes = [384, 8], strides = [1, 1]} : vector<434x8xbf16> to vector<384x8xbf16>
    %14 = vector.extract_strided_slice %7 {offsets = [48, 0], sizes = [384, 8], strides = [1, 1]} : vector<434x8xbf16> to vector<384x8xbf16>
    %15 = vector.extract_strided_slice %7 {offsets = [49, 0], sizes = [384, 8], strides = [1, 1]} : vector<434x8xbf16> to vector<384x8xbf16>
    %16 = vector.extract_strided_slice %7 {offsets = [50, 0], sizes = [384, 8], strides = [1, 1]} : vector<434x8xbf16> to vector<384x8xbf16>
    %17 = tpu.concatenate %8, %9, %10, %11, %12, %13, %14, %15, %16 in 1 : vector<384x8xbf16>, vector<384x8xbf16>, vector<384x8xbf16>, vector<384x8xbf16>, vector<384x8xbf16>, vector<384x8xbf16>, vector<384x8xbf16>, vector<384x8xbf16>, vector<384x8xbf16> -> vector<384x72xbf16>
    %c0_8 = arith.constant 0 : index
    %c0_9 = arith.constant 0 : index
    %18 = vector.load %arg3[%c0_8, %c0_9] : memref<72x128xbf16, #tpu.memory_space<vmem>>, vector<72x128xbf16>
    %cst_10 = arith.constant dense<0.000000e+00> : vector<384x128xf32>
    %19 = tpu.matmul %17, %18, %cst_10 {dimension_numbers = #tpu.dot_dimension_numbers<[1], [0], [0], [1], [0, 0, 1, 1], [], []>} : vector<384x72xbf16>, vector<72x128xbf16>, vector<384x128xf32> -> vector<384x128xf32>
    %c0_11 = arith.constant 0 : index
    %c0_12 = arith.constant 0 : index
    %20 = vector.load %arg4[%c0_11, %c0_12] : memref<1x128xf32, #tpu.memory_space<vmem>>, vector<1x128xf32>
    %21 = vector.broadcast %20 : vector<1x128xf32> to vector<384x128xf32>
    %22 = arith.addf %19, %21 : vector<384x128xf32>
    %c0_13 = arith.constant 0 : index
    %c0_14 = arith.constant 0 : index
    %c0_15 = arith.constant 0 : index
    %23 = vector.load %arg8[%c0_13, %c0_14, %c0_15] : memref<1x384x128xf32, #tpu.memory_space<vmem>>, vector<1x384x128xf32>
    %24 = vector.shape_cast %23 : vector<1x384x128xf32> to vector<384x128xf32>
    %25 = vector.shape_cast %22 : vector<384x128xf32> to vector<1x384x128xf32>
    tpu.vector_store %arg8[%c0_13, %c0_14, %c0_15], %25 {strides = array<i32>} : memref<1x384x128xf32, #tpu.memory_space<vmem>>, vector<1x384x128xf32>,
    %c0_16 = arith.constant 0 : index
    %c0_17 = arith.constant 0 : index
    %26 = vector.load %arg2[%c0_16, %c0_17] : memref<384x1xf32, #tpu.memory_space<vmem>>, vector<384x1xf32>
    %27 = vector.broadcast %26 : vector<384x1xf32> to vector<384x128xf32>
    %28 = arith.mulf %22, %27 : vector<384x128xf32>
    %cst_18 = arith.constant dense<0.000000e+00> : vector<128xf32>
    %29 = vector.multi_reduction <add>, %28, %cst_18 [0] : vector<384x128xf32> to vector<128xf32>
    %30 = vector.shape_cast %29 : vector<128xf32> to vector<1x128xf32>
    %31 = arith.mulf %22, %22 : vector<384x128xf32>
    %32 = vector.broadcast %26 : vector<384x1xf32> to vector<384x128xf32>
    %33 = arith.mulf %31, %32 : vector<384x128xf32>
    %cst_19 = arith.constant dense<0.000000e+00> : vector<128xf32>
    %34 = vector.multi_reduction <add>, %33, %cst_19 [0] : vector<384x128xf32> to vector<128xf32>
    %35 = vector.shape_cast %34 : vector<128xf32> to vector<1x128xf32>
    %36 = tpu.concatenate %30, %35 in 0 : vector<1x128xf32>, vector<1x128xf32> -> vector<2x128xf32>
    %c0_20 = arith.constant 0 : index
    %c0_21 = arith.constant 0 : index
    %c0_22 = arith.constant 0 : index
    %c0_23 = arith.constant 0 : index
    %37 = vector.load %arg9[%c0_20, %c0_21, %c0_22, %c0_23] : memref<1x1x2x128xf32, #tpu.memory_space<vmem>>, vector<1x1x2x128xf32>
    %38 = vector.shape_cast %37 : vector<1x1x2x128xf32> to vector<2x128xf32>
    %39 = vector.shape_cast %36 : vector<2x128xf32> to vector<1x1x2x128xf32>
    tpu.vector_store %arg9[%c0_20, %c0_21, %c0_22, %c0_23], %39 {strides = array<i32>} : memref<1x1x2x128xf32, #tpu.memory_space<vmem>>, vector<1x1x2x128xf32>,
    return
  }
  func.func @transform_0(%arg0: i32, %arg1: i32) -> (i32, i32) {
    %c0_i32 = arith.constant 0 : i32
    %c0_i32_0 = arith.constant 0 : i32
    %c0_i32_1 = arith.constant 0 : i32
    return %c0_i32, %c0_i32_0 : i32, i32
  }
  func.func @transform_1(%arg0: i32, %arg1: i32) -> (i32, i32) {
    %c0_i32 = arith.constant 0 : i32
    %c0_i32_0 = arith.constant 0 : i32
    %c0_i32_1 = arith.constant 0 : i32
    return %c0_i32, %c0_i32_0 : i32, i32
  }
  func.func @transform_2(%arg0: i32, %arg1: i32) -> (i32, i32) {
    %c0_i32 = arith.constant 0 : i32
    %c0_i32_0 = arith.constant 0 : i32
    %c0_i32_1 = arith.constant 0 : i32
    return %c0_i32, %c0_i32_0 : i32, i32
  }
  func.func @transform_3(%arg0: i32, %arg1: i32) -> (i32, i32, i32) {
    %c0_i32 = arith.constant 0 : i32
    %c0_i32_0 = arith.constant 0 : i32
    return %arg0, %arg1, %c0_i32 : i32, i32, i32
  }
  func.func @transform_4(%arg0: i32, %arg1: i32) -> (i32, i32, i32) {
    %c16_i32 = arith.constant 16 : i32
    %0 = arith.muli %arg1, %c16_i32 : i32
    %c16_i32_0 = arith.constant 16 : i32
    %1 = arith.addi %0, %c16_i32_0 : i32
    %c0_i32 = arith.constant 0 : i32
    %c0_i32_1 = arith.constant 0 : i32
    return %arg0, %1, %c0_i32 : i32, i32, i32
  }
  func.func @transform_5(%arg0: i32, %arg1: i32) -> (i32, i32, i32) {
    %c16_i32 = arith.constant 16 : i32
    %0 = arith.muli %arg1, %c16_i32 : i32
    %c16_i32_0 = arith.constant 16 : i32
    %1 = arith.addi %0, %c16_i32_0 : i32
    %c1_i32 = arith.constant 1 : i32
    %2 = arith.addi %1, %c1_i32 : i32
    %c0_i32 = arith.constant 0 : i32
    %c0_i32_1 = arith.constant 0 : i32
    return %arg0, %2, %c0_i32 : i32, i32, i32
  }
  func.func @transform_6(%arg0: i32, %arg1: i32) -> (i32, i32, i32) {
    %c0_i32 = arith.constant 0 : i32
    %c0_i32_0 = arith.constant 0 : i32
    return %arg0, %arg1, %c0_i32 : i32, i32, i32
  }
  func.func @transform_7(%arg0: i32, %arg1: i32) -> (i32, i32, i32, i32) {
    %c0_i32 = arith.constant 0 : i32
    %c0_i32_0 = arith.constant 0 : i32
    %c0_i32_1 = arith.constant 0 : i32
    return %arg0, %arg1, %c0_i32, %c0_i32_0 : i32, i32, i32, i32
  }
}

</mosaic_0001>

<bundles_post_ra>
// kernel: double_conv_forward.5
= control target key start
LH: loop header
LB: loop body
LE: loop exit
PB: predicated region body
PF: predicated region fallthrough
CT: control target
= control target key end

     0   :  { %s721_s12 = smov 0   ;;  %s723_s13 = smov 0   ;;  %s965_s0 = inlined_call_operand.vmem [shape: f32[1,128], index: 0, kind: input, shape index: {}]   ;;  %s966_s1 = inlined_call_operand.vmem [shape: f32[1,128], index: 1, kind: input, shape index: {}]   ;;  %s967_s2 = inlined_call_operand.vmem [shape: f32[2,384,128], index: 2, kind: input, shape index: {}]   ;;  %s968_s3 = inlined_call_operand.vmem [shape: f32[2,384,128], index: 3, kind: output, shape index: {}]  }
   0x1   :  { %s725_s14 = smov 0  }
   0x2 LB: > { %s25_s15 = sadd.s32 1, %s695_s13  ;;  %p645_p0 = scmp.ge.s32.totalorder %s699_s14, 1  ;;  %s699_s14 = sphi %s725_s14, %s13_s14   ;;  %s695_s13 = sphi %s723_s13, %s970_s13   ;;  %s691_s12 = sphi %s721_s12, %s969_s12  }
   0x3   : > { %p27_p1 = scmp.ge.s32.totalorder %s25_s15, 2  ;;  %p158_p2 = scmp.lt.s32.totalorder %s699_s14, 3 }
   0x5   : > { %s972_s15 = smov (%p27_p1, %s25_s15), 0  ;;  %p159_p3 = pnand %p645_p0, %p158_p2 }
   0x6   : > { %p191_p4 = scmp.lt.s32.totalorder (!%p159_p3), %s691_s12, 1 }
   0x7   : > { %162 = sbr.rel (%p159_p3) target bundleno = 83 (0x53), region = 32 }
   0xc   : > { %s974_s12 = smov (!%p191_p4, %s691_s12), 1  ;;  %v745_v0 = vld [vmem:[%s965_s0] ss:$0 sm:$0xff] }
   0xd   : > { %s650_s16 = smul.u32 384, %s974_s12  ;;  %v755_v1 = vld [vmem:[%s966_s1] ss:$0 sm:$0xff] }
   0xf   : > { %s750_s21 = scalar_lea.vmem %s967_s2, %s650_s16  ;;  %s783_s26 = scalar_lea.vmem %s968_s3, %s650_s16 }
  0x10   : > { %v210_v2 = vld [vmem:[%s750_s21] sm:$0xff]  ;;  %v211_v3 = vld [vmem:[%s750_s21 + $0x8] sm:$0xff]  ;;  %v212_v4 = vld [vmem:[%s750_s21 + $0x10] sm:$0xff] }
  0x11   : > { %v262_v5 = vmul.f32 %v745_v0, %v210_v2  ;;  %v263_v6 = vmul.f32 %v745_v0, %v211_v3  ;;  %v264_v7 = vmul.f32 %v745_v0, %v212_v4  ;;  %v213_v8 = vld [vmem:[%s750_s21 + $0x18] sm:$0xff]  ;;  %v214_v9 = vld [vmem:[%s750_s21 + $0x20] sm:$0xff]  ;;  %v215_v10 = vld [vmem:[%s750_s21 + $0x28] sm:$0xff] }
  0x12   : > { %v265_v11 = vmul.f32 %v745_v0, %v213_v8  ;;  %v266_v12 = vmul.f32 %v745_v0, %v214_v9  ;;  %v267_v13 = vmul.f32 %v745_v0, %v215_v10  ;;  %v216_v14 = vld [vmem:[%s750_s21 + $0x30] sm:$0xff]  ;;  %v217_v15 = vld [vmem:[%s750_s21 + $0x38] sm:$0xff]  ;;  %v218_v24 = vld [vmem:[%s750_s21 + $0x40] sm:$0xff] }
  0x13   : > { %v314_v16 = vadd.f32 %v755_v1, %v262_v5  ;;  %v315_v17 = vadd.f32 %v755_v1, %v263_v6  ;;  %v316_v18 = vadd.f32 %v755_v1, %v264_v7  ;;  %v268_v19 = vmul.f32 %v745_v0, %v216_v14  ;;  %v219_v32 = vld [vmem:[%s750_s21 + $0x48] sm:$0xff]  ;;  %v220_v33 = vld [vmem:[%s750_s21 + $0x50] sm:$0xff]  ;;  %v221_v34 = vld [vmem:[%s750_s21 + $0x58] sm:$0xff] }
  0x14   : > { %v317_v20 = vadd.f32 %v755_v1, %v265_v11  ;;  %v318_v21 = vadd.f32 %v755_v1, %v266_v12  ;;  %v319_v22 = vadd.f32 %v755_v1, %v267_v13  ;;  %v269_v23 = vmul.f32 %v745_v0, %v217_v15  ;;  %v222_v46 = vld [vmem:[%s750_s21 + $0x60] sm:$0xff]  ;;  %v223_v53 = vld [vmem:[%s750_s21 + $0x68] sm:$0xff]  ;;  %v224_v57 = vld [vmem:[%s750_s21 + $0x70] sm:$0xff] }
  0x15   : > { %vm362_vm0 = vcmp.ge.f32.partialorder %v314_v16, 0.0  ;;  %v410_v25 = vmul.f32 0.01, %v314_v16  ;;  %vm363_vm1 = vcmp.ge.f32.partialorder %v315_v17, 0.0  ;;  %v411_v26 = vmul.f32 0.01, %v315_v17 }
  0x16   : > { %vm364_vm2 = vcmp.ge.f32.partialorder %v316_v18, 0.0  ;;  %v412_v27 = vmul.f32 0.01, %v316_v18  ;;  %vm365_vm3 = vcmp.ge.f32.partialorder %v317_v20, 0.0  ;;  %v413_v28 = vmul.f32 0.01, %v317_v20 }
  0x17   : > { %v458_v29 = vsel %vm362_vm0, %v314_v16, %v410_v25  ;;  %v459_v30 = vsel %vm363_vm1, %v315_v17, %v411_v26  ;;  %vm366_vm4 = vcmp.ge.f32.partialorder %v318_v21, 0.0  ;;  %v414_v31 = vmul.f32 0.01, %v318_v21  ;;  %v225_v58 = vld [vmem:[%s750_s21 + $0x78] sm:$0xff]  ;;  %v226_v61 = vld [vmem:[%s750_s21 + $0x80] sm:$0xff]  ;;  %v227_v7 = vld [vmem:[%s750_s21 + $0x88] sm:$0xff] }
  0x18   : > { %506 = vst [vmem:[%s783_s26] sm:$0xff] %v458_v29  ;;  %v460_v35 = vsel %vm364_vm2, %v316_v18, %v412_v27  ;;  %v461_v36 = vsel %vm365_vm3, %v317_v20, %v413_v28  ;;  %vm367_vm5 = vcmp.ge.f32.partialorder %v319_v22, 0.0  ;;  %v415_v37 = vmul.f32 0.01, %v319_v22  ;;  %v228_v8 = vld [vmem:[%s750_s21 + $0x90] sm:$0xff]  ;;  %v230_v29 = vld [vmem:[%s750_s21 + $0xa0] sm:$0xff] }
  0x19   : > { %507 = vst [vmem:[%s783_s26 + $0x8] sm:$0xff] %v459_v30  ;;  %v462_v38 = vsel %vm366_vm4, %v318_v21, %v414_v31  ;;  %v320_v39 = vadd.f32 %v755_v1, %v268_v19  ;;  %v321_v40 = vadd.f32 %v755_v1, %v269_v23  ;;  %v270_v41 = vmul.f32 %v745_v0, %v218_v24  ;;  %v231_v30 = vld [vmem:[%s750_s21 + $0xa8] sm:$0xff]  ;;  %v232_v31 = vld [vmem:[%s750_s21 + $0xb0] sm:$0xff] }
  0x1a   : > { %508 = vst [vmem:[%s783_s26 + $0x10] sm:$0xff] %v460_v35  ;;  %v463_v42 = vsel %vm367_vm5, %v319_v22, %v415_v37  ;;  %v271_v43 = vmul.f32 %v745_v0, %v219_v32  ;;  %v272_v44 = vmul.f32 %v745_v0, %v220_v33  ;;  %v273_v45 = vmul.f32 %v745_v0, %v221_v34  ;;  %v229_v22 = vld [vmem:[%s750_s21 + $0x98] sm:$0xff] }
  0x1b   : > { %509 = vst [vmem:[%s783_s26 + $0x18] sm:$0xff] %v461_v36  ;;  %vm368_vm6 = vcmp.ge.f32.partialorder %v320_v39, 0.0  ;;  %v416_v47 = vmul.f32 0.01, %v320_v39  ;;  %vm369_vm7 = vcmp.ge.f32.partialorder %v321_v40, 0.0  ;;  %v322_v48 = vadd.f32 %v755_v1, %v270_v41  ;;  %v233_v35 = vld [vmem:[%s750_s21 + $0xb8] sm:$0xff] }
  0x1c   : > { %510 = vst [vmem:[%s783_s26 + $0x20] sm:$0xff] %v462_v38  ;;  %v417_v49 = vmul.f32 0.01, %v321_v40  ;;  %v323_v50 = vadd.f32 %v755_v1, %v271_v43  ;;  %v324_v51 = vadd.f32 %v755_v1, %v272_v44  ;;  %v325_v52 = vadd.f32 %v755_v1, %v273_v45  ;;  %v234_v36 = vld [vmem:[%s750_s21 + $0xc0] sm:$0xff] }
  0x1d   : > { %511 = vst [vmem:[%s783_s26 + $0x28] sm:$0xff] %v463_v42  ;;  %v464_v54 = vsel %vm368_vm6, %v320_v39, %v416_v47  ;;  %vm370_vm8 = vcmp.ge.f32.partialorder %v322_v48, 0.0  ;;  %v418_v55 = vmul.f32 0.01, %v322_v48  ;;  %v274_v56 = vmul.f32 %v745_v0, %v222_v46 }
  0x1e   : > { %512 = vst [vmem:[%s783_s26 + $0x30] sm:$0xff] %v464_v54  ;;  %v465_v59 = vsel %vm369_vm7, %v321_v40, %v417_v49  ;;  %vm371_vm9 = vcmp.ge.f32.partialorder %v323_v50, 0.0  ;;  %v419_v60 = vmul.f32 0.01, %v323_v50  ;;  %vm372_vm10 = vcmp.ge.f32.partialorder %v324_v51, 0.0  ;;  %v235_v40 = vld [vmem:[%s750_s21 + $0xc8] sm:$0xff] }
  0x1f   : > { %513 = vst [vmem:[%s783_s26 + $0x38] sm:$0xff] %v465_v59  ;;  %v466_v62 = vsel %vm370_vm8, %v322_v48, %v418_v55  ;;  %v420_v63 = vmul.f32 0.01, %v324_v51  ;;  %vm373_vm11 = vcmp.ge.f32.partialorder %v325_v52, 0.0  ;;  %v421_v2 = vmul.f32 0.01, %v325_v52 }
  0x20   : > { %514 = vst [vmem:[%s783_s26 + $0x40] sm:$0xff] %v466_v62  ;;  %v467_v3 = vsel %vm371_vm9, %v323_v50, %v419_v60  ;;  %v326_v4 = vadd.f32 %v755_v1, %v274_v56  ;;  %v275_v5 = vmul.f32 %v745_v0, %v223_v53  ;;  %v276_v6 = vmul.f32 %v745_v0, %v224_v57  ;;  %v236_v56 = vld [vmem:[%s750_s21 + $0xd0] sm:$0xff]  ;;  %v237_v57 = vld [vmem:[%s750_s21 + $0xd8] sm:$0xff]  ;;  %v238_v62 = vld [vmem:[%s750_s21 + $0xe0] sm:$0xff] }
  0x21   : > { %515 = vst [vmem:[%s783_s26 + $0x48] sm:$0xff] %v467_v3  ;;  %v468_v9 = vsel %vm372_vm10, %v324_v51, %v420_v63  ;;  %v469_v10 = vsel %vm373_vm11, %v325_v52, %v421_v2  ;;  %v277_v11 = vmul.f32 %v745_v0, %v225_v58  ;;  %v278_v12 = vmul.f32 %v745_v0, %v226_v61  ;;  %v239_v63 = vld [vmem:[%s750_s21 + $0xe8] sm:$0xff] }
  0x22   : > { %516 = vst [vmem:[%s783_s26 + $0x50] sm:$0xff] %v468_v9  ;;  %vm374_vm12 = vcmp.ge.f32.partialorder %v326_v4, 0.0  ;;  %v422_v13 = vmul.f32 0.01, %v326_v4  ;;  %v327_v14 = vadd.f32 %v755_v1, %v275_v5  ;;  %v328_v15 = vadd.f32 %v755_v1, %v276_v6  ;;  %v240_v9 = vld [vmem:[%s750_s21 + $0xf0] sm:$0xff] }
  0x23   : > { %517 = vst [vmem:[%s783_s26 + $0x58] sm:$0xff] %v469_v10  ;;  %v329_v16 = vadd.f32 %v755_v1, %v277_v11  ;;  %v330_v17 = vadd.f32 %v755_v1, %v278_v12  ;;  %v279_v18 = vmul.f32 %v745_v0, %v227_v7  ;;  %v280_v19 = vmul.f32 %v745_v0, %v228_v8 }
  0x24   : > { %v470_v20 = vsel %vm374_vm12, %v326_v4, %v422_v13  ;;  %vm375_vm13 = vcmp.ge.f32.partialorder %v327_v14, 0.0  ;;  %v423_v21 = vmul.f32 0.01, %v327_v14  ;;  %vm376_vm14 = vcmp.ge.f32.partialorder %v328_v15, 0.0 }
  0x25   : > { %518 = vst [vmem:[%s783_s26 + $0x60] sm:$0xff] %v470_v20  ;;  %v424_v23 = vmul.f32 0.01, %v328_v15  ;;  %vm377_vm15 = vcmp.ge.f32.partialorder %v329_v16, 0.0  ;;  %v425_v24 = vmul.f32 0.01, %v329_v16  ;;  %v331_v25 = vadd.f32 %v755_v1, %v279_v18 }
  0x26   : > { %v471_v26 = vsel %vm375_vm13, %v327_v14, %v423_v21  ;;  %vm378_vm0 = vcmp.ge.f32.partialorder %v330_v17, 0.0  ;;  %v426_v27 = vmul.f32 0.01, %v330_v17  ;;  %v332_v28 = vadd.f32 %v755_v1, %v280_v19  ;;  %v241_v14 = vld [vmem:[%s750_s21 + $0xf8] sm:$0xff] }
  0x27   : > { %519 = vst [vmem:[%s783_s26 + $0x68] sm:$0xff] %v471_v26  ;;  %v472_v32 = vsel %vm376_vm14, %v328_v15, %v424_v23  ;;  %v473_v33 = vsel %vm377_vm15, %v329_v16, %v425_v24  ;;  %vm379_vm1 = vcmp.ge.f32.partialorder %v331_v25, 0.0  ;;  %v427_v34 = vmul.f32 0.01, %v331_v25  ;;  %v243_v26 = vld [vmem:[%s750_s21 + $0x108] sm:$0xff] }
  0x28   : > { %520 = vst [vmem:[%s783_s26 + $0x70] sm:$0xff] %v472_v32  ;;  %v474_v37 = vsel %vm378_vm0, %v330_v17, %v426_v27  ;;  %vm380_vm2 = vcmp.ge.f32.partialorder %v332_v28, 0.0  ;;  %v428_v38 = vmul.f32 0.01, %v332_v28  ;;  %v281_v39 = vmul.f32 %v745_v0, %v229_v22 }
  0x29   : > { %521 = vst [vmem:[%s783_s26 + $0x78] sm:$0xff] %v473_v33  ;;  %v475_v41 = vsel %vm379_vm1, %v331_v25, %v427_v34  ;;  %v282_v42 = vmul.f32 %v745_v0, %v230_v29  ;;  %v283_v43 = vmul.f32 %v745_v0, %v231_v30  ;;  %v284_v44 = vmul.f32 %v745_v0, %v232_v31  ;;  %v242_v25 = vld [vmem:[%s750_s21 + $0x100] sm:$0xff] }
  0x2a   : > { %522 = vst [vmem:[%s783_s26 + $0x80] sm:$0xff] %v474_v37  ;;  %v476_v45 = vsel %vm380_vm2, %v332_v28, %v428_v38  ;;  %v333_v46 = vadd.f32 %v755_v1, %v281_v39  ;;  %v285_v47 = vmul.f32 %v745_v0, %v233_v35  ;;  %v286_v48 = vmul.f32 %v745_v0, %v234_v36  ;;  %v244_v36 = vld [vmem:[%s750_s21 + $0x110] sm:$0xff]  ;;  %v245_v37 = vld [vmem:[%s750_s21 + $0x118] sm:$0xff]  ;;  %v246_v38 = vld [vmem:[%s750_s21 + $0x120] sm:$0xff] }
  0x2b   : > { %523 = vst [vmem:[%s783_s26 + $0x88] sm:$0xff] %v475_v41  ;;  %v334_v49 = vadd.f32 %v755_v1, %v282_v42  ;;  %v335_v50 = vadd.f32 %v755_v1, %v283_v43  ;;  %v336_v51 = vadd.f32 %v755_v1, %v284_v44  ;;  %v287_v52 = vmul.f32 %v745_v0, %v235_v40 }
  0x2c   : > { %524 = vst [vmem:[%s783_s26 + $0x90] sm:$0xff] %v476_v45  ;;  %vm381_vm3 = vcmp.ge.f32.partialorder %v333_v46, 0.0  ;;  %v429_v53 = vmul.f32 0.01, %v333_v46  ;;  %v337_v54 = vadd.f32 %v755_v1, %v285_v47  ;;  %v338_v55 = vadd.f32 %v755_v1, %v286_v48 }
  0x2d   : > { %vm382_vm4 = vcmp.ge.f32.partialorder %v334_v49, 0.0  ;;  %v430_v58 = vmul.f32 0.01, %v334_v49  ;;  %vm383_vm5 = vcmp.ge.f32.partialorder %v335_v50, 0.0  ;;  %v431_v59 = vmul.f32 0.01, %v335_v50 }
  0x2e   : > { %v477_v60 = vsel %vm381_vm3, %v333_v46, %v429_v53  ;;  %vm384_vm6 = vcmp.ge.f32.partialorder %v336_v51, 0.0  ;;  %v432_v61 = vmul.f32 0.01, %v336_v51  ;;  %vm385_vm7 = vcmp.ge.f32.partialorder %v337_v54, 0.0 }
  0x2f   : > { %525 = vst [vmem:[%s783_s26 + $0x98] sm:$0xff] %v477_v60  ;;  %v478_v2 = vsel %vm382_vm4, %v334_v49, %v430_v58  ;;  %v479_v3 = vsel %vm383_vm5, %v335_v50, %v431_v59  ;;  %v433_v4 = vmul.f32 0.01, %v337_v54  ;;  %vm386_vm8 = vcmp.ge.f32.partialorder %v338_v55, 0.0  ;;  %v247_v49 = vld [vmem:[%s750_s21 + $0x128] sm:$0xff]  ;;  %v248_v50 = vld [vmem:[%s750_s21 + $0x130] sm:$0xff] }
  0x30   : > { %526 = vst [vmem:[%s783_s26 + $0xa0] sm:$0xff] %v478_v2  ;;  %v480_v5 = vsel %vm384_vm6, %v336_v51, %v432_v61  ;;  %v434_v6 = vmul.f32 0.01, %v338_v55  ;;  %v339_v7 = vadd.f32 %v755_v1, %v287_v52  ;;  %v288_v8 = vmul.f32 %v745_v0, %v236_v56  ;;  %v249_v51 = vld [vmem:[%s750_s21 + $0x138] sm:$0xff] }
  0x31   : > { %527 = vst [vmem:[%s783_s26 + $0xa8] sm:$0xff] %v479_v3  ;;  %v481_v10 = vsel %vm385_vm7, %v337_v54, %v433_v4  ;;  %v289_v11 = vmul.f32 %v745_v0, %v237_v57  ;;  %v290_v12 = vmul.f32 %v745_v0, %v238_v62  ;;  %v291_v13 = vmul.f32 %v745_v0, %v239_v63  ;;  %v250_v62 = vld [vmem:[%s750_s21 + $0x140] sm:$0xff] }
  0x32   : > { %528 = vst [vmem:[%s783_s26 + $0xb0] sm:$0xff] %v480_v5  ;;  %v482_v15 = vsel %vm386_vm8, %v338_v55, %v434_v6  ;;  %vm387_vm9 = vcmp.ge.f32.partialorder %v339_v7, 0.0  ;;  %v435_v16 = vmul.f32 0.01, %v339_v7  ;;  %v340_v17 = vadd.f32 %v755_v1, %v288_v8 }
  0x33   : > { %529 = vst [vmem:[%s783_s26 + $0xb8] sm:$0xff] %v481_v10  ;;  %v341_v18 = vadd.f32 %v755_v1, %v289_v11  ;;  %v342_v19 = vadd.f32 %v755_v1, %v290_v12  ;;  %v343_v20 = vadd.f32 %v755_v1, %v291_v13  ;;  %v292_v21 = vmul.f32 %v745_v0, %v240_v9  ;;  %v251_v10 = vld [vmem:[%s750_s21 + $0x148] sm:$0xff]  ;;  %v252_v11 = vld [vmem:[%s750_s21 + $0x150] sm:$0xff] }
  0x34   : > { %530 = vst [vmem:[%s783_s26 + $0xc0] sm:$0xff] %v482_v15  ;;  %v483_v22 = vsel %vm387_vm9, %v339_v7, %v435_v16  ;;  %vm388_vm10 = vcmp.ge.f32.partialorder %v340_v17, 0.0  ;;  %v436_v23 = vmul.f32 0.01, %v340_v17  ;;  %v293_v24 = vmul.f32 %v745_v0, %v241_v14  ;;  %v253_v15 = vld [vmem:[%s750_s21 + $0x158] sm:$0xff] }
  0x35   : > { %531 = vst [vmem:[%s783_s26 + $0xc8] sm:$0xff] %v483_v22  ;;  %vm389_vm11 = vcmp.ge.f32.partialorder %v341_v18, 0.0  ;;  %v437_v27 = vmul.f32 0.01, %v341_v18  ;;  %vm390_vm12 = vcmp.ge.f32.partialorder %v342_v19, 0.0  ;;  %vm391_vm13 = vcmp.ge.f32.partialorder %v343_v20, 0.0 }
  0x36   : > { %v484_v28 = vsel %vm388_vm10, %v340_v17, %v436_v23  ;;  %v438_v29 = vmul.f32 0.01, %v342_v19  ;;  %v439_v30 = vmul.f32 0.01, %v343_v20  ;;  %v344_v31 = vadd.f32 %v755_v1, %v292_v21  ;;  %v255_v23 = vld [vmem:[%s750_s21 + $0x168] sm:$0xff] }
  0x37   : > { %532 = vst [vmem:[%s783_s26 + $0xd0] sm:$0xff] %v484_v28  ;;  %v485_v32 = vsel %vm389_vm11, %v341_v18, %v437_v27  ;;  %v345_v33 = vadd.f32 %v755_v1, %v293_v24  ;;  %v294_v34 = vmul.f32 %v745_v0, %v242_v25  ;;  %v295_v35 = vmul.f32 %v745_v0, %v243_v26  ;;  %v254_v18 = vld [vmem:[%s750_s21 + $0x160] sm:$0xff]  ;;  %v256_v24 = vld [vmem:[%s750_s21 + $0x170] sm:$0xff] }
  0x38   : > { %533 = vst [vmem:[%s783_s26 + $0xd8] sm:$0xff] %v485_v32  ;;  %v486_v39 = vsel %vm390_vm12, %v342_v19, %v438_v29  ;;  %v487_v40 = vsel %vm391_vm13, %v343_v20, %v439_v30  ;;  %vm392_vm14 = vcmp.ge.f32.partialorder %v344_v31, 0.0  ;;  %v440_v41 = vmul.f32 0.01, %v344_v31 }
  0x39   : > { %534 = vst [vmem:[%s783_s26 + $0xe0] sm:$0xff] %v486_v39  ;;  %vm393_vm15 = vcmp.ge.f32.partialorder %v345_v33, 0.0  ;;  %v441_v42 = vmul.f32 0.01, %v345_v33  ;;  %v346_v43 = vadd.f32 %v755_v1, %v294_v34  ;;  %v347_v44 = vadd.f32 %v755_v1, %v295_v35 }
  0x3a   : > { %535 = vst [vmem:[%s783_s26 + $0xe8] sm:$0xff] %v487_v40  ;;  %v488_v45 = vsel %vm392_vm14, %v344_v31, %v440_v41  ;;  %v296_v46 = vmul.f32 %v745_v0, %v244_v36  ;;  %v297_v47 = vmul.f32 %v745_v0, %v245_v37  ;;  %v298_v48 = vmul.f32 %v745_v0, %v246_v38  ;;  %v257_v41 = vld [vmem:[%s750_s21 + $0x178] sm:$0xff] }
  0x3b   : > { %536 = vst [vmem:[%s783_s26 + $0xf0] sm:$0xff] %v488_v45  ;;  %v489_v52 = vsel %vm393_vm15, %v345_v33, %v441_v42  ;;  %vm394_vm0 = vcmp.ge.f32.partialorder %v346_v43, 0.0  ;;  %v442_v53 = vmul.f32 0.01, %v346_v43  ;;  %vm395_vm1 = vcmp.ge.f32.partialorder %v347_v44, 0.0 }
  0x3c   : > { %537 = vst [vmem:[%s783_s26 + $0xf8] sm:$0xff] %v489_v52  ;;  %v443_v54 = vmul.f32 0.01, %v347_v44  ;;  %v348_v55 = vadd.f32 %v755_v1, %v296_v46  ;;  %v349_v56 = vadd.f32 %v755_v1, %v297_v47  ;;  %v350_v57 = vadd.f32 %v755_v1, %v298_v48 }
  0x3d   : > { %v490_v58 = vsel %vm394_vm0, %v346_v43, %v442_v53  ;;  %v299_v59 = vmul.f32 %v745_v0, %v247_v49  ;;  %v300_v60 = vmul.f32 %v745_v0, %v248_v50  ;;  %v301_v61 = vmul.f32 %v745_v0, %v249_v51 }
  0x3e   : > { %538 = vst [vmem:[%s783_s26 + $0x100] sm:$0xff] %v490_v58  ;;  %v491_v63 = vsel %vm395_vm1, %v347_v44, %v443_v54  ;;  %vm396_vm2 = vcmp.ge.f32.partialorder %v348_v55, 0.0  ;;  %v444_v2 = vmul.f32 0.01, %v348_v55  ;;  %vm397_vm3 = vcmp.ge.f32.partialorder %v349_v56, 0.0 }
  0x3f   : > { %539 = vst [vmem:[%s783_s26 + $0x108] sm:$0xff] %v491_v63  ;;  %v445_v3 = vmul.f32 0.01, %v349_v56  ;;  %vm398_vm4 = vcmp.ge.f32.partialorder %v350_v57, 0.0  ;;  %v446_v4 = vmul.f32 0.01, %v350_v57  ;;  %v351_v5 = vadd.f32 %v755_v1, %v299_v59 }
  0x40   : > { %v492_v6 = vsel %vm396_vm2, %v348_v55, %v444_v2  ;;  %v352_v7 = vadd.f32 %v755_v1, %v300_v60  ;;  %v353_v8 = vadd.f32 %v755_v1, %v301_v61  ;;  %v302_v9 = vmul.f32 %v745_v0, %v250_v62 }
  0x41   : > { %540 = vst [vmem:[%s783_s26 + $0x110] sm:$0xff] %v492_v6  ;;  %v493_v12 = vsel %vm397_vm3, %v349_v56, %v445_v3  ;;  %v494_v13 = vsel %vm398_vm4, %v350_v57, %v446_v4  ;;  %vm399_vm5 = vcmp.ge.f32.partialorder %v351_v5, 0.0  ;;  %v447_v14 = vmul.f32 0.01, %v351_v5 }
  0x42   : > { %541 = vst [vmem:[%s783_s26 + $0x118] sm:$0xff] %v493_v12  ;;  %vm400_vm6 = vcmp.ge.f32.partialorder %v352_v7, 0.0  ;;  %v448_v16 = vmul.f32 0.01, %v352_v7  ;;  %vm401_vm7 = vcmp.ge.f32.partialorder %v353_v8, 0.0  ;;  %v354_v17 = vadd.f32 %v755_v1, %v302_v9 }
  0x43   : > { %542 = vst [vmem:[%s783_s26 + $0x120] sm:$0xff] %v494_v13  ;;  %v495_v19 = vsel %vm399_vm5, %v351_v5, %v447_v14  ;;  %v449_v20 = vmul.f32 0.01, %v353_v8  ;;  %v303_v21 = vmul.f32 %v745_v0, %v251_v10  ;;  %v304_v22 = vmul.f32 %v745_v0, %v252_v11 }
  0x44   : > { %543 = vst [vmem:[%s783_s26 + $0x128] sm:$0xff] %v495_v19  ;;  %v496_v25 = vsel %vm400_vm6, %v352_v7, %v448_v16  ;;  %vm402_vm8 = vcmp.ge.f32.partialorder %v354_v17, 0.0  ;;  %v450_v26 = vmul.f32 0.01, %v354_v17  ;;  %v305_v27 = vmul.f32 %v745_v0, %v253_v15 }
  0x45   : > { %544 = vst [vmem:[%s783_s26 + $0x130] sm:$0xff] %v496_v25  ;;  %v497_v28 = vsel %vm401_vm7, %v353_v8, %v449_v20  ;;  %v355_v29 = vadd.f32 %v755_v1, %v303_v21  ;;  %v356_v30 = vadd.f32 %v755_v1, %v304_v22  ;;  %v306_v31 = vmul.f32 %v745_v0, %v254_v18 }
  0x46   : > { %545 = vst [vmem:[%s783_s26 + $0x138] sm:$0xff] %v497_v28  ;;  %v498_v32 = vsel %vm402_vm8, %v354_v17, %v450_v26  ;;  %v357_v33 = vadd.f32 %v755_v1, %v305_v27  ;;  %v307_v34 = vmul.f32 %v745_v0, %v255_v23  ;;  %v308_v35 = vmul.f32 %v745_v0, %v256_v24 }
  0x47   : > { %546 = vst [vmem:[%s783_s26 + $0x140] sm:$0xff] %v498_v32  ;;  %vm403_vm9 = vcmp.ge.f32.partialorder %v355_v29, 0.0  ;;  %v451_v36 = vmul.f32 0.01, %v355_v29  ;;  %vm404_vm10 = vcmp.ge.f32.partialorder %v356_v30, 0.0  ;;  %v358_v37 = vadd.f32 %v755_v1, %v306_v31 }
  0x48   : > { %v452_v38 = vmul.f32 0.01, %v356_v30  ;;  %vm405_vm11 = vcmp.ge.f32.partialorder %v357_v33, 0.0  ;;  %v453_v39 = vmul.f32 0.01, %v357_v33  ;;  %v359_v40 = vadd.f32 %v755_v1, %v307_v34 }
  0x49   : > { %v499_v42 = vsel %vm403_vm9, %v355_v29, %v451_v36  ;;  %vm406_vm12 = vcmp.ge.f32.partialorder %v358_v37, 0.0  ;;  %v454_v43 = vmul.f32 0.01, %v358_v37  ;;  %v360_v44 = vadd.f32 %v755_v1, %v308_v35 }
  0x4a   : > { %547 = vst [vmem:[%s783_s26 + $0x148] sm:$0xff] %v499_v42  ;;  %v500_v45 = vsel %vm404_vm10, %v356_v30, %v452_v38  ;;  %v501_v46 = vsel %vm405_vm11, %v357_v33, %v453_v39  ;;  %vm407_vm13 = vcmp.ge.f32.partialorder %v359_v40, 0.0  ;;  %v455_v47 = vmul.f32 0.01, %v359_v40 }
  0x4b   : > { %548 = vst [vmem:[%s783_s26 + $0x150] sm:$0xff] %v500_v45  ;;  %v502_v48 = vsel %vm406_vm12, %v358_v37, %v454_v43  ;;  %vm408_vm14 = vcmp.ge.f32.partialorder %v360_v44, 0.0  ;;  %v456_v49 = vmul.f32 0.01, %v360_v44  ;;  %v309_v50 = vmul.f32 %v745_v0, %v257_v41 }
  0x4c   : > { %549 = vst [vmem:[%s783_s26 + $0x158] sm:$0xff] %v501_v46  ;;  %v503_v51 = vsel %vm407_vm13, %v359_v40, %v455_v47 }
  0x4d   : > { %550 = vst [vmem:[%s783_s26 + $0x160] sm:$0xff] %v502_v48  ;;  %v504_v52 = vsel %vm408_vm14, %v360_v44, %v456_v49  ;;  %v361_v53 = vadd.f32 %v755_v1, %v309_v50 }
  0x4e   : > { %551 = vst [vmem:[%s783_s26 + $0x168] sm:$0xff] %v503_v51 }
  0x4f   : > { %552 = vst [vmem:[%s783_s26 + $0x170] sm:$0xff] %v504_v52  ;;  %vm409_vm15 = vcmp.ge.f32.partialorder %v361_v53, 0.0  ;;  %v457_v54 = vmul.f32 0.01, %v361_v53 }
  0x51   : > { %v505_v55 = vsel %vm409_vm15, %v361_v53, %v457_v54 }
  0x52   : > { %553 = vst [vmem:[%s783_s26 + $0x178] sm:$0xff] %v505_v55 }
  0x53 PF: > { %s13_s14 = sadd.s32 1, %s699_s14   ;;  %s969_s12 = smov %s695_s13 }
  0x54   : > { %p10_p5 = scmp.ge.s32.totalorder %s13_s14, 4   ;;  %s970_s13 = smov %s972_s15 }
  0x56   :  { %12 = sbr.rel (!%p10_p5) target bundleno = 2 (0x2), region = 62 }

// kernel: double_conv_forward.4
= control target key start
LH: loop header
LB: loop body
LE: loop exit
PB: predicated region body
PF: predicated region fallthrough
CT: control target
= control target key end

     0   :  { %s3193_s24 = smov 0   ;;  %s3195_s25 = smov 0   ;;  %s5649_s0 = inlined_call_operand.vmem [shape: f32[384,1], index: 0, kind: input, shape index: {}]   ;;  %s5650_s1 = inlined_call_operand.vmem [shape: bf16[36,128], index: 1, kind: input, shape index: {}]   ;;  %s5651_s2 = inlined_call_operand.vmem [shape: f32[1,128], index: 2, kind: input, shape index: {}]   ;;  %s5652_s3 = inlined_call_operand.vmem [shape: bf16[2,432,4], index: 3, kind: input, shape index: {}, may-alias: {3,4,5}]   ;;  %s5653_s4 = inlined_call_operand.vmem [shape: bf16[2,432,4], index: 4, kind: input, shape index: {}, may-alias: {3,4,5}]   ;;  %s5654_s5 = inlined_call_operand.vmem [shape: bf16[2,432,4], index: 5, kind: input, shape index: {}, may-alias: {3,4,5}]   ;;  %s5655_s6 = inlined_call_operand.vmem [shape: f32[2,384,128], index: 6, kind: output, shape index: {0}]   ;;  %s5656_s7 = inlined_call_operand.vmem [shape: f32[2,1,2,128], index: 7, kind: output, shape index: {1}]  }
   0x1   :  { %s3197_s26 = smov 0  }
   0x2 LB: > { %s30_s27 = sadd.s32 1, %s3138_s25  ;;  %p2869_p0 = scmp.ge.s32.totalorder %s3142_s26, 1  ;;  %s3142_s26 = sphi %s3197_s26, %s18_s26   ;;  %s3138_s25 = sphi %s3195_s25, %s6030_s25   ;;  %s3134_s24 = sphi %s3193_s24, %s6029_s24  }
   0x3   : > { %p32_p1 = scmp.ge.s32.totalorder %s30_s27, 2  ;;  %p321_p2 = scmp.lt.s32.totalorder %s3142_s26, 3 }
   0x5   : > { %s6032_s27 = smov (%p32_p1, %s30_s27), 0  ;;  %p322_p3 = pnand %p2869_p0, %p321_p2 }
   0x7   : > { %325 = sbr.rel (%p322_p3) target bundleno = 900 (0x384), region = 44 }
   0xc   : > { %p399_p4 = scmp.lt.s32.totalorder %s3134_s24, 1  ;;  %vm652_vm0 = vsmask.f32 7424  ;;  %s3144_s9 = smov 4   ;;  %vm897_vm1 = vcmask 1046528   ;;  %vm648_vm2 = vcmask 1043456  }
   0xd   : > { %s3145_s14 = smov 8   ;;  %s3146_s15 = smov 12   ;;  %vm1094_vm3 = vsmask.f32 3328  ;;  %vm1248_vm4 = vcmask 1042432   ;;  %vm1514_vm5 = vcmask 31744  }
   0xe   : > { %s6034_s24 = smov (!%p399_p4, %s3134_s24), 1  ;;  %s3147_s20 = smov 16   ;;  %vm1563_vm6 = vcmask 64512   ;;  %vm1612_vm7 = vcmask 97280   ;;  %vm1661_vm8 = vcmask 130048   ;;  %vm1710_vm9 = vcmask 162816  }
   0xf   : > { %s3214_s28 = smul.u32 216, %s6034_s24  ;;  %s3148_s21 = smov 20   ;;  %vm1759_vm10 = vcmask 195584   ;;  %vm1808_vm11 = vcmask 228352   ;;  %vm1979_vm12 = vcmask 1041408   ;;  %vm1930_vm13 = vcmask 293888  }
  0x10   : > { %s3149_s22 = smov 24   ;;  %s3150_s23 = smov 28   ;;  %vm1857_vm14 = vcmask 261120   ;;  %vm2698_vm15 = vcmask 1040384  }
  0x11   : > { %s3220_s8 = scalar_lea.vmem %s5652_s3, %s3214_s28  ;;  %s3014_s10 = sadd.s32 192, %s3214_s28 }
  0x12   : > { %v3223_v0 = vld [vmem:[%s3220_s8 + $0x20] sm:$0xff]  ;;  %v3226_v1 = vld [vmem:[%s3220_s8 + $0x28] sm:$0xff]  ;;  %v3229_v2 = vld [vmem:[%s3220_s8 + $0x10] sm:$0xff]  ;;  %s3480_s13 = scalar_lea.vmem %s5653_s4, %s3014_s10  ;;  %s3016_s16 = sadd.s32 204, %s3214_s28 }
  0x13   : > { %v3232_v3 = vld [vmem:[%s3220_s8 + $0x18] sm:$0xff]  ;;  %v3235_v4 = vld [vmem:[%s3220_s8] sm:$0xff]  ;;  %v3238_v5 = vld [vmem:[%s3220_s8 + $0x8] sm:$0xff]  ;;  %v5700_v6 = vshll.u32 %v3223_v0, 16  ;;  %v5701_v7 = vshrl.u32 %v3223_v0, 16  ;;  %v5677_v8 = vshll.u32 %v3226_v1, 16  ;;  %s3789_s19 = scalar_lea.vmem %s5654_s5, %s3016_s16 }
  0x14   : > { %v5698_v9 = vshll.u32 %v3229_v2, 16  ;;  %v3245_v10 = vld [vmem:[%s3220_s8 + $0x30] sm:$0xff]  ;;  %v5699_v11 = vshrl.u32 %v3229_v2, 16  ;;  %v5702_v12 = vshll.u32 %v3232_v3, 16  ;;  %v654_v13 = vshrl.u32 %v3235_v4, 16  ;;  %v3270_v27 = vld [vmem:[%s3220_s8 + $0x40] sm:$0xff] }
  0x15   : > { %v656_v14 = vshll.u32 %v3235_v4, 16  ;;  %v687_v15 = vrot.slane %v5700_v6, 1  ;;  %v695_v16 = vrot.slane %v5677_v8, 1  ;;  %v5689_v18 = vshll.u32 %v3238_v5, 16  ;;  %v3273_v28 = vld [vmem:[%s3220_s8 + $0x38] sm:$0xff]  ;;  %v3292_v37 = vld [vmem:[%s3220_s8 + $0x48] sm:$0xff] }
  0x16   : > { %v671_v17 = vrot.slane %v5698_v9, 1  ;;  %v679_v19 = vrot.slane %v5702_v12, 1  ;;  %v5681_v21 = vshrl.u32 %v3226_v1, 16  ;;  %v5686_v22 = vshll.u32 %v3245_v10, 16  ;;  %v3306_v44 = vld [vmem:[%s3220_s8 + $0x58] sm:$0xff]  ;;  %v3315_v49 = vld [vmem:[%s3220_s8 + $0x50] sm:$0xff] }
  0x17   : > { %v658_v20 = vrot.slane %v656_v14, 1  ;;  %v691_v23 = vor.u32 %v5701_v7, %v687_v15  ;;  %v663_v25 = vrot.slane %v5689_v18, 1  ;;  %v5703_v26 = vshrl.u32 %v3232_v3, 16  ;;  %v3324_v52 = vld [vmem:[%s3220_s8 + $0x60] sm:$0xff]  ;;  %s3152_s28 = smov 32  }
  0x18   : > { %v675_v24 = vor.u32 %v5699_v11, %v671_v17  ;;  %v5697_v30 = vshrl.u32 %v3238_v5, 16  ;;  %v699_v34 = vor.u32 %v5681_v21, %v695_v16  ;;  %v703_v35 = vrot.slane %v5686_v22, 1 }
  0x19   : > { %v659_v29 = vor.u32 %v658_v20, %v654_v13  ;;  %v3277_v31 = vsel %vm652_vm0, %v691_v23, %v695_v16  ;;  %v683_v36 = vor.u32 %v5703_v26, %v679_v19  ;;  %v5665_v38 = vshll.u32 %v3270_v27, 16  ;;  %v3354_v16 = vld [vmem:[%s3220_s8 + $0x68] sm:$0xff] }
  0x1a   : > { %v680_v32 = vsel %vm652_vm0, %v675_v24, %v679_v19  ;;  %857 = vrot.lane.b32.xlu2 %v3277_v31, %s3144_s9  ;;  %v5682_v39 = vshll.u32 %v3273_v28, 16  ;;  %v667_v40 = vor.u32 %v5697_v30, %v663_v25  ;;  %v3299_v41 = vsel %vm652_vm0, %v699_v34, %v703_v35  ;;  %v3369_v24 = vld [vmem:[%s3220_s8 + $0x78] sm:$0xff] }
  0x1b   : > { %853 = vrot.lane.b32.xlu1 %v680_v32, %s3144_s9  ;;  %v664_v33 = vsel %vm652_vm0, %v659_v29, %v663_v25  ;;  %v3302_v42 = vsel %vm652_vm0, %v683_v36, %v687_v15  ;;  %v5668_v43 = vshrl.u32 %v3270_v27, 16  ;;  %v719_v45 = vrot.slane %v5665_v38, 1  ;;  %v3351_v15 = vld [vmem:[%s3220_s8 + $0x70] sm:$0xff] }
  0x1c   : > { %849 = vrot.lane.b32.xlu0 %v664_v33, %s3144_s9  ;;  %v5672_v46 = vshll.u32 %v3292_v37, 16  ;;  %v711_v47 = vrot.slane %v5682_v39, 1  ;;  %v5685_v48 = vshrl.u32 %v3273_v28, 16  ;;  %v672_v50 = vsel %vm652_vm0, %v667_v40, %v671_v17  ;;  %v3385_v40 = vld [vmem:[%s3220_s8 + $0x88] sm:$0xff] }
  0x1d   : > { %v5688_v51 = vshrl.u32 %v3245_v10, 16  ;;  %v5658_v53 = vshll.u32 %v3306_v44, 16  ;;  %v723_v54 = vor.u32 %v5668_v43, %v719_v45  ;;  %v5670_v57 = vshll.u32 %v3315_v49, 16 }
  0x1e   : > { %v727_v55 = vrot.slane %v5672_v46, 1  ;;  %v715_v56 = vor.u32 %v5685_v48, %v711_v47  ;;  %v5659_v60 = vshrl.u32 %v3306_v44, 16  ;;  %v5661_v61 = vshll.u32 %v3324_v52, 16 }
  0x1f   : > { %v707_v58 = vor.u32 %v5688_v51, %v703_v35  ;;  %v743_v59 = vrot.slane %v5658_v53, 1  ;;  %v735_v13 = vrot.slane %v5670_v57, 1  ;;  %v5671_v14 = vshrl.u32 %v3315_v49, 16 }
  0x20   : > { %v3342_v62 = vsel %vm652_vm0, %v723_v54, %v727_v55  ;;  %v3345_v63 = vsel %vm652_vm0, %v715_v56, %v719_v45  ;;  %v5673_v19 = vshrl.u32 %v3292_v37, 16  ;;  %v751_v23 = vrot.slane %v5661_v61, 1 }
  0x21   : > { %v3357_v17 = vsel %vm652_vm0, %v707_v58, %v711_v47  ;;  %v747_v20 = vor.u32 %v5659_v60, %v743_v59  ;;  %v739_v25 = vor.u32 %v5671_v14, %v735_v13  ;;  %v5657_v29 = vshll.u32 %v3351_v15, 16 }
  0x22   : > { %859 = vrot.lane.b32.xlu2 %v3299_v41, %s3144_s9  ;;  %v5660_v32 = vshll.u32 %v3354_v16, 16  ;;  %v731_v33 = vor.u32 %v5673_v19, %v727_v55  ;;  %v5662_v35 = vshrl.u32 %v3351_v15, 16  ;;  %v5663_v36 = vshll.u32 %v3369_v24, 16  ;;  %v3396_v55 = vld [vmem:[%s3220_s8 + $0x80] sm:$0xff] }
  0x23   : > { %855 = vrot.lane.b32.xlu1 %v3302_v42, %s3144_s9  ;;  %v3380_v34 = vsel %vm652_vm0, %v747_v20, %v751_v23  ;;  %v3388_v45 = vsel %vm652_vm0, %v739_v25, %v743_v59  ;;  %v767_v47 = vrot.slane %v5657_v29, 1  ;;  %v5664_v54 = vshrl.u32 %v3354_v16, 16  ;;  %v3407_v59 = vld [vmem:[%s3220_s8 + $0x90] sm:$0xff] }
  0x24   : > { %851 = vrot.lane.b32.xlu0 %v672_v50, %s3144_s9  ;;  %v759_v50 = vrot.slane %v5660_v32, 1  ;;  %v3399_v56 = vsel %vm652_vm0, %v731_v33, %v735_v13  ;;  %v5666_v58 = vshrl.u32 %v3324_v52, 16  ;;  %v5667_v20 = vshll.u32 %v3385_v40, 16 }
  0x25   : > { %v771_v13 = vor.u32 %v5662_v35, %v767_v47  ;;  %v775_v25 = vrot.slane %v5663_v36, 1  ;;  %v5669_v29 = vshll.u32 %v3396_v55, 16  ;;  %v5674_v32 = vshrl.u32 %v3385_v40, 16  ;;  %v3426_v35 = vld [vmem:[%s3220_s8 + $0xa0] sm:$0xff] }
  0x26   : > { %v763_v33 = vor.u32 %v5664_v54, %v759_v50  ;;  %v755_v53 = vor.u32 %v5666_v58, %v751_v23  ;;  %v791_v60 = vrot.slane %v5667_v20, 1  ;;  %v5675_v61 = vshll.u32 %v3407_v59, 16  ;;  %v3438_v58 = vld [vmem:[%s3220_s8 + $0x98] sm:$0xff] }
  0x27   : > { %v3429_v36 = vsel %vm652_vm0, %v771_v13, %v775_v25  ;;  %v783_v38 = vrot.slane %v5669_v29, 1  ;;  %v5676_v23 = vshrl.u32 %v3396_v55, 16  ;;  %v5680_v43 = vshrl.u32 %v3369_v24, 16 }
  0x28   : > { %v3432_v54 = vsel %vm652_vm0, %v763_v33, %v767_v47  ;;  %v3441_v20 = vsel %vm652_vm0, %v755_v53, %v759_v50  ;;  %v3449_v47 = vld [vmem:[%s3220_s8 + $0xa8] sm:$0xff]  ;;  %v5678_v13 = vshll.u32 %v3426_v35, 16  ;;  %v795_v53 = vor.u32 %v5674_v32, %v791_v60 }
  0x29   : > { %v799_v50 = vrot.slane %v5675_v61, 1  ;;  %v787_v33 = vor.u32 %v5676_v23, %v783_v38  ;;  %v5679_v29 = vshll.u32 %v3438_v58, 16  ;;  %v779_v57 = vor.u32 %v5680_v43, %v775_v25  ;;  %v3483_v25 = vld [vmem:[%s3220_s8 + $0xb8] sm:$0xff]  ;;  %v3501_v43 = vld [vmem:[%s3480_s13] sm:$0xff] }
  0x2a   : > { %865 = vrot.lane.b32.xlu2 %v3342_v62, %s3144_s9  ;;  %v815_v14 = vrot.slane %v5678_v13, 1  ;;  %v5683_v46 = vshrl.u32 %v3426_v35, 16  ;;  %v5684_v19 = vshll.u32 %v3449_v47, 16  ;;  %v5687_v8 = vshrl.u32 %v3438_v58, 16  ;;  %v3486_v13 = vld [vmem:[%s3220_s8 + $0xb0] sm:$0xff] }
  0x2b   : > { %863 = vrot.lane.b32.xlu1 %v3345_v63, %s3144_s9  ;;  %v3469_v32 = vsel %vm652_vm0, %v795_v53, %v799_v50  ;;  %v3472_v61 = vsel %vm652_vm0, %v787_v33, %v791_v60  ;;  %v807_v23 = vrot.slane %v5679_v29, 1  ;;  %v3489_v53 = vsel %vm652_vm0, %v779_v57, %v783_v38 }
  0x2c   : > { %861 = vrot.lane.b32.xlu0 %v3357_v17, %s3144_s9  ;;  %v5692_v60 = vshrl.u32 %v3407_v59, 16  ;;  %v819_v33 = vor.u32 %v5683_v46, %v815_v14  ;;  %v823_v29 = vrot.slane %v5684_v19, 1  ;;  %v5690_v57 = vshll.u32 %v3483_v25, 16 }
  0x2d   : > { %v811_v38 = vor.u32 %v5687_v8, %v807_v23  ;;  %v5691_v21 = vshll.u32 %v3486_v13, 16  ;;  %v5693_v19 = vshrl.u32 %v3483_v25, 16  ;;  %v5694_v48 = vshll.u32 %v3501_v43, 16 }
  0x2e   : > { %v803_v39 = vor.u32 %v5692_v60, %v799_v50  ;;  %v3512_v46 = vsel %vm652_vm0, %v819_v33, %v823_v29  ;;  %v839_v8 = vrot.slane %v5690_v57, 1  ;;  %v5695_v18 = vshrl.u32 %v3486_v13, 16 }
  0x2f   : > { %5750 = vst [vmem:[#allocation2_spill] sm:$0xff] %v3512_v46  ;;  %v3517_v22 = vsel %vm652_vm0, %v811_v38, %v815_v14  ;;  %v831_v51 = vrot.slane %v5691_v21, 1  ;;  %v5696_v33 = vshrl.u32 %v3449_v47, 16  ;;  %v3538_v38 = vrot.slane %v5694_v48, 1 }
  0x30   : > { %5751 = vst [vmem:[#allocation3_spill] sm:$0xff] %v3517_v22  ;;  %v3525_v50 = vsel %vm652_vm0, %v803_v39, %v807_v23  ;;  %v843_v14 = vor.u32 %v5693_v19, %v839_v8  ;;  %v899_v19 = vrot.slane %v3238_v5, 1  ;;  %v907_v48 = vrot.slane %v3226_v1, 1 }
  0x31   : > { %5752 = vst [vmem:[#allocation4_spill] sm:$0xff] %v3525_v50  ;;  %v835_v39 = vor.u32 %v5695_v18, %v831_v51  ;;  %v827_v23 = vor.u32 %v5696_v33, %v823_v29  ;;  %v901_v29 = vrot.slane %v3229_v2, 1  ;;  %v909_v18 = vrot.slane %v3245_v10, 1 }
  0x32   : > { %871 = vrot.lane.b32.xlu2 %v3380_v34, %s3144_s9  ;;  %5753 = vst [vmem:[#allocation5_spill] sm:$0xff] %v3538_v38  ;;  %v3546_v57 = vsel %vm652_vm0, %v843_v14, %v3538_v38  ;;  %v903_v14 = vrot.slane %v3232_v3, 1  ;;  %v905_v33 = vrot.slane %v3223_v0, 1  ;;  %v921_v30 = vrot.slane %v3324_v52, 1 }
  0x33   : > { %869 = vrot.lane.b32.xlu1 %v3388_v45, %s3144_s9  ;;  %5754 = vst [vmem:[#allocation6_spill] sm:$0xff] %v3546_v57  ;;  %v3549_v21 = vsel %vm652_vm0, %v835_v39, %v839_v8  ;;  %v3552_v60 = vsel %vm652_vm0, %v827_v23, %v831_v51  ;;  %v898_v8 = vrot.slane %v3235_v4, 1  ;;  %v902_v39 = vsel %vm897_vm1, %v899_v19, %v901_v29 }
  0x34   : > { %867 = vrot.lane.b32.xlu0 %v3399_v56, %s3144_s9  ;;  %5755 = vst [vmem:[#allocation7_spill] sm:$0xff] %v3549_v21  ;;  %v904_v51 = vsel %vm897_vm1, %v901_v29, %v903_v14  ;;  %v3574_v4 = vsel %vm897_vm1, %v907_v48, %v909_v18  ;;  %v3577_v29 = vsel %vm897_vm1, %v905_v33, %v907_v48  ;;  %v917_v9 = vrot.slane %v3315_v49, 1 }
  0x35   : > { %5756 = vst [vmem:[#allocation8_spill] sm:$0xff] %v3552_v60  ;;  %v900_v23 = vsel %vm897_vm1, %v898_v8, %v899_v19  ;;  %v3580_v19 = vsel %vm897_vm1, %v903_v14, %v905_v33  ;;  %v913_v8 = vrot.slane %v3270_v27, 1  ;;  %v925_v11 = vrot.slane %v3351_v15, 1 }
  0x36   : > { %5757 = vst [vmem:[#allocation9_spill] sm:$0xff] %v3574_v4  ;;  %v927_v6 = vrot.slane %v3369_v24, 1  ;;  %v923_v7 = vrot.slane %v3354_v16, 1  ;;  %v931_v26 = vrot.slane %v3385_v40, 1 }
  0x37   : > { %5758 = vst [vmem:[#allocation10_spill] sm:$0xff] %v3577_v29 }
  0x38   : > { %5759 = vst [vmem:[#allocation11_spill] sm:$0xff] %v3580_v19  ;;  %v3636_v12 = vsel %vm897_vm1, %v921_v30, %v923_v7 }
  0x39   : > { %5769 = vst [vmem:[#allocation21_spill] sm:$0xff] %v3636_v12 }
  0x3a   : > { %877 = vrot.lane.b32.xlu2 %v3429_v36, %s3144_s9 }
  0x3b   : > { %875 = vrot.lane.b32.xlu1 %v3432_v54, %s3144_s9 }
  0x3c   : > { %873 = vrot.lane.b32.xlu0 %v3441_v20, %s3144_s9 }
  0x42   : > { %883 = vrot.lane.b32.xlu2 %v3469_v32, %s3144_s9 }
  0x43   : > { %881 = vrot.lane.b32.xlu1 %v3472_v61, %s3144_s9 }
  0x44   : > { %879 = vrot.lane.b32.xlu0 %v3489_v53, %s3144_s9 }
  0x4a   : > { %889 = vrot.lane.b32.xlu2 %v3512_v46, %s3144_s9 }
  0x4b   : > { %887 = vrot.lane.b32.xlu1 %v3517_v22, %s3144_s9  ;;  %v5806_v22 = vshll.u32 %v3223_v0, 16 }
  0x4c   : > { %885 = vrot.lane.b32.xlu0 %v3525_v50, %s3144_s9 }
  0x4d   : > { %v1107_v46 = vrot.slane %v5806_v22, 5 }
  0x52   : > { %895 = vrot.lane.b32.xlu2 %v3546_v57, %s3144_s9 }
  0x53   : > { %893 = vrot.lane.b32.xlu1 %v3549_v21, %s3144_s9 }
  0x54   : > { %891 = vrot.lane.b32.xlu0 %v3552_v60, %s3144_s9 }
  0x5a   : > { %951 = vrot.lane.b32.xlu2 %v904_v51, %s3145_s14  ;;  %v915_v51 = vrot.slane %v3292_v37, 1 }
  0x5b   : > { %949 = vrot.lane.b32.xlu1 %v902_v39, %s3145_s14  ;;  %v911_v39 = vrot.slane %v3273_v28, 1 }
  0x5c   : > { %947 = vrot.lane.b32.xlu0 %v900_v23, %s3145_s14  ;;  %v3592_v48 = vsel %vm897_vm1, %v913_v8, %v915_v51  ;;  %v919_v23 = vrot.slane %v3306_v44, 1 }
  0x5d   : > { %5760 = vst [vmem:[#allocation12_spill] sm:$0xff] %v3592_v48  ;;  %v3595_v33 = vsel %vm897_vm1, %v911_v39, %v913_v8  ;;  %v3598_v14 = vsel %vm897_vm1, %v909_v18, %v911_v39  ;;  %v3616_v39 = vsel %vm897_vm1, %v915_v51, %v917_v9  ;;  %v3633_v51 = vsel %vm897_vm1, %v923_v7, %v925_v11 }
  0x5e   : > { %5761 = vst [vmem:[#allocation13_spill] sm:$0xff] %v3595_v33  ;;  %v3610_v8 = vsel %vm897_vm1, %v919_v23, %v921_v30  ;;  %v3613_v18 = vsel %vm897_vm1, %v917_v9, %v919_v23  ;;  %v3630_v9 = vsel %vm897_vm1, %v925_v11, %v927_v6 }
  0x5f   : > { %5762 = vst [vmem:[#allocation14_spill] sm:$0xff] %v3598_v14 }
  0x60   : > { %5763 = vst [vmem:[#allocation15_spill] sm:$0xff] %v3610_v8 }
  0x61   : > { %5764 = vst [vmem:[#allocation16_spill] sm:$0xff] %v3613_v18 }
  0x62   : > { %957 = vrot.lane.b32.xlu2 %v3574_v4, %s3145_s14  ;;  %5765 = vst [vmem:[#allocation17_spill] sm:$0xff] %v3616_v39  ;;  %v1008_v4 = vrot.slane %v3273_v28, 4 }
  0x63   : > { %955 = vrot.lane.b32.xlu1 %v3577_v29, %s3145_s14  ;;  %5767 = vst [vmem:[#allocation19_spill] sm:$0xff] %v3630_v9  ;;  %v1006_v29 = vrot.slane %v3245_v10, 4 }
  0x64   : > { %953 = vrot.lane.b32.xlu0 %v3580_v19, %s3145_s14  ;;  %5768 = vst [vmem:[#allocation20_spill] sm:$0xff] %v3633_v51 }
  0x6a   : > { %963 = vrot.lane.b32.xlu2 %v3592_v48, %s3145_s14  ;;  %v998_v48 = vrot.slane %v3229_v2, 4 }
  0x6b   : > { %961 = vrot.lane.b32.xlu1 %v3595_v33, %s3145_s14 }
  0x6c   : > { %959 = vrot.lane.b32.xlu0 %v3598_v14, %s3145_s14  ;;  %v941_v14 = vrot.slane %v3486_v13, 1 }
  0x72   : > { %969 = vrot.lane.b32.xlu2 %v3610_v8, %s3145_s14  ;;  %v935_v8 = vrot.slane %v3438_v58, 1 }
  0x73   : > { %967 = vrot.lane.b32.xlu1 %v3613_v18, %s3145_s14  ;;  %v929_v18 = vrot.slane %v3396_v55, 1 }
  0x74   : > { %965 = vrot.lane.b32.xlu0 %v3616_v39, %s3145_s14  ;;  %v3627_v23 = vpop.permute.xlu2 %857  ;;  %v933_v39 = vrot.slane %v3407_v59, 1 }
  0x75   : > { %5766 = vst [vmem:[#allocation18_spill] sm:$0xff] %v3627_v23  ;;  %v3653_v30 = vsel %vm897_vm1, %v929_v18, %v931_v26 }
  0x76   : > { %v3650_v7 = vsel %vm897_vm1, %v931_v26, %v933_v39  ;;  %5771 = vst [vmem:[#allocation23_spill] sm:$0xff] %v3653_v30 }
  0x77   : > { %5770 = vst [vmem:[#allocation22_spill] sm:$0xff] %v3650_v7 }
  0x7a   : > { %975 = vrot.lane.b32.xlu2 %v3630_v9, %s3145_s14  ;;  %v3656_v9 = vsel %vm897_vm1, %v927_v6, %v929_v18 }
  0x7b   : > { %973 = vrot.lane.b32.xlu1 %v3633_v51, %s3145_s14  ;;  %5772 = vst [vmem:[#allocation24_spill] sm:$0xff] %v3656_v9  ;;  %v939_v51 = vrot.slane %v3449_v47, 1 }
  0x7c   : > { %971 = vrot.lane.b32.xlu0 %v3636_v12, %s3145_s14  ;;  %v3647_v11 = vpop.permute.xlu2 %859  ;;  %v937_v12 = vrot.slane %v3426_v35, 1 }
  0x7e   : > { %v3670_v6 = vsel %vm897_vm1, %v937_v12, %v939_v51  ;;  %v3673_v18 = vsel %vm897_vm1, %v935_v8, %v937_v12 }
  0x7f   : > { %5774 = vst [vmem:[#allocation26_spill] sm:$0xff] %v3670_v6 }
  0x80   : > { %5775 = vst [vmem:[#allocation27_spill] sm:$0xff] %v3673_v18 }
  0x82   : > { %981 = vrot.lane.b32.xlu2 %v3650_v7, %s3145_s14  ;;  %v3676_v7 = vsel %vm897_vm1, %v933_v39, %v935_v8 }
  0x83   : > { %979 = vrot.lane.b32.xlu1 %v3653_v30, %s3145_s14  ;;  %5776 = vst [vmem:[#allocation28_spill] sm:$0xff] %v3676_v7  ;;  %v5718_v30 = vrot.slane %v3501_v43, 1 }
  0x84   : > { %977 = vrot.lane.b32.xlu0 %v3656_v9, %s3145_s14  ;;  %v3667_v26 = vpop.permute.xlu2 %865  ;;  %v943_v9 = vrot.slane %v3483_v25, 1 }
  0x85   : > { %5773 = vst [vmem:[#allocation25_spill] sm:$0xff] %v3667_v26 }
  0x86   : > { %v3696_v39 = vsel %vm897_vm1, %v943_v9, %v5718_v30  ;;  %v1002_v30 = vrot.slane %v3223_v0, 4 }
  0x87   : > { %5779 = vst [vmem:[#allocation31_spill] sm:$0xff] %v3696_v39 }
  0x8a   : > { %987 = vrot.lane.b32.xlu2 %v3670_v6, %s3145_s14  ;;  %v1000_v6 = vrot.slane %v3232_v3, 4 }
  0x8b   : > { %985 = vrot.lane.b32.xlu1 %v3673_v18, %s3145_s14  ;;  %v3699_v18 = vsel %vm897_vm1, %v941_v14, %v943_v9 }
  0x8c   : > { %983 = vrot.lane.b32.xlu0 %v3676_v7, %s3145_s14  ;;  %v3687_v12 = vpop.permute.xlu2 %871  ;;  %5780 = vst [vmem:[#allocation32_spill] sm:$0xff] %v3699_v18  ;;  %v3702_v7 = vsel %vm897_vm1, %v939_v51, %v941_v14  ;;  %v997_v14 = vrot.slane %v3238_v5, 4 }
  0x8d   : > { %5777 = vst [vmem:[#allocation29_spill] sm:$0xff] %v3687_v12  ;;  %v3689_v33 = vpop.permute.xlu1 %853 }
  0x8e   : > { %v3691_v8 = vpop.permute.xlu0 %849  ;;  %5781 = vst [vmem:[#allocation33_spill] sm:$0xff] %v3702_v7 }
  0x8f   : > { %5778 = vst [vmem:[#allocation30_spill] sm:$0xff] %v3691_v8 }
  0x92   : > { %993 = vrot.lane.b32.xlu2 %v3696_v39, %s3145_s14  ;;  %v1001_v39 = vsel %vm648_vm2, %v998_v48, %v1000_v6 }
  0x93   : > { %991 = vrot.lane.b32.xlu1 %v3699_v18, %s3145_s14  ;;  %v1003_v18 = vsel %vm648_vm2, %v1000_v6, %v1002_v30 }
  0x94   : > { %989 = vrot.lane.b32.xlu0 %v3702_v7, %s3145_s14  ;;  %v3713_v9 = vpop.permute.xlu2 %877  ;;  %v999_v7 = vsel %vm648_vm2, %v997_v14, %v998_v48  ;;  %v1009_v48 = vsel %vm648_vm2, %v1006_v29, %v1008_v4  ;;  %v1014_v14 = vrot.slane %v3315_v49, 4 }
  0x95   : > { %5782 = vst [vmem:[#allocation34_spill] sm:$0xff] %v3713_v9  ;;  %v3715_v19 = vpop.permute.xlu1 %855 }
  0x96   : > { %5783 = vst [vmem:[#allocation35_spill] sm:$0xff] %v3715_v19  ;;  %v3718_v51 = vpop.permute.xlu0 %851  ;;  %v1004_v19 = vrot.slane %v3226_v1, 4 }
  0x97   : > { %5784 = vst [vmem:[#allocation36_spill] sm:$0xff] %v3718_v51  ;;  %v1034_v51 = vrot.slane %v3426_v35, 4 }
  0x9a   : > { %1050 = vrot.lane.b32.xlu2 %v1003_v18, %s3146_s15  ;;  %v1007_v18 = vsel %vm648_vm2, %v1004_v19, %v1006_v29 }
  0x9b   : > { %1048 = vrot.lane.b32.xlu1 %v1001_v39, %s3146_s15  ;;  %v1005_v39 = vsel %vm648_vm2, %v1002_v30, %v1004_v19 }
  0x9c   : > { %1046 = vrot.lane.b32.xlu0 %v999_v7, %s3146_s15  ;;  %v3729_v9 = vpop.permute.xlu2 %883  ;;  %v1012_v7 = vrot.slane %v3292_v37, 4 }
  0x9d   : > { %5785 = vst [vmem:[#allocation37_spill] sm:$0xff] %v3729_v9  ;;  %v3731_v23 = vpop.permute.xlu1 %863 }
  0x9e   : > { %5786 = vst [vmem:[#allocation38_spill] sm:$0xff] %v3731_v23  ;;  %v3733_v6 = vpop.permute.xlu0 %861  ;;  %v1010_v23 = vrot.slane %v3270_v27, 4  ;;  %v1015_v29 = vsel %vm648_vm2, %v1012_v7, %v1014_v14 }
  0x9f   : > { %5787 = vst [vmem:[#allocation39_spill] sm:$0xff] %v3733_v6 }
  0xa0   : > { %v1013_v19 = vsel %vm648_vm2, %v1010_v23, %v1012_v7  ;;  %v1011_v30 = vsel %vm648_vm2, %v1008_v4, %v1010_v23 }
  0xa2   : > { %1056 = vrot.lane.b32.xlu2 %v1009_v48, %s3146_s15  ;;  %v1018_v48 = vrot.slane %v3324_v52, 4 }
  0xa3   : > { %1054 = vrot.lane.b32.xlu1 %v1007_v18, %s3146_s15  ;;  %v1020_v18 = vrot.slane %v3354_v16, 4 }
  0xa4   : > { %1052 = vrot.lane.b32.xlu0 %v1005_v39, %s3146_s15  ;;  %v3744_v9 = vpop.permute.xlu2 %889  ;;  %v1016_v39 = vrot.slane %v3306_v44, 4 }
  0xa5   : > { %5788 = vst [vmem:[#allocation40_spill] sm:$0xff] %v3744_v9  ;;  %v3746_v6 = vpop.permute.xlu1 %869  ;;  %v1021_v4 = vsel %vm648_vm2, %v1018_v48, %v1020_v18 }
  0xa6   : > { %5789 = vst [vmem:[#allocation41_spill] sm:$0xff] %v3746_v6  ;;  %v3748_v38 = vpop.permute.xlu0 %867  ;;  %v1019_v23 = vsel %vm648_vm2, %v1016_v39, %v1018_v48 }
  0xa7   : > { %5790 = vst [vmem:[#allocation42_spill] sm:$0xff] %v3748_v38 }
  0xaa   : > { %1062 = vrot.lane.b32.xlu2 %v1015_v29, %s3146_s15  ;;  %v1017_v29 = vsel %vm648_vm2, %v1014_v14, %v1016_v39 }
  0xab   : > { %1060 = vrot.lane.b32.xlu1 %v1013_v19, %s3146_s15  ;;  %v1024_v19 = vrot.slane %v3369_v24, 4 }
  0xac   : > { %1058 = vrot.lane.b32.xlu0 %v1011_v30, %s3146_s15  ;;  %v3759_v6 = vpop.permute.xlu2 %895  ;;  %v1026_v30 = vrot.slane %v3396_v55, 4 }
  0xad   : > { %v3761_v38 = vpop.permute.xlu1 %875 }
  0xae   : > { %5791 = vst [vmem:[#allocation43_spill] sm:$0xff] %v3761_v38  ;;  %v3763_v7 = vpop.permute.xlu0 %873  ;;  %v1022_v38 = vrot.slane %v3351_v15, 4  ;;  %v1027_v14 = vsel %vm648_vm2, %v1024_v19, %v1026_v30 }
  0xaf   : > { %5792 = vst [vmem:[#allocation44_spill] sm:$0xff] %v3763_v7 }
  0xb0   : > { %v1025_v39 = vsel %vm648_vm2, %v1022_v38, %v1024_v19  ;;  %v1028_v19 = vrot.slane %v3385_v40, 4 }
  0xb2   : > { %1068 = vrot.lane.b32.xlu2 %v1021_v4, %s3146_s15  ;;  %v1023_v4 = vsel %vm648_vm2, %v1020_v18, %v1022_v38 }
  0xb3   : > { %1066 = vrot.lane.b32.xlu1 %v1019_v23, %s3146_s15  ;;  %v1030_v23 = vrot.slane %v3407_v59, 4 }
  0xb4   : > { %1064 = vrot.lane.b32.xlu0 %v1017_v29, %s3146_s15  ;;  %v3774_v9 = vpop.permute.xlu2 %951  ;;  %v1032_v29 = vrot.slane %v3438_v58, 4 }
  0xb5   : > { %v3776_v7 = vpop.permute.xlu1 %881  ;;  %v1031_v60 = vsel %vm648_vm2, %v1028_v19, %v1030_v23 }
  0xb6   : > { %5793 = vst [vmem:[#allocation45_spill] sm:$0xff] %v3776_v7  ;;  %v3778_v48 = vpop.permute.xlu0 %879  ;;  %v1033_v7 = vsel %vm648_vm2, %v1030_v23, %v1032_v29 }
  0xb7   : > { %5794 = vst [vmem:[#allocation46_spill] sm:$0xff] %v3778_v48 }
  0xba   : > { %1074 = vrot.lane.b32.xlu2 %v1027_v14, %s3146_s15  ;;  %v508_v14 = vld [vmem:[%s3480_s13 + $0x8] sm:$0xf] }
  0xbb   : > { %1072 = vrot.lane.b32.xlu1 %v1025_v39, %s3146_s15  ;;  %v509_v39 = vld [vmem:[%s3789_s19] sm:$0xf]  ;;  %v637_v21 = vunpack.c.l.b16 %v508_v14  ;;  %v1035_v14 = vsel %vm648_vm2, %v1032_v29, %v1034_v51  ;;  %v5803_v29 = vshrl.u32 %v3232_v3, 16 }
  0xbc   : > { %1070 = vrot.lane.b32.xlu0 %v1023_v4, %s3146_s15  ;;  %v3795_v48 = vpop.permute.xlu2 %957  ;;  %v1029_v4 = vsel %vm648_vm2, %v1026_v30, %v1028_v19  ;;  %v643_v57 = vunpack.c.l.b16 %v509_v39 }
  0xbd   : > { %v3797_v38 = vpop.permute.xlu1 %887  ;;  %v639_v23 = vpack.c.b16 %v637_v21, %v637_v21  ;;  %v1042_v21 = vrot.slane %v3501_v43, 4 }
  0xbe   : > { %5795 = vst [vmem:[#allocation47_spill] sm:$0xff] %v3797_v38  ;;  %v3799_v18 = vpop.permute.xlu0 %885  ;;  %v1036_v38 = vrot.slane %v3449_v47, 4  ;;  %v646_v30 = vpack.c.b16 %v643_v57, %v643_v57 }
  0xbf   : > { %5796 = vst [vmem:[#allocation48_spill] sm:$0xff] %v3799_v18  ;;  %v1038_v18 = vrot.slane %v3486_v13, 4 }
  0xc0   : > { %v3822_v39 = vsel %vm648_vm2, %v639_v23, %v646_v30  ;;  %v1102_v23 = vrot.slane %v5803_v29, 4  ;;  %v5804_v30 = vshll.u32 %v3232_v3, 16  ;;  %v5809_v3 = vshrl.u32 %v3238_v5, 16 }
  0xc1   : > { %v1044_v57 = vrot.slane %v3822_v39, 4 }
  0xc2   : > { %1080 = vrot.lane.b32.xlu2 %v1033_v7, %s3146_s15  ;;  %v1039_v7 = vsel %vm648_vm2, %v1036_v38, %v1038_v18 }
  0xc3   : > { %1078 = vrot.lane.b32.xlu1 %v1031_v60, %s3146_s15  ;;  %v1037_v60 = vsel %vm648_vm2, %v1034_v51, %v1036_v38 }
  0xc4   : > { %1076 = vrot.lane.b32.xlu0 %v1029_v4, %s3146_s15  ;;  %v3812_v8 = vpop.permute.xlu2 %963  ;;  %v1040_v4 = vrot.slane %v3483_v25, 4 }
  0xc5   : > { %5797 = vst [vmem:[#allocation49_spill] sm:$0xff] %v3812_v8  ;;  %v3814_v12 = vpop.permute.xlu1 %893 }
  0xc6   : > { %5798 = vst [vmem:[#allocation50_spill] sm:$0xff] %v3814_v12  ;;  %v3816_v19 = vpop.permute.xlu0 %891  ;;  %v1043_v8 = vsel %vm648_vm2, %v1040_v4, %v1042_v21  ;;  %v1041_v29 = vsel %vm648_vm2, %v1038_v18, %v1040_v4  ;;  %v5814_v4 = vshrl.u32 %v3245_v10, 16 }
  0xc7   : > { %5799 = vst [vmem:[#allocation51_spill] sm:$0xff] %v3816_v19  ;;  %v5807_v19 = vshrl.u32 %v3229_v2, 16 }
  0xc9   : > { %v1098_v12 = vrot.slane %v5807_v19, 4 }
  0xca   : > { %1086 = vrot.lane.b32.xlu2 %v1039_v7, %s3146_s15  ;;  %v1103_v7 = vrot.slane %v5804_v30, 5  ;;  %v1095_v30 = vrot.slane %v5809_v3, 4 }
  0xcb   : > { %1084 = vrot.lane.b32.xlu1 %v1037_v60, %s3146_s15  ;;  %v5805_v60 = vshrl.u32 %v3223_v0, 16 }
  0xcc   : > { %1082 = vrot.lane.b32.xlu0 %v1035_v14, %s3146_s15  ;;  %v3830_v50 = vpop.permute.xlu2 %969  ;;  %v1104_v0 = vor.u32 %v1103_v7, %v1102_v23  ;;  %v5817_v23 = vshll.u32 %v3273_v28, 16 }
  0xcd   : > { %5800 = vst [vmem:[#allocation52_spill] sm:$0xff] %v3830_v50  ;;  %v3832_v38 = vpop.permute.xlu1 %949  ;;  %v1106_v14 = vrot.slane %v5805_v60, 4  ;;  %v5808_v50 = vshll.u32 %v3229_v2, 16  ;;  %v5810_v60 = vshll.u32 %v3238_v5, 16 }
  0xce   : > { %5801 = vst [vmem:[#allocation53_spill] sm:$0xff] %v3832_v38  ;;  %v3834_v51 = vpop.permute.xlu0 %947  ;;  %v1119_v7 = vrot.slane %v5817_v23, 5 }
  0xcf   : > { %5802 = vst [vmem:[#allocation54_spill] sm:$0xff] %v3834_v51  ;;  %v1099_v38 = vrot.slane %v5808_v50, 5  ;;  %v1045_v51 = vsel %vm648_vm2, %v1042_v21, %v1044_v57  ;;  %v1096_v26 = vrot.slane %v5810_v60, 5  ;;  %v1108_v22 = vor.u32 %v1107_v46, %v1106_v14 }
  0xd0   : > { %v5815_v46 = vshll.u32 %v3245_v10, 16 }
  0xd1   : > { %v1100_v2 = vor.u32 %v1099_v38, %v1098_v12  ;;  %v1097_v18 = vor.u32 %v1096_v26, %v1095_v30  ;;  %v1109_v5 = vsel %vm1094_vm3, %v1104_v0, %v1108_v22  ;;  %v5816_v38 = vshrl.u32 %v3273_v28, 16 }
  0xd2   : > { %1092 = vrot.lane.b32.xlu2 %v1045_v51, %s3146_s15  ;;  %v1115_v12 = vrot.slane %v5815_v46, 5  ;;  %v5818_v26 = vshrl.u32 %v3226_v1, 16 }
  0xd3   : > { %1090 = vrot.lane.b32.xlu1 %v1043_v8, %s3146_s15  ;;  %v1105_v57 = vsel %vm1094_vm3, %v1100_v2, %v1104_v0  ;;  %v1114_v8 = vrot.slane %v5814_v4, 4  ;;  %v1118_v51 = vrot.slane %v5816_v38, 4  ;;  %v1101_v30 = vsel %vm1094_vm3, %v1097_v18, %v1100_v2 }
  0xd4   : > { %1088 = vrot.lane.b32.xlu0 %v1041_v29, %s3146_s15  ;;  %v3858_v50 = vpop.permute.xlu2 %975  ;;  %v1110_v14 = vrot.slane %v5818_v26, 4  ;;  %v5819_v29 = vshll.u32 %v3226_v1, 16  ;;  %v5823_v1 = vshrl.u32 %v3292_v37, 16  ;;  %v5824_v2 = vshll.u32 %v3292_v37, 16 }
  0xd5   : > { %5811 = vst [vmem:[#allocation55_spill] sm:$0xff] %v3858_v50  ;;  %v3860_v19 = vpop.permute.xlu1 %955  ;;  %v1116_v10 = vor.u32 %v1115_v12, %v1114_v8  ;;  %v1120_v60 = vor.u32 %v1119_v7, %v1118_v51  ;;  %v5826_v26 = vshll.u32 %v3315_v49, 16  ;;  %v5827_v12 = vshrl.u32 %v3270_v27, 16  ;;  %v4093_v50 = vld [vmem:[%s3220_s8 + $0x40] sm:$0xff] }
  0xd6   : > { %5812 = vst [vmem:[#allocation56_spill] sm:$0xff] %v3860_v19  ;;  %v3862_v21 = vpop.permute.xlu0 %953  ;;  %v1111_v3 = vrot.slane %v5819_v29, 5  ;;  %v1126_v23 = vrot.slane %v5823_v1, 4  ;;  %v1127_v18 = vrot.slane %v5824_v2, 5  ;;  %v5828_v7 = vshll.u32 %v3270_v27, 16 }
  0xd7   : > { %5813 = vst [vmem:[#allocation57_spill] sm:$0xff] %v3862_v21  ;;  %v1131_v8 = vrot.slane %v5826_v26, 5  ;;  %v1122_v51 = vrot.slane %v5827_v12, 4  ;;  %v1121_v29 = vsel %vm1094_vm3, %v1116_v10, %v1120_v60 }
  0xd8   : > { %v1112_v0 = vor.u32 %v1111_v3, %v1110_v14  ;;  %v1123_v14 = vrot.slane %v5828_v7, 5  ;;  %v1128_v1 = vor.u32 %v1127_v18, %v1126_v23  ;;  %v5834_v18 = vshrl.u32 %v3354_v16, 16 }
  0xda   : > { %1204 = vrot.lane.b32.xlu2 %v1109_v5, %s3147_s20  ;;  %v5825_v5 = vshrl.u32 %v3315_v49, 16  ;;  %v1117_v3 = vsel %vm1094_vm3, %v1112_v0, %v1116_v10 }
  0xdb   : > { %1202 = vrot.lane.b32.xlu1 %v1105_v57, %s3147_s20 }
  0xdc   : > { %1200 = vrot.lane.b32.xlu0 %v1101_v30, %s3147_s20  ;;  %v3882_v4 = vpop.permute.xlu2 %981  ;;  %v1130_v57 = vrot.slane %v5825_v5, 4  ;;  %v1113_v30 = vsel %vm1094_vm3, %v1108_v22, %v1112_v0  ;;  %v1124_v5 = vor.u32 %v1123_v14, %v1122_v51  ;;  %v5832_v22 = vshrl.u32 %v3324_v52, 16 }
  0xdd   : > { %5820 = vst [vmem:[#allocation58_spill] sm:$0xff] %v3882_v4  ;;  %v3884_v46 = vpop.permute.xlu1 %961  ;;  %v5836_v14 = vshrl.u32 %v3306_v44, 16 }
  0xde   : > { %5821 = vst [vmem:[#allocation59_spill] sm:$0xff] %v3884_v46  ;;  %v3886_v38 = vpop.permute.xlu0 %959  ;;  %v1132_v2 = vor.u32 %v1131_v8, %v1130_v57  ;;  %v1129_v10 = vsel %vm1094_vm3, %v1124_v5, %v1128_v1  ;;  %v1138_v0 = vrot.slane %v5832_v22, 4  ;;  %v1142_v57 = vrot.slane %v5834_v18, 4 }
  0xdf   : > { %5822 = vst [vmem:[#allocation60_spill] sm:$0xff] %v3886_v38  ;;  %v5835_v8 = vshll.u32 %v3354_v16, 16 }
  0xe0   : > { %v1133_v7 = vsel %vm1094_vm3, %v1128_v1, %v1132_v2  ;;  %v1125_v1 = vsel %vm1094_vm3, %v1120_v60, %v1124_v5  ;;  %v5841_v60 = vshll.u32 %v3369_v24, 16 }
  0xe1   : > { %v1143_v51 = vrot.slane %v5835_v8, 5 }
  0xe2   : > { %1210 = vrot.lane.b32.xlu2 %v1121_v29, %s3147_s20  ;;  %v5833_v29 = vshll.u32 %v3324_v52, 16  ;;  %v1151_v5 = vrot.slane %v5841_v60, 5 }
  0xe3   : > { %1208 = vrot.lane.b32.xlu1 %v1117_v3, %s3147_s20  ;;  %v1134_v3 = vrot.slane %v5836_v14, 4  ;;  %v5840_v14 = vshrl.u32 %v3369_v24, 16 }
  0xe4   : > { %1206 = vrot.lane.b32.xlu0 %v1113_v30, %s3147_s20  ;;  %v3906_v26 = vpop.permute.xlu2 %987  ;;  %v1139_v23 = vrot.slane %v5833_v29, 5  ;;  %v5837_v30 = vshll.u32 %v3306_v44, 16  ;;  %v1144_v29 = vor.u32 %v1143_v51, %v1142_v57  ;;  %v5845_v57 = vshll.u32 %v3351_v15, 16 }
  0xe5   : > { %5829 = vst [vmem:[#allocation61_spill] sm:$0xff] %v3906_v26  ;;  %v3908_v12 = vpop.permute.xlu1 %967 }
  0xe6   : > { %5830 = vst [vmem:[#allocation62_spill] sm:$0xff] %v3908_v12  ;;  %v3910_v27 = vpop.permute.xlu0 %965  ;;  %v1140_v22 = vor.u32 %v1139_v23, %v1138_v0  ;;  %v1147_v51 = vrot.slane %v5845_v57, 5 }
  0xe7   : > { %5831 = vst [vmem:[#allocation63_spill] sm:$0xff] %v3910_v27  ;;  %v1135_v27 = vrot.slane %v5837_v30, 5  ;;  %v1150_v30 = vrot.slane %v5840_v14, 4 }
  0xe9   : > { %v1136_v18 = vor.u32 %v1135_v27, %v1134_v3  ;;  %v5844_v27 = vshrl.u32 %v3351_v15, 16  ;;  %v1145_v3 = vsel %vm1094_vm3, %v1140_v22, %v1144_v29  ;;  %v1152_v60 = vor.u32 %v1151_v5, %v1150_v30 }
  0xea   : > { %1216 = vrot.lane.b32.xlu2 %v1133_v7, %s3147_s20  ;;  %v5842_v7 = vshrl.u32 %v3396_v55, 16  ;;  %v5850_v5 = vshrl.u32 %v3438_v58, 16 }
  0xeb   : > { %1214 = vrot.lane.b32.xlu1 %v1129_v10, %s3147_s20  ;;  %v1146_v23 = vrot.slane %v5844_v27, 4  ;;  %v1137_v14 = vsel %vm1094_vm3, %v1132_v2, %v1136_v18  ;;  %v5848_v2 = vshrl.u32 %v3407_v59, 16 }
  0xec   : > { %1212 = vrot.lane.b32.xlu0 %v1125_v1, %s3147_s20  ;;  %v3930_v12 = vpop.permute.xlu2 %993  ;;  %v1154_v10 = vrot.slane %v5842_v7, 4  ;;  %v5843_v1 = vshll.u32 %v3396_v55, 16 }
  0xed   : > { %v3932_v8 = vpop.permute.xlu1 %973 }
  0xee   : > { %5838 = vst [vmem:[#allocation64_spill] sm:$0xff] %v3932_v8  ;;  %v3934_v26 = vpop.permute.xlu0 %971  ;;  %v1155_v0 = vrot.slane %v5843_v1, 5  ;;  %v1148_v8 = vor.u32 %v1147_v51, %v1146_v23  ;;  %v5852_v51 = vshrl.u32 %v3385_v40, 16 }
  0xef   : > { %5839 = vst [vmem:[#allocation65_spill] sm:$0xff] %v3934_v26  ;;  %v1141_v26 = vsel %vm1094_vm3, %v1136_v18, %v1140_v22  ;;  %v1162_v18 = vrot.slane %v5848_v2, 4 }
  0xf0   : > { %v1156_v7 = vor.u32 %v1155_v0, %v1154_v10  ;;  %v1153_v22 = vsel %vm1094_vm3, %v1148_v8, %v1152_v60  ;;  %v1166_v10 = vrot.slane %v5850_v5, 4  ;;  %v5851_v0 = vshll.u32 %v3438_v58, 16 }
  0xf2   : > { %1222 = vrot.lane.b32.xlu2 %v1145_v3, %s3147_s20  ;;  %v1157_v38 = vsel %vm1094_vm3, %v1152_v60, %v1156_v7  ;;  %v1167_v23 = vrot.slane %v5851_v0, 5  ;;  %v1158_v3 = vrot.slane %v5852_v51, 4  ;;  %v1149_v60 = vsel %vm1094_vm3, %v1144_v29, %v1148_v8 }
  0xf3   : > { %1220 = vrot.lane.b32.xlu1 %v1141_v26, %s3147_s20  ;;  %v5849_v26 = vshll.u32 %v3407_v59, 16  ;;  %v5856_v51 = vshrl.u32 %v3449_v47, 16  ;;  %v5857_v29 = vshll.u32 %v3449_v47, 16 }
  0xf4   : > { %1218 = vrot.lane.b32.xlu0 %v1137_v14, %s3147_s20  ;;  %v3954_v1 = vpop.permute.xlu2 %1050  ;;  %v5853_v14 = vshll.u32 %v3385_v40, 16 }
  0xf5   : > { %v3956_v27 = vpop.permute.xlu1 %979  ;;  %v1163_v30 = vrot.slane %v5849_v26, 5  ;;  %v1168_v26 = vor.u32 %v1167_v23, %v1166_v10  ;;  %v1175_v8 = vrot.slane %v5857_v29, 5  ;;  %v5861_v10 = vshll.u32 %v3426_v35, 16 }
  0xf6   : > { %5846 = vst [vmem:[#allocation66_spill] sm:$0xff] %v3956_v27  ;;  %v3958_v57 = vpop.permute.xlu0 %977 }
  0xf7   : > { %5847 = vst [vmem:[#allocation67_spill] sm:$0xff] %v3958_v57  ;;  %v1159_v57 = vrot.slane %v5853_v14, 5  ;;  %v1164_v2 = vor.u32 %v1163_v30, %v1162_v18  ;;  %v1174_v14 = vrot.slane %v5856_v51, 4  ;;  %v1171_v23 = vrot.slane %v5861_v10, 5 }
  0xf8   : > { %v5735_v10 = vshll.u32 %v3822_v39, 16 }
  0xf9   : > { %v1160_v5 = vor.u32 %v1159_v57, %v1158_v3  ;;  %v5860_v57 = vshrl.u32 %v3426_v35, 16  ;;  %v1169_v3 = vsel %vm1094_vm3, %v1164_v2, %v1168_v26  ;;  %v1176_v29 = vor.u32 %v1175_v8, %v1174_v14 }
  0xfa   : > { %1228 = vrot.lane.b32.xlu2 %v1157_v38, %s3147_s20  ;;  %v5858_v38 = vshrl.u32 %v3486_v13, 16  ;;  %v5862_v8 = vshll.u32 %v3501_v43, 16 }
  0xfb   : > { %1226 = vrot.lane.b32.xlu1 %v1153_v22, %s3147_s20  ;;  %v1170_v30 = vrot.slane %v5860_v57, 4  ;;  %v1161_v51 = vsel %vm1094_vm3, %v1156_v7, %v1160_v5  ;;  %v5734_v57 = vshrl.u32 %v3822_v39, 16 }
  0xfc   : > { %1224 = vrot.lane.b32.xlu0 %v1149_v60, %s3147_s20  ;;  %v3978_v27 = vpop.permute.xlu2 %1056  ;;  %v1178_v22 = vrot.slane %v5858_v38, 4  ;;  %v5859_v60 = vshll.u32 %v3486_v13, 16 }
  0xfd   : > { %v3980_v0 = vpop.permute.xlu1 %985 }
  0xfe   : > { %5854 = vst [vmem:[#allocation68_spill] sm:$0xff] %v3980_v0  ;;  %v3982_v46 = vpop.permute.xlu0 %983  ;;  %v1179_v18 = vrot.slane %v5859_v60, 5  ;;  %v1172_v0 = vor.u32 %v1171_v23, %v1170_v30  ;;  %v5733_v60 = vshrl.u32 %v3501_v43, 16  ;;  %v1197_v30 = vrot.slane %v5735_v10, 5 }
  0xff   : > { %5855 = vst [vmem:[#allocation69_spill] sm:$0xff] %v3982_v46  ;;  %v1165_v46 = vsel %vm1094_vm3, %v1160_v5, %v1164_v2  ;;  %v5863_v23 = vshrl.u32 %v3483_v25, 16 }
 0x100   : > { %v1180_v38 = vor.u32 %v1179_v18, %v1178_v22  ;;  %v1188_v14 = vrot.slane %v5733_v60, 4  ;;  %v1189_v22 = vrot.slane %v5862_v8, 5  ;;  %v1194_v18 = vrot.slane %v5734_v57, 4 }
 0x102   : > { %1234 = vrot.lane.b32.xlu2 %v1169_v3, %s3147_s20  ;;  %v1181_v5 = vsel %vm1094_vm3, %v1176_v29, %v1180_v38  ;;  %v1182_v3 = vrot.slane %v5863_v23, 4  ;;  %v1190_v8 = vor.u32 %v1189_v22, %v1188_v14  ;;  %v1198_v60 = vor.u32 %v1197_v30, %v1194_v18  ;;  %v4046_v14 = vld [vmem:[%s3220_s8 + $0x20] sm:$0xff]  ;;  %v4058_v30 = vld [vmem:[%s3220_s8 + $0x8] sm:$0xff] }
 0x103   : > { %1232 = vrot.lane.b32.xlu1 %v1165_v46, %s3147_s20  ;;  %v1177_v46 = vsel %vm1094_vm3, %v1172_v0, %v1176_v29  ;;  %v1173_v29 = vsel %vm1094_vm3, %v1168_v26, %v1172_v0  ;;  %v1254_v22 = vrot.slane %v4046_v14, 5 }
 0x104   : > { %1230 = vrot.lane.b32.xlu0 %v1161_v51, %s3147_s20  ;;  %v4005_v4 = vpop.permute.xlu2 %1062  ;;  %v5864_v51 = vshll.u32 %v3483_v25, 16  ;;  %v1199_v26 = vsel %vm1094_vm3, %v1190_v8, %v1198_v60  ;;  %v4050_v60 = vld [vmem:[%s3220_s8 + $0x10] sm:$0xff] }
 0x105   : > { %v4007_v2 = vpop.permute.xlu1 %991  ;;  %v1250_v18 = vrot.slane %v4050_v60, 5 }
 0x106   : > { %v4009_v7 = vpop.permute.xlu0 %989  ;;  %v1183_v21 = vrot.slane %v5864_v51, 5 }
 0x108   : > { %v1184_v57 = vor.u32 %v1183_v21, %v1182_v3  ;;  %v4042_v21 = vld [vmem:[%s3220_s8 + $0x18] sm:$0xff]  ;;  %v1249_v3 = vrot.slane %v4058_v30, 5 }
 0x109   : > { %5866 = vst [vmem:[#allocation71_spill] sm:$0xff] %v4042_v21 }
 0x10a   : > { %1240 = vrot.lane.b32.xlu2 %v1181_v5, %s3147_s20  ;;  %v1191_v0 = vsel %vm1094_vm3, %v1184_v57, %v1190_v8  ;;  %v1185_v5 = vsel %vm1094_vm3, %v1180_v38, %v1184_v57 }
 0x10b   : > { %1238 = vrot.lane.b32.xlu1 %v1177_v46, %s3147_s20  ;;  %v1252_v46 = vrot.slane %v4042_v21, 5 }
 0x10c   : > { %1236 = vrot.lane.b32.xlu0 %v1173_v29, %s3147_s20  ;;  %v4029_v10 = vpop.permute.xlu2 %1068 }
 0x10d   : > { %v4031_v23 = vpop.permute.xlu1 %1048  ;;  %v1255_v29 = vsel %vm1248_vm4, %v1252_v46, %v1254_v22  ;;  %v1253_v8 = vsel %vm1248_vm4, %v1250_v18, %v1252_v46 }
 0x10e   : > { %v4033_v19 = vpop.permute.xlu0 %1046 }
 0x10f   : > { %5865 = vst [vmem:[#allocation70_spill] sm:$0xff] %v4033_v19 }
 0x112   : > { %1246 = vrot.lane.b32.xlu2 %v1199_v26, %s3147_s20  ;;  %v1251_v26 = vsel %vm1248_vm4, %v1249_v3, %v1250_v18 }
 0x113   : > { %1244 = vrot.lane.b32.xlu1 %v1191_v0, %s3147_s20  ;;  %v4070_v0 = vld [vmem:[%s3220_s8 + $0x30] sm:$0xff] }
 0x114   : > { %1242 = vrot.lane.b32.xlu0 %v1185_v5, %s3147_s20  ;;  %v4053_v38 = vpop.permute.xlu2 %1074  ;;  %5870 = vst [vmem:[#allocation75_spill] sm:$0xff] %v4070_v0  ;;  %v1258_v5 = vrot.slane %v4070_v0, 5 }
 0x115   : > { %5867 = vst [vmem:[#allocation72_spill] sm:$0xff] %v4053_v38  ;;  %v4055_v57 = vpop.permute.xlu1 %1054 }
 0x116   : > { %5868 = vst [vmem:[#allocation73_spill] sm:$0xff] %v4055_v57  ;;  %v4061_v51 = vpop.permute.xlu0 %1052  ;;  %v4075_v57 = vld [vmem:[%s3220_s8 + $0x28] sm:$0xff] }
 0x117   : > { %5869 = vst [vmem:[#allocation74_spill] sm:$0xff] %v4061_v51  ;;  %v1260_v51 = vrot.slane %v3273_v28, 5  ;;  %v1256_v46 = vrot.slane %v4075_v57, 5  ;;  %v1264_v28 = vrot.slane %v3292_v37, 5  ;;  %v1270_v37 = vrot.slane %v3324_v52, 5 }
 0x118   : > { %v1278_v52 = vrot.slane %v3396_v55, 5  ;;  %v1280_v55 = vrot.slane %v3385_v40, 5  ;;  %v1288_v40 = vrot.slane %v3449_v47, 5  ;;  %v1296_v47 = vrot.slane %v3822_v39, 5 }
 0x11a   : > { %1302 = vrot.lane.b32.xlu2 %v1255_v29, %s3148_s21  ;;  %v1261_v29 = vsel %vm1248_vm4, %v1258_v5, %v1260_v51 }
 0x11b   : > { %1300 = vrot.lane.b32.xlu1 %v1253_v8, %s3148_s21  ;;  %v1259_v8 = vsel %vm1248_vm4, %v1256_v46, %v1258_v5 }
 0x11c   : > { %1298 = vrot.lane.b32.xlu0 %v1251_v26, %s3148_s21  ;;  %v4078_v38 = vpop.permute.xlu2 %1080  ;;  %v1257_v26 = vsel %vm1248_vm4, %v1254_v22, %v1256_v46 }
 0x11d   : > { %5871 = vst [vmem:[#allocation76_spill] sm:$0xff] %v4078_v38  ;;  %v4080_v18 = vpop.permute.xlu1 %1060  ;;  %v1266_v38 = vrot.slane %v3315_v49, 5  ;;  %v1272_v49 = vrot.slane %v3354_v16, 5  ;;  %v1274_v16 = vrot.slane %v3351_v15, 5  ;;  %v1282_v15 = vrot.slane %v3407_v59, 5 }
 0x11e   : > { %5872 = vst [vmem:[#allocation77_spill] sm:$0xff] %v4080_v18  ;;  %v4082_v3 = vpop.permute.xlu0 %1058  ;;  %v1286_v59 = vrot.slane %v3426_v35, 5  ;;  %v1294_v35 = vrot.slane %v3501_v43, 5 }
 0x11f   : > { %5873 = vst [vmem:[#allocation78_spill] sm:$0xff] %v4082_v3  ;;  %v1262_v3 = vrot.slane %v4093_v50, 5  ;;  %v1267_v22 = vsel %vm1248_vm4, %v1264_v28, %v1266_v38 }
 0x121   : > { %v1265_v46 = vsel %vm1248_vm4, %v1262_v3, %v1264_v28 }
 0x122   : > { %1308 = vrot.lane.b32.xlu2 %v1261_v29, %s3148_s21  ;;  %v1263_v29 = vsel %vm1248_vm4, %v1260_v51, %v1262_v3  ;;  %v1273_v51 = vsel %vm1248_vm4, %v1270_v37, %v1272_v49 }
 0x123   : > { %1306 = vrot.lane.b32.xlu1 %v1259_v8, %s3148_s21  ;;  %v1268_v8 = vrot.slane %v3306_v44, 5  ;;  %v1276_v44 = vrot.slane %v3369_v24, 5  ;;  %v1284_v24 = vrot.slane %v3438_v58, 5  ;;  %v1290_v58 = vrot.slane %v3486_v13, 5 }
 0x124   : > { %1304 = vrot.lane.b32.xlu0 %v1257_v26, %s3148_s21  ;;  %v4096_v18 = vpop.permute.xlu2 %1086  ;;  %v1292_v13 = vrot.slane %v3483_v25, 5 }
 0x125   : > { %5874 = vst [vmem:[#allocation79_spill] sm:$0xff] %v4096_v18  ;;  %v4098_v19 = vpop.permute.xlu1 %1066  ;;  %v1271_v3 = vsel %vm1248_vm4, %v1268_v8, %v1270_v37  ;;  %v1269_v28 = vsel %vm1248_vm4, %v1266_v38, %v1268_v8  ;;  %v1279_v38 = vsel %vm1248_vm4, %v1276_v44, %v1278_v52  ;;  %v1277_v37 = vsel %vm1248_vm4, %v1274_v16, %v1276_v44  ;;  %v4259_v18 = vld [vmem:[%s3220_s8 + $0x88] sm:$0xff] }
 0x126   : > { %5875 = vst [vmem:[#allocation80_spill] sm:$0xff] %v4098_v19  ;;  %v4100_v5 = vpop.permute.xlu0 %1064  ;;  %v1275_v8 = vsel %vm1248_vm4, %v1272_v49, %v1274_v16  ;;  %v1285_v49 = vsel %vm1248_vm4, %v1282_v15, %v1284_v24  ;;  %v1283_v44 = vsel %vm1248_vm4, %v1280_v55, %v1282_v15  ;;  %v1281_v16 = vsel %vm1248_vm4, %v1278_v52, %v1280_v55 }
 0x127   : > { %5876 = vst [vmem:[#allocation81_spill] sm:$0xff] %v4100_v5  ;;  %v1291_v52 = vsel %vm1248_vm4, %v1288_v40, %v1290_v58  ;;  %v1289_v15 = vsel %vm1248_vm4, %v1286_v59, %v1288_v40  ;;  %v1287_v55 = vsel %vm1248_vm4, %v1284_v24, %v1286_v59  ;;  %v1297_v24 = vsel %vm1248_vm4, %v1294_v35, %v1296_v47  ;;  %v4204_v47 = vld [vmem:[%s3220_s8 + $0x38] sm:$0xff] }
 0x128   : > { %v1295_v40 = vsel %vm1248_vm4, %v1292_v13, %v1294_v35  ;;  %v1293_v59 = vsel %vm1248_vm4, %v1290_v58, %v1292_v13  ;;  %5889 = vst [vmem:[#allocation94_spill] sm:$0xff] %v4204_v47 }
 0x129   : > { %5902 = vst [vmem:[#allocation107_spill] sm:$0xff] %v4259_v18 }
 0x12a   : > { %1314 = vrot.lane.b32.xlu2 %v1267_v22, %s3148_s21 }
 0x12b   : > { %1312 = vrot.lane.b32.xlu1 %v1265_v46, %s3148_s21 }
 0x12c   : > { %1310 = vrot.lane.b32.xlu0 %v1263_v29, %s3148_s21  ;;  %v4111_v26 = vpop.permute.xlu2 %1092 }
 0x12d   : > { %v4113_v5 = vpop.permute.xlu1 %1072 }
 0x12e   : > { %5877 = vst [vmem:[#allocation82_spill] sm:$0xff] %v4113_v5  ;;  %v4115_v19 = vpop.permute.xlu0 %1070  ;;  %v4238_v5 = vld [vmem:[%s3220_s8 + $0x70] sm:$0xff] }
 0x12f   : > { %5878 = vst [vmem:[#allocation83_spill] sm:$0xff] %v4115_v19 }
 0x130   : > { %5897 = vst [vmem:[#allocation102_spill] sm:$0xff] %v4238_v5 }
 0x132   : > { %1320 = vrot.lane.b32.xlu2 %v1273_v51, %s3148_s21 }
 0x133   : > { %1318 = vrot.lane.b32.xlu1 %v1271_v3, %s3148_s21 }
 0x134   : > { %1316 = vrot.lane.b32.xlu0 %v1269_v28, %s3148_s21  ;;  %v4126_v22 = vpop.permute.xlu2 %1204 }
 0x135   : > { %v4128_v46 = vpop.permute.xlu1 %1078 }
 0x136   : > { %5879 = vst [vmem:[#allocation84_spill] sm:$0xff] %v4128_v46  ;;  %v4130_v29 = vpop.permute.xlu0 %1076 }
 0x137   : > { %5880 = vst [vmem:[#allocation85_spill] sm:$0xff] %v4130_v29 }
 0x13a   : > { %1326 = vrot.lane.b32.xlu2 %v1279_v38, %s3148_s21 }
 0x13b   : > { %1324 = vrot.lane.b32.xlu1 %v1277_v37, %s3148_s21 }
 0x13c   : > { %1322 = vrot.lane.b32.xlu0 %v1275_v8, %s3148_s21  ;;  %v4141_v51 = vpop.permute.xlu2 %1210 }
 0x13d   : > { %v4143_v3 = vpop.permute.xlu1 %1084 }
 0x13e   : > { %5881 = vst [vmem:[#allocation86_spill] sm:$0xff] %v4143_v3  ;;  %v4145_v28 = vpop.permute.xlu0 %1082  ;;  %v4227_v3 = vld [vmem:[%s3220_s8 + $0x48] sm:$0xff] }
 0x13f   : > { %5882 = vst [vmem:[#allocation87_spill] sm:$0xff] %v4145_v28  ;;  %v4222_v28 = vld [vmem:[%s3220_s8 + $0x50] sm:$0xff] }
 0x140   : > { %5893 = vst [vmem:[#allocation98_spill] sm:$0xff] %v4222_v28 }
 0x141   : > { %5894 = vst [vmem:[#allocation99_spill] sm:$0xff] %v4227_v3 }
 0x142   : > { %1332 = vrot.lane.b32.xlu2 %v1285_v49, %s3148_s21 }
 0x143   : > { %1330 = vrot.lane.b32.xlu1 %v1283_v44, %s3148_s21 }
 0x144   : > { %1328 = vrot.lane.b32.xlu0 %v1281_v16, %s3148_s21  ;;  %v4156_v38 = vpop.permute.xlu2 %1216 }
 0x145   : > { %v4158_v37 = vpop.permute.xlu1 %1090 }
 0x146   : > { %v4160_v8 = vpop.permute.xlu0 %1088 }
 0x14a   : > { %1338 = vrot.lane.b32.xlu2 %v1291_v52, %s3148_s21 }
 0x14b   : > { %1336 = vrot.lane.b32.xlu1 %v1289_v15, %s3148_s21 }
 0x14c   : > { %1334 = vrot.lane.b32.xlu0 %v1287_v55, %s3148_s21  ;;  %v4171_v49 = vpop.permute.xlu2 %1222 }
 0x14d   : > { %v4173_v44 = vpop.permute.xlu1 %1202 }
 0x14e   : > { %v4175_v16 = vpop.permute.xlu0 %1200 }
 0x152   : > { %1344 = vrot.lane.b32.xlu2 %v1297_v24, %s3148_s21 }
 0x153   : > { %1342 = vrot.lane.b32.xlu1 %v1295_v40, %s3148_s21 }
 0x154   : > { %1340 = vrot.lane.b32.xlu0 %v1293_v59, %s3148_s21  ;;  %v4183_v25 = vpop.permute.xlu2 %1228  ;;  %v4217_v59 = vld [vmem:[%s3220_s8 + $0x58] sm:$0xff] }
 0x155   : > { %5883 = vst [vmem:[#allocation88_spill] sm:$0xff] %v4183_v25  ;;  %v4185_v52 = vpop.permute.xlu1 %1208 }
 0x156   : > { %5884 = vst [vmem:[#allocation89_spill] sm:$0xff] %v4185_v52  ;;  %v4187_v15 = vpop.permute.xlu0 %1206 }
 0x157   : > { %5885 = vst [vmem:[#allocation90_spill] sm:$0xff] %v4187_v15 }
 0x15a   : > { %1350 = vrot.lane.b32.xlu2 %v4075_v57, %s3149_s22 }
 0x15b   : > { %1348 = vrot.lane.b32.xlu1 %v4046_v14, %s3149_s22 }
 0x15c   : > { %1346 = vrot.lane.b32.xlu0 %v4042_v21, %s3149_s22  ;;  %v4195_v58 = vpop.permute.xlu2 %1234 }
 0x15d   : > { %5886 = vst [vmem:[#allocation91_spill] sm:$0xff] %v4195_v58  ;;  %v4197_v55 = vpop.permute.xlu1 %1214 }
 0x15e   : > { %5887 = vst [vmem:[#allocation92_spill] sm:$0xff] %v4197_v55  ;;  %v4199_v35 = vpop.permute.xlu0 %1212  ;;  %v3115_v55 = vld [vmem:[%s3220_s8 + $0xb8] sm:$0xff] }
 0x15f   : > { %5888 = vst [vmem:[#allocation93_spill] sm:$0xff] %v4199_v35  ;;  %v4285_v35 = vld [vmem:[%s3220_s8 + $0x98] sm:$0xff] }
 0x160   : > { %5908 = vst [vmem:[#allocation113_spill] sm:$0xff] %v4285_v35 }
 0x162   : > { %1356 = vrot.lane.b32.xlu2 %v4093_v50, %s3149_s22 }
 0x163   : > { %1354 = vrot.lane.b32.xlu1 %v4204_v47, %s3149_s22  ;;  %v4319_v47 = vld [vmem:[%s3789_s19 + $0x4] sm:$0xff]  ;;  %s2874_s19 = sshll.u32 %s6034_s24, 1 }
 0x164   : > { %1352 = vrot.lane.b32.xlu0 %v4070_v0, %s3149_s22  ;;  %v4210_v13 = vpop.permute.xlu2 %1240 }
 0x165   : > { %5890 = vst [vmem:[#allocation95_spill] sm:$0xff] %v4210_v13  ;;  %v4212_v24 = vpop.permute.xlu1 %1220 }
 0x166   : > { %5891 = vst [vmem:[#allocation96_spill] sm:$0xff] %v4212_v24  ;;  %v4214_v40 = vpop.permute.xlu0 %1218  ;;  %v4248_v24 = vld [vmem:[%s3220_s8 + $0x60] sm:$0xff] }
 0x167   : > { %5892 = vst [vmem:[#allocation97_spill] sm:$0xff] %v4214_v40  ;;  %v4243_v40 = vld [vmem:[%s3220_s8 + $0x68] sm:$0xff] }
 0x168   : > { %5898 = vst [vmem:[#allocation103_spill] sm:$0xff] %v4243_v40 }
 0x169   : > { %5899 = vst [vmem:[#allocation104_spill] sm:$0xff] %v4248_v24 }
 0x16a   : > { %1362 = vrot.lane.b32.xlu2 %v4217_v59, %s3149_s22 }
 0x16b   : > { %1360 = vrot.lane.b32.xlu1 %v4222_v28, %s3149_s22  ;;  %v4280_v28 = vld [vmem:[%s3220_s8 + $0xa0] sm:$0xff] }
 0x16c   : > { %1358 = vrot.lane.b32.xlu0 %v4227_v3, %s3149_s22  ;;  %v4231_v29 = vpop.permute.xlu2 %1246  ;;  %v4264_v3 = vld [vmem:[%s3220_s8 + $0x80] sm:$0xff]  ;;  %5907 = vst [vmem:[#allocation112_spill] sm:$0xff] %v4280_v28 }
 0x16d   : > { %v4233_v46 = vpop.permute.xlu1 %1226  ;;  %5903 = vst [vmem:[#allocation108_spill] sm:$0xff] %v4264_v3 }
 0x16e   : > { %5895 = vst [vmem:[#allocation100_spill] sm:$0xff] %v4233_v46  ;;  %v4235_v19 = vpop.permute.xlu0 %1224 }
 0x16f   : > { %5896 = vst [vmem:[#allocation101_spill] sm:$0xff] %v4235_v19 }
 0x172   : > { %1368 = vrot.lane.b32.xlu2 %v4238_v5, %s3149_s22 }
 0x173   : > { %1366 = vrot.lane.b32.xlu1 %v4243_v40, %s3149_s22  ;;  %v4269_v40 = vld [vmem:[%s3220_s8 + $0x78] sm:$0xff] }
 0x174   : > { %1364 = vrot.lane.b32.xlu0 %v4248_v24, %s3149_s22  ;;  %v4252_v46 = vpop.permute.xlu2 %1302  ;;  %5904 = vst [vmem:[#allocation109_spill] sm:$0xff] %v4269_v40 }
 0x175   : > { %v4254_v19 = vpop.permute.xlu1 %1232 }
 0x176   : > { %5900 = vst [vmem:[#allocation105_spill] sm:$0xff] %v4254_v19  ;;  %v4256_v13 = vpop.permute.xlu0 %1230 }
 0x177   : > { %5901 = vst [vmem:[#allocation106_spill] sm:$0xff] %v4256_v13 }
 0x17a   : > { %1374 = vrot.lane.b32.xlu2 %v4259_v18, %s3149_s22  ;;  %v3118_v18 = vld [vmem:[%s3480_s13] sm:$0xff]  ;;  %s3056_s13 = smul.u32 384, %s6034_s24 }
 0x17b   : > { %1372 = vrot.lane.b32.xlu1 %v4264_v3, %s3149_s22  ;;  %v4290_v3 = vld [vmem:[%s3220_s8 + $0x90] sm:$0xff] }
 0x17c   : > { %1370 = vrot.lane.b32.xlu0 %v4269_v40, %s3149_s22  ;;  %v4273_v19 = vpop.permute.xlu2 %1308  ;;  %5909 = vst [vmem:[#allocation114_spill] sm:$0xff] %v4290_v3  ;;  %s5151_s18 = scalar_lea.vmem %s5655_s6, %s3056_s13 }
 0x17d   : > { %v4275_v13 = vpop.permute.xlu1 %1238 }
 0x17e   : > { %5905 = vst [vmem:[#allocation110_spill] sm:$0xff] %v4275_v13  ;;  %v4277_v24 = vpop.permute.xlu0 %1236 }
 0x17f   : > { %5906 = vst [vmem:[#allocation111_spill] sm:$0xff] %v4277_v24 }
 0x182   : > { %1380 = vrot.lane.b32.xlu2 %v4280_v28, %s3149_s22  ;;  %v4303_v28 = vld [vmem:[%s3220_s8 + $0xb0] sm:$0xff] }
 0x183   : > { %1378 = vrot.lane.b32.xlu1 %v4285_v35, %s3149_s22  ;;  %v4308_v35 = vld [vmem:[%s3220_s8 + $0xa8] sm:$0xff] }
 0x184   : > { %1376 = vrot.lane.b32.xlu0 %v4290_v3, %s3149_s22  ;;  %v4294_v13 = vpop.permute.xlu2 %1314 }
 0x185   : > { %v4296_v24 = vpop.permute.xlu1 %1244 }
 0x186   : > { %v4298_v40 = vpop.permute.xlu0 %1242 }
 0x18a   : > { %1386 = vrot.lane.b32.xlu2 %v3115_v55, %s3149_s22 }
 0x18b   : > { %1384 = vrot.lane.b32.xlu1 %v4303_v28, %s3149_s22 }
 0x18c   : > { %1382 = vrot.lane.b32.xlu0 %v4308_v35, %s3149_s22  ;;  %v4312_v3 = vpop.permute.xlu2 %1320 }
 0x18d   : > { %v4314_v58 = vpop.permute.xlu1 %1300 }
 0x18e   : > { %v4316_v0 = vpop.permute.xlu0 %1298 }
 0x192   : > { %1392 = vrot.lane.b32.xlu2 %v4319_v47, %s3149_s22 }
 0x193   : > { %1390 = vrot.lane.b32.xlu1 %v3822_v39, %s3149_s22 }
 0x194   : > { %1388 = vrot.lane.b32.xlu0 %v3118_v18, %s3149_s22  ;;  %v4327_v15 = vpop.permute.xlu2 %1326  ;;  %s456_s22 = scalar_lea.vmem %s5656_s7, %s2874_s19 }
 0x195   : > { %v4329_v52 = vpop.permute.xlu1 %1306 }
 0x196   : > { %v4331_v25 = vpop.permute.xlu0 %1304 }
 0x19a   : > { %1415 = vrot.lane.b32.xlu2 %v3299_v41, %s3150_s23 }
 0x19b   : > { %1413 = vrot.lane.b32.xlu1 %v3277_v31, %s3150_s23 }
 0x19c   : > { %1411 = vrot.lane.b32.xlu0 %v3302_v42, %s3150_s23  ;;  %v4339_v21 = vpop.permute.xlu2 %1332 }
 0x19d   : > { %v4341_v5 = vpop.permute.xlu1 %1312 }
 0x19e   : > { %5910 = vst [vmem:[#allocation115_spill] sm:$0xff] %v4341_v5  ;;  %v4343_v18 = vpop.permute.xlu0 %1310  ;;  %v1562_v5 = vsel %vm1514_vm5, %v3115_v55, %v3759_v6 }
 0x1a2   : > { %1421 = vrot.lane.b32.xlu2 %v3342_v62, %s3150_s23  ;;  %v1611_v62 = vsel %vm1563_vm6, %v1562_v5, %v3930_v12 }
 0x1a3   : > { %1419 = vrot.lane.b32.xlu1 %v3345_v63, %s3150_s23  ;;  %v1660_v63 = vsel %vm1612_vm7, %v1611_v62, %v4111_v26 }
 0x1a4   : > { %1417 = vrot.lane.b32.xlu0 %v3357_v17, %s3150_s23  ;;  %v4351_v41 = vpop.permute.xlu2 %1338  ;;  %v1709_v17 = vsel %vm1661_vm8, %v1660_v63, %v4231_v29  ;;  %v5912_v63 = vld [vmem:[#allocation49_spill] sm:$0xff] }
 0x1a5   : > { %v4353_v31 = vpop.permute.xlu1 %1318 }
 0x1a6   : > { %v4355_v42 = vpop.permute.xlu0 %1316 }
 0x1aa   : > { %1427 = vrot.lane.b32.xlu2 %v3380_v34, %s3150_s23 }
 0x1ab   : > { %1425 = vrot.lane.b32.xlu1 %v3388_v45, %s3150_s23  ;;  %v3151_v45 = vmov 0  }
 0x1ac   : > { %1423 = vrot.lane.b32.xlu0 %v3399_v56, %s3150_s23  ;;  %v1345_v6 = vpop.permute.xlu2 %1344  ;;  %3092 = vset.pattern.permute.xlu1 %v3151_v45  ;;  %v1520_v56 = vsel %vm1514_vm5, %v4050_v60, %v3689_v33 }
 0x1ad   : > { %v4371_v12 = vpop.permute.xlu1 %1324  ;;  %v4374_v5 = vsel %vm1710_vm9, %v1709_v17, %v1345_v6  ;;  %3091 = vset.pattern.permute.xlu0 %v3151_v45  ;;  %3093 = vset.pattern.permute.xlu2 %v3151_v45  ;;  %v1569_v26 = vsel %vm1563_vm6, %v1520_v56, %v3774_v9  ;;  %v5913_v17 = vld [vmem:[#allocation50_spill] sm:$0xff] }
 0x1ae   : > { %v4376_v34 = vpop.permute.xlu0 %1322  ;;  %v1618_v29 = vsel %vm1612_vm7, %v1569_v26, %v3954_v1 }
 0x1af   : > { %v1667_v55 = vsel %vm1661_vm8, %v1618_v29, %v4126_v22  ;;  %v5915_v29 = vld [vmem:[#allocation2_spill] sm:$0xff] }
 0x1b0   : > { %v1716_v33 = vsel %vm1710_vm9, %v1667_v55, %v4252_v46 }
 0x1b2   : > { %1433 = vrot.lane.b32.xlu2 %v3429_v36, %s3150_s23 }
 0x1b3   : > { %1431 = vrot.lane.b32.xlu1 %v3432_v54, %s3150_s23  ;;  %v1526_v54 = vsel %vm1514_vm5, %v4075_v57, %v3647_v11 }
 0x1b4   : > { %1429 = vrot.lane.b32.xlu0 %v3441_v20, %s3150_s23  ;;  %v1351_v9 = vpop.permute.xlu2 %1350  ;;  %v1575_v22 = vsel %vm1563_vm6, %v1526_v54, %v3795_v48 }
 0x1b5   : > { %v4398_v60 = vpop.permute.xlu1 %1330  ;;  %v4401_v1 = vsel %vm1759_vm10, %v1716_v33, %v1351_v9  ;;  %v1624_v20 = vsel %vm1612_vm7, %v1575_v22, %v3978_v27 }
 0x1b6   : > { %v4403_v36 = vpop.permute.xlu0 %1328  ;;  %v1673_v46 = vsel %vm1661_vm8, %v1624_v20, %v4141_v51 }
 0x1b7   : > { %v1722_v11 = vsel %vm1710_vm9, %v1673_v46, %v4273_v19  ;;  %v5914_v19 = vld [vmem:[#allocation51_spill] sm:$0xff] }
 0x1b8   : > { %v1558_v6 = vsel %vm1514_vm5, %v4308_v35, %v5914_v19  ;;  %v5922_v19 = vld [vmem:[#allocation52_spill] sm:$0xff] }
 0x1b9   : > { %v1607_v55 = vsel %vm1563_vm6, %v1558_v6, %v4009_v7 }
 0x1ba   : > { %1439 = vrot.lane.b32.xlu2 %v3469_v32, %s3150_s23  ;;  %v5911_v32 = vld [vmem:[#allocation25_spill] sm:$0xff]  ;;  %v1656_v33 = vsel %vm1612_vm7, %v1607_v55, %v4160_v8 }
 0x1bb   : > { %1437 = vrot.lane.b32.xlu1 %v3472_v61, %s3150_s23  ;;  %v1532_v61 = vsel %vm1514_vm5, %v4093_v50, %v5911_v32  ;;  %v5916_v50 = vld [vmem:[#allocation3_spill] sm:$0xff]  ;;  %v5919_v32 = vshll.u32 %v3822_v39, 16 }
 0x1bc   : > { %1435 = vrot.lane.b32.xlu0 %v3489_v53, %s3150_s23  ;;  %v1357_v57 = vpop.permute.xlu2 %1356  ;;  %v1581_v51 = vsel %vm1563_vm6, %v1532_v61, %v5912_v63  ;;  %v1560_v53 = vsel %vm1514_vm5, %v4303_v28, %v5913_v17  ;;  %v3119_v61 = vld [vmem:[%s3220_s8] sm:$0xff]  ;;  %v5921_v17 = vld [vmem:[#allocation36_spill] sm:$0xff] }
 0x1bd   : > { %v4422_v48 = vpop.permute.xlu1 %1336  ;;  %v4425_v27 = vsel %vm1759_vm10, %v1722_v11, %v1357_v57  ;;  %v1630_v56 = vsel %vm1612_vm7, %v1581_v51, %v4005_v4  ;;  %v1609_v26 = vsel %vm1563_vm6, %v1560_v53, %v4007_v2  ;;  %v5917_v4 = vld [vmem:[#allocation4_spill] sm:$0xff]  ;;  %v1399_v2 = vshll.u32 %v4319_v47, 16  ;;  %v5918_v11 = vld [vmem:[#allocation29_spill] sm:$0xff]  ;;  %v5920_v63 = vld [vmem:[#allocation30_spill] sm:$0xff] }
 0x1be   : > { %v4427_v62 = vpop.permute.xlu0 %1334  ;;  %v1679_v28 = vsel %vm1661_vm8, %v1630_v56, %v4156_v38  ;;  %v1658_v35 = vsel %vm1612_vm7, %v1609_v26, %v4158_v37  ;;  %v1705_v37 = vsel %vm1661_vm8, %v1656_v33, %v4298_v40  ;;  %v1403_v57 = vshrl.u32 %v4319_v47, 16  ;;  %v5923_v56 = vld [vmem:[#allocation53_spill] sm:$0xff]  ;;  %v5924_v26 = vld [vmem:[#allocation54_spill] sm:$0xff] }
 0x1bf   : > { %v1728_v9 = vsel %vm1710_vm9, %v1679_v28, %v4294_v13  ;;  %v1707_v7 = vsel %vm1661_vm8, %v1658_v35, %v4296_v24  ;;  %v1538_v13 = vsel %vm1514_vm5, %v4217_v59, %v5918_v11  ;;  %v1401_v24 = vrot.slane %v1399_v2, 1  ;;  %v5925_v28 = vld [vmem:[#allocation70_spill] sm:$0xff]  ;;  %v5927_v2 = vld [vmem:[#allocation7_spill] sm:$0xff]  ;;  %v5930_v11 = vld [vmem:[#allocation5_spill] sm:$0xff] }
 0x1c0   : > { %v1395_v40 = vrot.slane %v5919_v32, 1  ;;  %v1516_v51 = vsel %vm1514_vm5, %v3119_v61, %v5920_v63  ;;  %v1518_v53 = vsel %vm1514_vm5, %v4058_v30, %v5921_v17  ;;  %v1587_v6 = vsel %vm1563_vm6, %v1538_v13, %v5922_v19 }
 0x1c1   : > { %v1567_v59 = vsel %vm1563_vm6, %v1518_v53, %v5923_v56  ;;  %v5931_v13 = vshrl.u32 %v3501_v43, 16  ;;  %v5934_v53 = vld [vmem:[#allocation102_spill] sm:$0xff]  ;;  %v5935_v56 = vld [vmem:[#allocation35_spill] sm:$0xff] }
 0x1c2   : > { %1445 = vrot.lane.b32.xlu2 %v5915_v29, %s3150_s23  ;;  %v1565_v29 = vsel %vm1563_vm6, %v1516_v51, %v5924_v26  ;;  %v1616_v55 = vsel %vm1612_vm7, %v1567_v59, %v4031_v23  ;;  %v4509_v23 = vrot.slane %v3151_v45, 1  ;;  %v5932_v51 = vld [vmem:[#allocation18_spill] sm:$0xff]  ;;  %v5936_v59 = vld [vmem:[#allocation71_spill] sm:$0xff] }
 0x1c3   : > { %1443 = vrot.lane.b32.xlu1 %v5916_v50, %s3150_s23  ;;  %v1636_v50 = vsel %vm1612_vm7, %v1587_v6, %v4029_v10  ;;  %v1614_v35 = vsel %vm1612_vm7, %v1565_v29, %v5925_v28  ;;  %v1665_v33 = vsel %vm1661_vm8, %v1616_v55, %v4173_v44  ;;  %v5928_v10 = vld [vmem:[#allocation8_spill] sm:$0xff]  ;;  %v1524_v17 = vsel %vm1514_vm5, %v4046_v14, %v5932_v51  ;;  %v5937_v29 = vld [vmem:[#allocation55_spill] sm:$0xff]  ;;  %v5939_v28 = vld [vmem:[#allocation57_spill] sm:$0xff] }
 0x1c4   : > { %1441 = vrot.lane.b32.xlu0 %v5917_v4, %s3150_s23  ;;  %v1363_v54 = vpop.permute.xlu2 %1362  ;;  %v1685_v30 = vsel %vm1661_vm8, %v1636_v50, %v4171_v49  ;;  %v5926_v4 = vld [vmem:[#allocation6_spill] sm:$0xff]  ;;  %v1663_v49 = vsel %vm1661_vm8, %v1614_v35, %v4175_v16  ;;  %v1522_v26 = vsel %vm1514_vm5, %v5936_v59, %v5935_v56  ;;  %v5938_v55 = vld [vmem:[#allocation56_spill] sm:$0xff]  ;;  %v5953_v59 = vld [vmem:[#allocation59_spill] sm:$0xff] }
 0x1c5   : > { %v1343_v38 = vpop.permute.xlu1 %1342  ;;  %v4466_v22 = vsel %vm1759_vm10, %v1728_v9, %v1363_v54  ;;  %v1405_v9 = vor.u32 %v1403_v57, %v1401_v24  ;;  %v1394_v57 = vor.u32 %v5931_v13, %v5930_v11  ;;  %v1712_v45 = vsel %vm1710_vm9, %v1663_v49, %v4316_v0  ;;  %v5933_v0 = vld [vmem:[#allocation34_spill] sm:$0xff]  ;;  %v5940_v14 = vld [vmem:[#allocation72_spill] sm:$0xff] }
 0x1c6   : > { %v4469_v20 = vsel %vm1710_vm9, %v1707_v7, %v1343_v38  ;;  %v1341_v46 = vpop.permute.xlu0 %1340  ;;  %v5929_v7 = vshrl.u32 %v3822_v39, 16  ;;  %v1734_v38 = vsel %vm1710_vm9, %v1685_v30, %v4312_v3  ;;  %v1544_v19 = vsel %vm1514_vm5, %v5934_v53, %v5933_v0  ;;  %v5945_v49 = vld [vmem:[#allocation90_spill] sm:$0xff]  ;;  %v5950_v53 = vld [vmem:[#allocation39_spill] sm:$0xff] }
 0x1c7   : > { %v4472_v8 = vsel %vm1710_vm9, %v1705_v37, %v1341_v46  ;;  %v1714_v37 = vsel %vm1710_vm9, %v1665_v33, %v4314_v58  ;;  %v1410_v58 = vsel %vm652_vm0, %v1405_v9, %v4509_v23  ;;  %v1396_v6 = vsel %vm652_vm0, %v1394_v57, %v1395_v40 }
 0x1c8   : > { %v1397_v54 = vor.u32 %v1395_v40, %v5929_v7  ;;  %v1593_v50 = vsel %vm1563_vm6, %v1544_v19, %v5937_v29  ;;  %v1571_v35 = vsel %vm1563_vm6, %v1522_v26, %v5939_v28  ;;  %v5942_v40 = vld [vmem:[#allocation74_spill] sm:$0xff]  ;;  %v5944_v7 = vld [vmem:[#allocation89_spill] sm:$0xff]  ;;  %v5954_v29 = vld [vmem:[#allocation60_spill] sm:$0xff] }
 0x1c9   : > { %v1642_v30 = vsel %vm1612_vm7, %v1593_v50, %v5940_v14  ;;  %v1620_v33 = vsel %vm1612_vm7, %v1571_v35, %v5942_v40  ;;  %v5956_v28 = vld [vmem:[#allocation77_spill] sm:$0xff]  ;;  %v5960_v40 = vld [vmem:[#allocation91_spill] sm:$0xff] }
 0x1ca   : > { %1451 = vrot.lane.b32.xlu2 %v5926_v4, %s3150_s23  ;;  %v1402_v63 = vsel %vm652_vm0, %v1397_v54, %v1401_v24  ;;  %v1573_v24 = vsel %vm1563_vm6, %v1524_v17, %v5938_v55  ;;  %v5941_v4 = vld [vmem:[#allocation73_spill] sm:$0xff]  ;;  %v5949_v17 = vld [vmem:[#allocation94_spill] sm:$0xff]  ;;  %v5955_v55 = vld [vmem:[#allocation76_spill] sm:$0xff] }
 0x1cb   : > { %1449 = vrot.lane.b32.xlu1 %v5927_v2, %s3150_s23  ;;  %v1622_v2 = vsel %vm1612_vm7, %v1573_v24, %v5941_v4  ;;  %v5957_v14 = vld [vmem:[#allocation9_spill] sm:$0xff]  ;;  %v5959_v4 = vld [vmem:[#allocation78_spill] sm:$0xff] }
 0x1cc   : > { %1447 = vrot.lane.b32.xlu0 %v5928_v10, %s3150_s23  ;;  %v1369_v44 = vpop.permute.xlu2 %1368  ;;  %v5943_v10 = vld [vmem:[#allocation88_spill] sm:$0xff]  ;;  %v1671_v54 = vsel %vm1661_vm8, %v1622_v2, %v5944_v7  ;;  %v5962_v7 = vld [vmem:[#allocation11_spill] sm:$0xff] }
 0x1cd   : > { %v1349_v46 = vpop.permute.xlu1 %1348  ;;  %v4525_v32 = vsel %vm1759_vm10, %v1734_v38, %v1369_v44  ;;  %v1691_v9 = vsel %vm1661_vm8, %v1642_v30, %v5943_v10  ;;  %v1669_v38 = vsel %vm1661_vm8, %v1620_v33, %v5945_v49  ;;  %v1720_v44 = vsel %vm1710_vm9, %v1671_v54, %v4329_v52  ;;  %v5948_v52 = vld [vmem:[#allocation38_spill] sm:$0xff]  ;;  %v5961_v10 = vld [vmem:[#allocation92_spill] sm:$0xff]  ;;  %v5963_v54 = vld [vmem:[#allocation93_spill] sm:$0xff] }
 0x1ce   : > { %v4528_v16 = vsel %vm1759_vm10, %v1714_v37, %v1349_v46  ;;  %v1347_v61 = vpop.permute.xlu0 %1346  ;;  %v1740_v37 = vsel %vm1710_vm9, %v1691_v9, %v4327_v15  ;;  %v1718_v13 = vsel %vm1710_vm9, %v1669_v38, %v4331_v25  ;;  %v5947_v15 = vld [vmem:[#allocation107_spill] sm:$0xff]  ;;  %v1530_v0 = vsel %vm1514_vm5, %v5949_v17, %v5948_v52  ;;  %v5958_v30 = vld [vmem:[#allocation10_spill] sm:$0xff]  ;;  %v5965_v52 = vld [vmem:[#allocation40_spill] sm:$0xff] }
 0x1cf   : > { %v4531_v3 = vsel %vm1759_vm10, %v1712_v45, %v1347_v61  ;;  %v5951_v25 = vld [vmem:[#allocation75_spill] sm:$0xff]  ;;  %v1579_v26 = vsel %vm1563_vm6, %v1530_v0, %v5953_v59  ;;  %v5967_v0 = vld [vmem:[#allocation41_spill] sm:$0xff] }
 0x1d0   : > { %v1528_v19 = vsel %vm1514_vm5, %v5951_v25, %v5950_v53  ;;  %v1628_v35 = vsel %vm1612_vm7, %v1579_v26, %v5956_v28  ;;  %v5968_v53 = vld [vmem:[#allocation98_spill] sm:$0xff] }
 0x1d1   : > { %v1577_v50 = vsel %vm1563_vm6, %v1528_v19, %v5954_v29  ;;  %v1677_v9 = vsel %vm1661_vm8, %v1628_v35, %v5961_v10  ;;  %v1536_v25 = vsel %vm1514_vm5, %v5968_v53, %v5967_v0  ;;  %v5969_v19 = vld [vmem:[#allocation42_spill] sm:$0xff]  ;;  %v5975_v35 = vld [vmem:[#allocation80_spill] sm:$0xff]  ;;  %v5983_v0 = vld [vmem:[#allocation43_spill] sm:$0xff] }
 0x1d2   : > { %1457 = vrot.lane.b32.xlu2 %v1410_v58, %s3150_s23  ;;  %v1626_v2 = vsel %vm1612_vm7, %v1577_v50, %v5959_v4  ;;  %v5972_v26 = vld [vmem:[#allocation62_spill] sm:$0xff]  ;;  %v5973_v50 = vld [vmem:[#allocation63_spill] sm:$0xff]  ;;  %v5977_v4 = vld [vmem:[#allocation13_spill] sm:$0xff] }
 0x1d3   : > { %1455 = vrot.lane.b32.xlu1 %v1402_v63, %s3150_s23  ;;  %v5946_v63 = vld [vmem:[#allocation37_spill] sm:$0xff]  ;;  %v1675_v49 = vsel %vm1661_vm8, %v1626_v2, %v5963_v54  ;;  %v1585_v29 = vsel %vm1563_vm6, %v1536_v25, %v5972_v26  ;;  %v5981_v54 = vld [vmem:[#allocation14_spill] sm:$0xff]  ;;  %v5986_v25 = vld [vmem:[#allocation104_spill] sm:$0xff] }
 0x1d4   : > { %1453 = vrot.lane.b32.xlu0 %v1396_v6, %s3150_s23  ;;  %v1375_v46 = vpop.permute.xlu2 %1374  ;;  %v1550_v51 = vsel %vm1514_vm5, %v5947_v15, %v5946_v63  ;;  %v5952_v6 = vld [vmem:[#allocation58_spill] sm:$0xff]  ;;  %v5978_v2 = vld [vmem:[#allocation81_spill] sm:$0xff] }
 0x1d5   : > { %v1355_v11 = vpop.permute.xlu1 %1354  ;;  %v4574_v57 = vsel %vm1759_vm10, %v1740_v37, %v1375_v46  ;;  %v1599_v56 = vsel %vm1563_vm6, %v1550_v51, %v5952_v6  ;;  %v5964_v37 = vld [vmem:[#allocation115_spill] sm:$0xff] }
 0x1d6   : > { %v4577_v45 = vsel %vm1759_vm10, %v1720_v44, %v1355_v11  ;;  %v1353_v61 = vpop.permute.xlu0 %1352  ;;  %v1648_v24 = vsel %vm1612_vm7, %v1599_v56, %v5955_v55  ;;  %v1726_v44 = vsel %vm1710_vm9, %v1677_v9, %v5964_v37  ;;  %v5971_v56 = vld [vmem:[#allocation61_spill] sm:$0xff]  ;;  %v5980_v9 = vld [vmem:[#allocation96_spill] sm:$0xff] }
 0x1d7   : > { %v4580_v58 = vsel %vm1759_vm10, %v1718_v13, %v1353_v61  ;;  %v1697_v33 = vsel %vm1661_vm8, %v1648_v24, %v5960_v40  ;;  %v1724_v13 = vsel %vm1710_vm9, %v1675_v49, %v4343_v18  ;;  %v5970_v18 = vld [vmem:[#allocation99_spill] sm:$0xff]  ;;  %v5982_v49 = vld [vmem:[#allocation97_spill] sm:$0xff] }
 0x1d8   : > { %v1746_v38 = vsel %vm1710_vm9, %v1697_v33, %v4339_v21  ;;  %v5966_v21 = vld [vmem:[#allocation112_spill] sm:$0xff]  ;;  %v1534_v6 = vsel %vm1514_vm5, %v5970_v18, %v5969_v19  ;;  %v5974_v24 = vld [vmem:[#allocation79_spill] sm:$0xff] }
 0x1d9   : > { %v1556_v17 = vsel %vm1514_vm5, %v5966_v21, %v5965_v52  ;;  %v1583_v55 = vsel %vm1563_vm6, %v1534_v6, %v5973_v50  ;;  %v5979_v33 = vld [vmem:[#allocation95_spill] sm:$0xff]  ;;  %v5987_v18 = vld [vmem:[#allocation64_spill] sm:$0xff]  ;;  %v5988_v6 = vld [vmem:[#allocation65_spill] sm:$0xff] }
 0x1da   : > { %1470 = vrot.lane.b32.xlu2 %v5957_v14, %s3152_s28  ;;  %v1605_v59 = vsel %vm1563_vm6, %v1556_v17, %v5971_v56  ;;  %v1634_v14 = vsel %vm1612_vm7, %v1585_v29, %v5975_v35  ;;  %v1632_v40 = vsel %vm1612_vm7, %v1583_v55, %v5978_v2  ;;  %v5990_v29 = vld [vmem:[#allocation15_spill] sm:$0xff]  ;;  %v5991_v50 = vld [vmem:[#allocation16_spill] sm:$0xff] }
 0x1db   : > { %1468 = vrot.lane.b32.xlu1 %v5958_v30, %s3152_s28  ;;  %v1654_v28 = vsel %vm1612_vm7, %v1605_v59, %v5974_v24  ;;  %v5976_v30 = vld [vmem:[#allocation12_spill] sm:$0xff]  ;;  %v5989_v59 = vld [vmem:[#allocation82_spill] sm:$0xff]  ;;  %v5992_v55 = vld [vmem:[#allocation83_spill] sm:$0xff] }
 0x1dc   : > { %1466 = vrot.lane.b32.xlu0 %v5962_v7, %s3152_s28  ;;  %v1381_v46 = vpop.permute.xlu2 %1380  ;;  %v1703_v10 = vsel %vm1661_vm8, %v1654_v28, %v5979_v33  ;;  %v1683_v7 = vsel %vm1661_vm8, %v1634_v14, %v5980_v9  ;;  %v5993_v28 = vld [vmem:[#allocation100_spill] sm:$0xff]  ;;  %v5994_v14 = vld [vmem:[#allocation17_spill] sm:$0xff] }
 0x1dd   : > { %v1361_v11 = vpop.permute.xlu1 %1360  ;;  %v4622_v61 = vsel %vm1759_vm10, %v1746_v38, %v1381_v46  ;;  %v1681_v38 = vsel %vm1661_vm8, %v1632_v40, %v5982_v49  ;;  %v1752_v37 = vsel %vm1710_vm9, %v1703_v10, %v4351_v41  ;;  %v5984_v41 = vld [vmem:[#allocation103_spill] sm:$0xff] }
 0x1de   : > { %v4625_v63 = vsel %vm1759_vm10, %v1726_v44, %v1361_v11  ;;  %v1359_v15 = vpop.permute.xlu0 %1358  ;;  %v1732_v44 = vsel %vm1710_vm9, %v1683_v7, %v4353_v31  ;;  %v1542_v53 = vsel %vm1514_vm5, %v5984_v41, %v5983_v0  ;;  %v5985_v31 = vld [vmem:[#allocation44_spill] sm:$0xff] }
 0x1df   : > { %v4628_v51 = vsel %vm1759_vm10, %v1724_v13, %v1359_v15  ;;  %v1730_v13 = vsel %vm1710_vm9, %v1681_v38, %v4355_v42  ;;  %v1540_v19 = vsel %vm1514_vm5, %v5986_v25, %v5985_v31  ;;  %v1591_v42 = vsel %vm1563_vm6, %v1542_v53, %v5987_v18  ;;  %v5996_v38 = vld [vmem:[#allocation45_spill] sm:$0xff]  ;;  %v6002_v0 = vld [vmem:[#allocation84_spill] sm:$0xff]  ;;  %v6003_v53 = vld [vmem:[#allocation19_spill] sm:$0xff] }
 0x1e0   : > { %v1589_v56 = vsel %vm1563_vm6, %v1540_v19, %v5988_v6  ;;  %v1640_v26 = vsel %vm1612_vm7, %v1591_v42, %v5989_v59  ;;  %v6004_v31 = vld [vmem:[#allocation20_spill] sm:$0xff]  ;;  %v6005_v25 = vld [vmem:[#allocation85_spill] sm:$0xff] }
 0x1e1   : > { %v1638_v24 = vsel %vm1612_vm7, %v1589_v56, %v5992_v55  ;;  %v1689_v35 = vsel %vm1661_vm8, %v1640_v26, %v5993_v28  ;;  %v6006_v18 = vld [vmem:[#allocation105_spill] sm:$0xff]  ;;  %v6008_v56 = vld [vmem:[#allocation106_spill] sm:$0xff] }
 0x1e2   : > { %1476 = vrot.lane.b32.xlu2 %v5976_v30, %s3152_s28  ;;  %v5995_v30 = vld [vmem:[#allocation101_spill] sm:$0xff]  ;;  %v1738_v2 = vsel %vm1710_vm9, %v1689_v35, %v4371_v12 }
 0x1e3   : > { %1474 = vrot.lane.b32.xlu1 %v5977_v4, %s3152_s28  ;;  %v1687_v4 = vsel %vm1661_vm8, %v1638_v24, %v5995_v30  ;;  %v6007_v6 = vld [vmem:[#allocation21_spill] sm:$0xff] }
 0x1e4   : > { %1472 = vrot.lane.b32.xlu0 %v5981_v54, %s3152_s28  ;;  %v1387_v46 = vpop.permute.xlu2 %1386  ;;  %v1736_v10 = vsel %vm1710_vm9, %v1687_v4, %v4376_v34  ;;  %v6000_v34 = vld [vmem:[#allocation66_spill] sm:$0xff]  ;;  %v6010_v30 = vld [vmem:[#allocation113_spill] sm:$0xff] }
 0x1e5   : > { %v1367_v11 = vpop.permute.xlu1 %1366  ;;  %v4670_v15 = vsel %vm1759_vm10, %v1752_v37, %v1387_v46  ;;  %v5997_v37 = vld [vmem:[#allocation108_spill] sm:$0xff]  ;;  %v5999_v46 = vld [vmem:[#allocation109_spill] sm:$0xff] }
 0x1e6   : > { %v4673_v52 = vsel %vm1759_vm10, %v1732_v44, %v1367_v11  ;;  %v1365_v21 = vpop.permute.xlu0 %1364  ;;  %v1548_v12 = vsel %vm1514_vm5, %v5997_v37, %v5996_v38  ;;  %v5998_v44 = vld [vmem:[#allocation46_spill] sm:$0xff] }
 0x1e7   : > { %v4676_v17 = vsel %vm1759_vm10, %v1730_v13, %v1365_v21  ;;  %v1546_v11 = vsel %vm1514_vm5, %v5999_v46, %v5998_v44  ;;  %v1597_v13 = vsel %vm1563_vm6, %v1548_v12, %v6000_v34  ;;  %v6015_v38 = vld [vmem:[#allocation86_spill] sm:$0xff]  ;;  %v6017_v44 = vld [vmem:[#allocation23_spill] sm:$0xff] }
 0x1e8   : > { %v1646_v41 = vsel %vm1612_vm7, %v1597_v13, %v6002_v0  ;;  %v6016_v12 = vld [vmem:[#allocation22_spill] sm:$0xff]  ;;  %v6018_v46 = vld [vmem:[#allocation87_spill] sm:$0xff] }
 0x1e9   : > { %v1695_v42 = vsel %vm1661_vm8, %v1646_v41, %v6006_v18  ;;  %v6019_v34 = vld [vmem:[#allocation110_spill] sm:$0xff] }
 0x1ea   : > { %1482 = vrot.lane.b32.xlu2 %v5990_v29, %s3152_s28  ;;  %v1744_v26 = vsel %vm1710_vm9, %v1695_v42, %v4398_v60 }
 0x1eb   : > { %1480 = vrot.lane.b32.xlu1 %v5991_v50, %s3152_s28 }
 0x1ec   : > { %1478 = vrot.lane.b32.xlu0 %v5994_v14, %s3152_s28  ;;  %v1393_v40 = vpop.permute.xlu2 %1392  ;;  %v6009_v14 = vld [vmem:[#allocation47_spill] sm:$0xff] }
 0x1ed   : > { %v1373_v33 = vpop.permute.xlu1 %1372  ;;  %v4708_v9 = vsel %vm1759_vm10, %v4374_v5, %v1393_v40  ;;  %v6001_v5 = vld [vmem:[#allocation67_spill] sm:$0xff]  ;;  %v1554_v4 = vsel %vm1514_vm5, %v6010_v30, %v6009_v14  ;;  %v6012_v40 = vld [vmem:[#allocation114_spill] sm:$0xff]  ;;  %v6026_v14 = vld [vmem:[#allocation32_spill] sm:$0xff] }
 0x1ee   : > { %v4711_v7 = vsel %vm1759_vm10, %v1738_v2, %v1373_v33  ;;  %v1371_v54 = vpop.permute.xlu0 %1370  ;;  %v1595_v21 = vsel %vm1563_vm6, %v1546_v11, %v6001_v5  ;;  %v6011_v2 = vld [vmem:[#allocation48_spill] sm:$0xff]  ;;  %v6027_v30 = vld [vmem:[#allocation33_spill] sm:$0xff] }
 0x1ef   : > { %v4714_v49 = vsel %vm1759_vm10, %v1736_v10, %v1371_v54  ;;  %v1644_v19 = vsel %vm1612_vm7, %v1595_v21, %v6005_v25  ;;  %v1552_v60 = vsel %vm1514_vm5, %v6012_v40, %v6011_v2  ;;  %v6013_v33 = vld [vmem:[#allocation68_spill] sm:$0xff]  ;;  %v6014_v54 = vld [vmem:[#allocation69_spill] sm:$0xff]  ;;  %v6021_v21 = vld [vmem:[#allocation111_spill] sm:$0xff]  ;;  %v1460_v2 = vrot.slane %v3822_v39, 1 }
 0x1f0   : > { %v1693_v59 = vsel %vm1661_vm8, %v1644_v19, %v6008_v56  ;;  %v1603_v10 = vsel %vm1563_vm6, %v1554_v4, %v6013_v33  ;;  %v6020_v5 = vld [vmem:[#allocation24_spill] sm:$0xff]  ;;  %v6022_v56 = vld [vmem:[#allocation26_spill] sm:$0xff]  ;;  %v1462_v4 = vrot.slane %v4319_v47, 1 }
 0x1f1   : > { %v1742_v55 = vsel %vm1710_vm9, %v1693_v59, %v4403_v36  ;;  %v1601_v36 = vsel %vm1563_vm6, %v1552_v60, %v6014_v54  ;;  %v1652_v37 = vsel %vm1612_vm7, %v1603_v10, %v6015_v38  ;;  %v6024_v59 = vld [vmem:[#allocation28_spill] sm:$0xff]  ;;  %v6028_v54 = vrot.slane %v3501_v43, 1 }
 0x1f2   : > { %1488 = vrot.lane.b32.xlu2 %v6003_v53, %s3152_s28  ;;  %v1650_v11 = vsel %vm1612_vm7, %v1601_v36, %v6018_v46  ;;  %v1701_v13 = vsel %vm1661_vm8, %v1652_v37, %v6019_v34  ;;  %v1465_v33 = vsel %vm897_vm1, %v1462_v4, %v4509_v23  ;;  %v1463_v10 = vsel %vm897_vm1, %v1460_v2, %v1462_v4  ;;  %v2161_v37 = vld [vmem:[%s5649_s0 + $0x8] sm:$0xff]  ;;  %v2163_v34 = vld [vmem:[%s5649_s0 + $0x18] sm:$0xff] }
 0x1f3   : > { %1486 = vrot.lane.b32.xlu1 %v6004_v31, %s3152_s28  ;;  %v1699_v0 = vsel %vm1661_vm8, %v1650_v11, %v6021_v21  ;;  %v1750_v41 = vsel %vm1710_vm9, %v1701_v13, %v4422_v48  ;;  %v6023_v48 = vld [vmem:[#allocation27_spill] sm:$0xff]  ;;  %v1461_v47 = vsel %vm897_vm1, %v6028_v54, %v1460_v2  ;;  %v1910_v11 = vld [vmem:[%s5650_s1 + $0x10] sm:$0x3]  ;;  %v2164_v13 = vld [vmem:[%s5649_s0 + $0x20] sm:$0xff] }
 0x1f4   : > { %1484 = vrot.lane.b32.xlu0 %v6007_v6, %s3152_s28  ;;  %v4742_v29 = vpop.permute.xlu2 %1415  ;;  %v1748_v25 = vsel %vm1710_vm9, %v1699_v0, %v4427_v62  ;;  %v2169_v2 = vld [vmem:[%s5649_s0 + $0x48] sm:$0xff]  ;;  %v2172_v54 = vld [vmem:[%s5649_s0 + $0x60] sm:$0xff] }
 0x1f5   : > { %v1379_v50 = vpop.permute.xlu1 %1378 }
 0x1f6   : > { %v4747_v24 = vsel %vm1759_vm10, %v1744_v26, %v1379_v50  ;;  %v1377_v28 = vpop.permute.xlu0 %1376 }
 0x1f7   : > { %v4750_v35 = vsel %vm1759_vm10, %v1742_v55, %v1377_v28  ;;  %v6025_v28 = vld [vmem:[#allocation31_spill] sm:$0xff] }
 0x1fa   : > { %1494 = vrot.lane.b32.xlu2 %v6016_v12, %s3152_s28  ;;  %v2162_v12 = vld [vmem:[%s5649_s0 + $0x10] sm:$0xff] }
 0x1fb   : > { %1492 = vrot.lane.b32.xlu1 %v6017_v44, %s3152_s28 }
 0x1fc   : > { %1490 = vrot.lane.b32.xlu0 %v6020_v5, %s3152_s28  ;;  %v1422_v53 = vpop.permute.xlu2 %1421  ;;  %v1924_v5 = vunpack.c.l.b16 %v1910_v11 }
 0x1fd   : > { %v1385_v31 = vpop.permute.xlu1 %1384  ;;  %v4782_v19 = vsel %vm1808_vm11, %v4425_v27, %v1422_v53 }
 0x1fe   : > { %v4785_v18 = vsel %vm1759_vm10, %v1750_v41, %v1385_v31  ;;  %v1383_v42 = vpop.permute.xlu0 %1382  ;;  %v1927_v21 = vpack.c.b16 %v1924_v5, %v1924_v5  ;;  %v2180_v5 = vld [vmem:[%s5649_s0 + $0xa0] sm:$0xff] }
 0x1ff   : > { %v4788_v6 = vsel %vm1759_vm10, %v1748_v25, %v1383_v42 }
 0x200   : > { %v1981_v0 = vsel %vm1979_vm12, %v1927_v21, 0  ;;  %v2181_v21 = vld [vmem:[%s5649_s0 + $0xa8] sm:$0xff] }
 0x201   : > { %1988 = vmatpush.bf16.msra.mxu0 %v1981_v0  ;;  %3045 = vmatpush.bf16.msra.mxu1 %v1981_v0 }
 0x202   : > { %1500 = vrot.lane.b32.xlu2 %v6022_v56, %s3152_s28  ;;  %3046 = vmatpush.bf16.msra.mxu2 %v1981_v0 }
 0x203   : > { %1498 = vrot.lane.b32.xlu1 %v6023_v48, %s3152_s28  ;;  %3047 = vmatpush.bf16.msra.mxu3 %v1981_v0  ;;  %v3044_v48 = vld [vmem:[%s5650_s1 + $0x8] sm:$0xff]  ;;  %v2182_v0 = vld [vmem:[%s5649_s0 + $0xb0] sm:$0xff] }
 0x204   : > { %1496 = vrot.lane.b32.xlu0 %v6024_v59, %s3152_s28  ;;  %v4796_v62 = vpop.permute.xlu2 %1427  ;;  %v2168_v59 = vld [vmem:[%s5649_s0 + $0x40] sm:$0xff] }
 0x205   : > { %v1391_v27 = vpop.permute.xlu1 %1390  ;;  %1989 = vmatpush.bf16.msra.mxu0 %v3044_v48  ;;  %3048 = vmatpush.bf16.msra.mxu1 %v3044_v48 }
 0x206   : > { %v4800_v26 = vsel %vm1759_vm10, %v4469_v20, %v1391_v27  ;;  %v1389_v50 = vpop.permute.xlu0 %1388  ;;  %3049 = vmatpush.bf16.msra.mxu2 %v3044_v48 }
 0x207   : > { %v4804_v55 = vsel %vm1759_vm10, %v4472_v8, %v1389_v50  ;;  %3050 = vmatpush.bf16.msra.mxu3 %v3044_v48  ;;  %v2186_v48 = vld [vmem:[%s5649_s0 + $0xd0] sm:$0xff] }
 0x20a   : > { %1506 = vrot.lane.b32.xlu2 %v6025_v28, %s3152_s28 }
 0x20b   : > { %1504 = vrot.lane.b32.xlu1 %v6026_v14, %s3152_s28 }
 0x20c   : > { %1502 = vrot.lane.b32.xlu0 %v6027_v30, %s3152_s28  ;;  %v1434_v20 = vpop.permute.xlu2 %1433 }
 0x20d   : > { %v4814_v40 = vpop.permute.xlu1 %1413  ;;  %v4818_v8 = vsel %vm1808_vm11, %v4525_v32, %v1434_v20 }
 0x20e   : > { %v4820_v60 = vpop.permute.xlu0 %1411 }
 0x212   : > { %1512 = vrot.lane.b32.xlu2 %v1465_v33, %s3152_s28 }
 0x213   : > { %1510 = vrot.lane.b32.xlu1 %v1463_v10, %s3152_s28 }
 0x214   : > { %1508 = vrot.lane.b32.xlu0 %v1461_v47, %s3152_s28  ;;  %v1440_v39 = vpop.permute.xlu2 %1439  ;;  %v2173_v47 = vld [vmem:[%s5649_s0 + $0x68] sm:$0xff] }
 0x215   : > { %v1420_v32 = vpop.permute.xlu1 %1419  ;;  %v4833_v36 = vsel %vm1808_vm11, %v4574_v57, %v1440_v39  ;;  %v2160_v57 = vld [vmem:[%s5649_s0] sm:$0xff]  ;;  %v2174_v39 = vld [vmem:[%s5649_s0 + $0x70] sm:$0xff] }
 0x216   : > { %v4837_v23 = vsel %vm1808_vm11, %v4577_v45, %v1420_v32  ;;  %v1418_v38 = vpop.permute.xlu0 %1417 }
 0x217   : > { %v4841_v43 = vsel %vm1808_vm11, %v4580_v58, %v1418_v38 }
 0x21a   : > { %2220 = vperm.xlu2 %3093, %v2162_v12   ;;  %v2176_v12 = vld [vmem:[%s5649_s0 + $0x80] sm:$0xff] }
 0x21b   : > { %2215 = vperm.xlu1 %3092, %v2161_v37   ;;  %v2175_v37 = vld [vmem:[%s5649_s0 + $0x78] sm:$0xff] }
 0x21c   : > { %2210 = vperm.xlu0 %3091, %v2160_v57   ;;  %v1446_v45 = vpop.permute.xlu2 %1445  ;;  %v2177_v57 = vld [vmem:[%s5649_s0 + $0x88] sm:$0xff] }
 0x21d   : > { %v4852_v44 = vpop.permute.xlu1 %1425  ;;  %v4856_v58 = vsel %vm1808_vm11, %v4622_v61, %v1446_v45  ;;  %v2165_v61 = vld [vmem:[%s5649_s0 + $0x28] sm:$0xff] }
 0x21e   : > { %v4858_v46 = vpop.permute.xlu0 %1423 }
 0x222   : > { %2230 = vperm.xlu2 %3093, %v2164_v13   ;;  %v2179_v13 = vld [vmem:[%s5649_s0 + $0x98] sm:$0xff] }
 0x223   : > { %2225 = vperm.xlu1 %3092, %v2163_v34   ;;  %v2178_v34 = vld [vmem:[%s5649_s0 + $0x90] sm:$0xff] }
 0x224   : > { %2235 = vperm.xlu0 %3091, %v2165_v61   ;;  %v1452_v41 = vpop.permute.xlu2 %1451 }
 0x225   : > { %v1432_v53 = vpop.permute.xlu1 %1431  ;;  %v4874_v31 = vsel %vm1808_vm11, %v4670_v15, %v1452_v41  ;;  %v2166_v15 = vld [vmem:[%s5649_s0 + $0x30] sm:$0xff] }
 0x226   : > { %v4878_v25 = vsel %vm1808_vm11, %v4673_v52, %v1432_v53  ;;  %v1430_v42 = vpop.permute.xlu0 %1429  ;;  %v2167_v52 = vld [vmem:[%s5649_s0 + $0x38] sm:$0xff] }
 0x227   : > { %v4882_v56 = vsel %vm1808_vm11, %v4676_v17, %v1430_v42  ;;  %v3043_v17 = vld [vmem:[%s5650_s1] sm:$0xff]  ;;  %v2183_v53 = vld [vmem:[%s5649_s0 + $0xb8] sm:$0xff]  ;;  %v2185_v42 = vld [vmem:[%s5649_s0 + $0xc8] sm:$0xff] }
 0x228   : > { %1990 = vmatpush.bf16.msra.mxu0 %v3043_v17  ;;  %3051 = vmatpush.bf16.msra.mxu1 %v3043_v17 }
 0x229   : > { %3052 = vmatpush.bf16.msra.mxu2 %v3043_v17  ;;  %3053 = vmatpush.bf16.msra.mxu3 %v3043_v17 }
 0x22a   : > { %2245 = vperm.xlu2 %3093, %v2167_v52   ;;  %v1812_v52 = vsel %vm1808_vm11, %v4528_v16, %v4814_v40  ;;  %v2188_v16 = vld [vmem:[%s5649_s0 + $0xe0] sm:$0xff] }
 0x22b   : > { %2240 = vperm.xlu1 %3092, %v2166_v15  }
 0x22c   : > { %2250 = vperm.xlu0 %3091, %v2168_v59   ;;  %v1458_v27 = vpop.permute.xlu2 %1457  ;;  %v1822_v59 = vsel %vm1808_vm11, %v4628_v51, %v4858_v46  ;;  %v2189_v51 = vld [vmem:[%s5649_s0 + $0xe8] sm:$0xff] }
 0x22d   : > { %v1438_v50 = vpop.permute.xlu1 %1437  ;;  %v4901_v28 = vsel %vm1808_vm11, %v4708_v9, %v1458_v27  ;;  %v2170_v9 = vld [vmem:[%s5649_s0 + $0x50] sm:$0xff] }
 0x22e   : > { %v4905_v14 = vsel %vm1808_vm11, %v4711_v7, %v1438_v50  ;;  %v1436_v30 = vpop.permute.xlu0 %1435  ;;  %v2171_v7 = vld [vmem:[%s5649_s0 + $0x58] sm:$0xff] }
 0x22f   : > { %v4909_v4 = vsel %vm1808_vm11, %v4714_v49, %v1436_v30  ;;  %v2187_v30 = vld [vmem:[%s5649_s0 + $0xd8] sm:$0xff] }
 0x232   : > { %2260 = vperm.xlu2 %3093, %v2170_v9   ;;  %v2190_v9 = vld [vmem:[%s5649_s0 + $0xf0] sm:$0xff] }
 0x233   : > { %2255 = vperm.xlu1 %3092, %v2169_v2  }
 0x234   : > { %2265 = vperm.xlu0 %3091, %v2171_v7   ;;  %v1471_v40 = vpop.permute.xlu2 %1470  ;;  %v2191_v7 = vld [vmem:[%s5649_s0 + $0xf8] sm:$0xff] }
 0x235   : > { %v1444_v20 = vpop.permute.xlu1 %1443 }
 0x236   : > { %v4922_v49 = vsel %vm1808_vm11, %v4747_v24, %v1444_v20  ;;  %v1442_v33 = vpop.permute.xlu0 %1441  ;;  %v2192_v20 = vld [vmem:[%s5649_s0 + $0x100] sm:$0xff] }
 0x237   : > { %v4926_v10 = vsel %vm1808_vm11, %v4750_v35, %v1442_v33 }
 0x23a   : > { %2275 = vperm.xlu2 %3093, %v2173_v47   ;;  %v1824_v47 = vsel %vm1808_vm11, %v4625_v63, %v4852_v44  ;;  %v2194_v63 = vld [vmem:[%s5649_s0 + $0x110] sm:$0xff] }
 0x23b   : > { %2270 = vperm.xlu1 %3092, %v2172_v54   ;;  %v1814_v54 = vsel %vm1808_vm11, %v4401_v1, %v4742_v29  ;;  %v2193_v1 = vld [vmem:[%s5649_s0 + $0x108] sm:$0xff]  ;;  %v2195_v29 = vld [vmem:[%s5649_s0 + $0x118] sm:$0xff] }
 0x23c   : > { %2280 = vperm.xlu0 %3091, %v2174_v39   ;;  %v5024_v33 = vpop.permute.xlu2 %1476 }
 0x23d   : > { %v1450_v24 = vpop.permute.xlu1 %1449 }
 0x23e   : > { %v4939_v35 = vsel %vm1808_vm11, %v4785_v18, %v1450_v24  ;;  %v1448_v32 = vpop.permute.xlu0 %1447 }
 0x23f   : > { %v4943_v38 = vsel %vm1808_vm11, %v4788_v6, %v1448_v32  ;;  %v1863_v32 = vsel %vm1857_vm14, %v1814_v54, %v1471_v40 }
 0x242   : > { %2290 = vperm.xlu2 %3093, %v2176_v12  }
 0x243   : > { %2285 = vperm.xlu1 %3092, %v2175_v37  }
 0x244   : > { %2295 = vperm.xlu0 %3091, %v2177_v57   ;;  %v1483_v44 = vpop.permute.xlu2 %1482  ;;  %v2196_v57 = vld [vmem:[%s5649_s0 + $0x120] sm:$0xff] }
 0x245   : > { %v1456_v18 = vpop.permute.xlu1 %1455 }
 0x246   : > { %v4956_v6 = vsel %vm1808_vm11, %v4800_v26, %v1456_v18  ;;  %v1454_v45 = vpop.permute.xlu0 %1453  ;;  %v1810_v26 = vsel %vm1808_vm11, %v4531_v3, %v4820_v60  ;;  %v2184_v60 = vld [vmem:[%s5649_s0 + $0xc0] sm:$0xff]  ;;  %v2197_v18 = vld [vmem:[%s5649_s0 + $0x128] sm:$0xff] }
 0x247   : > { %v4960_v11 = vsel %vm1808_vm11, %v4804_v55, %v1454_v45 }
 0x24a   : > { %2305 = vperm.xlu2 %3093, %v2179_v13   ;;  %v1826_v13 = vsel %vm1808_vm11, %v4466_v22, %v4796_v62  ;;  %v2199_v22 = vld [vmem:[%s5649_s0 + $0x138] sm:$0xff]  ;;  %v2200_v62 = vld [vmem:[%s5649_s0 + $0x140] sm:$0xff] }
 0x24b   : > { %2300 = vperm.xlu1 %3092, %v2178_v34   ;;  %v2198_v34 = vld [vmem:[%s5649_s0 + $0x130] sm:$0xff] }
 0x24c   : > { %2310 = vperm.xlu0 %3091, %v2180_v5  }
 0x24d   : > { %v1469_v41 = vpop.permute.xlu1 %1468 }
 0x24e   : > { %v1467_v55 = vpop.permute.xlu0 %1466  ;;  %v1861_v27 = vsel %vm1857_vm14, %v1812_v52, %v1469_v41  ;;  %v2203_v41 = vld [vmem:[%s5649_s0 + $0x158] sm:$0xff] }
 0x24f   : > { %v1859_v61 = vsel %vm1857_vm14, %v1810_v26, %v1467_v55  ;;  %v1489_v26 = vpop.permute.xlu2 %1488 }
 0x250   : > { %2987 = vmatmul.msk.bf16.vlgmr.msra.gmra.mxu0 %vm1930_vm13, %v1859_v61  ;;  %v1875_v61 = vsel %vm1857_vm14, %v1826_v13, %v1483_v44 }
 0x252   : > { %2320 = vperm.xlu2 %3093, %v2182_v0  }
 0x253   : > { %2315 = vperm.xlu1 %3092, %v2181_v21  }
 0x254   : > { %2325 = vperm.xlu0 %3091, %v2183_v53  }
 0x255   : > { %v4994_v15 = vpop.permute.xlu1 %1474 }
 0x256   : > { %v1473_v3 = vpop.permute.xlu0 %1472 }
 0x257   : > { %v1865_v55 = vsel %vm1857_vm14, %v4841_v43, %v1473_v3  ;;  %v2201_v43 = vld [vmem:[%s5649_s0 + $0x148] sm:$0xff]  ;;  %v1495_v53 = vpop.permute.xlu2 %1494  ;;  %v2204_v3 = vld [vmem:[%s5649_s0 + $0x160] sm:$0xff] }
 0x258   : > { %v1887_v52 = vsel %vm1857_vm14, %v4833_v36, %v1495_v53 }
 0x25a   : > { %2335 = vperm.xlu2 %3093, %v2185_v42   ;;  %v1867_v42 = vsel %vm1857_vm14, %v4837_v23, %v4994_v15  ;;  %v2206_v23 = vld [vmem:[%s5649_s0 + $0x170] sm:$0xff]  ;;  %v1869_v15 = vsel %vm1857_vm14, %v4782_v19, %v5024_v33 }
 0x25b   : > { %2330 = vperm.xlu1 %3092, %v2184_v60  }
 0x25c   : > { %2340 = vperm.xlu0 %3091, %v2186_v48  }
 0x25d   : > { %v1481_v46 = vpop.permute.xlu1 %1480 }
 0x25e   : > { %v1479_v17 = vpop.permute.xlu0 %1478  ;;  %v1873_v37 = vsel %vm1857_vm14, %v1824_v47, %v1481_v46 }
 0x25f   : > { %v1871_v50 = vsel %vm1857_vm14, %v1822_v59, %v1479_v17  ;;  %v2205_v17 = vld [vmem:[%s5649_s0 + $0x168] sm:$0xff]  ;;  %v1501_v36 = vpop.permute.xlu2 %1500 }
 0x260   : > { %2988 = vmatmul.msk.bf16.gmra.mxu0 %vm1930_vm13, %v1861_v27  ;;  %2993 = vmatmul.msk.bf16.vlgmr.msra.gmra.mxu1 %vm1930_vm13, %v1871_v50  ;;  %v1893_v40 = vsel %vm1857_vm14, %v4856_v58, %v1501_v36 }
 0x262   : > { %2350 = vperm.xlu2 %3093, %v2188_v16   ;;  %v1881_v16 = vsel %vm1857_vm14, %v4818_v8, %v1489_v26  ;;  %v5146_v8 = vld [vmem:[%s5651_s2] ss:$0 sm:$0xff] }
 0x263   : > { %2345 = vperm.xlu1 %3092, %v2187_v30  }
 0x264   : > { %2355 = vperm.xlu0 %3091, %v2189_v51  }
 0x265   : > { %v5032_v24 = vpop.permute.xlu1 %1486 }
 0x266   : > { %v1485_v2 = vpop.permute.xlu0 %1484  ;;  %v1879_v27 = vsel %vm1857_vm14, %v4878_v25, %v5032_v24 }
 0x267   : > { %v1877_v48 = vsel %vm1857_vm14, %v4882_v56, %v1485_v2  ;;  %v2207_v56 = vld [vmem:[%s5649_s0 + $0x178] sm:$0xff] }
 0x26a   : > { %2365 = vperm.xlu2 %3093, %v2191_v7  }
 0x26b   : > { %2360 = vperm.xlu1 %3092, %v2190_v9  }
 0x26c   : > { %2370 = vperm.xlu0 %3091, %v2192_v20  }
 0x26d   : > { %v1493_v45 = vpop.permute.xlu1 %1492 }
 0x26e   : > { %v1491_v39 = vpop.permute.xlu0 %1490  ;;  %v1885_v0 = vsel %vm1857_vm14, %v4905_v14, %v1493_v45  ;;  %v2202_v14 = vld [vmem:[%s5649_s0 + $0x150] sm:$0xff] }
 0x26f   : > { %v1883_v12 = vsel %vm1857_vm14, %v4909_v4, %v1491_v39 }
 0x270   : > { %2989 = vmatmul.msk.bf16.gmra.mxu0 %vm1930_vm13, %v1863_v32  ;;  %2994 = vmatmul.msk.bf16.gmra.mxu1 %vm1930_vm13, %v1873_v37 }
 0x271   : > { %2999 = vmatmul.msk.bf16.vlgmr.msra.gmra.mxu2 %vm1930_vm13, %v1883_v12 }
 0x272   : > { %2380 = vperm.xlu2 %3093, %v2194_v63  }
 0x273   : > { %2375 = vperm.xlu1 %3092, %v2193_v1  }
 0x274   : > { %2385 = vperm.xlu0 %3091, %v2195_v29  }
 0x276   : > { %v1497_v4 = vpop.permute.xlu0 %1496 }
 0x277   : > { %v1889_v50 = vsel %vm1857_vm14, %v4926_v10, %v1497_v4 }
 0x27a   : > { %2395 = vperm.xlu2 %3093, %v2197_v18  }
 0x27b   : > { %2390 = vperm.xlu1 %3092, %v2196_v57  }
 0x27c   : > { %2400 = vperm.xlu0 %3091, %v2198_v34  }
 0x27e   : > { %v1503_v5 = vpop.permute.xlu0 %1502 }
 0x27f   : > { %v1895_v21 = vsel %vm1857_vm14, %v4943_v38, %v1503_v5  ;;  %v1499_v38 = vpop.permute.xlu1 %1498 }
 0x280   : > { %2990 = vmatmul.msk.bf16.gmra.mxu0 %vm1930_vm13, %v1865_v55  ;;  %2995 = vmatmul.msk.bf16.gmra.mxu1 %vm1930_vm13, %v1875_v61  ;;  %v1891_v25 = vsel %vm1857_vm14, %v4922_v49, %v1499_v38 }
 0x281   : > { %3000 = vmatmul.msk.bf16.gmra.mxu2 %vm1930_vm13, %v1885_v0  ;;  %3005 = vmatmul.msk.bf16.vlgmr.msra.gmra.mxu3 %vm1930_vm13, %v1895_v21 }
 0x282   : > { %2410 = vperm.xlu2 %3093, %v2200_v62  }
 0x283   : > { %2405 = vperm.xlu1 %3092, %v2199_v22  }
 0x284   : > { %2415 = vperm.xlu0 %3091, %v2201_v43  }
 0x286   : > { %v1509_v19 = vpop.permute.xlu0 %1508 }
 0x287   : > { %v1505_v60 = vpop.permute.xlu1 %1504  ;;  %v1901_v10 = vsel %vm1857_vm14, %v4960_v11, %v1509_v19 }
 0x288   : > { %v1897_v59 = vsel %vm1857_vm14, %v4939_v35, %v1505_v60  ;;  %v1507_v35 = vpop.permute.xlu2 %1506 }
 0x289   : > { %v1899_v30 = vsel %vm1857_vm14, %v4874_v31, %v1507_v35 }
 0x28a   : > { %2425 = vperm.xlu2 %3093, %v2203_v41  }
 0x28b   : > { %2420 = vperm.xlu1 %3092, %v2202_v14  }
 0x28c   : > { %2430 = vperm.xlu0 %3091, %v2204_v3  }
 0x28e   : > { %v5165_v7 = vpop.permute.xlu0 %2210 }
 0x28f   : > { %v1511_v31 = vpop.permute.xlu1 %1510 }
 0x290   : > { %2991 = vmatmul.msk.bf16.gmra.mxu0 %vm1930_vm13, %v1867_v42  ;;  %2996 = vmatmul.msk.bf16.gmra.mxu1 %vm1930_vm13, %v1877_v48  ;;  %v1903_v51 = vsel %vm1857_vm14, %v4956_v6, %v1511_v31  ;;  %v1513_v49 = vpop.permute.xlu2 %1512 }
 0x291   : > { %3001 = vmatmul.msk.bf16.gmra.mxu2 %vm1930_vm13, %v1887_v52  ;;  %3006 = vmatmul.msk.bf16.gmra.mxu3 %vm1930_vm13, %v1897_v59  ;;  %v1905_v46 = vsel %vm1857_vm14, %v4901_v28, %v1513_v49 }
 0x292   : > { %2440 = vperm.xlu2 %3093, %v2206_v23  }
 0x293   : > { %2435 = vperm.xlu1 %3092, %v2205_v17  }
 0x294   : > { %2445 = vperm.xlu0 %3091, %v2207_v56  }
 0x296   : > { %v5182_v32 = vpop.permute.xlu0 %2235 }
 0x297   : > { %v5156_v11 = vpop.permute.xlu1 %2215 }
 0x298   : > { %v5163_v2 = vpop.permute.xlu2 %2220 }
 0x29e   : > { %v5202_v4 = vpop.permute.xlu0 %2250 }
 0x29f   : > { %v5172_v33 = vpop.permute.xlu1 %2225 }
 0x2a0   : > { %2992 = vmatmul.msk.bf16.gmra.mxu0 %vm1930_vm13, %v1869_v15  ;;  %2997 = vmatmul.msk.bf16.gmra.mxu1 %vm1930_vm13, %v1879_v27  ;;  %v5174_v39 = vpop.permute.xlu2 %2230 }
 0x2a1   : > { %3002 = vmatmul.msk.bf16.gmra.mxu2 %vm1930_vm13, %v1889_v50  ;;  %3007 = vmatmul.msk.bf16.gmra.mxu3 %vm1930_vm13, %v1899_v30 }
 0x2a6   : > { %v5218_v26 = vpop.permute.xlu0 %2265 }
 0x2a7   : > { %v5188_v37 = vpop.permute.xlu1 %2240 }
 0x2a8   : > { %v5196_v44 = vpop.permute.xlu2 %2245 }
 0x2ae   : > { %v5248_v48 = vpop.permute.xlu0 %2280 }
 0x2af   : > { %v5210_v13 = vpop.permute.xlu1 %2255 }
 0x2b0   : > { %2998 = vmatmul.msk.bf16.gmra.mxu1 %vm1930_vm13, %v1881_v16  ;;  %v5216_v5 = vpop.permute.xlu2 %2260 }
 0x2b1   : > { %3003 = vmatmul.msk.bf16.gmra.mxu2 %vm1930_vm13, %v1891_v25  ;;  %3008 = vmatmul.msk.bf16.gmra.mxu3 %vm1930_vm13, %v1901_v10 }
 0x2b6   : > { %v5276_v30 = vpop.permute.xlu0 %2295 }
 0x2b7   : > { %v5233_v43 = vpop.permute.xlu1 %2270 }
 0x2b8   : > { %v5237_v38 = vpop.permute.xlu2 %2275 }
 0x2bf   : > { %v5256_v52 = vpop.permute.xlu1 %2285 }
 0x2c0   : > { %v5270_v50 = vpop.permute.xlu2 %2290 }
 0x2c1   : > { %3004 = vmatmul.msk.bf16.gmra.mxu2 %vm1930_vm13, %v1893_v40  ;;  %3009 = vmatmul.msk.bf16.gmra.mxu3 %vm1930_vm13, %v1903_v51 }
 0x2cd   : > { %v1992_v58 = vpop.f32.mrf.mxu0 }
 0x2ce   : > { %v5154_v6 = vadd.f32 %v5146_v8, %v1992_v58 }
 0x2d0   : > { %2112 = vst [vmem:[%s5151_s18] sm:$0xff] %v5154_v6 }
 0x2d1   : > { %3010 = vmatmul.msk.bf16.gmra.mxu3 %vm1930_vm13, %v1905_v46  ;;  %v5296_v46 = vpop.permute.xlu1 %2300 }
 0x2d5   : > { %v1994_v9 = vpop.f32.mrf.mxu0 }
 0x2d6   : > { %v5168_v20 = vadd.f32 %v5146_v8, %v1994_v9  ;;  %v2549_v9 = vmul.f32 %v5154_v6, %v5154_v6 }
 0x2d8   : > { %2113 = vst [vmem:[%s5151_s18 + $0x8] sm:$0xff] %v5168_v20  ;;  %v2550_v25 = vmul.f32 %v5168_v20, %v5168_v20 }
 0x2dd   : > { %v1997_v54 = vpop.f32.mrf.mxu0  ;;  %v2022_v47 = vpop.f32.mrf.mxu1 }
 0x2de   : > { %v5177_v28 = vadd.f32 %v5146_v8, %v1997_v54  ;;  %v5180_v24 = vadd.f32 %v5146_v8, %v2022_v47  ;;  %v5306_v47 = vpop.permute.xlu2 %2305 }
 0x2e0   : > { %2114 = vst [vmem:[%s5151_s18 + $0x10] sm:$0xff] %v5177_v28  ;;  %v2551_v54 = vmul.f32 %v5177_v28, %v5177_v28 }
 0x2e1   : > { %2124 = vst [vmem:[%s5151_s18 + $0x60] sm:$0xff] %v5180_v24 }
 0x2e5   : > { %v1999_v12 = vpop.f32.mrf.mxu0  ;;  %v2024_v1 = vpop.f32.mrf.mxu1 }
 0x2e6   : > { %v5191_v63 = vadd.f32 %v5146_v8, %v1999_v12  ;;  %v5194_v29 = vadd.f32 %v5146_v8, %v2024_v1  ;;  %v2449_v12 = vmul.f32 %v5156_v11, %v5168_v20  ;;  %v2598_v1 = vmul.f32 %v2550_v25, %v5156_v11 }
 0x2e7   : > { %v2599_v11 = vmul.f32 %v2551_v54, %v5163_v2 }
 0x2e8   : > { %2115 = vst [vmem:[%s5151_s18 + $0x18] sm:$0xff] %v5191_v63 }
 0x2e9   : > { %2125 = vst [vmem:[%s5151_s18 + $0x68] sm:$0xff] %v5194_v29 }
 0x2ed   : > { %v2002_v57 = vpop.f32.mrf.mxu0  ;;  %v2027_v18 = vpop.f32.mrf.mxu1 }
 0x2ee   : > { %v5205_v45 = vadd.f32 %v5146_v8, %v2002_v57  ;;  %v5208_v34 = vadd.f32 %v5146_v8, %v2027_v18  ;;  %v2552_v57 = vmul.f32 %v5191_v63, %v5191_v63  ;;  %v5317_v18 = vpop.permute.xlu0 %2310 }
 0x2f0   : > { %2116 = vst [vmem:[%s5151_s18 + $0x20] sm:$0xff] %v5205_v45  ;;  %v2553_v20 = vmul.f32 %v5205_v45, %v5205_v45 }
 0x2f1   : > { %2126 = vst [vmem:[%s5151_s18 + $0x70] sm:$0xff] %v5208_v34 }
 0x2f4   : > { %v2052_v55 = vpop.f32.mrf.mxu2 }
 0x2f5   : > { %v5221_v61 = vadd.f32 %v5146_v8, %v2052_v55  ;;  %v2004_v21 = vpop.f32.mrf.mxu0  ;;  %v2029_v0 = vpop.f32.mrf.mxu1  ;;  %v2448_v55 = vmul.f32 %v5165_v7, %v5154_v6 }
 0x2f6   : > { %v5224_v22 = vadd.f32 %v5146_v8, %v2004_v21  ;;  %v5227_v62 = vadd.f32 %v5146_v8, %v2029_v0  ;;  %v2597_v21 = vmul.f32 %v2549_v9, %v5165_v7  ;;  %v2450_v0 = vmul.f32 %v5163_v2, %v5177_v28 }
 0x2f7   : > { %2136 = vst [vmem:[%s5151_s18 + $0xc0] sm:$0xff] %v5221_v61  ;;  %v2451_v2 = vmul.f32 %v5172_v33, %v5191_v63  ;;  %v2601_v63 = vmul.f32 %v2553_v20, %v5174_v39 }
 0x2f8   : > { %2117 = vst [vmem:[%s5151_s18 + $0x28] sm:$0xff] %v5224_v22 }
 0x2f9   : > { %2127 = vst [vmem:[%s5151_s18 + $0x78] sm:$0xff] %v5227_v62 }
 0x2fc   : > { %v2054_v14 = vpop.f32.mrf.mxu2 }
 0x2fd   : > { %v5240_v41 = vadd.f32 %v5146_v8, %v2054_v14  ;;  %v2007_v53 = vpop.f32.mrf.mxu0  ;;  %v2032_v3 = vpop.f32.mrf.mxu1 }
 0x2fe   : > { %v5243_v60 = vadd.f32 %v5146_v8, %v2007_v53  ;;  %v5246_v42 = vadd.f32 %v5146_v8, %v2032_v3  ;;  %v2496_v3 = vadd.f32 %v2449_v12, %v2448_v55 }
 0x2ff   : > { %2137 = vst [vmem:[%s5151_s18 + $0xc8] sm:$0xff] %v5240_v41 }
 0x300   : > { %2118 = vst [vmem:[%s5151_s18 + $0x30] sm:$0xff] %v5243_v60  ;;  %v2497_v25 = vadd.f32 %v2496_v3, %v2450_v0  ;;  %v2555_v9 = vmul.f32 %v5243_v60, %v5243_v60  ;;  %v2454_v0 = vmul.f32 %v5188_v37, %v5243_v60 }
 0x301   : > { %2128 = vst [vmem:[%s5151_s18 + $0x80] sm:$0xff] %v5246_v42 }
 0x302   : > { %v2498_v54 = vadd.f32 %v2497_v25, %v2451_v2  ;;  %v5380_v2 = vpop.permute.xlu0 %2325 }
 0x304   : > { %v2057_v59 = vpop.f32.mrf.mxu2  ;;  %v2082_v17 = vpop.f32.mrf.mxu3 }
 0x305   : > { %v5259_v23 = vadd.f32 %v5146_v8, %v2057_v59  ;;  %v5262_v56 = vadd.f32 %v5146_v8, %v2082_v17  ;;  %v2009_v36 = vpop.f32.mrf.mxu0  ;;  %v2034_v35 = vpop.f32.mrf.mxu1  ;;  %v2645_v59 = vadd.f32 %v2598_v1, %v2597_v21  ;;  %v2453_v1 = vmul.f32 %v5182_v32, %v5224_v22 }
 0x306   : > { %v5265_v15 = vadd.f32 %v5146_v8, %v2009_v36  ;;  %v5268_v27 = vadd.f32 %v5146_v8, %v2034_v35  ;;  %v2600_v36 = vmul.f32 %v2552_v57, %v5172_v33  ;;  %v5349_v33 = vpop.permute.xlu1 %2315  ;;  %v5358_v57 = vpop.permute.xlu2 %2320 }
 0x307   : > { %2138 = vst [vmem:[%s5151_s18 + $0xd0] sm:$0xff] %v5259_v23 }
 0x308   : > { %2148 = vst [vmem:[%s5151_s18 + $0x120] sm:$0xff] %v5262_v56  ;;  %v2455_v60 = vmul.f32 %v5196_v44, %v5265_v15 }
 0x309   : > { %2119 = vst [vmem:[%s5151_s18 + $0x38] sm:$0xff] %v5265_v15 }
 0x30a   : > { %2129 = vst [vmem:[%s5151_s18 + $0x88] sm:$0xff] %v5268_v27 }
 0x30c   : > { %v2059_v19 = vpop.f32.mrf.mxu2  ;;  %v2084_v16 = vpop.f32.mrf.mxu3 }
 0x30d   : > { %v5285_v10 = vadd.f32 %v5146_v8, %v2059_v19  ;;  %v5288_v31 = vadd.f32 %v5146_v8, %v2084_v16  ;;  %v2012_v40 = vpop.f32.mrf.mxu0  ;;  %v2037_v51 = vpop.f32.mrf.mxu1  ;;  %v2554_v16 = vmul.f32 %v5224_v22, %v5224_v22 }
 0x30e   : > { %v5291_v49 = vadd.f32 %v5146_v8, %v2012_v40  ;;  %v5294_v58 = vadd.f32 %v5146_v8, %v2037_v51  ;;  %v2646_v40 = vadd.f32 %v2645_v59, %v2599_v11  ;;  %v2452_v51 = vmul.f32 %v5174_v39, %v5205_v45 }
 0x30f   : > { %2139 = vst [vmem:[%s5151_s18 + $0xd8] sm:$0xff] %v5285_v10  ;;  %v2602_v45 = vmul.f32 %v2554_v16, %v5182_v32  ;;  %v2556_v39 = vmul.f32 %v5265_v15, %v5265_v15 }
 0x310   : > { %2149 = vst [vmem:[%s5151_s18 + $0x128] sm:$0xff] %v5288_v31  ;;  %v2647_v12 = vadd.f32 %v2646_v40, %v2600_v36  ;;  %v2499_v55 = vadd.f32 %v2498_v54, %v2452_v51  ;;  %v2557_v22 = vmul.f32 %v5291_v49, %v5291_v49  ;;  %v2456_v40 = vmul.f32 %v5202_v4, %v5291_v49 }
 0x311   : > { %2120 = vst [vmem:[%s5151_s18 + $0x40] sm:$0xff] %v5291_v49  ;;  %v2604_v16 = vmul.f32 %v2556_v39, %v5196_v44  ;;  %v5394_v44 = vpop.permute.xlu1 %2330 }
 0x312   : > { %2130 = vst [vmem:[%s5151_s18 + $0x90] sm:$0xff] %v5294_v58  ;;  %v2648_v21 = vadd.f32 %v2647_v12, %v2601_v63  ;;  %v2605_v63 = vmul.f32 %v2557_v22, %v5202_v4 }
 0x314   : > { %v2062_v14 = vpop.f32.mrf.mxu2  ;;  %v2087_v53 = vpop.f32.mrf.mxu3  ;;  %v2649_v36 = vadd.f32 %v2648_v21, %v2602_v45 }
 0x315   : > { %v5328_v17 = vadd.f32 %v5146_v8, %v2062_v14  ;;  %v5331_v6 = vadd.f32 %v5146_v8, %v2087_v53  ;;  %v2014_v7 = vpop.f32.mrf.mxu0  ;;  %v2039_v28 = vpop.f32.mrf.mxu1  ;;  %v2603_v14 = vmul.f32 %v2555_v9, %v5188_v37 }
 0x316   : > { %v2015_v35 = vadd.f32 %v5146_v8, %v2014_v7  ;;  %v5338_v19 = vadd.f32 %v5146_v8, %v2039_v28  ;;  %v2500_v7 = vadd.f32 %v2499_v55, %v2453_v1 }
 0x317   : > { %2140 = vst [vmem:[%s5151_s18 + $0xe0] sm:$0xff] %v5328_v17  ;;  %v2650_v15 = vadd.f32 %v2649_v36, %v2603_v14 }
 0x318   : > { %2150 = vst [vmem:[%s5151_s18 + $0x130] sm:$0xff] %v5331_v6  ;;  %v2501_v25 = vadd.f32 %v2500_v7, %v2454_v0  ;;  %v2558_v51 = vmul.f32 %v2015_v35, %v2015_v35  ;;  %v2457_v54 = vmul.f32 %v5210_v13, %v2015_v35  ;;  %v2561_v7 = vmul.f32 %v5180_v24, %v5180_v24 }
 0x319   : > { %2121 = vst [vmem:[%s5151_s18 + $0x48] sm:$0xff] %v2015_v35  ;;  %v2651_v1 = vadd.f32 %v2650_v15, %v2604_v16  ;;  %v5418_v16 = vpop.permute.xlu0 %2340 }
 0x31a   : > { %2131 = vst [vmem:[%s5151_s18 + $0x98] sm:$0xff] %v5338_v19  ;;  %v2502_v9 = vadd.f32 %v2501_v25, %v2455_v60  ;;  %v2606_v49 = vmul.f32 %v2558_v51, %v5210_v13  ;;  %v2562_v25 = vmul.f32 %v5194_v29, %v5194_v29 }
 0x31b   : > { %v2652_v4 = vadd.f32 %v2651_v1, %v2605_v63 }
 0x31c   : > { %v2064_v11 = vpop.f32.mrf.mxu2  ;;  %v2089_v20 = vpop.f32.mrf.mxu3  ;;  %v2503_v45 = vadd.f32 %v2502_v9, %v2456_v40  ;;  %v2460_v40 = vmul.f32 %v5233_v43, %v5180_v24  ;;  %v2609_v9 = vmul.f32 %v2561_v7, %v5233_v43  ;;  %v2610_v24 = vmul.f32 %v2562_v25, %v5237_v38 }
 0x31d   : > { %v5369_v53 = vadd.f32 %v5146_v8, %v2064_v11  ;;  %v5372_v32 = vadd.f32 %v5146_v8, %v2089_v20  ;;  %v2017_v3 = vpop.f32.mrf.mxu0  ;;  %v2042_v59 = vpop.f32.mrf.mxu1  ;;  %v2653_v60 = vadd.f32 %v2652_v4, %v2606_v49 }
 0x31e   : > { %v2018_v28 = vadd.f32 %v5146_v8, %v2017_v3  ;;  %v5378_v37 = vadd.f32 %v5146_v8, %v2042_v59  ;;  %v2504_v14 = vadd.f32 %v2503_v45, %v2457_v54  ;;  %v5409_v59 = vpop.permute.xlu2 %2335  ;;  %v2461_v54 = vmul.f32 %v5237_v38, %v5194_v29  ;;  %v5445_v38 = vpop.permute.xlu1 %2345 }
 0x31f   : > { %2141 = vst [vmem:[%s5151_s18 + $0xe8] sm:$0xff] %v5369_v53 }
 0x320   : > { %2151 = vst [vmem:[%s5151_s18 + $0x138] sm:$0xff] %v5372_v32  ;;  %v2559_v12 = vmul.f32 %v2018_v28, %v2018_v28  ;;  %v2458_v39 = vmul.f32 %v5216_v5, %v2018_v28 }
 0x321   : > { %2122 = vst [vmem:[%s5151_s18 + $0x50] sm:$0xff] %v2018_v28 }
 0x322   : > { %2132 = vst [vmem:[%s5151_s18 + $0xa0] sm:$0xff] %v5378_v37  ;;  %v2607_v22 = vmul.f32 %v2559_v12, %v5216_v5  ;;  %v2505_v28 = vadd.f32 %v2504_v14, %v2458_v39  ;;  %v2563_v12 = vmul.f32 %v5208_v34, %v5208_v34 }
 0x324   : > { %v2067_v55 = vpop.f32.mrf.mxu2  ;;  %v2092_v21 = vpop.f32.mrf.mxu3  ;;  %v2654_v51 = vadd.f32 %v2653_v60, %v2607_v22  ;;  %v2611_v14 = vmul.f32 %v2563_v12, %v5248_v48  ;;  %v2463_v22 = vmul.f32 %v5256_v52, %v5227_v62  ;;  %v2466_v12 = vmul.f32 %v5296_v46, %v5294_v58 }
 0x325   : > { %v5399_v0 = vadd.f32 %v5146_v8, %v2067_v55  ;;  %v5402_v35 = vadd.f32 %v5146_v8, %v2092_v21  ;;  %v2019_v11 = vpop.f32.mrf.mxu0  ;;  %v2044_v20 = vpop.f32.mrf.mxu1  ;;  %v2564_v21 = vmul.f32 %v5227_v62, %v5227_v62 }
 0x326   : > { %v2020_v13 = vadd.f32 %v5146_v8, %v2019_v11  ;;  %v5407_v3 = vadd.f32 %v5146_v8, %v2044_v20  ;;  %v5456_v60 = vpop.permute.xlu2 %2350 }
 0x327   : > { %2142 = vst [vmem:[%s5151_s18 + $0xf0] sm:$0xff] %v5399_v0 }
 0x328   : > { %2152 = vst [vmem:[%s5151_s18 + $0x140] sm:$0xff] %v5402_v35  ;;  %v2459_v36 = vmul.f32 %v5218_v26, %v2020_v13  ;;  %v2560_v5 = vmul.f32 %v2020_v13, %v2020_v13 }
 0x329   : > { %2123 = vst [vmem:[%s5151_s18 + $0x58] sm:$0xff] %v2020_v13 }
 0x32a   : > { %v2506_v15 = vadd.f32 %v2505_v28, %v2459_v36  ;;  %v2608_v63 = vmul.f32 %v2560_v5, %v5218_v26  ;;  %2133 = vst [vmem:[%s5151_s18 + $0xa8] sm:$0xff] %v5407_v3  ;;  %v2462_v26 = vmul.f32 %v5248_v48, %v5208_v34  ;;  %v2565_v34 = vmul.f32 %v5246_v42, %v5246_v42 }
 0x32b   : > { %v2566_v28 = vmul.f32 %v5268_v27, %v5268_v27  ;;  %v2612_v36 = vmul.f32 %v2564_v21, %v5256_v52  ;;  %v2464_v5 = vmul.f32 %v5270_v50, %v5246_v42 }
 0x32c   : > { %v2507_v1 = vadd.f32 %v2506_v15, %v2460_v40  ;;  %v2655_v45 = vadd.f32 %v2654_v51, %v2608_v63  ;;  %v2069_v49 = vpop.f32.mrf.mxu2  ;;  %v2094_v39 = vpop.f32.mrf.mxu3  ;;  %v2613_v62 = vmul.f32 %v2565_v34, %v5270_v50  ;;  %v2465_v51 = vmul.f32 %v5276_v30, %v5268_v27 }
 0x32d   : > { %v5437_v55 = vadd.f32 %v5146_v8, %v2069_v49  ;;  %v5440_v43 = vadd.f32 %v5146_v8, %v2094_v39  ;;  %v2047_v29 = vpop.f32.mrf.mxu1  ;;  %v5464_v40 = vpop.permute.xlu0 %2355  ;;  %v2567_v15 = vmul.f32 %v5294_v58, %v5294_v58  ;;  %v2614_v42 = vmul.f32 %v2566_v28, %v5276_v30 }
 0x32e   : > { %v2508_v4 = vadd.f32 %v2507_v1, %v2461_v54  ;;  %v2656_v11 = vadd.f32 %v2655_v45, %v2609_v9  ;;  %v2048_v20 = vadd.f32 %v5146_v8, %v2047_v29  ;;  %v2568_v45 = vmul.f32 %v5338_v19, %v5338_v19 }
 0x32f   : > { %2143 = vst [vmem:[%s5151_s18 + $0xf8] sm:$0xff] %v5437_v55  ;;  %v2569_v30 = vmul.f32 %v5378_v37, %v5378_v37  ;;  %v2615_v58 = vmul.f32 %v2567_v15, %v5296_v46 }
 0x330   : > { %v2509_v13 = vadd.f32 %v2508_v4, %v2462_v26  ;;  %v2657_v7 = vadd.f32 %v2656_v11, %v2610_v24  ;;  %2153 = vst [vmem:[%s5151_s18 + $0x148] sm:$0xff] %v5440_v43  ;;  %v2467_v26 = vmul.f32 %v5306_v47, %v5338_v19  ;;  %v5492_v4 = vpop.permute.xlu1 %2360  ;;  %v2570_v11 = vmul.f32 %v5407_v3, %v5407_v3 }
 0x331   : > { %2134 = vst [vmem:[%s5151_s18 + $0xb0] sm:$0xff] %v2048_v20  ;;  %v2616_v34 = vmul.f32 %v2568_v45, %v5306_v47  ;;  %v2617_v19 = vmul.f32 %v2569_v30, %v5317_v18 }
 0x332   : > { %v2510_v25 = vadd.f32 %v2509_v13, %v2463_v22  ;;  %v2658_v48 = vadd.f32 %v2657_v7, %v2611_v14  ;;  %v2468_v14 = vmul.f32 %v5317_v18, %v5378_v37  ;;  %v5500_v13 = vpop.permute.xlu2 %2365  ;;  %v2469_v7 = vmul.f32 %v5349_v33, %v5407_v3 }
 0x333   : > { %v2618_v37 = vmul.f32 %v2570_v11, %v5349_v33  ;;  %v2470_v3 = vmul.f32 %v5358_v57, %v2048_v20 }
 0x334   : > { %v2659_v63 = vadd.f32 %v2658_v48, %v2612_v36  ;;  %v2511_v9 = vadd.f32 %v2510_v25, %v2464_v5  ;;  %v2072_v54 = vpop.f32.mrf.mxu2  ;;  %v2097_v52 = vpop.f32.mrf.mxu3  ;;  %v2571_v5 = vmul.f32 %v2048_v20, %v2048_v20  ;;  %v2472_v20 = vmul.f32 %v5394_v44, %v5221_v61 }
 0x335   : > { %v5475_v1 = vadd.f32 %v5146_v8, %v2072_v54  ;;  %v5478_v27 = vadd.f32 %v5146_v8, %v2097_v52  ;;  %v2049_v50 = vpop.f32.mrf.mxu1  ;;  %v5505_v47 = vpop.permute.xlu0 %2370 }
 0x336   : > { %v2512_v49 = vadd.f32 %v2511_v9, %v2465_v51  ;;  %v2660_v39 = vadd.f32 %v2659_v63, %v2613_v62  ;;  %v2050_v24 = vadd.f32 %v5146_v8, %v2049_v50  ;;  %v2573_v9 = vmul.f32 %v5221_v61, %v5221_v61 }
 0x337   : > { %2144 = vst [vmem:[%s5151_s18 + $0x100] sm:$0xff] %v5475_v1  ;;  %v2619_v33 = vmul.f32 %v2571_v5, %v5358_v57  ;;  %v2473_v57 = vmul.f32 %v5409_v59, %v5240_v41 }
 0x338   : > { %v2513_v29 = vadd.f32 %v2512_v49, %v2466_v12  ;;  %v2661_v21 = vadd.f32 %v2660_v39, %v2614_v42  ;;  %2154 = vst [vmem:[%s5151_s18 + $0x150] sm:$0xff] %v5478_v27  ;;  %v2572_v63 = vmul.f32 %v2050_v24, %v2050_v24  ;;  %v2471_v42 = vmul.f32 %v5380_v2, %v2050_v24  ;;  %v5528_v39 = vpop.permute.xlu1 %2375 }
 0x339   : > { %2135 = vst [vmem:[%s5151_s18 + $0xb8] sm:$0xff] %v2050_v24  ;;  %v2574_v12 = vmul.f32 %v5240_v41, %v5240_v41  ;;  %v2621_v30 = vmul.f32 %v2573_v9, %v5394_v44  ;;  %v2575_v24 = vmul.f32 %v5259_v23, %v5259_v23  ;;  %v2474_v41 = vmul.f32 %v5418_v16, %v5259_v23 }
 0x33a   : > { %v2514_v22 = vadd.f32 %v2513_v29, %v2467_v26  ;;  %v2662_v46 = vadd.f32 %v2661_v21, %v2615_v58  ;;  %v2620_v49 = vmul.f32 %v2572_v63, %v5380_v2  ;;  %v5535_v61 = vpop.permute.xlu2 %2380  ;;  %v2578_v23 = vmul.f32 %v5369_v53, %v5369_v53 }
 0x33b   : > { %v2622_v2 = vmul.f32 %v2574_v12, %v5409_v59  ;;  %v2623_v59 = vmul.f32 %v2575_v24, %v5418_v16  ;;  %v2477_v16 = vmul.f32 %v5464_v40, %v5369_v53  ;;  %v2478_v53 = vmul.f32 %v5492_v4, %v5399_v0 }
 0x33c   : > { %v2515_v28 = vadd.f32 %v2514_v22, %v2468_v14  ;;  %v2663_v36 = vadd.f32 %v2662_v46, %v2616_v34  ;;  %v2074_v25 = vpop.f32.mrf.mxu2  ;;  %v2099_v48 = vpop.f32.mrf.mxu3  ;;  %v2576_v34 = vmul.f32 %v5285_v10, %v5285_v10  ;;  %v2480_v24 = vmul.f32 %v5505_v47, %v5475_v1 }
 0x33d   : > { %v5509_v62 = vadd.f32 %v5146_v8, %v2074_v25  ;;  %v5512_v51 = vadd.f32 %v5146_v8, %v2099_v48  ;;  %v5546_v46 = vpop.permute.xlu0 %2385  ;;  %v2476_v25 = vmul.f32 %v5456_v60, %v5328_v17 }
 0x33e   : > { %v2516_v18 = vadd.f32 %v2515_v28, %v2469_v7  ;;  %v2664_v15 = vadd.f32 %v2663_v36, %v2617_v19  ;;  %v2577_v19 = vmul.f32 %v5328_v17, %v5328_v17  ;;  %v2475_v7 = vmul.f32 %v5445_v38, %v5285_v10 }
 0x33f   : > { %2145 = vst [vmem:[%s5151_s18 + $0x108] sm:$0xff] %v5509_v62  ;;  %v2624_v5 = vmul.f32 %v2576_v34, %v5445_v38  ;;  %v2579_v10 = vmul.f32 %v5399_v0, %v5399_v0 }
 0x340   : > { %v2665_v54 = vadd.f32 %v2664_v15, %v2618_v37  ;;  %v2517_v52 = vadd.f32 %v2516_v18, %v2470_v3  ;;  %2155 = vst [vmem:[%s5151_s18 + $0x158] sm:$0xff] %v5512_v51  ;;  %v2625_v18 = vmul.f32 %v2577_v19, %v5456_v60  ;;  %v2391_v38 = vpop.permute.xlu1 %2390  ;;  %v2580_v60 = vmul.f32 %v5437_v55, %v5437_v55 }
 0x342   : > { %v2666_v50 = vadd.f32 %v2665_v54, %v2619_v33  ;;  %v2518_v45 = vadd.f32 %v2517_v52, %v2471_v42  ;;  %v2626_v54 = vmul.f32 %v2578_v23, %v5464_v40  ;;  %v2396_v12 = vpop.permute.xlu2 %2395  ;;  %v2627_v40 = vmul.f32 %v2579_v10, %v5492_v4 }
 0x343   : > { %v2586_v23 = vmul.f32 %v5288_v31, %v5288_v31 }
 0x344   : > { %v2519_v58 = vadd.f32 %v2518_v45, %v2472_v20  ;;  %v2667_v26 = vadd.f32 %v2666_v50, %v2620_v49  ;;  %v2077_v29 = vpop.f32.mrf.mxu2  ;;  %v2102_v21 = vpop.f32.mrf.mxu3  ;;  %v2581_v20 = vmul.f32 %v5475_v1, %v5475_v1  ;;  %v2479_v50 = vmul.f32 %v5500_v13, %v5437_v55 }
 0x345   : > { %v2078_v11 = vadd.f32 %v5146_v8, %v2077_v29  ;;  %v5540_v44 = vadd.f32 %v5146_v8, %v2102_v21  ;;  %v2401_v0 = vpop.permute.xlu0 %2400  ;;  %v2481_v55 = vmul.f32 %v5528_v39, %v5509_v62 }
 0x346   : > { %v2520_v14 = vadd.f32 %v2519_v58, %v2473_v57  ;;  %v2668_v22 = vadd.f32 %v2667_v26, %v2621_v30  ;;  %v2582_v30 = vmul.f32 %v5509_v62, %v5509_v62  ;;  %v2628_v57 = vmul.f32 %v2580_v60, %v5500_v13 }
 0x347   : > { %2146 = vst [vmem:[%s5151_s18 + $0x110] sm:$0xff] %v2078_v11  ;;  %v2629_v4 = vmul.f32 %v2581_v20, %v5505_v47  ;;  %v2482_v1 = vmul.f32 %v5535_v61, %v2078_v11  ;;  %v2585_v47 = vmul.f32 %v5262_v56, %v5262_v56 }
 0x348   : > { %v2521_v28 = vadd.f32 %v2520_v14, %v2474_v41  ;;  %v2669_v36 = vadd.f32 %v2668_v22, %v2622_v2  ;;  %2156 = vst [vmem:[%s5151_s18 + $0x160] sm:$0xff] %v5540_v44  ;;  %v2583_v2 = vmul.f32 %v2078_v11, %v2078_v11  ;;  %v2630_v34 = vmul.f32 %v2582_v30, %v5528_v39 }
 0x34a   : > { %v2522_v48 = vadd.f32 %v2521_v28, %v2475_v7  ;;  %v2670_v37 = vadd.f32 %v2669_v36, %v2623_v59  ;;  %v2406_v59 = vpop.permute.xlu1 %2405  ;;  %v2631_v28 = vmul.f32 %v2583_v2, %v5535_v61  ;;  %v2411_v36 = vpop.permute.xlu2 %2410  ;;  %v2587_v61 = vmul.f32 %v5331_v6, %v5331_v6 }
 0x34c   : > { %v2671_v15 = vadd.f32 %v2670_v37, %v2624_v5  ;;  %v2523_v3 = vadd.f32 %v2522_v48, %v2476_v25  ;;  %v2079_v63 = vpop.f32.mrf.mxu2  ;;  %v2104_v9 = vpop.f32.mrf.mxu3  ;;  %v2484_v5 = vmul.f32 %v2391_v38, %v5262_v56  ;;  %v2486_v56 = vmul.f32 %v2401_v0, %v5331_v6 }
 0x34d   : > { %v2080_v17 = vadd.f32 %v5146_v8, %v2079_v63  ;;  %v5569_v52 = vadd.f32 %v5146_v8, %v2104_v9  ;;  %v2416_v37 = vpop.permute.xlu0 %2415  ;;  %v2634_v63 = vmul.f32 %v2586_v23, %v2396_v12  ;;  %v2488_v6 = vmul.f32 %v2411_v36, %v5402_v35 }
 0x34e   : > { %v2524_v33 = vadd.f32 %v2523_v3, %v2477_v16  ;;  %v2672_v42 = vadd.f32 %v2671_v15, %v2625_v18  ;;  %v2633_v18 = vmul.f32 %v2585_v47, %v2391_v38  ;;  %v2485_v16 = vmul.f32 %v2396_v12, %v5288_v31 }
 0x34f   : > { %2147 = vst [vmem:[%s5151_s18 + $0x118] sm:$0xff] %v2080_v17  ;;  %v2584_v19 = vmul.f32 %v2080_v17, %v2080_v17  ;;  %v2483_v39 = vmul.f32 %v5546_v46, %v2080_v17  ;;  %v2589_v38 = vmul.f32 %v5402_v35, %v5402_v35  ;;  %v2635_v31 = vmul.f32 %v2587_v61, %v2401_v0 }
 0x350   : > { %v2525_v45 = vadd.f32 %v2524_v33, %v2478_v53  ;;  %v2673_v49 = vadd.f32 %v2672_v42, %v2626_v54  ;;  %2157 = vst [vmem:[%s5151_s18 + $0x168] sm:$0xff] %v5569_v52  ;;  %v2588_v54 = vmul.f32 %v5372_v32, %v5372_v32  ;;  %v2487_v53 = vmul.f32 %v2406_v59, %v5372_v32 }
 0x351   : > { %v2632_v48 = vmul.f32 %v2584_v19, %v5546_v46  ;;  %v2591_v0 = vmul.f32 %v5478_v27, %v5478_v27 }
 0x352   : > { %v2526_v58 = vadd.f32 %v2525_v45, %v2479_v50  ;;  %v2674_v26 = vadd.f32 %v2673_v49, %v2627_v40  ;;  %v2421_v42 = vpop.permute.xlu1 %2420  ;;  %v2636_v12 = vmul.f32 %v2588_v54, %v2406_v59  ;;  %v2426_v50 = vpop.permute.xlu2 %2425  ;;  %v2637_v45 = vmul.f32 %v2589_v38, %v2411_v36 }
 0x353   : > { %v2489_v49 = vmul.f32 %v2416_v37, %v5440_v43 }
 0x354   : > { %v2527_v29 = vadd.f32 %v2526_v58, %v2480_v24  ;;  %v2675_v21 = vadd.f32 %v2674_v26, %v2628_v57  ;;  %v2107_v41 = vpop.f32.mrf.mxu3  ;;  %v2490_v58 = vmul.f32 %v2421_v42, %v5478_v27  ;;  %v2592_v26 = vmul.f32 %v5512_v51, %v5512_v51 }
 0x355   : > { %v5593_v14 = vadd.f32 %v5146_v8, %v2107_v41  ;;  %v2431_v57 = vpop.permute.xlu0 %2430  ;;  %v2594_v41 = vmul.f32 %v5569_v52, %v5569_v52 }
 0x356   : > { %v2528_v13 = vadd.f32 %v2527_v29, %v2481_v55  ;;  %v2676_v22 = vadd.f32 %v2675_v21, %v2629_v4  ;;  %v2593_v55 = vmul.f32 %v5540_v44, %v5540_v44  ;;  %v2639_v29 = vmul.f32 %v2591_v0, %v2421_v42 }
 0x357   : > { %2158 = vst [vmem:[%s5151_s18 + $0x170] sm:$0xff] %v5593_v14 }
 0x358   : > { %v2677_v62 = vadd.f32 %v2676_v22, %v2630_v34  ;;  %v2529_v7 = vadd.f32 %v2528_v13, %v2482_v1  ;;  %v2640_v34 = vmul.f32 %v2592_v26, %v2426_v50  ;;  %v2492_v13 = vmul.f32 %v2431_v57, %v5540_v44 }
 0x359   : > { %v2641_v19 = vmul.f32 %v2593_v55, %v2431_v57 }
 0x35a   : > { %v2678_v11 = vadd.f32 %v2677_v62, %v2631_v28  ;;  %v2530_v25 = vadd.f32 %v2529_v7, %v2483_v39  ;;  %v2436_v1 = vpop.permute.xlu1 %2435  ;;  %v2595_v7 = vmul.f32 %v5593_v14, %v5593_v14 }
 0x35b   : > { %v2493_v59 = vmul.f32 %v2436_v1, %v5569_v52  ;;  %v2642_v28 = vmul.f32 %v2594_v41, %v2436_v1 }
 0x35c   : > { %v2531_v10 = vadd.f32 %v2530_v25, %v2484_v5  ;;  %v2679_v15 = vadd.f32 %v2678_v11, %v2632_v48  ;;  %v2109_v3 = vpop.f32.mrf.mxu3 }
 0x35d   : > { %v2110_v9 = vadd.f32 %v5146_v8, %v2109_v3  ;;  %v2590_v8 = vmul.f32 %v5440_v43, %v5440_v43  ;;  %v2491_v43 = vmul.f32 %v2426_v50, %v5512_v51  ;;  %v2441_v51 = vpop.permute.xlu2 %2440  ;;  %v2446_v11 = vpop.permute.xlu0 %2445 }
 0x35e   : > { %v2532_v17 = vadd.f32 %v2531_v10, %v2485_v16  ;;  %v2680_v46 = vadd.f32 %v2679_v15, %v2633_v18  ;;  %v2494_v23 = vmul.f32 %v2441_v51, %v5593_v14  ;;  %v2643_v48 = vmul.f32 %v2595_v7, %v2441_v51 }
 0x35f   : > { %2159 = vst [vmem:[%s5151_s18 + $0x178] sm:$0xff] %v2110_v9  ;;  %v2638_v24 = vmul.f32 %v2590_v8, %v2416_v37  ;;  %v2596_v5 = vmul.f32 %v2110_v9, %v2110_v9  ;;  %v2495_v37 = vmul.f32 %v2446_v11, %v2110_v9 }
 0x360   : > { %v2533_v60 = vadd.f32 %v2532_v17, %v2486_v56  ;;  %v2681_v33 = vadd.f32 %v2680_v46, %v2634_v63 }
 0x361   : > { %v2644_v16 = vmul.f32 %v2596_v5, %v2446_v11 }
 0x362   : > { %v2534_v20 = vadd.f32 %v2533_v60, %v2487_v53  ;;  %v2682_v40 = vadd.f32 %v2681_v33, %v2635_v31 }
 0x364   : > { %v2683_v30 = vadd.f32 %v2682_v40, %v2636_v12  ;;  %v2535_v32 = vadd.f32 %v2534_v20, %v2488_v6 }
 0x366   : > { %v2536_v4 = vadd.f32 %v2535_v32, %v2489_v49  ;;  %v2684_v35 = vadd.f32 %v2683_v30, %v2637_v45 }
 0x368   : > { %v2537_v21 = vadd.f32 %v2536_v4, %v2490_v58  ;;  %v2685_v2 = vadd.f32 %v2684_v35, %v2638_v24 }
 0x36a   : > { %v2538_v27 = vadd.f32 %v2537_v21, %v2491_v43  ;;  %v2686_v22 = vadd.f32 %v2685_v2, %v2639_v29 }
 0x36c   : > { %v2539_v47 = vadd.f32 %v2538_v27, %v2492_v13  ;;  %v2687_v62 = vadd.f32 %v2686_v22, %v2640_v34 }
 0x36e   : > { %v2540_v39 = vadd.f32 %v2539_v47, %v2493_v59  ;;  %v2688_v36 = vadd.f32 %v2687_v62, %v2641_v19 }
 0x370   : > { %v2689_v44 = vadd.f32 %v2688_v36, %v2642_v28  ;;  %v2541_v25 = vadd.f32 %v2540_v39, %v2494_v23 }
 0x372   : > { %v2690_v18 = vadd.f32 %v2689_v44, %v2643_v48  ;;  %v2542_v52 = vadd.f32 %v2541_v25, %v2495_v37 }
 0x374   : > { %v2543_v61 = vrot.slane %v2542_v52, 4  ;;  %v2691_v10 = vadd.f32 %v2690_v18, %v2644_v16 }
 0x376   : > { %v2544_v15 = vadd.f32 %v2543_v61, %v2542_v52  ;;  %v2692_v3 = vrot.slane %v2691_v10, 4 }
 0x378   : > { %v2545_v63 = vrot.slane %v2544_v15, 2  ;;  %v2693_v56 = vadd.f32 %v2692_v3, %v2691_v10 }
 0x37a   : > { %v2546_v54 = vadd.f32 %v2545_v63, %v2544_v15  ;;  %v2694_v17 = vrot.slane %v2693_v56, 2 }
 0x37c   : > { %v2547_v46 = vrot.slane %v2546_v54, 1  ;;  %v2695_v14 = vadd.f32 %v2694_v17, %v2693_v56 }
 0x37e   : > { %v2696_v38 = vrot.slane %v2695_v14, 1  ;;  %v2548_v9 = vadd.f32 %v2547_v46, %v2546_v54 }
 0x380   : > { %v2697_v31 = vadd.f32 %v2696_v38, %v2695_v14 }
 0x382   : > { %v2699_v53 = vsel %vm2698_vm15, %v2548_v9, %v2697_v31 }
 0x383   : > { %2700 = vst [vmem:[%s456_s22] sm:$0x3] %v2699_v53 }
 0x384 PF: > { %s18_s26 = sadd.s32 1, %s3142_s26   ;;  %s6029_s24 = smov %s3138_s25 }
 0x385   : > { %p15_p5 = scmp.ge.s32.totalorder %s18_s26, 4   ;;  %s6030_s25 = smov %s6032_s27 }
 0x387   :  { %17 = sbr.rel (!%p15_p5) target bundleno = 2 (0x2), region = 92 }

// kernel: double_conv_forward.6
= control target key start
LH: loop header
LB: loop body
LE: loop exit
PB: predicated region body
PF: predicated region fallthrough
CT: control target
= control target key end

     0   :  { %s3224_s24 = smov 0   ;;  %s3226_s25 = smov 0   ;;  %s5687_s0 = inlined_call_operand.vmem [shape: f32[384,1], index: 0, kind: input, shape index: {}]   ;;  %s5688_s1 = inlined_call_operand.vmem [shape: bf16[72,128], index: 1, kind: input, shape index: {}]   ;;  %s5689_s2 = inlined_call_operand.vmem [shape: f32[1,128], index: 2, kind: input, shape index: {}]   ;;  %s5690_s3 = inlined_call_operand.vmem [shape: bf16[2,432,8], index: 3, kind: input, shape index: {}, may-alias: {3,4,5}]   ;;  %s5691_s4 = inlined_call_operand.vmem [shape: bf16[2,432,8], index: 4, kind: input, shape index: {}, may-alias: {3,4,5}]   ;;  %s5692_s5 = inlined_call_operand.vmem [shape: bf16[2,432,8], index: 5, kind: input, shape index: {}, may-alias: {3,4,5}]   ;;  %s5693_s6 = inlined_call_operand.vmem [shape: f32[2,384,128], index: 6, kind: output, shape index: {0}]   ;;  %s5694_s7 = inlined_call_operand.vmem [shape: f32[2,1,2,128], index: 7, kind: output, shape index: {1}]  }
   0x1   :  { %s3228_s26 = smov 0  }
   0x2 LB: > { %s30_s27 = sadd.s32 1, %s3169_s25  ;;  %p2884_p0 = scmp.ge.s32.totalorder %s3173_s26, 1  ;;  %s3173_s26 = sphi %s3228_s26, %s18_s26   ;;  %s3169_s25 = sphi %s3226_s25, %s6068_s25   ;;  %s3165_s24 = sphi %s3224_s24, %s6067_s24  }
   0x3   : > { %p32_p1 = scmp.ge.s32.totalorder %s30_s27, 2  ;;  %p321_p2 = scmp.lt.s32.totalorder %s3173_s26, 3 }
   0x5   : > { %s6070_s27 = smov (%p32_p1, %s30_s27), 0  ;;  %p322_p3 = pnand %p2884_p0, %p321_p2 }
   0x7   : > { %325 = sbr.rel (%p322_p3) target bundleno = 900 (0x384), region = 44 }
   0xc   : > { %p399_p4 = scmp.lt.s32.totalorder %s3165_s24, 1  ;;  %vm652_vm0 = vsmask.f32 7424  ;;  %s3175_s9 = smov 8   ;;  %vm897_vm1 = vcmask 1046528   ;;  %vm648_vm2 = vcmask 1043456  }
   0xd   : > { %s3176_s14 = smov 16   ;;  %s3177_s15 = smov 24   ;;  %vm1094_vm3 = vsmask.f32 3328  ;;  %vm1248_vm4 = vcmask 1042432   ;;  %vm1514_vm5 = vcmask 64512  }
   0xe   : > { %s6072_s24 = smov (!%p399_p4, %s3165_s24), 1  ;;  %s3178_s20 = smov 32   ;;  %vm1563_vm6 = vcmask 130048   ;;  %vm1612_vm7 = vcmask 195584   ;;  %vm1661_vm8 = vcmask 261120   ;;  %vm1710_vm9 = vcmask 326656  }
   0xf   : > { %s3245_s28 = smul.u32 216, %s6072_s24  ;;  %s3179_s21 = smov 40   ;;  %vm1759_vm10 = vcmask 392192   ;;  %vm1808_vm11 = vcmask 457728   ;;  %vm1946_vm12 = vcmask 588800   ;;  %vm1857_vm13 = vcmask 523264  }
  0x10   : > { %s3180_s22 = smov 48   ;;  %s3181_s23 = smov 56   ;;  %vm2713_vm14 = vcmask 1040384  }
  0x11   : > { %s3251_s8 = scalar_lea.vmem %s5690_s3, %s3245_s28  ;;  %s3037_s10 = sadd.s32 192, %s3245_s28 }
  0x12   : > { %v3254_v0 = vld [vmem:[%s3251_s8 + $0x20] sm:$0xff]  ;;  %v3257_v1 = vld [vmem:[%s3251_s8 + $0x28] sm:$0xff]  ;;  %v3260_v2 = vld [vmem:[%s3251_s8 + $0x10] sm:$0xff]  ;;  %s3511_s13 = scalar_lea.vmem %s5691_s4, %s3037_s10  ;;  %s3039_s16 = sadd.s32 204, %s3245_s28 }
  0x13   : > { %v3263_v3 = vld [vmem:[%s3251_s8 + $0x18] sm:$0xff]  ;;  %v3266_v4 = vld [vmem:[%s3251_s8] sm:$0xff]  ;;  %v3269_v5 = vld [vmem:[%s3251_s8 + $0x8] sm:$0xff]  ;;  %v5738_v6 = vshll.u32 %v3254_v0, 16  ;;  %v5739_v7 = vshrl.u32 %v3254_v0, 16  ;;  %v5715_v8 = vshll.u32 %v3257_v1, 16  ;;  %s3820_s19 = scalar_lea.vmem %s5692_s5, %s3039_s16 }
  0x14   : > { %v5736_v9 = vshll.u32 %v3260_v2, 16  ;;  %v3276_v10 = vld [vmem:[%s3251_s8 + $0x30] sm:$0xff]  ;;  %v5737_v11 = vshrl.u32 %v3260_v2, 16  ;;  %v5740_v12 = vshll.u32 %v3263_v3, 16  ;;  %v654_v13 = vshrl.u32 %v3266_v4, 16  ;;  %v3301_v27 = vld [vmem:[%s3251_s8 + $0x40] sm:$0xff] }
  0x15   : > { %v656_v14 = vshll.u32 %v3266_v4, 16  ;;  %v687_v15 = vrot.slane %v5738_v6, 1  ;;  %v695_v16 = vrot.slane %v5715_v8, 1  ;;  %v5727_v18 = vshll.u32 %v3269_v5, 16  ;;  %v3304_v28 = vld [vmem:[%s3251_s8 + $0x38] sm:$0xff]  ;;  %v3323_v37 = vld [vmem:[%s3251_s8 + $0x48] sm:$0xff] }
  0x16   : > { %v671_v17 = vrot.slane %v5736_v9, 1  ;;  %v679_v19 = vrot.slane %v5740_v12, 1  ;;  %v5719_v21 = vshrl.u32 %v3257_v1, 16  ;;  %v5724_v22 = vshll.u32 %v3276_v10, 16  ;;  %v3337_v44 = vld [vmem:[%s3251_s8 + $0x58] sm:$0xff]  ;;  %v3346_v49 = vld [vmem:[%s3251_s8 + $0x50] sm:$0xff] }
  0x17   : > { %v658_v20 = vrot.slane %v656_v14, 1  ;;  %v691_v23 = vor.u32 %v5739_v7, %v687_v15  ;;  %v663_v25 = vrot.slane %v5727_v18, 1  ;;  %v5741_v26 = vshrl.u32 %v3263_v3, 16  ;;  %v3355_v52 = vld [vmem:[%s3251_s8 + $0x60] sm:$0xff]  ;;  %s3183_s28 = smov 64   ;;  %s3087_s17 = smul.u32 384, %s6072_s24 }
  0x18   : > { %v675_v24 = vor.u32 %v5737_v11, %v671_v17  ;;  %v5735_v30 = vshrl.u32 %v3269_v5, 16  ;;  %v699_v34 = vor.u32 %v5719_v21, %v695_v16  ;;  %v703_v35 = vrot.slane %v5724_v22, 1 }
  0x19   : > { %v659_v29 = vor.u32 %v658_v20, %v654_v13  ;;  %v3308_v31 = vsel %vm652_vm0, %v691_v23, %v695_v16  ;;  %v683_v36 = vor.u32 %v5741_v26, %v679_v19  ;;  %v5703_v38 = vshll.u32 %v3301_v27, 16  ;;  %v3385_v16 = vld [vmem:[%s3251_s8 + $0x68] sm:$0xff] }
  0x1a   : > { %v680_v32 = vsel %vm652_vm0, %v675_v24, %v679_v19  ;;  %857 = vrot.lane.b32.xlu2 %v3308_v31, %s3175_s9  ;;  %v5720_v39 = vshll.u32 %v3304_v28, 16  ;;  %v667_v40 = vor.u32 %v5735_v30, %v663_v25  ;;  %v3330_v41 = vsel %vm652_vm0, %v699_v34, %v703_v35  ;;  %v3400_v24 = vld [vmem:[%s3251_s8 + $0x78] sm:$0xff] }
  0x1b   : > { %853 = vrot.lane.b32.xlu1 %v680_v32, %s3175_s9  ;;  %v664_v33 = vsel %vm652_vm0, %v659_v29, %v663_v25  ;;  %v3333_v42 = vsel %vm652_vm0, %v683_v36, %v687_v15  ;;  %v5706_v43 = vshrl.u32 %v3301_v27, 16  ;;  %v719_v45 = vrot.slane %v5703_v38, 1  ;;  %v3382_v15 = vld [vmem:[%s3251_s8 + $0x70] sm:$0xff] }
  0x1c   : > { %849 = vrot.lane.b32.xlu0 %v664_v33, %s3175_s9  ;;  %v5710_v46 = vshll.u32 %v3323_v37, 16  ;;  %v711_v47 = vrot.slane %v5720_v39, 1  ;;  %v5723_v48 = vshrl.u32 %v3304_v28, 16  ;;  %v672_v50 = vsel %vm652_vm0, %v667_v40, %v671_v17  ;;  %v3416_v40 = vld [vmem:[%s3251_s8 + $0x88] sm:$0xff] }
  0x1d   : > { %v5726_v51 = vshrl.u32 %v3276_v10, 16  ;;  %v5696_v53 = vshll.u32 %v3337_v44, 16  ;;  %v723_v54 = vor.u32 %v5706_v43, %v719_v45  ;;  %v5708_v57 = vshll.u32 %v3346_v49, 16 }
  0x1e   : > { %v727_v55 = vrot.slane %v5710_v46, 1  ;;  %v715_v56 = vor.u32 %v5723_v48, %v711_v47  ;;  %v5697_v60 = vshrl.u32 %v3337_v44, 16  ;;  %v5699_v61 = vshll.u32 %v3355_v52, 16 }
  0x1f   : > { %v707_v58 = vor.u32 %v5726_v51, %v703_v35  ;;  %v743_v59 = vrot.slane %v5696_v53, 1  ;;  %v735_v13 = vrot.slane %v5708_v57, 1  ;;  %v5709_v14 = vshrl.u32 %v3346_v49, 16 }
  0x20   : > { %v3373_v62 = vsel %vm652_vm0, %v723_v54, %v727_v55  ;;  %v3376_v63 = vsel %vm652_vm0, %v715_v56, %v719_v45  ;;  %v5711_v19 = vshrl.u32 %v3323_v37, 16  ;;  %v751_v23 = vrot.slane %v5699_v61, 1 }
  0x21   : > { %v3388_v17 = vsel %vm652_vm0, %v707_v58, %v711_v47  ;;  %v747_v20 = vor.u32 %v5697_v60, %v743_v59  ;;  %v739_v25 = vor.u32 %v5709_v14, %v735_v13  ;;  %v5695_v29 = vshll.u32 %v3382_v15, 16 }
  0x22   : > { %859 = vrot.lane.b32.xlu2 %v3330_v41, %s3175_s9  ;;  %v5698_v32 = vshll.u32 %v3385_v16, 16  ;;  %v731_v33 = vor.u32 %v5711_v19, %v727_v55  ;;  %v5700_v35 = vshrl.u32 %v3382_v15, 16  ;;  %v5701_v36 = vshll.u32 %v3400_v24, 16  ;;  %v3427_v55 = vld [vmem:[%s3251_s8 + $0x80] sm:$0xff] }
  0x23   : > { %855 = vrot.lane.b32.xlu1 %v3333_v42, %s3175_s9  ;;  %v3411_v34 = vsel %vm652_vm0, %v747_v20, %v751_v23  ;;  %v3419_v45 = vsel %vm652_vm0, %v739_v25, %v743_v59  ;;  %v767_v47 = vrot.slane %v5695_v29, 1  ;;  %v5702_v54 = vshrl.u32 %v3385_v16, 16  ;;  %v3438_v59 = vld [vmem:[%s3251_s8 + $0x90] sm:$0xff] }
  0x24   : > { %851 = vrot.lane.b32.xlu0 %v672_v50, %s3175_s9  ;;  %v759_v50 = vrot.slane %v5698_v32, 1  ;;  %v3430_v56 = vsel %vm652_vm0, %v731_v33, %v735_v13  ;;  %v5704_v58 = vshrl.u32 %v3355_v52, 16  ;;  %v5705_v20 = vshll.u32 %v3416_v40, 16 }
  0x25   : > { %v771_v13 = vor.u32 %v5700_v35, %v767_v47  ;;  %v775_v25 = vrot.slane %v5701_v36, 1  ;;  %v5707_v29 = vshll.u32 %v3427_v55, 16  ;;  %v5712_v32 = vshrl.u32 %v3416_v40, 16  ;;  %v3457_v35 = vld [vmem:[%s3251_s8 + $0xa0] sm:$0xff] }
  0x26   : > { %v763_v33 = vor.u32 %v5702_v54, %v759_v50  ;;  %v755_v53 = vor.u32 %v5704_v58, %v751_v23  ;;  %v791_v60 = vrot.slane %v5705_v20, 1  ;;  %v5713_v61 = vshll.u32 %v3438_v59, 16  ;;  %v3469_v58 = vld [vmem:[%s3251_s8 + $0x98] sm:$0xff] }
  0x27   : > { %v3460_v36 = vsel %vm652_vm0, %v771_v13, %v775_v25  ;;  %v783_v38 = vrot.slane %v5707_v29, 1  ;;  %v5714_v23 = vshrl.u32 %v3427_v55, 16  ;;  %v5718_v43 = vshrl.u32 %v3400_v24, 16 }
  0x28   : > { %v3463_v54 = vsel %vm652_vm0, %v763_v33, %v767_v47  ;;  %v3472_v20 = vsel %vm652_vm0, %v755_v53, %v759_v50  ;;  %v3480_v47 = vld [vmem:[%s3251_s8 + $0xa8] sm:$0xff]  ;;  %v5716_v13 = vshll.u32 %v3457_v35, 16  ;;  %v795_v53 = vor.u32 %v5712_v32, %v791_v60 }
  0x29   : > { %v799_v50 = vrot.slane %v5713_v61, 1  ;;  %v787_v33 = vor.u32 %v5714_v23, %v783_v38  ;;  %v5717_v29 = vshll.u32 %v3469_v58, 16  ;;  %v779_v57 = vor.u32 %v5718_v43, %v775_v25  ;;  %v3514_v25 = vld [vmem:[%s3251_s8 + $0xb8] sm:$0xff]  ;;  %v3532_v43 = vld [vmem:[%s3511_s13] sm:$0xff] }
  0x2a   : > { %865 = vrot.lane.b32.xlu2 %v3373_v62, %s3175_s9  ;;  %v815_v14 = vrot.slane %v5716_v13, 1  ;;  %v5721_v46 = vshrl.u32 %v3457_v35, 16  ;;  %v5722_v19 = vshll.u32 %v3480_v47, 16  ;;  %v5725_v8 = vshrl.u32 %v3469_v58, 16  ;;  %v3517_v13 = vld [vmem:[%s3251_s8 + $0xb0] sm:$0xff] }
  0x2b   : > { %863 = vrot.lane.b32.xlu1 %v3376_v63, %s3175_s9  ;;  %v3500_v32 = vsel %vm652_vm0, %v795_v53, %v799_v50  ;;  %v3503_v61 = vsel %vm652_vm0, %v787_v33, %v791_v60  ;;  %v807_v23 = vrot.slane %v5717_v29, 1  ;;  %v3520_v53 = vsel %vm652_vm0, %v779_v57, %v783_v38 }
  0x2c   : > { %861 = vrot.lane.b32.xlu0 %v3388_v17, %s3175_s9  ;;  %v5730_v60 = vshrl.u32 %v3438_v59, 16  ;;  %v819_v33 = vor.u32 %v5721_v46, %v815_v14  ;;  %v823_v29 = vrot.slane %v5722_v19, 1  ;;  %v5728_v57 = vshll.u32 %v3514_v25, 16 }
  0x2d   : > { %v811_v38 = vor.u32 %v5725_v8, %v807_v23  ;;  %v5729_v21 = vshll.u32 %v3517_v13, 16  ;;  %v5731_v19 = vshrl.u32 %v3514_v25, 16  ;;  %v5732_v48 = vshll.u32 %v3532_v43, 16 }
  0x2e   : > { %v803_v39 = vor.u32 %v5730_v60, %v799_v50  ;;  %v3543_v46 = vsel %vm652_vm0, %v819_v33, %v823_v29  ;;  %v839_v8 = vrot.slane %v5728_v57, 1  ;;  %v5733_v18 = vshrl.u32 %v3517_v13, 16 }
  0x2f   : > { %5788 = vst [vmem:[#allocation2_spill] sm:$0xff] %v3543_v46  ;;  %v3548_v22 = vsel %vm652_vm0, %v811_v38, %v815_v14  ;;  %v831_v51 = vrot.slane %v5729_v21, 1  ;;  %v5734_v33 = vshrl.u32 %v3480_v47, 16  ;;  %v3569_v38 = vrot.slane %v5732_v48, 1 }
  0x30   : > { %5789 = vst [vmem:[#allocation3_spill] sm:$0xff] %v3548_v22  ;;  %v3556_v50 = vsel %vm652_vm0, %v803_v39, %v807_v23  ;;  %v843_v14 = vor.u32 %v5731_v19, %v839_v8  ;;  %v899_v19 = vrot.slane %v3269_v5, 1  ;;  %v907_v48 = vrot.slane %v3257_v1, 1 }
  0x31   : > { %5790 = vst [vmem:[#allocation4_spill] sm:$0xff] %v3556_v50  ;;  %v835_v39 = vor.u32 %v5733_v18, %v831_v51  ;;  %v827_v23 = vor.u32 %v5734_v33, %v823_v29  ;;  %v901_v29 = vrot.slane %v3260_v2, 1  ;;  %v909_v18 = vrot.slane %v3276_v10, 1 }
  0x32   : > { %871 = vrot.lane.b32.xlu2 %v3411_v34, %s3175_s9  ;;  %5791 = vst [vmem:[#allocation5_spill] sm:$0xff] %v3569_v38  ;;  %v3577_v57 = vsel %vm652_vm0, %v843_v14, %v3569_v38  ;;  %v903_v14 = vrot.slane %v3263_v3, 1  ;;  %v905_v33 = vrot.slane %v3254_v0, 1  ;;  %v921_v30 = vrot.slane %v3355_v52, 1 }
  0x33   : > { %869 = vrot.lane.b32.xlu1 %v3419_v45, %s3175_s9  ;;  %5792 = vst [vmem:[#allocation6_spill] sm:$0xff] %v3577_v57  ;;  %v3580_v21 = vsel %vm652_vm0, %v835_v39, %v839_v8  ;;  %v3583_v60 = vsel %vm652_vm0, %v827_v23, %v831_v51  ;;  %v898_v8 = vrot.slane %v3266_v4, 1  ;;  %v902_v39 = vsel %vm897_vm1, %v899_v19, %v901_v29 }
  0x34   : > { %867 = vrot.lane.b32.xlu0 %v3430_v56, %s3175_s9  ;;  %5793 = vst [vmem:[#allocation7_spill] sm:$0xff] %v3580_v21  ;;  %v904_v51 = vsel %vm897_vm1, %v901_v29, %v903_v14  ;;  %v3605_v4 = vsel %vm897_vm1, %v907_v48, %v909_v18  ;;  %v3608_v29 = vsel %vm897_vm1, %v905_v33, %v907_v48  ;;  %v917_v9 = vrot.slane %v3346_v49, 1 }
  0x35   : > { %5794 = vst [vmem:[#allocation8_spill] sm:$0xff] %v3583_v60  ;;  %v900_v23 = vsel %vm897_vm1, %v898_v8, %v899_v19  ;;  %v3611_v19 = vsel %vm897_vm1, %v903_v14, %v905_v33  ;;  %v913_v8 = vrot.slane %v3301_v27, 1  ;;  %v925_v11 = vrot.slane %v3382_v15, 1 }
  0x36   : > { %5795 = vst [vmem:[#allocation9_spill] sm:$0xff] %v3605_v4  ;;  %v927_v6 = vrot.slane %v3400_v24, 1  ;;  %v923_v7 = vrot.slane %v3385_v16, 1  ;;  %v931_v26 = vrot.slane %v3416_v40, 1 }
  0x37   : > { %5796 = vst [vmem:[#allocation10_spill] sm:$0xff] %v3608_v29 }
  0x38   : > { %5797 = vst [vmem:[#allocation11_spill] sm:$0xff] %v3611_v19  ;;  %v3667_v12 = vsel %vm897_vm1, %v921_v30, %v923_v7 }
  0x39   : > { %5807 = vst [vmem:[#allocation21_spill] sm:$0xff] %v3667_v12 }
  0x3a   : > { %877 = vrot.lane.b32.xlu2 %v3460_v36, %s3175_s9 }
  0x3b   : > { %875 = vrot.lane.b32.xlu1 %v3463_v54, %s3175_s9 }
  0x3c   : > { %873 = vrot.lane.b32.xlu0 %v3472_v20, %s3175_s9 }
  0x42   : > { %883 = vrot.lane.b32.xlu2 %v3500_v32, %s3175_s9 }
  0x43   : > { %881 = vrot.lane.b32.xlu1 %v3503_v61, %s3175_s9 }
  0x44   : > { %879 = vrot.lane.b32.xlu0 %v3520_v53, %s3175_s9 }
  0x4a   : > { %889 = vrot.lane.b32.xlu2 %v3543_v46, %s3175_s9 }
  0x4b   : > { %887 = vrot.lane.b32.xlu1 %v3548_v22, %s3175_s9  ;;  %v5844_v22 = vshll.u32 %v3254_v0, 16 }
  0x4c   : > { %885 = vrot.lane.b32.xlu0 %v3556_v50, %s3175_s9 }
  0x4d   : > { %v1107_v46 = vrot.slane %v5844_v22, 5 }
  0x52   : > { %895 = vrot.lane.b32.xlu2 %v3577_v57, %s3175_s9 }
  0x53   : > { %893 = vrot.lane.b32.xlu1 %v3580_v21, %s3175_s9 }
  0x54   : > { %891 = vrot.lane.b32.xlu0 %v3583_v60, %s3175_s9 }
  0x5a   : > { %951 = vrot.lane.b32.xlu2 %v904_v51, %s3176_s14  ;;  %v915_v51 = vrot.slane %v3323_v37, 1 }
  0x5b   : > { %949 = vrot.lane.b32.xlu1 %v902_v39, %s3176_s14  ;;  %v911_v39 = vrot.slane %v3304_v28, 1 }
  0x5c   : > { %947 = vrot.lane.b32.xlu0 %v900_v23, %s3176_s14  ;;  %v3623_v48 = vsel %vm897_vm1, %v913_v8, %v915_v51  ;;  %v919_v23 = vrot.slane %v3337_v44, 1 }
  0x5d   : > { %5798 = vst [vmem:[#allocation12_spill] sm:$0xff] %v3623_v48  ;;  %v3626_v33 = vsel %vm897_vm1, %v911_v39, %v913_v8  ;;  %v3629_v14 = vsel %vm897_vm1, %v909_v18, %v911_v39  ;;  %v3647_v39 = vsel %vm897_vm1, %v915_v51, %v917_v9  ;;  %v3664_v51 = vsel %vm897_vm1, %v923_v7, %v925_v11 }
  0x5e   : > { %5799 = vst [vmem:[#allocation13_spill] sm:$0xff] %v3626_v33  ;;  %v3641_v8 = vsel %vm897_vm1, %v919_v23, %v921_v30  ;;  %v3644_v18 = vsel %vm897_vm1, %v917_v9, %v919_v23  ;;  %v3661_v9 = vsel %vm897_vm1, %v925_v11, %v927_v6 }
  0x5f   : > { %5800 = vst [vmem:[#allocation14_spill] sm:$0xff] %v3629_v14 }
  0x60   : > { %5801 = vst [vmem:[#allocation15_spill] sm:$0xff] %v3641_v8 }
  0x61   : > { %5802 = vst [vmem:[#allocation16_spill] sm:$0xff] %v3644_v18 }
  0x62   : > { %957 = vrot.lane.b32.xlu2 %v3605_v4, %s3176_s14  ;;  %5803 = vst [vmem:[#allocation17_spill] sm:$0xff] %v3647_v39  ;;  %v1008_v4 = vrot.slane %v3304_v28, 4 }
  0x63   : > { %955 = vrot.lane.b32.xlu1 %v3608_v29, %s3176_s14  ;;  %5805 = vst [vmem:[#allocation19_spill] sm:$0xff] %v3661_v9  ;;  %v1006_v29 = vrot.slane %v3276_v10, 4 }
  0x64   : > { %953 = vrot.lane.b32.xlu0 %v3611_v19, %s3176_s14  ;;  %5806 = vst [vmem:[#allocation20_spill] sm:$0xff] %v3664_v51 }
  0x6a   : > { %963 = vrot.lane.b32.xlu2 %v3623_v48, %s3176_s14  ;;  %v998_v48 = vrot.slane %v3260_v2, 4 }
  0x6b   : > { %961 = vrot.lane.b32.xlu1 %v3626_v33, %s3176_s14 }
  0x6c   : > { %959 = vrot.lane.b32.xlu0 %v3629_v14, %s3176_s14  ;;  %v941_v14 = vrot.slane %v3517_v13, 1 }
  0x72   : > { %969 = vrot.lane.b32.xlu2 %v3641_v8, %s3176_s14  ;;  %v935_v8 = vrot.slane %v3469_v58, 1 }
  0x73   : > { %967 = vrot.lane.b32.xlu1 %v3644_v18, %s3176_s14  ;;  %v929_v18 = vrot.slane %v3427_v55, 1 }
  0x74   : > { %965 = vrot.lane.b32.xlu0 %v3647_v39, %s3176_s14  ;;  %v3658_v23 = vpop.permute.xlu2 %857  ;;  %v933_v39 = vrot.slane %v3438_v59, 1 }
  0x75   : > { %5804 = vst [vmem:[#allocation18_spill] sm:$0xff] %v3658_v23  ;;  %v3684_v30 = vsel %vm897_vm1, %v929_v18, %v931_v26 }
  0x76   : > { %v3681_v7 = vsel %vm897_vm1, %v931_v26, %v933_v39  ;;  %5809 = vst [vmem:[#allocation23_spill] sm:$0xff] %v3684_v30 }
  0x77   : > { %5808 = vst [vmem:[#allocation22_spill] sm:$0xff] %v3681_v7 }
  0x7a   : > { %975 = vrot.lane.b32.xlu2 %v3661_v9, %s3176_s14  ;;  %v3687_v9 = vsel %vm897_vm1, %v927_v6, %v929_v18 }
  0x7b   : > { %973 = vrot.lane.b32.xlu1 %v3664_v51, %s3176_s14  ;;  %5810 = vst [vmem:[#allocation24_spill] sm:$0xff] %v3687_v9  ;;  %v939_v51 = vrot.slane %v3480_v47, 1 }
  0x7c   : > { %971 = vrot.lane.b32.xlu0 %v3667_v12, %s3176_s14  ;;  %v3678_v11 = vpop.permute.xlu2 %859  ;;  %v937_v12 = vrot.slane %v3457_v35, 1 }
  0x7e   : > { %v3701_v6 = vsel %vm897_vm1, %v937_v12, %v939_v51  ;;  %v3704_v18 = vsel %vm897_vm1, %v935_v8, %v937_v12 }
  0x7f   : > { %5812 = vst [vmem:[#allocation26_spill] sm:$0xff] %v3701_v6 }
  0x80   : > { %5813 = vst [vmem:[#allocation27_spill] sm:$0xff] %v3704_v18 }
  0x82   : > { %981 = vrot.lane.b32.xlu2 %v3681_v7, %s3176_s14  ;;  %v3707_v7 = vsel %vm897_vm1, %v933_v39, %v935_v8 }
  0x83   : > { %979 = vrot.lane.b32.xlu1 %v3684_v30, %s3176_s14  ;;  %5814 = vst [vmem:[#allocation28_spill] sm:$0xff] %v3707_v7  ;;  %v5756_v30 = vrot.slane %v3532_v43, 1 }
  0x84   : > { %977 = vrot.lane.b32.xlu0 %v3687_v9, %s3176_s14  ;;  %v3698_v26 = vpop.permute.xlu2 %865  ;;  %v943_v9 = vrot.slane %v3514_v25, 1 }
  0x85   : > { %5811 = vst [vmem:[#allocation25_spill] sm:$0xff] %v3698_v26 }
  0x86   : > { %v3727_v39 = vsel %vm897_vm1, %v943_v9, %v5756_v30  ;;  %v1002_v30 = vrot.slane %v3254_v0, 4 }
  0x87   : > { %5817 = vst [vmem:[#allocation31_spill] sm:$0xff] %v3727_v39 }
  0x8a   : > { %987 = vrot.lane.b32.xlu2 %v3701_v6, %s3176_s14  ;;  %v1000_v6 = vrot.slane %v3263_v3, 4 }
  0x8b   : > { %985 = vrot.lane.b32.xlu1 %v3704_v18, %s3176_s14  ;;  %v3730_v18 = vsel %vm897_vm1, %v941_v14, %v943_v9 }
  0x8c   : > { %983 = vrot.lane.b32.xlu0 %v3707_v7, %s3176_s14  ;;  %v3718_v12 = vpop.permute.xlu2 %871  ;;  %5818 = vst [vmem:[#allocation32_spill] sm:$0xff] %v3730_v18  ;;  %v3733_v7 = vsel %vm897_vm1, %v939_v51, %v941_v14  ;;  %v997_v14 = vrot.slane %v3269_v5, 4 }
  0x8d   : > { %5815 = vst [vmem:[#allocation29_spill] sm:$0xff] %v3718_v12  ;;  %v3720_v33 = vpop.permute.xlu1 %853 }
  0x8e   : > { %v3722_v8 = vpop.permute.xlu0 %849  ;;  %5819 = vst [vmem:[#allocation33_spill] sm:$0xff] %v3733_v7 }
  0x8f   : > { %5816 = vst [vmem:[#allocation30_spill] sm:$0xff] %v3722_v8 }
  0x92   : > { %993 = vrot.lane.b32.xlu2 %v3727_v39, %s3176_s14  ;;  %v1001_v39 = vsel %vm648_vm2, %v998_v48, %v1000_v6 }
  0x93   : > { %991 = vrot.lane.b32.xlu1 %v3730_v18, %s3176_s14  ;;  %v1003_v18 = vsel %vm648_vm2, %v1000_v6, %v1002_v30 }
  0x94   : > { %989 = vrot.lane.b32.xlu0 %v3733_v7, %s3176_s14  ;;  %v3744_v9 = vpop.permute.xlu2 %877  ;;  %v999_v7 = vsel %vm648_vm2, %v997_v14, %v998_v48  ;;  %v1009_v48 = vsel %vm648_vm2, %v1006_v29, %v1008_v4  ;;  %v1014_v14 = vrot.slane %v3346_v49, 4 }
  0x95   : > { %5820 = vst [vmem:[#allocation34_spill] sm:$0xff] %v3744_v9  ;;  %v3746_v19 = vpop.permute.xlu1 %855 }
  0x96   : > { %5821 = vst [vmem:[#allocation35_spill] sm:$0xff] %v3746_v19  ;;  %v3749_v51 = vpop.permute.xlu0 %851  ;;  %v1004_v19 = vrot.slane %v3257_v1, 4 }
  0x97   : > { %5822 = vst [vmem:[#allocation36_spill] sm:$0xff] %v3749_v51  ;;  %v1034_v51 = vrot.slane %v3457_v35, 4 }
  0x9a   : > { %1050 = vrot.lane.b32.xlu2 %v1003_v18, %s3177_s15  ;;  %v1007_v18 = vsel %vm648_vm2, %v1004_v19, %v1006_v29 }
  0x9b   : > { %1048 = vrot.lane.b32.xlu1 %v1001_v39, %s3177_s15  ;;  %v1005_v39 = vsel %vm648_vm2, %v1002_v30, %v1004_v19 }
  0x9c   : > { %1046 = vrot.lane.b32.xlu0 %v999_v7, %s3177_s15  ;;  %v3760_v9 = vpop.permute.xlu2 %883  ;;  %v1012_v7 = vrot.slane %v3323_v37, 4 }
  0x9d   : > { %5823 = vst [vmem:[#allocation37_spill] sm:$0xff] %v3760_v9  ;;  %v3762_v23 = vpop.permute.xlu1 %863 }
  0x9e   : > { %5824 = vst [vmem:[#allocation38_spill] sm:$0xff] %v3762_v23  ;;  %v3764_v6 = vpop.permute.xlu0 %861  ;;  %v1010_v23 = vrot.slane %v3301_v27, 4  ;;  %v1015_v29 = vsel %vm648_vm2, %v1012_v7, %v1014_v14 }
  0x9f   : > { %5825 = vst [vmem:[#allocation39_spill] sm:$0xff] %v3764_v6 }
  0xa0   : > { %v1013_v19 = vsel %vm648_vm2, %v1010_v23, %v1012_v7  ;;  %v1011_v30 = vsel %vm648_vm2, %v1008_v4, %v1010_v23 }
  0xa2   : > { %1056 = vrot.lane.b32.xlu2 %v1009_v48, %s3177_s15  ;;  %v1018_v48 = vrot.slane %v3355_v52, 4 }
  0xa3   : > { %1054 = vrot.lane.b32.xlu1 %v1007_v18, %s3177_s15  ;;  %v1020_v18 = vrot.slane %v3385_v16, 4 }
  0xa4   : > { %1052 = vrot.lane.b32.xlu0 %v1005_v39, %s3177_s15  ;;  %v3775_v9 = vpop.permute.xlu2 %889  ;;  %v1016_v39 = vrot.slane %v3337_v44, 4 }
  0xa5   : > { %5826 = vst [vmem:[#allocation40_spill] sm:$0xff] %v3775_v9  ;;  %v3777_v6 = vpop.permute.xlu1 %869  ;;  %v1021_v4 = vsel %vm648_vm2, %v1018_v48, %v1020_v18 }
  0xa6   : > { %5827 = vst [vmem:[#allocation41_spill] sm:$0xff] %v3777_v6  ;;  %v3779_v38 = vpop.permute.xlu0 %867  ;;  %v1019_v23 = vsel %vm648_vm2, %v1016_v39, %v1018_v48 }
  0xa7   : > { %5828 = vst [vmem:[#allocation42_spill] sm:$0xff] %v3779_v38 }
  0xaa   : > { %1062 = vrot.lane.b32.xlu2 %v1015_v29, %s3177_s15  ;;  %v1017_v29 = vsel %vm648_vm2, %v1014_v14, %v1016_v39 }
  0xab   : > { %1060 = vrot.lane.b32.xlu1 %v1013_v19, %s3177_s15  ;;  %v1024_v19 = vrot.slane %v3400_v24, 4 }
  0xac   : > { %1058 = vrot.lane.b32.xlu0 %v1011_v30, %s3177_s15  ;;  %v3790_v6 = vpop.permute.xlu2 %895  ;;  %v1026_v30 = vrot.slane %v3427_v55, 4 }
  0xad   : > { %v3792_v38 = vpop.permute.xlu1 %875 }
  0xae   : > { %5829 = vst [vmem:[#allocation43_spill] sm:$0xff] %v3792_v38  ;;  %v3794_v7 = vpop.permute.xlu0 %873  ;;  %v1022_v38 = vrot.slane %v3382_v15, 4  ;;  %v1027_v14 = vsel %vm648_vm2, %v1024_v19, %v1026_v30 }
  0xaf   : > { %5830 = vst [vmem:[#allocation44_spill] sm:$0xff] %v3794_v7 }
  0xb0   : > { %v1025_v39 = vsel %vm648_vm2, %v1022_v38, %v1024_v19  ;;  %v1028_v19 = vrot.slane %v3416_v40, 4 }
  0xb2   : > { %1068 = vrot.lane.b32.xlu2 %v1021_v4, %s3177_s15  ;;  %v1023_v4 = vsel %vm648_vm2, %v1020_v18, %v1022_v38 }
  0xb3   : > { %1066 = vrot.lane.b32.xlu1 %v1019_v23, %s3177_s15  ;;  %v1030_v23 = vrot.slane %v3438_v59, 4 }
  0xb4   : > { %1064 = vrot.lane.b32.xlu0 %v1017_v29, %s3177_s15  ;;  %v3805_v9 = vpop.permute.xlu2 %951  ;;  %v1032_v29 = vrot.slane %v3469_v58, 4 }
  0xb5   : > { %v3807_v7 = vpop.permute.xlu1 %881  ;;  %v1031_v60 = vsel %vm648_vm2, %v1028_v19, %v1030_v23 }
  0xb6   : > { %5831 = vst [vmem:[#allocation45_spill] sm:$0xff] %v3807_v7  ;;  %v3809_v48 = vpop.permute.xlu0 %879  ;;  %v1033_v7 = vsel %vm648_vm2, %v1030_v23, %v1032_v29 }
  0xb7   : > { %5832 = vst [vmem:[#allocation46_spill] sm:$0xff] %v3809_v48 }
  0xba   : > { %1074 = vrot.lane.b32.xlu2 %v1027_v14, %s3177_s15  ;;  %v508_v14 = vld [vmem:[%s3511_s13 + $0x8] sm:$0xf] }
  0xbb   : > { %1072 = vrot.lane.b32.xlu1 %v1025_v39, %s3177_s15  ;;  %v509_v39 = vld [vmem:[%s3820_s19] sm:$0xf]  ;;  %v637_v21 = vunpack.c.l.b16 %v508_v14  ;;  %v1035_v14 = vsel %vm648_vm2, %v1032_v29, %v1034_v51  ;;  %v5841_v29 = vshrl.u32 %v3263_v3, 16 }
  0xbc   : > { %1070 = vrot.lane.b32.xlu0 %v1023_v4, %s3177_s15  ;;  %v3826_v48 = vpop.permute.xlu2 %957  ;;  %v1029_v4 = vsel %vm648_vm2, %v1026_v30, %v1028_v19  ;;  %v643_v57 = vunpack.c.l.b16 %v509_v39 }
  0xbd   : > { %v3828_v38 = vpop.permute.xlu1 %887  ;;  %v639_v23 = vpack.c.b16 %v637_v21, %v637_v21  ;;  %v1042_v21 = vrot.slane %v3532_v43, 4 }
  0xbe   : > { %5833 = vst [vmem:[#allocation47_spill] sm:$0xff] %v3828_v38  ;;  %v3830_v18 = vpop.permute.xlu0 %885  ;;  %v1036_v38 = vrot.slane %v3480_v47, 4  ;;  %v646_v30 = vpack.c.b16 %v643_v57, %v643_v57 }
  0xbf   : > { %5834 = vst [vmem:[#allocation48_spill] sm:$0xff] %v3830_v18  ;;  %v1038_v18 = vrot.slane %v3517_v13, 4 }
  0xc0   : > { %v3853_v39 = vsel %vm648_vm2, %v639_v23, %v646_v30  ;;  %v1102_v23 = vrot.slane %v5841_v29, 4  ;;  %v5842_v30 = vshll.u32 %v3263_v3, 16  ;;  %v5847_v3 = vshrl.u32 %v3269_v5, 16 }
  0xc1   : > { %v1044_v57 = vrot.slane %v3853_v39, 4 }
  0xc2   : > { %1080 = vrot.lane.b32.xlu2 %v1033_v7, %s3177_s15  ;;  %v1039_v7 = vsel %vm648_vm2, %v1036_v38, %v1038_v18 }
  0xc3   : > { %1078 = vrot.lane.b32.xlu1 %v1031_v60, %s3177_s15  ;;  %v1037_v60 = vsel %vm648_vm2, %v1034_v51, %v1036_v38 }
  0xc4   : > { %1076 = vrot.lane.b32.xlu0 %v1029_v4, %s3177_s15  ;;  %v3843_v8 = vpop.permute.xlu2 %963  ;;  %v1040_v4 = vrot.slane %v3514_v25, 4 }
  0xc5   : > { %5835 = vst [vmem:[#allocation49_spill] sm:$0xff] %v3843_v8  ;;  %v3845_v12 = vpop.permute.xlu1 %893 }
  0xc6   : > { %5836 = vst [vmem:[#allocation50_spill] sm:$0xff] %v3845_v12  ;;  %v3847_v19 = vpop.permute.xlu0 %891  ;;  %v1043_v8 = vsel %vm648_vm2, %v1040_v4, %v1042_v21  ;;  %v1041_v29 = vsel %vm648_vm2, %v1038_v18, %v1040_v4  ;;  %v5852_v4 = vshrl.u32 %v3276_v10, 16 }
  0xc7   : > { %5837 = vst [vmem:[#allocation51_spill] sm:$0xff] %v3847_v19  ;;  %v5845_v19 = vshrl.u32 %v3260_v2, 16 }
  0xc9   : > { %v1098_v12 = vrot.slane %v5845_v19, 4 }
  0xca   : > { %1086 = vrot.lane.b32.xlu2 %v1039_v7, %s3177_s15  ;;  %v1103_v7 = vrot.slane %v5842_v30, 5  ;;  %v1095_v30 = vrot.slane %v5847_v3, 4 }
  0xcb   : > { %1084 = vrot.lane.b32.xlu1 %v1037_v60, %s3177_s15  ;;  %v5843_v60 = vshrl.u32 %v3254_v0, 16 }
  0xcc   : > { %1082 = vrot.lane.b32.xlu0 %v1035_v14, %s3177_s15  ;;  %v3861_v50 = vpop.permute.xlu2 %969  ;;  %v1104_v0 = vor.u32 %v1103_v7, %v1102_v23  ;;  %v5855_v23 = vshll.u32 %v3304_v28, 16 }
  0xcd   : > { %5838 = vst [vmem:[#allocation52_spill] sm:$0xff] %v3861_v50  ;;  %v3863_v38 = vpop.permute.xlu1 %949  ;;  %v1106_v14 = vrot.slane %v5843_v60, 4  ;;  %v5846_v50 = vshll.u32 %v3260_v2, 16  ;;  %v5848_v60 = vshll.u32 %v3269_v5, 16 }
  0xce   : > { %5839 = vst [vmem:[#allocation53_spill] sm:$0xff] %v3863_v38  ;;  %v3865_v51 = vpop.permute.xlu0 %947  ;;  %v1119_v7 = vrot.slane %v5855_v23, 5 }
  0xcf   : > { %5840 = vst [vmem:[#allocation54_spill] sm:$0xff] %v3865_v51  ;;  %v1099_v38 = vrot.slane %v5846_v50, 5  ;;  %v1045_v51 = vsel %vm648_vm2, %v1042_v21, %v1044_v57  ;;  %v1096_v26 = vrot.slane %v5848_v60, 5  ;;  %v1108_v22 = vor.u32 %v1107_v46, %v1106_v14 }
  0xd0   : > { %v5853_v46 = vshll.u32 %v3276_v10, 16 }
  0xd1   : > { %v1100_v2 = vor.u32 %v1099_v38, %v1098_v12  ;;  %v1097_v18 = vor.u32 %v1096_v26, %v1095_v30  ;;  %v1109_v5 = vsel %vm1094_vm3, %v1104_v0, %v1108_v22  ;;  %v5854_v38 = vshrl.u32 %v3304_v28, 16 }
  0xd2   : > { %1092 = vrot.lane.b32.xlu2 %v1045_v51, %s3177_s15  ;;  %v1115_v12 = vrot.slane %v5853_v46, 5  ;;  %v5856_v26 = vshrl.u32 %v3257_v1, 16 }
  0xd3   : > { %1090 = vrot.lane.b32.xlu1 %v1043_v8, %s3177_s15  ;;  %v1105_v57 = vsel %vm1094_vm3, %v1100_v2, %v1104_v0  ;;  %v1114_v8 = vrot.slane %v5852_v4, 4  ;;  %v1118_v51 = vrot.slane %v5854_v38, 4  ;;  %v1101_v30 = vsel %vm1094_vm3, %v1097_v18, %v1100_v2 }
  0xd4   : > { %1088 = vrot.lane.b32.xlu0 %v1041_v29, %s3177_s15  ;;  %v3889_v50 = vpop.permute.xlu2 %975  ;;  %v1110_v14 = vrot.slane %v5856_v26, 4  ;;  %v5857_v29 = vshll.u32 %v3257_v1, 16  ;;  %v5861_v1 = vshrl.u32 %v3323_v37, 16  ;;  %v5862_v2 = vshll.u32 %v3323_v37, 16 }
  0xd5   : > { %5849 = vst [vmem:[#allocation55_spill] sm:$0xff] %v3889_v50  ;;  %v3891_v19 = vpop.permute.xlu1 %955  ;;  %v1116_v10 = vor.u32 %v1115_v12, %v1114_v8  ;;  %v1120_v60 = vor.u32 %v1119_v7, %v1118_v51  ;;  %v5864_v26 = vshll.u32 %v3346_v49, 16  ;;  %v5865_v12 = vshrl.u32 %v3301_v27, 16  ;;  %v4124_v50 = vld [vmem:[%s3251_s8 + $0x40] sm:$0xff] }
  0xd6   : > { %5850 = vst [vmem:[#allocation56_spill] sm:$0xff] %v3891_v19  ;;  %v3893_v21 = vpop.permute.xlu0 %953  ;;  %v1111_v3 = vrot.slane %v5857_v29, 5  ;;  %v1126_v23 = vrot.slane %v5861_v1, 4  ;;  %v1127_v18 = vrot.slane %v5862_v2, 5  ;;  %v5866_v7 = vshll.u32 %v3301_v27, 16 }
  0xd7   : > { %5851 = vst [vmem:[#allocation57_spill] sm:$0xff] %v3893_v21  ;;  %v1131_v8 = vrot.slane %v5864_v26, 5  ;;  %v1122_v51 = vrot.slane %v5865_v12, 4  ;;  %v1121_v29 = vsel %vm1094_vm3, %v1116_v10, %v1120_v60 }
  0xd8   : > { %v1112_v0 = vor.u32 %v1111_v3, %v1110_v14  ;;  %v1123_v14 = vrot.slane %v5866_v7, 5  ;;  %v1128_v1 = vor.u32 %v1127_v18, %v1126_v23  ;;  %v5872_v18 = vshrl.u32 %v3385_v16, 16 }
  0xda   : > { %1204 = vrot.lane.b32.xlu2 %v1109_v5, %s3178_s20  ;;  %v5863_v5 = vshrl.u32 %v3346_v49, 16  ;;  %v1117_v3 = vsel %vm1094_vm3, %v1112_v0, %v1116_v10 }
  0xdb   : > { %1202 = vrot.lane.b32.xlu1 %v1105_v57, %s3178_s20 }
  0xdc   : > { %1200 = vrot.lane.b32.xlu0 %v1101_v30, %s3178_s20  ;;  %v3913_v4 = vpop.permute.xlu2 %981  ;;  %v1130_v57 = vrot.slane %v5863_v5, 4  ;;  %v1113_v30 = vsel %vm1094_vm3, %v1108_v22, %v1112_v0  ;;  %v1124_v5 = vor.u32 %v1123_v14, %v1122_v51  ;;  %v5870_v22 = vshrl.u32 %v3355_v52, 16 }
  0xdd   : > { %5858 = vst [vmem:[#allocation58_spill] sm:$0xff] %v3913_v4  ;;  %v3915_v46 = vpop.permute.xlu1 %961  ;;  %v5874_v14 = vshrl.u32 %v3337_v44, 16 }
  0xde   : > { %5859 = vst [vmem:[#allocation59_spill] sm:$0xff] %v3915_v46  ;;  %v3917_v38 = vpop.permute.xlu0 %959  ;;  %v1132_v2 = vor.u32 %v1131_v8, %v1130_v57  ;;  %v1129_v10 = vsel %vm1094_vm3, %v1124_v5, %v1128_v1  ;;  %v1138_v0 = vrot.slane %v5870_v22, 4  ;;  %v1142_v57 = vrot.slane %v5872_v18, 4 }
  0xdf   : > { %5860 = vst [vmem:[#allocation60_spill] sm:$0xff] %v3917_v38  ;;  %v5873_v8 = vshll.u32 %v3385_v16, 16 }
  0xe0   : > { %v1133_v7 = vsel %vm1094_vm3, %v1128_v1, %v1132_v2  ;;  %v1125_v1 = vsel %vm1094_vm3, %v1120_v60, %v1124_v5  ;;  %v5879_v60 = vshll.u32 %v3400_v24, 16 }
  0xe1   : > { %v1143_v51 = vrot.slane %v5873_v8, 5 }
  0xe2   : > { %1210 = vrot.lane.b32.xlu2 %v1121_v29, %s3178_s20  ;;  %v5871_v29 = vshll.u32 %v3355_v52, 16  ;;  %v1151_v5 = vrot.slane %v5879_v60, 5 }
  0xe3   : > { %1208 = vrot.lane.b32.xlu1 %v1117_v3, %s3178_s20  ;;  %v1134_v3 = vrot.slane %v5874_v14, 4  ;;  %v5878_v14 = vshrl.u32 %v3400_v24, 16 }
  0xe4   : > { %1206 = vrot.lane.b32.xlu0 %v1113_v30, %s3178_s20  ;;  %v3937_v26 = vpop.permute.xlu2 %987  ;;  %v1139_v23 = vrot.slane %v5871_v29, 5  ;;  %v5875_v30 = vshll.u32 %v3337_v44, 16  ;;  %v1144_v29 = vor.u32 %v1143_v51, %v1142_v57  ;;  %v5883_v57 = vshll.u32 %v3382_v15, 16 }
  0xe5   : > { %5867 = vst [vmem:[#allocation61_spill] sm:$0xff] %v3937_v26  ;;  %v3939_v12 = vpop.permute.xlu1 %967 }
  0xe6   : > { %5868 = vst [vmem:[#allocation62_spill] sm:$0xff] %v3939_v12  ;;  %v3941_v27 = vpop.permute.xlu0 %965  ;;  %v1140_v22 = vor.u32 %v1139_v23, %v1138_v0  ;;  %v1147_v51 = vrot.slane %v5883_v57, 5 }
  0xe7   : > { %5869 = vst [vmem:[#allocation63_spill] sm:$0xff] %v3941_v27  ;;  %v1135_v27 = vrot.slane %v5875_v30, 5  ;;  %v1150_v30 = vrot.slane %v5878_v14, 4 }
  0xe9   : > { %v1136_v18 = vor.u32 %v1135_v27, %v1134_v3  ;;  %v5882_v27 = vshrl.u32 %v3382_v15, 16  ;;  %v1145_v3 = vsel %vm1094_vm3, %v1140_v22, %v1144_v29  ;;  %v1152_v60 = vor.u32 %v1151_v5, %v1150_v30 }
  0xea   : > { %1216 = vrot.lane.b32.xlu2 %v1133_v7, %s3178_s20  ;;  %v5880_v7 = vshrl.u32 %v3427_v55, 16  ;;  %v5888_v5 = vshrl.u32 %v3469_v58, 16 }
  0xeb   : > { %1214 = vrot.lane.b32.xlu1 %v1129_v10, %s3178_s20  ;;  %v1146_v23 = vrot.slane %v5882_v27, 4  ;;  %v1137_v14 = vsel %vm1094_vm3, %v1132_v2, %v1136_v18  ;;  %v5886_v2 = vshrl.u32 %v3438_v59, 16 }
  0xec   : > { %1212 = vrot.lane.b32.xlu0 %v1125_v1, %s3178_s20  ;;  %v3961_v12 = vpop.permute.xlu2 %993  ;;  %v1154_v10 = vrot.slane %v5880_v7, 4  ;;  %v5881_v1 = vshll.u32 %v3427_v55, 16 }
  0xed   : > { %v3963_v8 = vpop.permute.xlu1 %973 }
  0xee   : > { %5876 = vst [vmem:[#allocation64_spill] sm:$0xff] %v3963_v8  ;;  %v3965_v26 = vpop.permute.xlu0 %971  ;;  %v1155_v0 = vrot.slane %v5881_v1, 5  ;;  %v1148_v8 = vor.u32 %v1147_v51, %v1146_v23  ;;  %v5890_v51 = vshrl.u32 %v3416_v40, 16 }
  0xef   : > { %5877 = vst [vmem:[#allocation65_spill] sm:$0xff] %v3965_v26  ;;  %v1141_v26 = vsel %vm1094_vm3, %v1136_v18, %v1140_v22  ;;  %v1162_v18 = vrot.slane %v5886_v2, 4 }
  0xf0   : > { %v1156_v7 = vor.u32 %v1155_v0, %v1154_v10  ;;  %v1153_v22 = vsel %vm1094_vm3, %v1148_v8, %v1152_v60  ;;  %v1166_v10 = vrot.slane %v5888_v5, 4  ;;  %v5889_v0 = vshll.u32 %v3469_v58, 16 }
  0xf2   : > { %1222 = vrot.lane.b32.xlu2 %v1145_v3, %s3178_s20  ;;  %v1157_v38 = vsel %vm1094_vm3, %v1152_v60, %v1156_v7  ;;  %v1167_v23 = vrot.slane %v5889_v0, 5  ;;  %v1158_v3 = vrot.slane %v5890_v51, 4  ;;  %v1149_v60 = vsel %vm1094_vm3, %v1144_v29, %v1148_v8 }
  0xf3   : > { %1220 = vrot.lane.b32.xlu1 %v1141_v26, %s3178_s20  ;;  %v5887_v26 = vshll.u32 %v3438_v59, 16  ;;  %v5894_v51 = vshrl.u32 %v3480_v47, 16  ;;  %v5895_v29 = vshll.u32 %v3480_v47, 16 }
  0xf4   : > { %1218 = vrot.lane.b32.xlu0 %v1137_v14, %s3178_s20  ;;  %v3985_v1 = vpop.permute.xlu2 %1050  ;;  %v5891_v14 = vshll.u32 %v3416_v40, 16 }
  0xf5   : > { %v3987_v27 = vpop.permute.xlu1 %979  ;;  %v1163_v30 = vrot.slane %v5887_v26, 5  ;;  %v1168_v26 = vor.u32 %v1167_v23, %v1166_v10  ;;  %v1175_v8 = vrot.slane %v5895_v29, 5  ;;  %v5899_v10 = vshll.u32 %v3457_v35, 16 }
  0xf6   : > { %5884 = vst [vmem:[#allocation66_spill] sm:$0xff] %v3987_v27  ;;  %v3989_v57 = vpop.permute.xlu0 %977 }
  0xf7   : > { %5885 = vst [vmem:[#allocation67_spill] sm:$0xff] %v3989_v57  ;;  %v1159_v57 = vrot.slane %v5891_v14, 5  ;;  %v1164_v2 = vor.u32 %v1163_v30, %v1162_v18  ;;  %v1174_v14 = vrot.slane %v5894_v51, 4  ;;  %v1171_v23 = vrot.slane %v5899_v10, 5 }
  0xf8   : > { %v5773_v10 = vshll.u32 %v3853_v39, 16 }
  0xf9   : > { %v1160_v5 = vor.u32 %v1159_v57, %v1158_v3  ;;  %v5898_v57 = vshrl.u32 %v3457_v35, 16  ;;  %v1169_v3 = vsel %vm1094_vm3, %v1164_v2, %v1168_v26  ;;  %v1176_v29 = vor.u32 %v1175_v8, %v1174_v14 }
  0xfa   : > { %1228 = vrot.lane.b32.xlu2 %v1157_v38, %s3178_s20  ;;  %v5896_v38 = vshrl.u32 %v3517_v13, 16  ;;  %v5900_v8 = vshll.u32 %v3532_v43, 16 }
  0xfb   : > { %1226 = vrot.lane.b32.xlu1 %v1153_v22, %s3178_s20  ;;  %v1170_v30 = vrot.slane %v5898_v57, 4  ;;  %v1161_v51 = vsel %vm1094_vm3, %v1156_v7, %v1160_v5  ;;  %v5772_v57 = vshrl.u32 %v3853_v39, 16 }
  0xfc   : > { %1224 = vrot.lane.b32.xlu0 %v1149_v60, %s3178_s20  ;;  %v4009_v27 = vpop.permute.xlu2 %1056  ;;  %v1178_v22 = vrot.slane %v5896_v38, 4  ;;  %v5897_v60 = vshll.u32 %v3517_v13, 16 }
  0xfd   : > { %v4011_v0 = vpop.permute.xlu1 %985 }
  0xfe   : > { %5892 = vst [vmem:[#allocation68_spill] sm:$0xff] %v4011_v0  ;;  %v4013_v46 = vpop.permute.xlu0 %983  ;;  %v1179_v18 = vrot.slane %v5897_v60, 5  ;;  %v1172_v0 = vor.u32 %v1171_v23, %v1170_v30  ;;  %v5771_v60 = vshrl.u32 %v3532_v43, 16  ;;  %v1197_v30 = vrot.slane %v5773_v10, 5 }
  0xff   : > { %5893 = vst [vmem:[#allocation69_spill] sm:$0xff] %v4013_v46  ;;  %v1165_v46 = vsel %vm1094_vm3, %v1160_v5, %v1164_v2  ;;  %v5901_v23 = vshrl.u32 %v3514_v25, 16 }
 0x100   : > { %v1180_v38 = vor.u32 %v1179_v18, %v1178_v22  ;;  %v1188_v14 = vrot.slane %v5771_v60, 4  ;;  %v1189_v22 = vrot.slane %v5900_v8, 5  ;;  %v1194_v18 = vrot.slane %v5772_v57, 4 }
 0x102   : > { %1234 = vrot.lane.b32.xlu2 %v1169_v3, %s3178_s20  ;;  %v1181_v5 = vsel %vm1094_vm3, %v1176_v29, %v1180_v38  ;;  %v1182_v3 = vrot.slane %v5901_v23, 4  ;;  %v1190_v8 = vor.u32 %v1189_v22, %v1188_v14  ;;  %v1198_v60 = vor.u32 %v1197_v30, %v1194_v18  ;;  %v4077_v14 = vld [vmem:[%s3251_s8 + $0x20] sm:$0xff]  ;;  %v4089_v30 = vld [vmem:[%s3251_s8 + $0x8] sm:$0xff] }
 0x103   : > { %1232 = vrot.lane.b32.xlu1 %v1165_v46, %s3178_s20  ;;  %v1177_v46 = vsel %vm1094_vm3, %v1172_v0, %v1176_v29  ;;  %v1173_v29 = vsel %vm1094_vm3, %v1168_v26, %v1172_v0  ;;  %v1254_v22 = vrot.slane %v4077_v14, 5 }
 0x104   : > { %1230 = vrot.lane.b32.xlu0 %v1161_v51, %s3178_s20  ;;  %v4036_v4 = vpop.permute.xlu2 %1062  ;;  %v5902_v51 = vshll.u32 %v3514_v25, 16  ;;  %v1199_v26 = vsel %vm1094_vm3, %v1190_v8, %v1198_v60  ;;  %v4081_v60 = vld [vmem:[%s3251_s8 + $0x10] sm:$0xff] }
 0x105   : > { %v4038_v2 = vpop.permute.xlu1 %991  ;;  %v1250_v18 = vrot.slane %v4081_v60, 5 }
 0x106   : > { %v4040_v7 = vpop.permute.xlu0 %989  ;;  %v1183_v21 = vrot.slane %v5902_v51, 5 }
 0x108   : > { %v1184_v57 = vor.u32 %v1183_v21, %v1182_v3  ;;  %v4073_v21 = vld [vmem:[%s3251_s8 + $0x18] sm:$0xff]  ;;  %v1249_v3 = vrot.slane %v4089_v30, 5 }
 0x109   : > { %5904 = vst [vmem:[#allocation71_spill] sm:$0xff] %v4073_v21 }
 0x10a   : > { %1240 = vrot.lane.b32.xlu2 %v1181_v5, %s3178_s20  ;;  %v1191_v0 = vsel %vm1094_vm3, %v1184_v57, %v1190_v8  ;;  %v1185_v5 = vsel %vm1094_vm3, %v1180_v38, %v1184_v57 }
 0x10b   : > { %1238 = vrot.lane.b32.xlu1 %v1177_v46, %s3178_s20  ;;  %v1252_v46 = vrot.slane %v4073_v21, 5 }
 0x10c   : > { %1236 = vrot.lane.b32.xlu0 %v1173_v29, %s3178_s20  ;;  %v4060_v10 = vpop.permute.xlu2 %1068 }
 0x10d   : > { %v4062_v23 = vpop.permute.xlu1 %1048  ;;  %v1255_v29 = vsel %vm1248_vm4, %v1252_v46, %v1254_v22  ;;  %v1253_v8 = vsel %vm1248_vm4, %v1250_v18, %v1252_v46 }
 0x10e   : > { %v4064_v19 = vpop.permute.xlu0 %1046 }
 0x10f   : > { %5903 = vst [vmem:[#allocation70_spill] sm:$0xff] %v4064_v19 }
 0x112   : > { %1246 = vrot.lane.b32.xlu2 %v1199_v26, %s3178_s20  ;;  %v1251_v26 = vsel %vm1248_vm4, %v1249_v3, %v1250_v18 }
 0x113   : > { %1244 = vrot.lane.b32.xlu1 %v1191_v0, %s3178_s20  ;;  %v4101_v0 = vld [vmem:[%s3251_s8 + $0x30] sm:$0xff] }
 0x114   : > { %1242 = vrot.lane.b32.xlu0 %v1185_v5, %s3178_s20  ;;  %v4084_v38 = vpop.permute.xlu2 %1074  ;;  %5908 = vst [vmem:[#allocation75_spill] sm:$0xff] %v4101_v0  ;;  %v1258_v5 = vrot.slane %v4101_v0, 5 }
 0x115   : > { %5905 = vst [vmem:[#allocation72_spill] sm:$0xff] %v4084_v38  ;;  %v4086_v57 = vpop.permute.xlu1 %1054 }
 0x116   : > { %5906 = vst [vmem:[#allocation73_spill] sm:$0xff] %v4086_v57  ;;  %v4092_v51 = vpop.permute.xlu0 %1052  ;;  %v4106_v57 = vld [vmem:[%s3251_s8 + $0x28] sm:$0xff] }
 0x117   : > { %5907 = vst [vmem:[#allocation74_spill] sm:$0xff] %v4092_v51  ;;  %v1260_v51 = vrot.slane %v3304_v28, 5  ;;  %v1256_v46 = vrot.slane %v4106_v57, 5  ;;  %v1264_v28 = vrot.slane %v3323_v37, 5  ;;  %v1270_v37 = vrot.slane %v3355_v52, 5 }
 0x118   : > { %v1278_v52 = vrot.slane %v3427_v55, 5  ;;  %v1280_v55 = vrot.slane %v3416_v40, 5  ;;  %v1288_v40 = vrot.slane %v3480_v47, 5  ;;  %v1296_v47 = vrot.slane %v3853_v39, 5 }
 0x11a   : > { %1302 = vrot.lane.b32.xlu2 %v1255_v29, %s3179_s21  ;;  %v1261_v29 = vsel %vm1248_vm4, %v1258_v5, %v1260_v51 }
 0x11b   : > { %1300 = vrot.lane.b32.xlu1 %v1253_v8, %s3179_s21  ;;  %v1259_v8 = vsel %vm1248_vm4, %v1256_v46, %v1258_v5 }
 0x11c   : > { %1298 = vrot.lane.b32.xlu0 %v1251_v26, %s3179_s21  ;;  %v4109_v38 = vpop.permute.xlu2 %1080  ;;  %v1257_v26 = vsel %vm1248_vm4, %v1254_v22, %v1256_v46 }
 0x11d   : > { %5909 = vst [vmem:[#allocation76_spill] sm:$0xff] %v4109_v38  ;;  %v4111_v18 = vpop.permute.xlu1 %1060  ;;  %v1266_v38 = vrot.slane %v3346_v49, 5  ;;  %v1272_v49 = vrot.slane %v3385_v16, 5  ;;  %v1274_v16 = vrot.slane %v3382_v15, 5  ;;  %v1282_v15 = vrot.slane %v3438_v59, 5 }
 0x11e   : > { %5910 = vst [vmem:[#allocation77_spill] sm:$0xff] %v4111_v18  ;;  %v4113_v3 = vpop.permute.xlu0 %1058  ;;  %v1286_v59 = vrot.slane %v3457_v35, 5  ;;  %v1294_v35 = vrot.slane %v3532_v43, 5 }
 0x11f   : > { %5911 = vst [vmem:[#allocation78_spill] sm:$0xff] %v4113_v3  ;;  %v1262_v3 = vrot.slane %v4124_v50, 5  ;;  %v1267_v22 = vsel %vm1248_vm4, %v1264_v28, %v1266_v38 }
 0x121   : > { %v1265_v46 = vsel %vm1248_vm4, %v1262_v3, %v1264_v28 }
 0x122   : > { %1308 = vrot.lane.b32.xlu2 %v1261_v29, %s3179_s21  ;;  %v1263_v29 = vsel %vm1248_vm4, %v1260_v51, %v1262_v3  ;;  %v1273_v51 = vsel %vm1248_vm4, %v1270_v37, %v1272_v49 }
 0x123   : > { %1306 = vrot.lane.b32.xlu1 %v1259_v8, %s3179_s21  ;;  %v1268_v8 = vrot.slane %v3337_v44, 5  ;;  %v1276_v44 = vrot.slane %v3400_v24, 5  ;;  %v1284_v24 = vrot.slane %v3469_v58, 5  ;;  %v1290_v58 = vrot.slane %v3517_v13, 5 }
 0x124   : > { %1304 = vrot.lane.b32.xlu0 %v1257_v26, %s3179_s21  ;;  %v4127_v18 = vpop.permute.xlu2 %1086  ;;  %v1292_v13 = vrot.slane %v3514_v25, 5 }
 0x125   : > { %5912 = vst [vmem:[#allocation79_spill] sm:$0xff] %v4127_v18  ;;  %v4129_v19 = vpop.permute.xlu1 %1066  ;;  %v1271_v3 = vsel %vm1248_vm4, %v1268_v8, %v1270_v37  ;;  %v1269_v28 = vsel %vm1248_vm4, %v1266_v38, %v1268_v8  ;;  %v1279_v38 = vsel %vm1248_vm4, %v1276_v44, %v1278_v52  ;;  %v1277_v37 = vsel %vm1248_vm4, %v1274_v16, %v1276_v44  ;;  %v4290_v18 = vld [vmem:[%s3251_s8 + $0x88] sm:$0xff] }
 0x126   : > { %5913 = vst [vmem:[#allocation80_spill] sm:$0xff] %v4129_v19  ;;  %v4131_v5 = vpop.permute.xlu0 %1064  ;;  %v1275_v8 = vsel %vm1248_vm4, %v1272_v49, %v1274_v16  ;;  %v1285_v49 = vsel %vm1248_vm4, %v1282_v15, %v1284_v24  ;;  %v1283_v44 = vsel %vm1248_vm4, %v1280_v55, %v1282_v15  ;;  %v1281_v16 = vsel %vm1248_vm4, %v1278_v52, %v1280_v55 }
 0x127   : > { %5914 = vst [vmem:[#allocation81_spill] sm:$0xff] %v4131_v5  ;;  %v1291_v52 = vsel %vm1248_vm4, %v1288_v40, %v1290_v58  ;;  %v1289_v15 = vsel %vm1248_vm4, %v1286_v59, %v1288_v40  ;;  %v1287_v55 = vsel %vm1248_vm4, %v1284_v24, %v1286_v59  ;;  %v1297_v24 = vsel %vm1248_vm4, %v1294_v35, %v1296_v47  ;;  %v4235_v47 = vld [vmem:[%s3251_s8 + $0x38] sm:$0xff] }
 0x128   : > { %v1295_v40 = vsel %vm1248_vm4, %v1292_v13, %v1294_v35  ;;  %v1293_v59 = vsel %vm1248_vm4, %v1290_v58, %v1292_v13  ;;  %5927 = vst [vmem:[#allocation94_spill] sm:$0xff] %v4235_v47 }
 0x129   : > { %5940 = vst [vmem:[#allocation107_spill] sm:$0xff] %v4290_v18 }
 0x12a   : > { %1314 = vrot.lane.b32.xlu2 %v1267_v22, %s3179_s21 }
 0x12b   : > { %1312 = vrot.lane.b32.xlu1 %v1265_v46, %s3179_s21 }
 0x12c   : > { %1310 = vrot.lane.b32.xlu0 %v1263_v29, %s3179_s21  ;;  %v4142_v26 = vpop.permute.xlu2 %1092 }
 0x12d   : > { %v4144_v5 = vpop.permute.xlu1 %1072 }
 0x12e   : > { %5915 = vst [vmem:[#allocation82_spill] sm:$0xff] %v4144_v5  ;;  %v4146_v19 = vpop.permute.xlu0 %1070  ;;  %v4269_v5 = vld [vmem:[%s3251_s8 + $0x70] sm:$0xff] }
 0x12f   : > { %5916 = vst [vmem:[#allocation83_spill] sm:$0xff] %v4146_v19 }
 0x130   : > { %5935 = vst [vmem:[#allocation102_spill] sm:$0xff] %v4269_v5 }
 0x132   : > { %1320 = vrot.lane.b32.xlu2 %v1273_v51, %s3179_s21 }
 0x133   : > { %1318 = vrot.lane.b32.xlu1 %v1271_v3, %s3179_s21 }
 0x134   : > { %1316 = vrot.lane.b32.xlu0 %v1269_v28, %s3179_s21  ;;  %v4157_v22 = vpop.permute.xlu2 %1204 }
 0x135   : > { %v4159_v46 = vpop.permute.xlu1 %1078 }
 0x136   : > { %5917 = vst [vmem:[#allocation84_spill] sm:$0xff] %v4159_v46  ;;  %v4161_v29 = vpop.permute.xlu0 %1076 }
 0x137   : > { %5918 = vst [vmem:[#allocation85_spill] sm:$0xff] %v4161_v29 }
 0x13a   : > { %1326 = vrot.lane.b32.xlu2 %v1279_v38, %s3179_s21 }
 0x13b   : > { %1324 = vrot.lane.b32.xlu1 %v1277_v37, %s3179_s21 }
 0x13c   : > { %1322 = vrot.lane.b32.xlu0 %v1275_v8, %s3179_s21  ;;  %v4172_v51 = vpop.permute.xlu2 %1210 }
 0x13d   : > { %v4174_v3 = vpop.permute.xlu1 %1084 }
 0x13e   : > { %5919 = vst [vmem:[#allocation86_spill] sm:$0xff] %v4174_v3  ;;  %v4176_v28 = vpop.permute.xlu0 %1082  ;;  %v4258_v3 = vld [vmem:[%s3251_s8 + $0x48] sm:$0xff] }
 0x13f   : > { %5920 = vst [vmem:[#allocation87_spill] sm:$0xff] %v4176_v28  ;;  %v4253_v28 = vld [vmem:[%s3251_s8 + $0x50] sm:$0xff] }
 0x140   : > { %5931 = vst [vmem:[#allocation98_spill] sm:$0xff] %v4253_v28 }
 0x141   : > { %5932 = vst [vmem:[#allocation99_spill] sm:$0xff] %v4258_v3 }
 0x142   : > { %1332 = vrot.lane.b32.xlu2 %v1285_v49, %s3179_s21 }
 0x143   : > { %1330 = vrot.lane.b32.xlu1 %v1283_v44, %s3179_s21 }
 0x144   : > { %1328 = vrot.lane.b32.xlu0 %v1281_v16, %s3179_s21  ;;  %v4187_v38 = vpop.permute.xlu2 %1216 }
 0x145   : > { %v4189_v37 = vpop.permute.xlu1 %1090 }
 0x146   : > { %v4191_v8 = vpop.permute.xlu0 %1088 }
 0x14a   : > { %1338 = vrot.lane.b32.xlu2 %v1291_v52, %s3179_s21 }
 0x14b   : > { %1336 = vrot.lane.b32.xlu1 %v1289_v15, %s3179_s21 }
 0x14c   : > { %1334 = vrot.lane.b32.xlu0 %v1287_v55, %s3179_s21  ;;  %v4202_v49 = vpop.permute.xlu2 %1222 }
 0x14d   : > { %v4204_v44 = vpop.permute.xlu1 %1202 }
 0x14e   : > { %v4206_v16 = vpop.permute.xlu0 %1200 }
 0x152   : > { %1344 = vrot.lane.b32.xlu2 %v1297_v24, %s3179_s21 }
 0x153   : > { %1342 = vrot.lane.b32.xlu1 %v1295_v40, %s3179_s21 }
 0x154   : > { %1340 = vrot.lane.b32.xlu0 %v1293_v59, %s3179_s21  ;;  %v4214_v25 = vpop.permute.xlu2 %1228  ;;  %v4248_v59 = vld [vmem:[%s3251_s8 + $0x58] sm:$0xff] }
 0x155   : > { %5921 = vst [vmem:[#allocation88_spill] sm:$0xff] %v4214_v25  ;;  %v4216_v52 = vpop.permute.xlu1 %1208 }
 0x156   : > { %5922 = vst [vmem:[#allocation89_spill] sm:$0xff] %v4216_v52  ;;  %v4218_v15 = vpop.permute.xlu0 %1206 }
 0x157   : > { %5923 = vst [vmem:[#allocation90_spill] sm:$0xff] %v4218_v15 }
 0x15a   : > { %1350 = vrot.lane.b32.xlu2 %v4106_v57, %s3180_s22 }
 0x15b   : > { %1348 = vrot.lane.b32.xlu1 %v4077_v14, %s3180_s22 }
 0x15c   : > { %1346 = vrot.lane.b32.xlu0 %v4073_v21, %s3180_s22  ;;  %v4226_v58 = vpop.permute.xlu2 %1234 }
 0x15d   : > { %5924 = vst [vmem:[#allocation91_spill] sm:$0xff] %v4226_v58  ;;  %v4228_v55 = vpop.permute.xlu1 %1214 }
 0x15e   : > { %5925 = vst [vmem:[#allocation92_spill] sm:$0xff] %v4228_v55  ;;  %v4230_v35 = vpop.permute.xlu0 %1212  ;;  %v3146_v55 = vld [vmem:[%s3251_s8 + $0xb8] sm:$0xff] }
 0x15f   : > { %5926 = vst [vmem:[#allocation93_spill] sm:$0xff] %v4230_v35  ;;  %v4316_v35 = vld [vmem:[%s3251_s8 + $0x98] sm:$0xff] }
 0x160   : > { %5946 = vst [vmem:[#allocation113_spill] sm:$0xff] %v4316_v35 }
 0x162   : > { %1356 = vrot.lane.b32.xlu2 %v4124_v50, %s3180_s22 }
 0x163   : > { %1354 = vrot.lane.b32.xlu1 %v4235_v47, %s3180_s22  ;;  %v4350_v47 = vld [vmem:[%s3820_s19 + $0x4] sm:$0xff] }
 0x164   : > { %1352 = vrot.lane.b32.xlu0 %v4101_v0, %s3180_s22  ;;  %v4241_v13 = vpop.permute.xlu2 %1240 }
 0x165   : > { %5928 = vst [vmem:[#allocation95_spill] sm:$0xff] %v4241_v13  ;;  %v4243_v24 = vpop.permute.xlu1 %1220 }
 0x166   : > { %5929 = vst [vmem:[#allocation96_spill] sm:$0xff] %v4243_v24  ;;  %v4245_v40 = vpop.permute.xlu0 %1218  ;;  %v4279_v24 = vld [vmem:[%s3251_s8 + $0x60] sm:$0xff] }
 0x167   : > { %5930 = vst [vmem:[#allocation97_spill] sm:$0xff] %v4245_v40  ;;  %v4274_v40 = vld [vmem:[%s3251_s8 + $0x68] sm:$0xff] }
 0x168   : > { %5936 = vst [vmem:[#allocation103_spill] sm:$0xff] %v4274_v40 }
 0x169   : > { %5937 = vst [vmem:[#allocation104_spill] sm:$0xff] %v4279_v24 }
 0x16a   : > { %1362 = vrot.lane.b32.xlu2 %v4248_v59, %s3180_s22 }
 0x16b   : > { %1360 = vrot.lane.b32.xlu1 %v4253_v28, %s3180_s22  ;;  %v4311_v28 = vld [vmem:[%s3251_s8 + $0xa0] sm:$0xff] }
 0x16c   : > { %1358 = vrot.lane.b32.xlu0 %v4258_v3, %s3180_s22  ;;  %v4262_v29 = vpop.permute.xlu2 %1246  ;;  %v4295_v3 = vld [vmem:[%s3251_s8 + $0x80] sm:$0xff]  ;;  %5945 = vst [vmem:[#allocation112_spill] sm:$0xff] %v4311_v28 }
 0x16d   : > { %v4264_v46 = vpop.permute.xlu1 %1226  ;;  %5941 = vst [vmem:[#allocation108_spill] sm:$0xff] %v4295_v3 }
 0x16e   : > { %5933 = vst [vmem:[#allocation100_spill] sm:$0xff] %v4264_v46  ;;  %v4266_v19 = vpop.permute.xlu0 %1224 }
 0x16f   : > { %5934 = vst [vmem:[#allocation101_spill] sm:$0xff] %v4266_v19 }
 0x172   : > { %1368 = vrot.lane.b32.xlu2 %v4269_v5, %s3180_s22 }
 0x173   : > { %1366 = vrot.lane.b32.xlu1 %v4274_v40, %s3180_s22  ;;  %v4300_v40 = vld [vmem:[%s3251_s8 + $0x78] sm:$0xff] }
 0x174   : > { %1364 = vrot.lane.b32.xlu0 %v4279_v24, %s3180_s22  ;;  %v4283_v46 = vpop.permute.xlu2 %1302  ;;  %5942 = vst [vmem:[#allocation109_spill] sm:$0xff] %v4300_v40 }
 0x175   : > { %v4285_v19 = vpop.permute.xlu1 %1232 }
 0x176   : > { %5938 = vst [vmem:[#allocation105_spill] sm:$0xff] %v4285_v19  ;;  %v4287_v13 = vpop.permute.xlu0 %1230 }
 0x177   : > { %5939 = vst [vmem:[#allocation106_spill] sm:$0xff] %v4287_v13 }
 0x17a   : > { %1374 = vrot.lane.b32.xlu2 %v4290_v18, %s3180_s22  ;;  %v3149_v18 = vld [vmem:[%s3511_s13] sm:$0xff] }
 0x17b   : > { %1372 = vrot.lane.b32.xlu1 %v4295_v3, %s3180_s22  ;;  %v4321_v3 = vld [vmem:[%s3251_s8 + $0x90] sm:$0xff] }
 0x17c   : > { %1370 = vrot.lane.b32.xlu0 %v4300_v40, %s3180_s22  ;;  %v4304_v19 = vpop.permute.xlu2 %1308  ;;  %5947 = vst [vmem:[#allocation114_spill] sm:$0xff] %v4321_v3 }
 0x17d   : > { %v4306_v13 = vpop.permute.xlu1 %1238 }
 0x17e   : > { %5943 = vst [vmem:[#allocation110_spill] sm:$0xff] %v4306_v13  ;;  %v4308_v24 = vpop.permute.xlu0 %1236 }
 0x17f   : > { %5944 = vst [vmem:[#allocation111_spill] sm:$0xff] %v4308_v24 }
 0x182   : > { %1380 = vrot.lane.b32.xlu2 %v4311_v28, %s3180_s22  ;;  %v4334_v28 = vld [vmem:[%s3251_s8 + $0xb0] sm:$0xff] }
 0x183   : > { %1378 = vrot.lane.b32.xlu1 %v4316_v35, %s3180_s22  ;;  %v4339_v35 = vld [vmem:[%s3251_s8 + $0xa8] sm:$0xff] }
 0x184   : > { %1376 = vrot.lane.b32.xlu0 %v4321_v3, %s3180_s22  ;;  %v4325_v13 = vpop.permute.xlu2 %1314 }
 0x185   : > { %v4327_v24 = vpop.permute.xlu1 %1244 }
 0x186   : > { %v4329_v40 = vpop.permute.xlu0 %1242 }
 0x18a   : > { %1386 = vrot.lane.b32.xlu2 %v3146_v55, %s3180_s22 }
 0x18b   : > { %1384 = vrot.lane.b32.xlu1 %v4334_v28, %s3180_s22 }
 0x18c   : > { %1382 = vrot.lane.b32.xlu0 %v4339_v35, %s3180_s22  ;;  %v4343_v3 = vpop.permute.xlu2 %1320 }
 0x18d   : > { %v4345_v58 = vpop.permute.xlu1 %1300 }
 0x18e   : > { %v4347_v0 = vpop.permute.xlu0 %1298 }
 0x192   : > { %1392 = vrot.lane.b32.xlu2 %v4350_v47, %s3180_s22 }
 0x193   : > { %1390 = vrot.lane.b32.xlu1 %v3853_v39, %s3180_s22 }
 0x194   : > { %1388 = vrot.lane.b32.xlu0 %v3149_v18, %s3180_s22  ;;  %v4358_v15 = vpop.permute.xlu2 %1326  ;;  %s5189_s22 = scalar_lea.vmem %s5693_s6, %s3087_s17 }
 0x195   : > { %v4360_v52 = vpop.permute.xlu1 %1306 }
 0x196   : > { %v4362_v25 = vpop.permute.xlu0 %1304 }
 0x19a   : > { %1415 = vrot.lane.b32.xlu2 %v3330_v41, %s3181_s23 }
 0x19b   : > { %1413 = vrot.lane.b32.xlu1 %v3308_v31, %s3181_s23 }
 0x19c   : > { %1411 = vrot.lane.b32.xlu0 %v3333_v42, %s3181_s23  ;;  %v4370_v21 = vpop.permute.xlu2 %1332 }
 0x19d   : > { %v4372_v5 = vpop.permute.xlu1 %1312 }
 0x19e   : > { %5948 = vst [vmem:[#allocation115_spill] sm:$0xff] %v4372_v5  ;;  %v4374_v18 = vpop.permute.xlu0 %1310  ;;  %v1562_v5 = vsel %vm1514_vm5, %v3146_v55, %v3790_v6 }
 0x1a2   : > { %1421 = vrot.lane.b32.xlu2 %v3373_v62, %s3181_s23  ;;  %v1611_v62 = vsel %vm1563_vm6, %v1562_v5, %v3961_v12 }
 0x1a3   : > { %1419 = vrot.lane.b32.xlu1 %v3376_v63, %s3181_s23  ;;  %v1660_v63 = vsel %vm1612_vm7, %v1611_v62, %v4142_v26 }
 0x1a4   : > { %1417 = vrot.lane.b32.xlu0 %v3388_v17, %s3181_s23  ;;  %v4382_v41 = vpop.permute.xlu2 %1338  ;;  %v1709_v17 = vsel %vm1661_vm8, %v1660_v63, %v4262_v29  ;;  %v5950_v63 = vld [vmem:[#allocation49_spill] sm:$0xff] }
 0x1a5   : > { %v4384_v31 = vpop.permute.xlu1 %1318 }
 0x1a6   : > { %v4386_v42 = vpop.permute.xlu0 %1316 }
 0x1aa   : > { %1427 = vrot.lane.b32.xlu2 %v3411_v34, %s3181_s23 }
 0x1ab   : > { %1425 = vrot.lane.b32.xlu1 %v3419_v45, %s3181_s23  ;;  %v3182_v45 = vmov 0  }
 0x1ac   : > { %1423 = vrot.lane.b32.xlu0 %v3430_v56, %s3181_s23  ;;  %v1345_v6 = vpop.permute.xlu2 %1344  ;;  %3123 = vset.pattern.permute.xlu1 %v3182_v45  ;;  %v1520_v56 = vsel %vm1514_vm5, %v4081_v60, %v3720_v33 }
 0x1ad   : > { %v4402_v12 = vpop.permute.xlu1 %1324  ;;  %v4405_v5 = vsel %vm1710_vm9, %v1709_v17, %v1345_v6  ;;  %3122 = vset.pattern.permute.xlu0 %v3182_v45  ;;  %3124 = vset.pattern.permute.xlu2 %v3182_v45  ;;  %v1569_v26 = vsel %vm1563_vm6, %v1520_v56, %v3805_v9  ;;  %v5951_v17 = vld [vmem:[#allocation50_spill] sm:$0xff] }
 0x1ae   : > { %v4407_v34 = vpop.permute.xlu0 %1322  ;;  %v1618_v29 = vsel %vm1612_vm7, %v1569_v26, %v3985_v1 }
 0x1af   : > { %v1667_v55 = vsel %vm1661_vm8, %v1618_v29, %v4157_v22  ;;  %v5953_v29 = vld [vmem:[#allocation2_spill] sm:$0xff] }
 0x1b0   : > { %v1716_v33 = vsel %vm1710_vm9, %v1667_v55, %v4283_v46 }
 0x1b2   : > { %1433 = vrot.lane.b32.xlu2 %v3460_v36, %s3181_s23 }
 0x1b3   : > { %1431 = vrot.lane.b32.xlu1 %v3463_v54, %s3181_s23  ;;  %v1526_v54 = vsel %vm1514_vm5, %v4106_v57, %v3678_v11 }
 0x1b4   : > { %1429 = vrot.lane.b32.xlu0 %v3472_v20, %s3181_s23  ;;  %v1351_v9 = vpop.permute.xlu2 %1350  ;;  %v1575_v22 = vsel %vm1563_vm6, %v1526_v54, %v3826_v48 }
 0x1b5   : > { %v4429_v60 = vpop.permute.xlu1 %1330  ;;  %v4432_v1 = vsel %vm1759_vm10, %v1716_v33, %v1351_v9  ;;  %v1624_v20 = vsel %vm1612_vm7, %v1575_v22, %v4009_v27 }
 0x1b6   : > { %v4434_v36 = vpop.permute.xlu0 %1328  ;;  %v1673_v46 = vsel %vm1661_vm8, %v1624_v20, %v4172_v51 }
 0x1b7   : > { %v1722_v11 = vsel %vm1710_vm9, %v1673_v46, %v4304_v19  ;;  %v5952_v19 = vld [vmem:[#allocation51_spill] sm:$0xff] }
 0x1b8   : > { %v1558_v6 = vsel %vm1514_vm5, %v4339_v35, %v5952_v19  ;;  %v5960_v19 = vld [vmem:[#allocation52_spill] sm:$0xff] }
 0x1b9   : > { %v1607_v55 = vsel %vm1563_vm6, %v1558_v6, %v4040_v7 }
 0x1ba   : > { %1439 = vrot.lane.b32.xlu2 %v3500_v32, %s3181_s23  ;;  %v5949_v32 = vld [vmem:[#allocation25_spill] sm:$0xff]  ;;  %v1656_v33 = vsel %vm1612_vm7, %v1607_v55, %v4191_v8 }
 0x1bb   : > { %1437 = vrot.lane.b32.xlu1 %v3503_v61, %s3181_s23  ;;  %v1532_v61 = vsel %vm1514_vm5, %v4124_v50, %v5949_v32  ;;  %v5954_v50 = vld [vmem:[#allocation3_spill] sm:$0xff]  ;;  %v5957_v32 = vshll.u32 %v3853_v39, 16 }
 0x1bc   : > { %1435 = vrot.lane.b32.xlu0 %v3520_v53, %s3181_s23  ;;  %v1357_v57 = vpop.permute.xlu2 %1356  ;;  %v1581_v51 = vsel %vm1563_vm6, %v1532_v61, %v5950_v63  ;;  %v1560_v53 = vsel %vm1514_vm5, %v4334_v28, %v5951_v17  ;;  %v3150_v61 = vld [vmem:[%s3251_s8] sm:$0xff]  ;;  %v5959_v17 = vld [vmem:[#allocation36_spill] sm:$0xff] }
 0x1bd   : > { %v4453_v48 = vpop.permute.xlu1 %1336  ;;  %v4456_v27 = vsel %vm1759_vm10, %v1722_v11, %v1357_v57  ;;  %v1630_v56 = vsel %vm1612_vm7, %v1581_v51, %v4036_v4  ;;  %v1609_v26 = vsel %vm1563_vm6, %v1560_v53, %v4038_v2  ;;  %v5955_v4 = vld [vmem:[#allocation4_spill] sm:$0xff]  ;;  %v1399_v2 = vshll.u32 %v4350_v47, 16  ;;  %v5956_v11 = vld [vmem:[#allocation29_spill] sm:$0xff]  ;;  %v5958_v63 = vld [vmem:[#allocation30_spill] sm:$0xff] }
 0x1be   : > { %v4458_v62 = vpop.permute.xlu0 %1334  ;;  %v1679_v28 = vsel %vm1661_vm8, %v1630_v56, %v4187_v38  ;;  %v1658_v35 = vsel %vm1612_vm7, %v1609_v26, %v4189_v37  ;;  %v1705_v37 = vsel %vm1661_vm8, %v1656_v33, %v4329_v40  ;;  %v1403_v57 = vshrl.u32 %v4350_v47, 16  ;;  %v5961_v56 = vld [vmem:[#allocation53_spill] sm:$0xff]  ;;  %v5962_v26 = vld [vmem:[#allocation54_spill] sm:$0xff] }
 0x1bf   : > { %v1728_v9 = vsel %vm1710_vm9, %v1679_v28, %v4325_v13  ;;  %v1707_v7 = vsel %vm1661_vm8, %v1658_v35, %v4327_v24  ;;  %v1538_v13 = vsel %vm1514_vm5, %v4248_v59, %v5956_v11  ;;  %v1401_v24 = vrot.slane %v1399_v2, 1  ;;  %v5963_v28 = vld [vmem:[#allocation70_spill] sm:$0xff]  ;;  %v5965_v2 = vld [vmem:[#allocation7_spill] sm:$0xff]  ;;  %v5968_v11 = vld [vmem:[#allocation5_spill] sm:$0xff] }
 0x1c0   : > { %v1395_v40 = vrot.slane %v5957_v32, 1  ;;  %v1516_v51 = vsel %vm1514_vm5, %v3150_v61, %v5958_v63  ;;  %v1518_v53 = vsel %vm1514_vm5, %v4089_v30, %v5959_v17  ;;  %v1587_v6 = vsel %vm1563_vm6, %v1538_v13, %v5960_v19 }
 0x1c1   : > { %v1567_v59 = vsel %vm1563_vm6, %v1518_v53, %v5961_v56  ;;  %v5969_v13 = vshrl.u32 %v3532_v43, 16  ;;  %v5972_v53 = vld [vmem:[#allocation102_spill] sm:$0xff]  ;;  %v5973_v56 = vld [vmem:[#allocation35_spill] sm:$0xff] }
 0x1c2   : > { %1445 = vrot.lane.b32.xlu2 %v5953_v29, %s3181_s23  ;;  %v1565_v29 = vsel %vm1563_vm6, %v1516_v51, %v5962_v26  ;;  %v1616_v55 = vsel %vm1612_vm7, %v1567_v59, %v4062_v23  ;;  %v4540_v23 = vrot.slane %v3182_v45, 1  ;;  %v5970_v51 = vld [vmem:[#allocation18_spill] sm:$0xff]  ;;  %v5974_v59 = vld [vmem:[#allocation71_spill] sm:$0xff] }
 0x1c3   : > { %1443 = vrot.lane.b32.xlu1 %v5954_v50, %s3181_s23  ;;  %v1636_v50 = vsel %vm1612_vm7, %v1587_v6, %v4060_v10  ;;  %v1614_v35 = vsel %vm1612_vm7, %v1565_v29, %v5963_v28  ;;  %v1665_v33 = vsel %vm1661_vm8, %v1616_v55, %v4204_v44  ;;  %v5966_v10 = vld [vmem:[#allocation8_spill] sm:$0xff]  ;;  %v1524_v17 = vsel %vm1514_vm5, %v4077_v14, %v5970_v51  ;;  %v5975_v29 = vld [vmem:[#allocation55_spill] sm:$0xff]  ;;  %v5977_v28 = vld [vmem:[#allocation57_spill] sm:$0xff] }
 0x1c4   : > { %1441 = vrot.lane.b32.xlu0 %v5955_v4, %s3181_s23  ;;  %v1363_v54 = vpop.permute.xlu2 %1362  ;;  %v1685_v30 = vsel %vm1661_vm8, %v1636_v50, %v4202_v49  ;;  %v5964_v4 = vld [vmem:[#allocation6_spill] sm:$0xff]  ;;  %v1663_v49 = vsel %vm1661_vm8, %v1614_v35, %v4206_v16  ;;  %v1522_v26 = vsel %vm1514_vm5, %v5974_v59, %v5973_v56  ;;  %v5976_v55 = vld [vmem:[#allocation56_spill] sm:$0xff]  ;;  %v5991_v59 = vld [vmem:[#allocation59_spill] sm:$0xff] }
 0x1c5   : > { %v1343_v38 = vpop.permute.xlu1 %1342  ;;  %v4497_v22 = vsel %vm1759_vm10, %v1728_v9, %v1363_v54  ;;  %v1405_v9 = vor.u32 %v1403_v57, %v1401_v24  ;;  %v1394_v57 = vor.u32 %v5969_v13, %v5968_v11  ;;  %v1712_v45 = vsel %vm1710_vm9, %v1663_v49, %v4347_v0  ;;  %v5971_v0 = vld [vmem:[#allocation34_spill] sm:$0xff]  ;;  %v5978_v14 = vld [vmem:[#allocation72_spill] sm:$0xff] }
 0x1c6   : > { %v4500_v20 = vsel %vm1710_vm9, %v1707_v7, %v1343_v38  ;;  %v1341_v46 = vpop.permute.xlu0 %1340  ;;  %v5967_v7 = vshrl.u32 %v3853_v39, 16  ;;  %v1734_v38 = vsel %vm1710_vm9, %v1685_v30, %v4343_v3  ;;  %v1544_v19 = vsel %vm1514_vm5, %v5972_v53, %v5971_v0  ;;  %v5983_v49 = vld [vmem:[#allocation90_spill] sm:$0xff]  ;;  %v5988_v53 = vld [vmem:[#allocation39_spill] sm:$0xff] }
 0x1c7   : > { %v4503_v8 = vsel %vm1710_vm9, %v1705_v37, %v1341_v46  ;;  %v1714_v37 = vsel %vm1710_vm9, %v1665_v33, %v4345_v58  ;;  %v1410_v58 = vsel %vm652_vm0, %v1405_v9, %v4540_v23  ;;  %v1396_v6 = vsel %vm652_vm0, %v1394_v57, %v1395_v40 }
 0x1c8   : > { %v1397_v54 = vor.u32 %v1395_v40, %v5967_v7  ;;  %v1593_v50 = vsel %vm1563_vm6, %v1544_v19, %v5975_v29  ;;  %v1571_v35 = vsel %vm1563_vm6, %v1522_v26, %v5977_v28  ;;  %v5980_v40 = vld [vmem:[#allocation74_spill] sm:$0xff]  ;;  %v5982_v7 = vld [vmem:[#allocation89_spill] sm:$0xff]  ;;  %v5992_v29 = vld [vmem:[#allocation60_spill] sm:$0xff] }
 0x1c9   : > { %v1642_v30 = vsel %vm1612_vm7, %v1593_v50, %v5978_v14  ;;  %v1620_v33 = vsel %vm1612_vm7, %v1571_v35, %v5980_v40  ;;  %v5994_v28 = vld [vmem:[#allocation77_spill] sm:$0xff]  ;;  %v5998_v40 = vld [vmem:[#allocation91_spill] sm:$0xff] }
 0x1ca   : > { %1451 = vrot.lane.b32.xlu2 %v5964_v4, %s3181_s23  ;;  %v1402_v63 = vsel %vm652_vm0, %v1397_v54, %v1401_v24  ;;  %v1573_v24 = vsel %vm1563_vm6, %v1524_v17, %v5976_v55  ;;  %v5979_v4 = vld [vmem:[#allocation73_spill] sm:$0xff]  ;;  %v5987_v17 = vld [vmem:[#allocation94_spill] sm:$0xff]  ;;  %v5993_v55 = vld [vmem:[#allocation76_spill] sm:$0xff] }
 0x1cb   : > { %1449 = vrot.lane.b32.xlu1 %v5965_v2, %s3181_s23  ;;  %v1622_v2 = vsel %vm1612_vm7, %v1573_v24, %v5979_v4  ;;  %v5995_v14 = vld [vmem:[#allocation9_spill] sm:$0xff]  ;;  %v5997_v4 = vld [vmem:[#allocation78_spill] sm:$0xff] }
 0x1cc   : > { %1447 = vrot.lane.b32.xlu0 %v5966_v10, %s3181_s23  ;;  %v1369_v44 = vpop.permute.xlu2 %1368  ;;  %v5981_v10 = vld [vmem:[#allocation88_spill] sm:$0xff]  ;;  %v1671_v54 = vsel %vm1661_vm8, %v1622_v2, %v5982_v7  ;;  %v6000_v7 = vld [vmem:[#allocation11_spill] sm:$0xff] }
 0x1cd   : > { %v1349_v46 = vpop.permute.xlu1 %1348  ;;  %v4556_v32 = vsel %vm1759_vm10, %v1734_v38, %v1369_v44  ;;  %v1691_v9 = vsel %vm1661_vm8, %v1642_v30, %v5981_v10  ;;  %v1669_v38 = vsel %vm1661_vm8, %v1620_v33, %v5983_v49  ;;  %v1720_v44 = vsel %vm1710_vm9, %v1671_v54, %v4360_v52  ;;  %v5986_v52 = vld [vmem:[#allocation38_spill] sm:$0xff]  ;;  %v5999_v10 = vld [vmem:[#allocation92_spill] sm:$0xff]  ;;  %v6001_v54 = vld [vmem:[#allocation93_spill] sm:$0xff] }
 0x1ce   : > { %v4559_v16 = vsel %vm1759_vm10, %v1714_v37, %v1349_v46  ;;  %v1347_v61 = vpop.permute.xlu0 %1346  ;;  %v1740_v37 = vsel %vm1710_vm9, %v1691_v9, %v4358_v15  ;;  %v1718_v13 = vsel %vm1710_vm9, %v1669_v38, %v4362_v25  ;;  %v5985_v15 = vld [vmem:[#allocation107_spill] sm:$0xff]  ;;  %v1530_v0 = vsel %vm1514_vm5, %v5987_v17, %v5986_v52  ;;  %v5996_v30 = vld [vmem:[#allocation10_spill] sm:$0xff]  ;;  %v6003_v52 = vld [vmem:[#allocation40_spill] sm:$0xff] }
 0x1cf   : > { %v4562_v3 = vsel %vm1759_vm10, %v1712_v45, %v1347_v61  ;;  %v5989_v25 = vld [vmem:[#allocation75_spill] sm:$0xff]  ;;  %v1579_v26 = vsel %vm1563_vm6, %v1530_v0, %v5991_v59  ;;  %v6005_v0 = vld [vmem:[#allocation41_spill] sm:$0xff] }
 0x1d0   : > { %v1528_v19 = vsel %vm1514_vm5, %v5989_v25, %v5988_v53  ;;  %v1628_v35 = vsel %vm1612_vm7, %v1579_v26, %v5994_v28  ;;  %v6006_v53 = vld [vmem:[#allocation98_spill] sm:$0xff] }
 0x1d1   : > { %v1577_v50 = vsel %vm1563_vm6, %v1528_v19, %v5992_v29  ;;  %v1677_v9 = vsel %vm1661_vm8, %v1628_v35, %v5999_v10  ;;  %v1536_v25 = vsel %vm1514_vm5, %v6006_v53, %v6005_v0  ;;  %v6007_v19 = vld [vmem:[#allocation42_spill] sm:$0xff]  ;;  %v6013_v35 = vld [vmem:[#allocation80_spill] sm:$0xff]  ;;  %v6021_v0 = vld [vmem:[#allocation43_spill] sm:$0xff] }
 0x1d2   : > { %1457 = vrot.lane.b32.xlu2 %v1410_v58, %s3181_s23  ;;  %v1626_v2 = vsel %vm1612_vm7, %v1577_v50, %v5997_v4  ;;  %v6010_v26 = vld [vmem:[#allocation62_spill] sm:$0xff]  ;;  %v6011_v50 = vld [vmem:[#allocation63_spill] sm:$0xff]  ;;  %v6015_v4 = vld [vmem:[#allocation13_spill] sm:$0xff] }
 0x1d3   : > { %1455 = vrot.lane.b32.xlu1 %v1402_v63, %s3181_s23  ;;  %v5984_v63 = vld [vmem:[#allocation37_spill] sm:$0xff]  ;;  %v1675_v49 = vsel %vm1661_vm8, %v1626_v2, %v6001_v54  ;;  %v1585_v29 = vsel %vm1563_vm6, %v1536_v25, %v6010_v26  ;;  %v6019_v54 = vld [vmem:[#allocation14_spill] sm:$0xff]  ;;  %v6024_v25 = vld [vmem:[#allocation104_spill] sm:$0xff] }
 0x1d4   : > { %1453 = vrot.lane.b32.xlu0 %v1396_v6, %s3181_s23  ;;  %v1375_v46 = vpop.permute.xlu2 %1374  ;;  %v1550_v51 = vsel %vm1514_vm5, %v5985_v15, %v5984_v63  ;;  %v5990_v6 = vld [vmem:[#allocation58_spill] sm:$0xff]  ;;  %v6016_v2 = vld [vmem:[#allocation81_spill] sm:$0xff]  ;;  %s2889_s23 = sshll.u32 %s6072_s24, 1 }
 0x1d5   : > { %v1355_v11 = vpop.permute.xlu1 %1354  ;;  %v4605_v57 = vsel %vm1759_vm10, %v1740_v37, %v1375_v46  ;;  %v1599_v56 = vsel %vm1563_vm6, %v1550_v51, %v5990_v6  ;;  %v6002_v37 = vld [vmem:[#allocation115_spill] sm:$0xff]  ;;  %s456_s30 = scalar_lea.vmem %s5694_s7, %s2889_s23 }
 0x1d6   : > { %v4608_v45 = vsel %vm1759_vm10, %v1720_v44, %v1355_v11  ;;  %v1353_v61 = vpop.permute.xlu0 %1352  ;;  %v1648_v24 = vsel %vm1612_vm7, %v1599_v56, %v5993_v55  ;;  %v1726_v44 = vsel %vm1710_vm9, %v1677_v9, %v6002_v37  ;;  %v6009_v56 = vld [vmem:[#allocation61_spill] sm:$0xff]  ;;  %v6018_v9 = vld [vmem:[#allocation96_spill] sm:$0xff] }
 0x1d7   : > { %v4611_v58 = vsel %vm1759_vm10, %v1718_v13, %v1353_v61  ;;  %v1697_v33 = vsel %vm1661_vm8, %v1648_v24, %v5998_v40  ;;  %v1724_v13 = vsel %vm1710_vm9, %v1675_v49, %v4374_v18  ;;  %v6008_v18 = vld [vmem:[#allocation99_spill] sm:$0xff]  ;;  %v6020_v49 = vld [vmem:[#allocation97_spill] sm:$0xff] }
 0x1d8   : > { %v1746_v38 = vsel %vm1710_vm9, %v1697_v33, %v4370_v21  ;;  %v6004_v21 = vld [vmem:[#allocation112_spill] sm:$0xff]  ;;  %v1534_v6 = vsel %vm1514_vm5, %v6008_v18, %v6007_v19  ;;  %v6012_v24 = vld [vmem:[#allocation79_spill] sm:$0xff] }
 0x1d9   : > { %v1556_v17 = vsel %vm1514_vm5, %v6004_v21, %v6003_v52  ;;  %v1583_v55 = vsel %vm1563_vm6, %v1534_v6, %v6011_v50  ;;  %v6017_v33 = vld [vmem:[#allocation95_spill] sm:$0xff]  ;;  %v6025_v18 = vld [vmem:[#allocation64_spill] sm:$0xff]  ;;  %v6026_v6 = vld [vmem:[#allocation65_spill] sm:$0xff] }
 0x1da   : > { %1470 = vrot.lane.b32.xlu2 %v5995_v14, %s3183_s28  ;;  %v1605_v59 = vsel %vm1563_vm6, %v1556_v17, %v6009_v56  ;;  %v1634_v14 = vsel %vm1612_vm7, %v1585_v29, %v6013_v35  ;;  %v1632_v40 = vsel %vm1612_vm7, %v1583_v55, %v6016_v2  ;;  %v6028_v29 = vld [vmem:[#allocation15_spill] sm:$0xff]  ;;  %v6029_v50 = vld [vmem:[#allocation16_spill] sm:$0xff] }
 0x1db   : > { %1468 = vrot.lane.b32.xlu1 %v5996_v30, %s3183_s28  ;;  %v1654_v28 = vsel %vm1612_vm7, %v1605_v59, %v6012_v24  ;;  %v6014_v30 = vld [vmem:[#allocation12_spill] sm:$0xff]  ;;  %v6027_v59 = vld [vmem:[#allocation82_spill] sm:$0xff]  ;;  %v6030_v55 = vld [vmem:[#allocation83_spill] sm:$0xff] }
 0x1dc   : > { %1466 = vrot.lane.b32.xlu0 %v6000_v7, %s3183_s28  ;;  %v1381_v46 = vpop.permute.xlu2 %1380  ;;  %v1703_v10 = vsel %vm1661_vm8, %v1654_v28, %v6017_v33  ;;  %v1683_v7 = vsel %vm1661_vm8, %v1634_v14, %v6018_v9  ;;  %v6031_v28 = vld [vmem:[#allocation100_spill] sm:$0xff]  ;;  %v6032_v14 = vld [vmem:[#allocation17_spill] sm:$0xff] }
 0x1dd   : > { %v1361_v11 = vpop.permute.xlu1 %1360  ;;  %v4653_v61 = vsel %vm1759_vm10, %v1746_v38, %v1381_v46  ;;  %v1681_v38 = vsel %vm1661_vm8, %v1632_v40, %v6020_v49  ;;  %v1752_v37 = vsel %vm1710_vm9, %v1703_v10, %v4382_v41  ;;  %v6022_v41 = vld [vmem:[#allocation103_spill] sm:$0xff] }
 0x1de   : > { %v4656_v63 = vsel %vm1759_vm10, %v1726_v44, %v1361_v11  ;;  %v1359_v15 = vpop.permute.xlu0 %1358  ;;  %v1732_v44 = vsel %vm1710_vm9, %v1683_v7, %v4384_v31  ;;  %v1542_v53 = vsel %vm1514_vm5, %v6022_v41, %v6021_v0  ;;  %v6023_v31 = vld [vmem:[#allocation44_spill] sm:$0xff] }
 0x1df   : > { %v4659_v51 = vsel %vm1759_vm10, %v1724_v13, %v1359_v15  ;;  %v1730_v13 = vsel %vm1710_vm9, %v1681_v38, %v4386_v42  ;;  %v1540_v19 = vsel %vm1514_vm5, %v6024_v25, %v6023_v31  ;;  %v1591_v42 = vsel %vm1563_vm6, %v1542_v53, %v6025_v18  ;;  %v6034_v38 = vld [vmem:[#allocation45_spill] sm:$0xff]  ;;  %v6040_v0 = vld [vmem:[#allocation84_spill] sm:$0xff]  ;;  %v6041_v53 = vld [vmem:[#allocation19_spill] sm:$0xff] }
 0x1e0   : > { %v1589_v56 = vsel %vm1563_vm6, %v1540_v19, %v6026_v6  ;;  %v1640_v26 = vsel %vm1612_vm7, %v1591_v42, %v6027_v59  ;;  %v6042_v31 = vld [vmem:[#allocation20_spill] sm:$0xff]  ;;  %v6043_v25 = vld [vmem:[#allocation85_spill] sm:$0xff] }
 0x1e1   : > { %v1638_v24 = vsel %vm1612_vm7, %v1589_v56, %v6030_v55  ;;  %v1689_v35 = vsel %vm1661_vm8, %v1640_v26, %v6031_v28  ;;  %v6044_v18 = vld [vmem:[#allocation105_spill] sm:$0xff]  ;;  %v6046_v56 = vld [vmem:[#allocation106_spill] sm:$0xff] }
 0x1e2   : > { %1476 = vrot.lane.b32.xlu2 %v6014_v30, %s3183_s28  ;;  %v6033_v30 = vld [vmem:[#allocation101_spill] sm:$0xff]  ;;  %v1738_v2 = vsel %vm1710_vm9, %v1689_v35, %v4402_v12 }
 0x1e3   : > { %1474 = vrot.lane.b32.xlu1 %v6015_v4, %s3183_s28  ;;  %v1687_v4 = vsel %vm1661_vm8, %v1638_v24, %v6033_v30  ;;  %v6045_v6 = vld [vmem:[#allocation21_spill] sm:$0xff] }
 0x1e4   : > { %1472 = vrot.lane.b32.xlu0 %v6019_v54, %s3183_s28  ;;  %v1387_v46 = vpop.permute.xlu2 %1386  ;;  %v1736_v10 = vsel %vm1710_vm9, %v1687_v4, %v4407_v34  ;;  %v6038_v34 = vld [vmem:[#allocation66_spill] sm:$0xff]  ;;  %v6048_v30 = vld [vmem:[#allocation113_spill] sm:$0xff] }
 0x1e5   : > { %v1367_v11 = vpop.permute.xlu1 %1366  ;;  %v4701_v15 = vsel %vm1759_vm10, %v1752_v37, %v1387_v46  ;;  %v6035_v37 = vld [vmem:[#allocation108_spill] sm:$0xff]  ;;  %v6037_v46 = vld [vmem:[#allocation109_spill] sm:$0xff] }
 0x1e6   : > { %v4704_v52 = vsel %vm1759_vm10, %v1732_v44, %v1367_v11  ;;  %v1365_v21 = vpop.permute.xlu0 %1364  ;;  %v1548_v12 = vsel %vm1514_vm5, %v6035_v37, %v6034_v38  ;;  %v6036_v44 = vld [vmem:[#allocation46_spill] sm:$0xff] }
 0x1e7   : > { %v4707_v17 = vsel %vm1759_vm10, %v1730_v13, %v1365_v21  ;;  %v1546_v11 = vsel %vm1514_vm5, %v6037_v46, %v6036_v44  ;;  %v1597_v13 = vsel %vm1563_vm6, %v1548_v12, %v6038_v34  ;;  %v6053_v38 = vld [vmem:[#allocation86_spill] sm:$0xff]  ;;  %v6055_v44 = vld [vmem:[#allocation23_spill] sm:$0xff] }
 0x1e8   : > { %v1646_v41 = vsel %vm1612_vm7, %v1597_v13, %v6040_v0  ;;  %v6054_v12 = vld [vmem:[#allocation22_spill] sm:$0xff]  ;;  %v6056_v46 = vld [vmem:[#allocation87_spill] sm:$0xff] }
 0x1e9   : > { %v1695_v42 = vsel %vm1661_vm8, %v1646_v41, %v6044_v18  ;;  %v6057_v34 = vld [vmem:[#allocation110_spill] sm:$0xff] }
 0x1ea   : > { %1482 = vrot.lane.b32.xlu2 %v6028_v29, %s3183_s28  ;;  %v1744_v26 = vsel %vm1710_vm9, %v1695_v42, %v4429_v60 }
 0x1eb   : > { %1480 = vrot.lane.b32.xlu1 %v6029_v50, %s3183_s28 }
 0x1ec   : > { %1478 = vrot.lane.b32.xlu0 %v6032_v14, %s3183_s28  ;;  %v1393_v40 = vpop.permute.xlu2 %1392  ;;  %v6047_v14 = vld [vmem:[#allocation47_spill] sm:$0xff] }
 0x1ed   : > { %v1373_v33 = vpop.permute.xlu1 %1372  ;;  %v4739_v9 = vsel %vm1759_vm10, %v4405_v5, %v1393_v40  ;;  %v6039_v5 = vld [vmem:[#allocation67_spill] sm:$0xff]  ;;  %v1554_v4 = vsel %vm1514_vm5, %v6048_v30, %v6047_v14  ;;  %v6050_v40 = vld [vmem:[#allocation114_spill] sm:$0xff]  ;;  %v6064_v14 = vld [vmem:[#allocation32_spill] sm:$0xff] }
 0x1ee   : > { %v4742_v7 = vsel %vm1759_vm10, %v1738_v2, %v1373_v33  ;;  %v1371_v54 = vpop.permute.xlu0 %1370  ;;  %v1595_v21 = vsel %vm1563_vm6, %v1546_v11, %v6039_v5  ;;  %v6049_v2 = vld [vmem:[#allocation48_spill] sm:$0xff]  ;;  %v6065_v30 = vld [vmem:[#allocation33_spill] sm:$0xff] }
 0x1ef   : > { %v4745_v49 = vsel %vm1759_vm10, %v1736_v10, %v1371_v54  ;;  %v1644_v19 = vsel %vm1612_vm7, %v1595_v21, %v6043_v25  ;;  %v1552_v60 = vsel %vm1514_vm5, %v6050_v40, %v6049_v2  ;;  %v6051_v33 = vld [vmem:[#allocation68_spill] sm:$0xff]  ;;  %v6052_v54 = vld [vmem:[#allocation69_spill] sm:$0xff]  ;;  %v6059_v21 = vld [vmem:[#allocation111_spill] sm:$0xff]  ;;  %v1460_v2 = vrot.slane %v3853_v39, 1 }
 0x1f0   : > { %v1693_v59 = vsel %vm1661_vm8, %v1644_v19, %v6046_v56  ;;  %v1603_v10 = vsel %vm1563_vm6, %v1554_v4, %v6051_v33  ;;  %v6058_v5 = vld [vmem:[#allocation24_spill] sm:$0xff]  ;;  %v6060_v56 = vld [vmem:[#allocation26_spill] sm:$0xff]  ;;  %v1462_v4 = vrot.slane %v4350_v47, 1 }
 0x1f1   : > { %v1742_v55 = vsel %vm1710_vm9, %v1693_v59, %v4434_v36  ;;  %v1601_v36 = vsel %vm1563_vm6, %v1552_v60, %v6052_v54  ;;  %v1652_v37 = vsel %vm1612_vm7, %v1603_v10, %v6053_v38  ;;  %v6062_v59 = vld [vmem:[#allocation28_spill] sm:$0xff]  ;;  %v6066_v54 = vrot.slane %v3532_v43, 1 }
 0x1f2   : > { %1488 = vrot.lane.b32.xlu2 %v6041_v53, %s3183_s28  ;;  %v1650_v11 = vsel %vm1612_vm7, %v1601_v36, %v6056_v46  ;;  %v1701_v13 = vsel %vm1661_vm8, %v1652_v37, %v6057_v34  ;;  %v1465_v33 = vsel %vm897_vm1, %v1462_v4, %v4540_v23  ;;  %v1463_v10 = vsel %vm897_vm1, %v1460_v2, %v1462_v4  ;;  %v1914_v37 = vld [vmem:[%s5688_s1 + $0x20] sm:$0xf] }
 0x1f3   : > { %1486 = vrot.lane.b32.xlu1 %v6042_v31, %s3183_s28  ;;  %v1699_v0 = vsel %vm1661_vm8, %v1650_v11, %v6059_v21  ;;  %v1750_v41 = vsel %vm1710_vm9, %v1701_v13, %v4453_v48  ;;  %v6061_v48 = vld [vmem:[#allocation27_spill] sm:$0xff]  ;;  %v1461_v47 = vsel %vm897_vm1, %v6066_v54, %v1460_v2  ;;  %v3069_v21 = vld [vmem:[%s5688_s1 + $0x18] sm:$0xff] }
 0x1f4   : > { %1484 = vrot.lane.b32.xlu0 %v6045_v6, %s3183_s28  ;;  %v4773_v29 = vpop.permute.xlu2 %1415  ;;  %v1748_v25 = vsel %vm1710_vm9, %v1699_v0, %v4458_v62  ;;  %v2178_v0 = vld [vmem:[%s5687_s0 + $0x18] sm:$0xff] }
 0x1f5   : > { %v1379_v50 = vpop.permute.xlu1 %1378 }
 0x1f6   : > { %v4778_v24 = vsel %vm1759_vm10, %v1744_v26, %v1379_v50  ;;  %v1377_v28 = vpop.permute.xlu0 %1376 }
 0x1f7   : > { %v4781_v35 = vsel %vm1759_vm10, %v1742_v55, %v1377_v28  ;;  %v6063_v28 = vld [vmem:[#allocation31_spill] sm:$0xff] }
 0x1fa   : > { %1494 = vrot.lane.b32.xlu2 %v6054_v12, %s3183_s28  ;;  %v2176_v12 = vld [vmem:[%s5687_s0 + $0x8] sm:$0xff] }
 0x1fb   : > { %1492 = vrot.lane.b32.xlu1 %v6055_v44, %s3183_s28  ;;  %v1936_v44 = vunpack.c.l.b16 %v1914_v37 }
 0x1fc   : > { %1490 = vrot.lane.b32.xlu0 %v6058_v5, %s3183_s28  ;;  %v1422_v53 = vpop.permute.xlu2 %1421 }
 0x1fd   : > { %v1385_v31 = vpop.permute.xlu1 %1384  ;;  %v4813_v19 = vsel %vm1808_vm11, %v4456_v27, %v1422_v53  ;;  %v1941_v46 = vpack.c.b16 %v1936_v44, %v1936_v44  ;;  %v3068_v53 = vld [vmem:[%s5688_s1 + $0x10] sm:$0xff]  ;;  %v2191_v44 = vld [vmem:[%s5687_s0 + $0x80] sm:$0xff] }
 0x1fe   : > { %v4816_v18 = vsel %vm1759_vm10, %v1750_v41, %v1385_v31  ;;  %v1383_v42 = vpop.permute.xlu0 %1382  ;;  %v2179_v41 = vld [vmem:[%s5687_s0 + $0x20] sm:$0xff] }
 0x1ff   : > { %v4819_v6 = vsel %vm1759_vm10, %v1748_v25, %v1383_v42 }
 0x202   : > { %1500 = vrot.lane.b32.xlu2 %v6060_v56, %s3183_s28 }
 0x203   : > { %1498 = vrot.lane.b32.xlu1 %v6061_v48, %s3183_s28 }
 0x204   : > { %1496 = vrot.lane.b32.xlu0 %v6062_v59, %s3183_s28  ;;  %v4827_v62 = vpop.permute.xlu2 %1427 }
 0x205   : > { %v1391_v27 = vpop.permute.xlu1 %1390 }
 0x206   : > { %v4831_v26 = vsel %vm1759_vm10, %v4500_v20, %v1391_v27  ;;  %v1389_v50 = vpop.permute.xlu0 %1388  ;;  %v3067_v27 = vld [vmem:[%s5688_s1 + $0x8] sm:$0xff] }
 0x207   : > { %v4835_v55 = vsel %vm1759_vm10, %v4503_v8, %v1389_v50  ;;  %v2183_v50 = vld [vmem:[%s5687_s0 + $0x40] sm:$0xff] }
 0x20a   : > { %1506 = vrot.lane.b32.xlu2 %v6063_v28, %s3183_s28 }
 0x20b   : > { %1504 = vrot.lane.b32.xlu1 %v6064_v14, %s3183_s28 }
 0x20c   : > { %1502 = vrot.lane.b32.xlu0 %v6065_v30, %s3183_s28  ;;  %v1434_v20 = vpop.permute.xlu2 %1433 }
 0x20d   : > { %v4845_v40 = vpop.permute.xlu1 %1413  ;;  %v4849_v8 = vsel %vm1808_vm11, %v4556_v32, %v1434_v20 }
 0x20e   : > { %v4851_v60 = vpop.permute.xlu0 %1411 }
 0x212   : > { %1512 = vrot.lane.b32.xlu2 %v1465_v33, %s3183_s28  ;;  %v2184_v33 = vld [vmem:[%s5687_s0 + $0x48] sm:$0xff] }
 0x213   : > { %1510 = vrot.lane.b32.xlu1 %v1463_v10, %s3183_s28 }
 0x214   : > { %1508 = vrot.lane.b32.xlu0 %v1461_v47, %s3183_s28  ;;  %v1440_v39 = vpop.permute.xlu2 %1439 }
 0x215   : > { %v1420_v32 = vpop.permute.xlu1 %1419  ;;  %v4864_v36 = vsel %vm1808_vm11, %v4605_v57, %v1440_v39  ;;  %v2177_v57 = vld [vmem:[%s5687_s0 + $0x10] sm:$0xff]  ;;  %v2187_v39 = vld [vmem:[%s5687_s0 + $0x60] sm:$0xff] }
 0x216   : > { %v4868_v23 = vsel %vm1808_vm11, %v4608_v45, %v1420_v32  ;;  %v1418_v38 = vpop.permute.xlu0 %1417  ;;  %v2175_v45 = vld [vmem:[%s5687_s0] sm:$0xff]  ;;  %v2188_v32 = vld [vmem:[%s5687_s0 + $0x68] sm:$0xff] }
 0x217   : > { %v4872_v43 = vsel %vm1808_vm11, %v4611_v58, %v1418_v38  ;;  %v1996_v58 = vsel %vm648_vm2, %v1941_v46, 0  ;;  %v2189_v38 = vld [vmem:[%s5687_s0 + $0x70] sm:$0xff] }
 0x218   : > { %2001 = vmatpush.bf16.msra.mxu0 %v1996_v58  ;;  %3070 = vmatpush.bf16.msra.mxu1 %v1996_v58 }
 0x219   : > { %3071 = vmatpush.bf16.msra.mxu2 %v1996_v58  ;;  %3072 = vmatpush.bf16.msra.mxu3 %v1996_v58 }
 0x21a   : > { %2235 = vperm.xlu2 %3124, %v2177_v57   ;;  %v2190_v57 = vld [vmem:[%s5687_s0 + $0x78] sm:$0xff] }
 0x21b   : > { %2230 = vperm.xlu1 %3123, %v2176_v12  }
 0x21c   : > { %2225 = vperm.xlu0 %3122, %v2175_v45   ;;  %v1446_v11 = vpop.permute.xlu2 %1445  ;;  %2002 = vmatpush.bf16.msra.mxu0 %v3069_v21  ;;  %v2192_v45 = vld [vmem:[%s5687_s0 + $0x88] sm:$0xff] }
 0x21d   : > { %v4887_v34 = vpop.permute.xlu1 %1425  ;;  %v4891_v13 = vsel %vm1808_vm11, %v4653_v61, %v1446_v11  ;;  %v2180_v61 = vld [vmem:[%s5687_s0 + $0x28] sm:$0xff]  ;;  %3073 = vmatpush.bf16.msra.mxu1 %v3069_v21  ;;  %3074 = vmatpush.bf16.msra.mxu2 %v3069_v21  ;;  %v2193_v11 = vld [vmem:[%s5687_s0 + $0x90] sm:$0xff] }
 0x21e   : > { %v4893_v5 = vpop.permute.xlu0 %1423  ;;  %3075 = vmatpush.bf16.msra.mxu3 %v3069_v21  ;;  %v2194_v21 = vld [vmem:[%s5687_s0 + $0x98] sm:$0xff] }
 0x220   : > { %2003 = vmatpush.bf16.msra.mxu0 %v3068_v53 }
 0x221   : > { %3076 = vmatpush.bf16.msra.mxu1 %v3068_v53  ;;  %3077 = vmatpush.bf16.msra.mxu2 %v3068_v53 }
 0x222   : > { %2245 = vperm.xlu2 %3124, %v2179_v41   ;;  %3078 = vmatpush.bf16.msra.mxu3 %v3068_v53  ;;  %v2197_v53 = vld [vmem:[%s5687_s0 + $0xb0] sm:$0xff] }
 0x223   : > { %2240 = vperm.xlu1 %3123, %v2178_v0   ;;  %v2195_v0 = vld [vmem:[%s5687_s0 + $0xa0] sm:$0xff] }
 0x224   : > { %2250 = vperm.xlu0 %3122, %v2180_v61   ;;  %v1452_v31 = vpop.permute.xlu2 %1451  ;;  %2004 = vmatpush.bf16.msra.mxu0 %v3067_v27  ;;  %v2196_v61 = vld [vmem:[%s5687_s0 + $0xa8] sm:$0xff] }
 0x225   : > { %v1432_v25 = vpop.permute.xlu1 %1431  ;;  %v4912_v42 = vsel %vm1808_vm11, %v4701_v15, %v1452_v31  ;;  %v2181_v15 = vld [vmem:[%s5687_s0 + $0x30] sm:$0xff]  ;;  %3079 = vmatpush.bf16.msra.mxu1 %v3067_v27  ;;  %3080 = vmatpush.bf16.msra.mxu2 %v3067_v27 }
 0x226   : > { %v4916_v56 = vsel %vm1808_vm11, %v4704_v52, %v1432_v25  ;;  %v1430_v48 = vpop.permute.xlu0 %1429  ;;  %v2182_v52 = vld [vmem:[%s5687_s0 + $0x38] sm:$0xff]  ;;  %3081 = vmatpush.bf16.msra.mxu3 %v3067_v27  ;;  %v2201_v27 = vld [vmem:[%s5687_s0 + $0xd0] sm:$0xff] }
 0x227   : > { %v4920_v59 = vsel %vm1808_vm11, %v4707_v17, %v1430_v48  ;;  %v3066_v17 = vld [vmem:[%s5688_s1] sm:$0xff]  ;;  %v2198_v25 = vld [vmem:[%s5687_s0 + $0xb8] sm:$0xff]  ;;  %v2200_v48 = vld [vmem:[%s5687_s0 + $0xc8] sm:$0xff] }
 0x228   : > { %2005 = vmatpush.bf16.msra.mxu0 %v3066_v17 }
 0x229   : > { %3082 = vmatpush.bf16.msra.mxu1 %v3066_v17  ;;  %3083 = vmatpush.bf16.msra.mxu2 %v3066_v17 }
 0x22a   : > { %2260 = vperm.xlu2 %3124, %v2182_v52   ;;  %3084 = vmatpush.bf16.msra.mxu3 %v3066_v17  ;;  %v1812_v52 = vsel %vm1808_vm11, %v4559_v16, %v4845_v40  ;;  %v2203_v16 = vld [vmem:[%s5687_s0 + $0xe0] sm:$0xff] }
 0x22b   : > { %2255 = vperm.xlu1 %3123, %v2181_v15  }
 0x22c   : > { %2265 = vperm.xlu0 %3122, %v2183_v50   ;;  %v1458_v28 = vpop.permute.xlu2 %1457  ;;  %v1822_v50 = vsel %vm1808_vm11, %v4659_v51, %v4893_v5  ;;  %v2204_v51 = vld [vmem:[%s5687_s0 + $0xe8] sm:$0xff] }
 0x22d   : > { %v1438_v14 = vpop.permute.xlu1 %1437  ;;  %v4939_v30 = vsel %vm1808_vm11, %v4739_v9, %v1458_v28  ;;  %v2185_v9 = vld [vmem:[%s5687_s0 + $0x50] sm:$0xff] }
 0x22e   : > { %v4943_v4 = vsel %vm1808_vm11, %v4742_v7, %v1438_v14  ;;  %v1436_v2 = vpop.permute.xlu0 %1435  ;;  %v2186_v7 = vld [vmem:[%s5687_s0 + $0x58] sm:$0xff] }
 0x22f   : > { %v4947_v20 = vsel %vm1808_vm11, %v4745_v49, %v1436_v2  ;;  %v2202_v2 = vld [vmem:[%s5687_s0 + $0xd8] sm:$0xff] }
 0x232   : > { %2275 = vperm.xlu2 %3124, %v2185_v9   ;;  %v2205_v9 = vld [vmem:[%s5687_s0 + $0xf0] sm:$0xff] }
 0x233   : > { %2270 = vperm.xlu1 %3123, %v2184_v33  }
 0x234   : > { %2280 = vperm.xlu0 %3122, %v2186_v7   ;;  %v1471_v40 = vpop.permute.xlu2 %1470  ;;  %v2206_v7 = vld [vmem:[%s5687_s0 + $0xf8] sm:$0xff] }
 0x235   : > { %v1444_v10 = vpop.permute.xlu1 %1443 }
 0x236   : > { %v4960_v49 = vsel %vm1808_vm11, %v4778_v24, %v1444_v10  ;;  %v1442_v54 = vpop.permute.xlu0 %1441  ;;  %v2207_v10 = vld [vmem:[%s5687_s0 + $0x100] sm:$0xff] }
 0x237   : > { %v4964_v47 = vsel %vm1808_vm11, %v4781_v35, %v1442_v54 }
 0x23a   : > { %2290 = vperm.xlu2 %3124, %v2188_v32   ;;  %v1824_v32 = vsel %vm1808_vm11, %v4656_v63, %v4887_v34  ;;  %v2209_v63 = vld [vmem:[%s5687_s0 + $0x110] sm:$0xff] }
 0x23b   : > { %2285 = vperm.xlu1 %3123, %v2187_v39   ;;  %v1814_v39 = vsel %vm1808_vm11, %v4432_v1, %v4773_v29  ;;  %v2208_v1 = vld [vmem:[%s5687_s0 + $0x108] sm:$0xff]  ;;  %v2210_v29 = vld [vmem:[%s5687_s0 + $0x118] sm:$0xff] }
 0x23c   : > { %2295 = vperm.xlu0 %3122, %v2189_v38   ;;  %v5062_v54 = vpop.permute.xlu2 %1476 }
 0x23d   : > { %v1450_v24 = vpop.permute.xlu1 %1449 }
 0x23e   : > { %v4977_v35 = vsel %vm1808_vm11, %v4816_v18, %v1450_v24  ;;  %v1448_v37 = vpop.permute.xlu0 %1447 }
 0x23f   : > { %v4981_v12 = vsel %vm1808_vm11, %v4819_v6, %v1448_v37  ;;  %v1863_v37 = vsel %vm1857_vm13, %v1814_v39, %v1471_v40 }
 0x242   : > { %2305 = vperm.xlu2 %3124, %v2191_v44  }
 0x243   : > { %2300 = vperm.xlu1 %3123, %v2190_v57  }
 0x244   : > { %2310 = vperm.xlu0 %3122, %v2192_v45   ;;  %v1483_v34 = vpop.permute.xlu2 %1482  ;;  %v2211_v45 = vld [vmem:[%s5687_s0 + $0x120] sm:$0xff] }
 0x245   : > { %v1456_v18 = vpop.permute.xlu1 %1455 }
 0x246   : > { %v4994_v6 = vsel %vm1808_vm11, %v4831_v26, %v1456_v18  ;;  %v1454_v46 = vpop.permute.xlu0 %1453  ;;  %v1810_v26 = vsel %vm1808_vm11, %v4562_v3, %v4851_v60  ;;  %v2199_v60 = vld [vmem:[%s5687_s0 + $0xc0] sm:$0xff]  ;;  %v2212_v18 = vld [vmem:[%s5687_s0 + $0x128] sm:$0xff] }
 0x247   : > { %v4998_v58 = vsel %vm1808_vm11, %v4835_v55, %v1454_v46 }
 0x24a   : > { %2320 = vperm.xlu2 %3124, %v2194_v21   ;;  %v1826_v21 = vsel %vm1808_vm11, %v4497_v22, %v4827_v62  ;;  %v2214_v22 = vld [vmem:[%s5687_s0 + $0x138] sm:$0xff]  ;;  %v2215_v62 = vld [vmem:[%s5687_s0 + $0x140] sm:$0xff] }
 0x24b   : > { %2315 = vperm.xlu1 %3123, %v2193_v11   ;;  %v2213_v11 = vld [vmem:[%s5687_s0 + $0x130] sm:$0xff] }
 0x24c   : > { %2325 = vperm.xlu0 %3122, %v2195_v0  }
 0x24d   : > { %v1469_v31 = vpop.permute.xlu1 %1468 }
 0x24e   : > { %v1467_v55 = vpop.permute.xlu0 %1466  ;;  %v1861_v28 = vsel %vm1857_vm13, %v1812_v52, %v1469_v31  ;;  %v2218_v31 = vld [vmem:[%s5687_s0 + $0x158] sm:$0xff] }
 0x24f   : > { %v1859_v41 = vsel %vm1857_vm13, %v1810_v26, %v1467_v55  ;;  %v1489_v26 = vpop.permute.xlu2 %1488 }
 0x250   : > { %3010 = vmatmul.msk.bf16.vlgmr.msra.gmra.mxu0 %vm1946_vm12, %v1859_v41  ;;  %v1875_v41 = vsel %vm1857_vm13, %v1826_v21, %v1483_v34 }
 0x252   : > { %2335 = vperm.xlu2 %3124, %v2197_v53  }
 0x253   : > { %2330 = vperm.xlu1 %3123, %v2196_v61  }
 0x254   : > { %2340 = vperm.xlu0 %3122, %v2198_v25  }
 0x255   : > { %v5032_v15 = vpop.permute.xlu1 %1474 }
 0x256   : > { %v1473_v3 = vpop.permute.xlu0 %1472 }
 0x257   : > { %v1865_v55 = vsel %vm1857_vm13, %v4872_v43, %v1473_v3  ;;  %v2216_v43 = vld [vmem:[%s5687_s0 + $0x148] sm:$0xff]  ;;  %v1495_v25 = vpop.permute.xlu2 %1494  ;;  %v2219_v3 = vld [vmem:[%s5687_s0 + $0x160] sm:$0xff] }
 0x258   : > { %v1887_v52 = vsel %vm1857_vm13, %v4864_v36, %v1495_v25 }
 0x25a   : > { %2350 = vperm.xlu2 %3124, %v2200_v48   ;;  %v1867_v48 = vsel %vm1857_vm13, %v4868_v23, %v5032_v15  ;;  %v2221_v23 = vld [vmem:[%s5687_s0 + $0x170] sm:$0xff]  ;;  %v1869_v15 = vsel %vm1857_vm13, %v4813_v19, %v5062_v54 }
 0x25b   : > { %2345 = vperm.xlu1 %3123, %v2199_v60  }
 0x25c   : > { %2355 = vperm.xlu0 %3122, %v2201_v27  }
 0x25d   : > { %v1481_v5 = vpop.permute.xlu1 %1480 }
 0x25e   : > { %v1479_v17 = vpop.permute.xlu0 %1478  ;;  %v1873_v57 = vsel %vm1857_vm13, %v1824_v32, %v1481_v5 }
 0x25f   : > { %v1871_v14 = vsel %vm1857_vm13, %v1822_v50, %v1479_v17  ;;  %v2220_v17 = vld [vmem:[%s5687_s0 + $0x168] sm:$0xff]  ;;  %v1501_v36 = vpop.permute.xlu2 %1500 }
 0x260   : > { %3011 = vmatmul.msk.bf16.gmra.mxu0 %vm1946_vm12, %v1861_v28  ;;  %3016 = vmatmul.msk.bf16.vlgmr.msra.gmra.mxu1 %vm1946_vm12, %v1871_v14  ;;  %v1893_v40 = vsel %vm1857_vm13, %v4891_v13, %v1501_v36 }
 0x262   : > { %2365 = vperm.xlu2 %3124, %v2203_v16   ;;  %v1881_v16 = vsel %vm1857_vm13, %v4849_v8, %v1489_v26  ;;  %v5184_v8 = vld [vmem:[%s5689_s2] ss:$0 sm:$0xff] }
 0x263   : > { %2360 = vperm.xlu1 %3123, %v2202_v2  }
 0x264   : > { %2370 = vperm.xlu0 %3122, %v2204_v51  }
 0x265   : > { %v5070_v24 = vpop.permute.xlu1 %1486 }
 0x266   : > { %v1485_v33 = vpop.permute.xlu0 %1484  ;;  %v1879_v28 = vsel %vm1857_vm13, %v4916_v56, %v5070_v24 }
 0x267   : > { %v1877_v27 = vsel %vm1857_vm13, %v4920_v59, %v1485_v33  ;;  %v2222_v59 = vld [vmem:[%s5687_s0 + $0x178] sm:$0xff] }
 0x26a   : > { %2380 = vperm.xlu2 %3124, %v2206_v7  }
 0x26b   : > { %2375 = vperm.xlu1 %3123, %v2205_v9  }
 0x26c   : > { %2385 = vperm.xlu0 %3122, %v2207_v10  }
 0x26d   : > { %v1493_v46 = vpop.permute.xlu1 %1492 }
 0x26e   : > { %v1491_v38 = vpop.permute.xlu0 %1490  ;;  %v1885_v53 = vsel %vm1857_vm13, %v4943_v4, %v1493_v46  ;;  %v2217_v4 = vld [vmem:[%s5687_s0 + $0x150] sm:$0xff] }
 0x26f   : > { %v1883_v44 = vsel %vm1857_vm13, %v4947_v20, %v1491_v38 }
 0x270   : > { %3012 = vmatmul.msk.bf16.gmra.mxu0 %vm1946_vm12, %v1863_v37  ;;  %3017 = vmatmul.msk.bf16.gmra.mxu1 %vm1946_vm12, %v1873_v57 }
 0x271   : > { %3022 = vmatmul.msk.bf16.vlgmr.msra.gmra.mxu2 %vm1946_vm12, %v1883_v44 }
 0x272   : > { %2395 = vperm.xlu2 %3124, %v2209_v63  }
 0x273   : > { %2390 = vperm.xlu1 %3123, %v2208_v1  }
 0x274   : > { %2400 = vperm.xlu0 %3122, %v2210_v29  }
 0x276   : > { %v1497_v20 = vpop.permute.xlu0 %1496 }
 0x277   : > { %v1889_v14 = vsel %vm1857_vm13, %v4964_v47, %v1497_v20 }
 0x27a   : > { %2410 = vperm.xlu2 %3124, %v2212_v18  }
 0x27b   : > { %2405 = vperm.xlu1 %3123, %v2211_v45  }
 0x27c   : > { %2415 = vperm.xlu0 %3122, %v2213_v11  }
 0x27e   : > { %v1503_v0 = vpop.permute.xlu0 %1502 }
 0x27f   : > { %v1895_v61 = vsel %vm1857_vm13, %v4981_v12, %v1503_v0  ;;  %v1499_v12 = vpop.permute.xlu1 %1498 }
 0x280   : > { %3013 = vmatmul.msk.bf16.gmra.mxu0 %vm1946_vm12, %v1865_v55  ;;  %3018 = vmatmul.msk.bf16.gmra.mxu1 %vm1946_vm12, %v1875_v41  ;;  %v1891_v56 = vsel %vm1857_vm13, %v4960_v49, %v1499_v12 }
 0x281   : > { %3023 = vmatmul.msk.bf16.gmra.mxu2 %vm1946_vm12, %v1885_v53  ;;  %3028 = vmatmul.msk.bf16.vlgmr.msra.gmra.mxu3 %vm1946_vm12, %v1895_v61 }
 0x282   : > { %2425 = vperm.xlu2 %3124, %v2215_v62  }
 0x283   : > { %2420 = vperm.xlu1 %3123, %v2214_v22  }
 0x284   : > { %2430 = vperm.xlu0 %3122, %v2216_v43  }
 0x286   : > { %v1509_v19 = vpop.permute.xlu0 %1508 }
 0x287   : > { %v1505_v60 = vpop.permute.xlu1 %1504  ;;  %v1901_v47 = vsel %vm1857_vm13, %v4998_v58, %v1509_v19 }
 0x288   : > { %v1897_v50 = vsel %vm1857_vm13, %v4977_v35, %v1505_v60  ;;  %v1507_v35 = vpop.permute.xlu2 %1506 }
 0x289   : > { %v1899_v2 = vsel %vm1857_vm13, %v4912_v42, %v1507_v35 }
 0x28a   : > { %2440 = vperm.xlu2 %3124, %v2218_v31  }
 0x28b   : > { %2435 = vperm.xlu1 %3123, %v2217_v4  }
 0x28c   : > { %2445 = vperm.xlu0 %3122, %v2219_v3  }
 0x28e   : > { %v5203_v7 = vpop.permute.xlu0 %2225 }
 0x28f   : > { %v1511_v42 = vpop.permute.xlu1 %1510 }
 0x290   : > { %3014 = vmatmul.msk.bf16.gmra.mxu0 %vm1946_vm12, %v1867_v48  ;;  %3019 = vmatmul.msk.bf16.gmra.mxu1 %vm1946_vm12, %v1877_v27  ;;  %v1903_v51 = vsel %vm1857_vm13, %v4994_v6, %v1511_v42  ;;  %v1513_v49 = vpop.permute.xlu2 %1512 }
 0x291   : > { %3024 = vmatmul.msk.bf16.gmra.mxu2 %vm1946_vm12, %v1887_v52  ;;  %3029 = vmatmul.msk.bf16.gmra.mxu3 %vm1946_vm12, %v1897_v50  ;;  %v1905_v5 = vsel %vm1857_vm13, %v4939_v30, %v1513_v49 }
 0x292   : > { %2455 = vperm.xlu2 %3124, %v2221_v23  }
 0x293   : > { %2450 = vperm.xlu1 %3123, %v2220_v17  }
 0x294   : > { %2460 = vperm.xlu0 %3122, %v2222_v59  }
 0x296   : > { %v5220_v37 = vpop.permute.xlu0 %2250 }
 0x297   : > { %v5194_v58 = vpop.permute.xlu1 %2230 }
 0x298   : > { %v5201_v33 = vpop.permute.xlu2 %2235 }
 0x29e   : > { %v5240_v20 = vpop.permute.xlu0 %2265 }
 0x29f   : > { %v5210_v54 = vpop.permute.xlu1 %2240 }
 0x2a0   : > { %3015 = vmatmul.msk.bf16.gmra.mxu0 %vm1946_vm12, %v1869_v15  ;;  %3020 = vmatmul.msk.bf16.gmra.mxu1 %vm1946_vm12, %v1879_v28  ;;  %v5212_v38 = vpop.permute.xlu2 %2245 }
 0x2a1   : > { %3025 = vmatmul.msk.bf16.gmra.mxu2 %vm1946_vm12, %v1889_v14  ;;  %3030 = vmatmul.msk.bf16.gmra.mxu3 %vm1946_vm12, %v1899_v2 }
 0x2a6   : > { %v5256_v26 = vpop.permute.xlu0 %2280 }
 0x2a7   : > { %v5226_v57 = vpop.permute.xlu1 %2255 }
 0x2a8   : > { %v5234_v34 = vpop.permute.xlu2 %2260 }
 0x2ae   : > { %v5286_v27 = vpop.permute.xlu0 %2295 }
 0x2af   : > { %v5248_v21 = vpop.permute.xlu1 %2270 }
 0x2b0   : > { %3021 = vmatmul.msk.bf16.gmra.mxu1 %vm1946_vm12, %v1881_v16  ;;  %v5254_v0 = vpop.permute.xlu2 %2275 }
 0x2b1   : > { %3026 = vmatmul.msk.bf16.gmra.mxu2 %vm1946_vm12, %v1891_v56  ;;  %3031 = vmatmul.msk.bf16.gmra.mxu3 %vm1946_vm12, %v1901_v47 }
 0x2b6   : > { %v5314_v2 = vpop.permute.xlu0 %2310 }
 0x2b7   : > { %v5271_v43 = vpop.permute.xlu1 %2285 }
 0x2b8   : > { %v5275_v12 = vpop.permute.xlu2 %2290 }
 0x2bf   : > { %v5294_v52 = vpop.permute.xlu1 %2300 }
 0x2c0   : > { %v5308_v14 = vpop.permute.xlu2 %2305 }
 0x2c1   : > { %3027 = vmatmul.msk.bf16.gmra.mxu2 %vm1946_vm12, %v1893_v40  ;;  %3032 = vmatmul.msk.bf16.gmra.mxu3 %vm1946_vm12, %v1903_v51 }
 0x2cd   : > { %v2007_v13 = vpop.f32.mrf.mxu0 }
 0x2ce   : > { %v5192_v6 = vadd.f32 %v5184_v8, %v2007_v13 }
 0x2d0   : > { %2127 = vst [vmem:[%s5189_s22] sm:$0xff] %v5192_v6 }
 0x2d1   : > { %3033 = vmatmul.msk.bf16.gmra.mxu3 %vm1946_vm12, %v1905_v5  ;;  %v5334_v5 = vpop.permute.xlu1 %2315 }
 0x2d5   : > { %v2009_v9 = vpop.f32.mrf.mxu0 }
 0x2d6   : > { %v5206_v10 = vadd.f32 %v5184_v8, %v2009_v9  ;;  %v2564_v9 = vmul.f32 %v5192_v6, %v5192_v6 }
 0x2d8   : > { %2128 = vst [vmem:[%s5189_s22 + $0x8] sm:$0xff] %v5206_v10  ;;  %v2565_v56 = vmul.f32 %v5206_v10, %v5206_v10 }
 0x2dd   : > { %v2012_v39 = vpop.f32.mrf.mxu0  ;;  %v2037_v32 = vpop.f32.mrf.mxu1 }
 0x2de   : > { %v5215_v30 = vadd.f32 %v5184_v8, %v2012_v39  ;;  %v5218_v24 = vadd.f32 %v5184_v8, %v2037_v32  ;;  %v5344_v32 = vpop.permute.xlu2 %2320 }
 0x2e0   : > { %2129 = vst [vmem:[%s5189_s22 + $0x10] sm:$0xff] %v5215_v30  ;;  %v2566_v39 = vmul.f32 %v5215_v30, %v5215_v30 }
 0x2e1   : > { %2139 = vst [vmem:[%s5189_s22 + $0x60] sm:$0xff] %v5218_v24 }
 0x2e5   : > { %v2014_v44 = vpop.f32.mrf.mxu0  ;;  %v2039_v1 = vpop.f32.mrf.mxu1 }
 0x2e6   : > { %v5229_v63 = vadd.f32 %v5184_v8, %v2014_v44  ;;  %v5232_v29 = vadd.f32 %v5184_v8, %v2039_v1  ;;  %v2464_v44 = vmul.f32 %v5194_v58, %v5206_v10  ;;  %v2613_v1 = vmul.f32 %v2565_v56, %v5194_v58 }
 0x2e7   : > { %v2614_v58 = vmul.f32 %v2566_v39, %v5201_v33 }
 0x2e8   : > { %2130 = vst [vmem:[%s5189_s22 + $0x18] sm:$0xff] %v5229_v63 }
 0x2e9   : > { %2140 = vst [vmem:[%s5189_s22 + $0x68] sm:$0xff] %v5232_v29 }
 0x2ed   : > { %v2017_v45 = vpop.f32.mrf.mxu0  ;;  %v2042_v18 = vpop.f32.mrf.mxu1 }
 0x2ee   : > { %v5243_v46 = vadd.f32 %v5184_v8, %v2017_v45  ;;  %v5246_v11 = vadd.f32 %v5184_v8, %v2042_v18  ;;  %v2567_v45 = vmul.f32 %v5229_v63, %v5229_v63  ;;  %v5355_v18 = vpop.permute.xlu0 %2325 }
 0x2f0   : > { %2131 = vst [vmem:[%s5189_s22 + $0x20] sm:$0xff] %v5243_v46  ;;  %v2568_v10 = vmul.f32 %v5243_v46, %v5243_v46 }
 0x2f1   : > { %2141 = vst [vmem:[%s5189_s22 + $0x70] sm:$0xff] %v5246_v11 }
 0x2f4   : > { %v2067_v55 = vpop.f32.mrf.mxu2 }
 0x2f5   : > { %v5259_v41 = vadd.f32 %v5184_v8, %v2067_v55  ;;  %v2019_v61 = vpop.f32.mrf.mxu0  ;;  %v2044_v53 = vpop.f32.mrf.mxu1  ;;  %v2463_v55 = vmul.f32 %v5203_v7, %v5192_v6 }
 0x2f6   : > { %v5262_v22 = vadd.f32 %v5184_v8, %v2019_v61  ;;  %v5265_v62 = vadd.f32 %v5184_v8, %v2044_v53  ;;  %v2612_v61 = vmul.f32 %v2564_v9, %v5203_v7  ;;  %v2465_v53 = vmul.f32 %v5201_v33, %v5215_v30 }
 0x2f7   : > { %2151 = vst [vmem:[%s5189_s22 + $0xc0] sm:$0xff] %v5259_v41  ;;  %v2466_v33 = vmul.f32 %v5210_v54, %v5229_v63  ;;  %v2616_v63 = vmul.f32 %v2568_v10, %v5212_v38 }
 0x2f8   : > { %2132 = vst [vmem:[%s5189_s22 + $0x28] sm:$0xff] %v5262_v22 }
 0x2f9   : > { %2142 = vst [vmem:[%s5189_s22 + $0x78] sm:$0xff] %v5265_v62 }
 0x2fc   : > { %v2069_v4 = vpop.f32.mrf.mxu2 }
 0x2fd   : > { %v5278_v31 = vadd.f32 %v5184_v8, %v2069_v4  ;;  %v2022_v25 = vpop.f32.mrf.mxu0  ;;  %v2047_v3 = vpop.f32.mrf.mxu1 }
 0x2fe   : > { %v5281_v60 = vadd.f32 %v5184_v8, %v2022_v25  ;;  %v5284_v48 = vadd.f32 %v5184_v8, %v2047_v3  ;;  %v2511_v3 = vadd.f32 %v2464_v44, %v2463_v55 }
 0x2ff   : > { %2152 = vst [vmem:[%s5189_s22 + $0xc8] sm:$0xff] %v5278_v31 }
 0x300   : > { %2133 = vst [vmem:[%s5189_s22 + $0x30] sm:$0xff] %v5281_v60  ;;  %v2512_v56 = vadd.f32 %v2511_v3, %v2465_v53  ;;  %v2570_v9 = vmul.f32 %v5281_v60, %v5281_v60  ;;  %v2469_v53 = vmul.f32 %v5226_v57, %v5281_v60 }
 0x301   : > { %2143 = vst [vmem:[%s5189_s22 + $0x80] sm:$0xff] %v5284_v48 }
 0x302   : > { %v2513_v39 = vadd.f32 %v2512_v56, %v2466_v33  ;;  %v5418_v33 = vpop.permute.xlu0 %2340 }
 0x304   : > { %v2072_v50 = vpop.f32.mrf.mxu2  ;;  %v2097_v17 = vpop.f32.mrf.mxu3 }
 0x305   : > { %v5297_v23 = vadd.f32 %v5184_v8, %v2072_v50  ;;  %v5300_v59 = vadd.f32 %v5184_v8, %v2097_v17  ;;  %v2024_v36 = vpop.f32.mrf.mxu0  ;;  %v2049_v35 = vpop.f32.mrf.mxu1  ;;  %v2660_v50 = vadd.f32 %v2613_v1, %v2612_v61  ;;  %v2468_v1 = vmul.f32 %v5220_v37, %v5262_v22 }
 0x306   : > { %v5303_v15 = vadd.f32 %v5184_v8, %v2024_v36  ;;  %v5306_v28 = vadd.f32 %v5184_v8, %v2049_v35  ;;  %v2615_v36 = vmul.f32 %v2567_v45, %v5210_v54  ;;  %v5387_v54 = vpop.permute.xlu1 %2330  ;;  %v5396_v45 = vpop.permute.xlu2 %2335 }
 0x307   : > { %2153 = vst [vmem:[%s5189_s22 + $0xd0] sm:$0xff] %v5297_v23 }
 0x308   : > { %2163 = vst [vmem:[%s5189_s22 + $0x120] sm:$0xff] %v5300_v59  ;;  %v2470_v60 = vmul.f32 %v5234_v34, %v5303_v15 }
 0x309   : > { %2134 = vst [vmem:[%s5189_s22 + $0x38] sm:$0xff] %v5303_v15 }
 0x30a   : > { %2144 = vst [vmem:[%s5189_s22 + $0x88] sm:$0xff] %v5306_v28 }
 0x30c   : > { %v2074_v19 = vpop.f32.mrf.mxu2  ;;  %v2099_v16 = vpop.f32.mrf.mxu3 }
 0x30d   : > { %v5323_v47 = vadd.f32 %v5184_v8, %v2074_v19  ;;  %v5326_v42 = vadd.f32 %v5184_v8, %v2099_v16  ;;  %v2027_v40 = vpop.f32.mrf.mxu0  ;;  %v2052_v51 = vpop.f32.mrf.mxu1  ;;  %v2569_v16 = vmul.f32 %v5262_v22, %v5262_v22 }
 0x30e   : > { %v5329_v49 = vadd.f32 %v5184_v8, %v2027_v40  ;;  %v5332_v13 = vadd.f32 %v5184_v8, %v2052_v51  ;;  %v2661_v40 = vadd.f32 %v2660_v50, %v2614_v58  ;;  %v2467_v51 = vmul.f32 %v5212_v38, %v5243_v46 }
 0x30f   : > { %2154 = vst [vmem:[%s5189_s22 + $0xd8] sm:$0xff] %v5323_v47  ;;  %v2617_v46 = vmul.f32 %v2569_v16, %v5220_v37  ;;  %v2571_v38 = vmul.f32 %v5303_v15, %v5303_v15 }
 0x310   : > { %2164 = vst [vmem:[%s5189_s22 + $0x128] sm:$0xff] %v5326_v42  ;;  %v2662_v44 = vadd.f32 %v2661_v40, %v2615_v36  ;;  %v2514_v55 = vadd.f32 %v2513_v39, %v2467_v51  ;;  %v2572_v22 = vmul.f32 %v5329_v49, %v5329_v49  ;;  %v2471_v40 = vmul.f32 %v5240_v20, %v5329_v49 }
 0x311   : > { %2135 = vst [vmem:[%s5189_s22 + $0x40] sm:$0xff] %v5329_v49  ;;  %v2619_v16 = vmul.f32 %v2571_v38, %v5234_v34  ;;  %v5432_v34 = vpop.permute.xlu1 %2345 }
 0x312   : > { %2145 = vst [vmem:[%s5189_s22 + $0x90] sm:$0xff] %v5332_v13  ;;  %v2663_v61 = vadd.f32 %v2662_v44, %v2616_v63  ;;  %v2620_v63 = vmul.f32 %v2572_v22, %v5240_v20 }
 0x314   : > { %v2077_v4 = vpop.f32.mrf.mxu2  ;;  %v2102_v25 = vpop.f32.mrf.mxu3  ;;  %v2664_v36 = vadd.f32 %v2663_v61, %v2617_v46 }
 0x315   : > { %v5366_v17 = vadd.f32 %v5184_v8, %v2077_v4  ;;  %v5369_v6 = vadd.f32 %v5184_v8, %v2102_v25  ;;  %v2029_v7 = vpop.f32.mrf.mxu0  ;;  %v2054_v30 = vpop.f32.mrf.mxu1  ;;  %v2618_v4 = vmul.f32 %v2570_v9, %v5226_v57 }
 0x316   : > { %v2030_v35 = vadd.f32 %v5184_v8, %v2029_v7  ;;  %v5376_v19 = vadd.f32 %v5184_v8, %v2054_v30  ;;  %v2515_v7 = vadd.f32 %v2514_v55, %v2468_v1 }
 0x317   : > { %2155 = vst [vmem:[%s5189_s22 + $0xe0] sm:$0xff] %v5366_v17  ;;  %v2665_v15 = vadd.f32 %v2664_v36, %v2618_v4 }
 0x318   : > { %2165 = vst [vmem:[%s5189_s22 + $0x130] sm:$0xff] %v5369_v6  ;;  %v2516_v56 = vadd.f32 %v2515_v7, %v2469_v53  ;;  %v2573_v51 = vmul.f32 %v2030_v35, %v2030_v35  ;;  %v2472_v39 = vmul.f32 %v5248_v21, %v2030_v35  ;;  %v2576_v7 = vmul.f32 %v5218_v24, %v5218_v24 }
 0x319   : > { %2136 = vst [vmem:[%s5189_s22 + $0x48] sm:$0xff] %v2030_v35  ;;  %v2666_v1 = vadd.f32 %v2665_v15, %v2619_v16  ;;  %v5456_v16 = vpop.permute.xlu0 %2355 }
 0x31a   : > { %2146 = vst [vmem:[%s5189_s22 + $0x98] sm:$0xff] %v5376_v19  ;;  %v2517_v9 = vadd.f32 %v2516_v56, %v2470_v60  ;;  %v2621_v49 = vmul.f32 %v2573_v51, %v5248_v21  ;;  %v2577_v56 = vmul.f32 %v5232_v29, %v5232_v29 }
 0x31b   : > { %v2667_v20 = vadd.f32 %v2666_v1, %v2620_v63 }
 0x31c   : > { %v2079_v58 = vpop.f32.mrf.mxu2  ;;  %v2104_v10 = vpop.f32.mrf.mxu3  ;;  %v2518_v46 = vadd.f32 %v2517_v9, %v2471_v40  ;;  %v2475_v40 = vmul.f32 %v5271_v43, %v5218_v24  ;;  %v2624_v9 = vmul.f32 %v2576_v7, %v5271_v43  ;;  %v2625_v24 = vmul.f32 %v2577_v56, %v5275_v12 }
 0x31d   : > { %v5407_v25 = vadd.f32 %v5184_v8, %v2079_v58  ;;  %v5410_v37 = vadd.f32 %v5184_v8, %v2104_v10  ;;  %v2032_v3 = vpop.f32.mrf.mxu0  ;;  %v2057_v50 = vpop.f32.mrf.mxu1  ;;  %v2668_v60 = vadd.f32 %v2667_v20, %v2621_v49 }
 0x31e   : > { %v2033_v30 = vadd.f32 %v5184_v8, %v2032_v3  ;;  %v5416_v57 = vadd.f32 %v5184_v8, %v2057_v50  ;;  %v2519_v4 = vadd.f32 %v2518_v46, %v2472_v39  ;;  %v5447_v50 = vpop.permute.xlu2 %2350  ;;  %v2476_v39 = vmul.f32 %v5275_v12, %v5232_v29  ;;  %v5483_v12 = vpop.permute.xlu1 %2360 }
 0x31f   : > { %2156 = vst [vmem:[%s5189_s22 + $0xe8] sm:$0xff] %v5407_v25 }
 0x320   : > { %2166 = vst [vmem:[%s5189_s22 + $0x138] sm:$0xff] %v5410_v37  ;;  %v2574_v44 = vmul.f32 %v2033_v30, %v2033_v30  ;;  %v2473_v38 = vmul.f32 %v5254_v0, %v2033_v30 }
 0x321   : > { %2137 = vst [vmem:[%s5189_s22 + $0x50] sm:$0xff] %v2033_v30 }
 0x322   : > { %2147 = vst [vmem:[%s5189_s22 + $0xa0] sm:$0xff] %v5416_v57  ;;  %v2622_v22 = vmul.f32 %v2574_v44, %v5254_v0  ;;  %v2520_v30 = vadd.f32 %v2519_v4, %v2473_v38  ;;  %v2578_v44 = vmul.f32 %v5246_v11, %v5246_v11 }
 0x324   : > { %v2082_v55 = vpop.f32.mrf.mxu2  ;;  %v2107_v61 = vpop.f32.mrf.mxu3  ;;  %v2669_v51 = vadd.f32 %v2668_v60, %v2622_v22  ;;  %v2626_v4 = vmul.f32 %v2578_v44, %v5286_v27  ;;  %v2478_v22 = vmul.f32 %v5294_v52, %v5265_v62  ;;  %v2481_v44 = vmul.f32 %v5334_v5, %v5332_v13 }
 0x325   : > { %v5437_v53 = vadd.f32 %v5184_v8, %v2082_v55  ;;  %v5440_v35 = vadd.f32 %v5184_v8, %v2107_v61  ;;  %v2034_v58 = vpop.f32.mrf.mxu0  ;;  %v2059_v10 = vpop.f32.mrf.mxu1  ;;  %v2579_v61 = vmul.f32 %v5265_v62, %v5265_v62 }
 0x326   : > { %v2035_v21 = vadd.f32 %v5184_v8, %v2034_v58  ;;  %v5445_v3 = vadd.f32 %v5184_v8, %v2059_v10  ;;  %v5494_v60 = vpop.permute.xlu2 %2365 }
 0x327   : > { %2157 = vst [vmem:[%s5189_s22 + $0xf0] sm:$0xff] %v5437_v53 }
 0x328   : > { %2167 = vst [vmem:[%s5189_s22 + $0x140] sm:$0xff] %v5440_v35  ;;  %v2474_v36 = vmul.f32 %v5256_v26, %v2035_v21  ;;  %v2575_v0 = vmul.f32 %v2035_v21, %v2035_v21 }
 0x329   : > { %2138 = vst [vmem:[%s5189_s22 + $0x58] sm:$0xff] %v2035_v21 }
 0x32a   : > { %v2521_v15 = vadd.f32 %v2520_v30, %v2474_v36  ;;  %v2623_v63 = vmul.f32 %v2575_v0, %v5256_v26  ;;  %2148 = vst [vmem:[%s5189_s22 + $0xa8] sm:$0xff] %v5445_v3  ;;  %v2477_v26 = vmul.f32 %v5286_v27, %v5246_v11  ;;  %v2580_v11 = vmul.f32 %v5284_v48, %v5284_v48 }
 0x32b   : > { %v2581_v30 = vmul.f32 %v5306_v28, %v5306_v28  ;;  %v2627_v36 = vmul.f32 %v2579_v61, %v5294_v52  ;;  %v2479_v0 = vmul.f32 %v5308_v14, %v5284_v48 }
 0x32c   : > { %v2522_v1 = vadd.f32 %v2521_v15, %v2475_v40  ;;  %v2670_v46 = vadd.f32 %v2669_v51, %v2623_v63  ;;  %v2084_v49 = vpop.f32.mrf.mxu2  ;;  %v2109_v38 = vpop.f32.mrf.mxu3  ;;  %v2628_v62 = vmul.f32 %v2580_v11, %v5308_v14  ;;  %v2480_v51 = vmul.f32 %v5314_v2, %v5306_v28 }
 0x32d   : > { %v5475_v55 = vadd.f32 %v5184_v8, %v2084_v49  ;;  %v5478_v43 = vadd.f32 %v5184_v8, %v2109_v38  ;;  %v2062_v29 = vpop.f32.mrf.mxu1  ;;  %v5502_v40 = vpop.permute.xlu0 %2370  ;;  %v2582_v15 = vmul.f32 %v5332_v13, %v5332_v13  ;;  %v2629_v48 = vmul.f32 %v2581_v30, %v5314_v2 }
 0x32e   : > { %v2523_v20 = vadd.f32 %v2522_v1, %v2476_v39  ;;  %v2671_v58 = vadd.f32 %v2670_v46, %v2624_v9  ;;  %v2063_v10 = vadd.f32 %v5184_v8, %v2062_v29  ;;  %v2583_v46 = vmul.f32 %v5376_v19, %v5376_v19 }
 0x32f   : > { %2158 = vst [vmem:[%s5189_s22 + $0xf8] sm:$0xff] %v5475_v55  ;;  %v2584_v2 = vmul.f32 %v5416_v57, %v5416_v57  ;;  %v2630_v13 = vmul.f32 %v2582_v15, %v5334_v5 }
 0x330   : > { %v2524_v21 = vadd.f32 %v2523_v20, %v2477_v26  ;;  %v2672_v7 = vadd.f32 %v2671_v58, %v2625_v24  ;;  %2168 = vst [vmem:[%s5189_s22 + $0x148] sm:$0xff] %v5478_v43  ;;  %v2482_v26 = vmul.f32 %v5344_v32, %v5376_v19  ;;  %v5530_v20 = vpop.permute.xlu1 %2375  ;;  %v2585_v58 = vmul.f32 %v5445_v3, %v5445_v3 }
 0x331   : > { %2149 = vst [vmem:[%s5189_s22 + $0xb0] sm:$0xff] %v2063_v10  ;;  %v2631_v11 = vmul.f32 %v2583_v46, %v5344_v32  ;;  %v2632_v19 = vmul.f32 %v2584_v2, %v5355_v18 }
 0x332   : > { %v2525_v56 = vadd.f32 %v2524_v21, %v2478_v22  ;;  %v2673_v27 = vadd.f32 %v2672_v7, %v2626_v4  ;;  %v2483_v4 = vmul.f32 %v5355_v18, %v5416_v57  ;;  %v5538_v21 = vpop.permute.xlu2 %2380  ;;  %v2484_v7 = vmul.f32 %v5387_v54, %v5445_v3 }
 0x333   : > { %v2633_v57 = vmul.f32 %v2585_v58, %v5387_v54  ;;  %v2485_v3 = vmul.f32 %v5396_v45, %v2063_v10 }
 0x334   : > { %v2674_v63 = vadd.f32 %v2673_v27, %v2627_v36  ;;  %v2526_v9 = vadd.f32 %v2525_v56, %v2479_v0  ;;  %v2087_v39 = vpop.f32.mrf.mxu2  ;;  %v2112_v52 = vpop.f32.mrf.mxu3  ;;  %v2586_v0 = vmul.f32 %v2063_v10, %v2063_v10  ;;  %v2487_v10 = vmul.f32 %v5432_v34, %v5259_v41 }
 0x335   : > { %v5513_v1 = vadd.f32 %v5184_v8, %v2087_v39  ;;  %v5516_v28 = vadd.f32 %v5184_v8, %v2112_v52  ;;  %v2064_v14 = vpop.f32.mrf.mxu1  ;;  %v5543_v32 = vpop.permute.xlu0 %2385 }
 0x336   : > { %v2527_v49 = vadd.f32 %v2526_v9, %v2480_v51  ;;  %v2675_v38 = vadd.f32 %v2674_v63, %v2628_v62  ;;  %v2065_v24 = vadd.f32 %v5184_v8, %v2064_v14  ;;  %v2588_v9 = vmul.f32 %v5259_v41, %v5259_v41 }
 0x337   : > { %2159 = vst [vmem:[%s5189_s22 + $0x100] sm:$0xff] %v5513_v1  ;;  %v2634_v54 = vmul.f32 %v2586_v0, %v5396_v45  ;;  %v2488_v45 = vmul.f32 %v5447_v50, %v5278_v31 }
 0x338   : > { %v2528_v29 = vadd.f32 %v2527_v49, %v2481_v44  ;;  %v2676_v61 = vadd.f32 %v2675_v38, %v2629_v48  ;;  %2169 = vst [vmem:[%s5189_s22 + $0x150] sm:$0xff] %v5516_v28  ;;  %v2587_v63 = vmul.f32 %v2065_v24, %v2065_v24  ;;  %v2486_v48 = vmul.f32 %v5418_v33, %v2065_v24  ;;  %v5566_v38 = vpop.permute.xlu1 %2390 }
 0x339   : > { %2150 = vst [vmem:[%s5189_s22 + $0xb8] sm:$0xff] %v2065_v24  ;;  %v2589_v44 = vmul.f32 %v5278_v31, %v5278_v31  ;;  %v2636_v2 = vmul.f32 %v2588_v9, %v5432_v34  ;;  %v2590_v24 = vmul.f32 %v5297_v23, %v5297_v23  ;;  %v2489_v31 = vmul.f32 %v5456_v16, %v5297_v23 }
 0x33a   : > { %v2529_v22 = vadd.f32 %v2528_v29, %v2482_v26  ;;  %v2677_v5 = vadd.f32 %v2676_v61, %v2630_v13  ;;  %v2635_v49 = vmul.f32 %v2587_v63, %v5418_v33  ;;  %v5573_v41 = vpop.permute.xlu2 %2395  ;;  %v2593_v23 = vmul.f32 %v5407_v25, %v5407_v25 }
 0x33b   : > { %v2637_v33 = vmul.f32 %v2589_v44, %v5447_v50  ;;  %v2638_v50 = vmul.f32 %v2590_v24, %v5456_v16  ;;  %v2492_v16 = vmul.f32 %v5502_v40, %v5407_v25  ;;  %v2493_v25 = vmul.f32 %v5530_v20, %v5437_v53 }
 0x33c   : > { %v2530_v30 = vadd.f32 %v2529_v22, %v2483_v4  ;;  %v2678_v36 = vadd.f32 %v2677_v5, %v2631_v11  ;;  %v2089_v56 = vpop.f32.mrf.mxu2  ;;  %v2114_v27 = vpop.f32.mrf.mxu3  ;;  %v2591_v11 = vmul.f32 %v5323_v47, %v5323_v47  ;;  %v2495_v24 = vmul.f32 %v5543_v32, %v5513_v1 }
 0x33d   : > { %v5547_v62 = vadd.f32 %v5184_v8, %v2089_v56  ;;  %v5550_v51 = vadd.f32 %v5184_v8, %v2114_v27  ;;  %v5584_v5 = vpop.permute.xlu0 %2400  ;;  %v2491_v56 = vmul.f32 %v5494_v60, %v5366_v17 }
 0x33e   : > { %v2531_v18 = vadd.f32 %v2530_v30, %v2484_v7  ;;  %v2679_v15 = vadd.f32 %v2678_v36, %v2632_v19  ;;  %v2592_v19 = vmul.f32 %v5366_v17, %v5366_v17  ;;  %v2490_v7 = vmul.f32 %v5483_v12, %v5323_v47 }
 0x33f   : > { %2160 = vst [vmem:[%s5189_s22 + $0x108] sm:$0xff] %v5547_v62  ;;  %v2639_v0 = vmul.f32 %v2591_v11, %v5483_v12  ;;  %v2594_v47 = vmul.f32 %v5437_v53, %v5437_v53 }
 0x340   : > { %v2680_v39 = vadd.f32 %v2679_v15, %v2633_v57  ;;  %v2532_v52 = vadd.f32 %v2531_v18, %v2485_v3  ;;  %2170 = vst [vmem:[%s5189_s22 + $0x158] sm:$0xff] %v5550_v51  ;;  %v2640_v18 = vmul.f32 %v2592_v19, %v5494_v60  ;;  %v2406_v12 = vpop.permute.xlu1 %2405  ;;  %v2595_v60 = vmul.f32 %v5475_v55, %v5475_v55 }
 0x342   : > { %v2681_v14 = vadd.f32 %v2680_v39, %v2634_v54  ;;  %v2533_v46 = vadd.f32 %v2532_v52, %v2486_v48  ;;  %v2641_v39 = vmul.f32 %v2593_v23, %v5502_v40  ;;  %v2411_v44 = vpop.permute.xlu2 %2410  ;;  %v2642_v40 = vmul.f32 %v2594_v47, %v5530_v20 }
 0x343   : > { %v2601_v23 = vmul.f32 %v5326_v42, %v5326_v42 }
 0x344   : > { %v2534_v13 = vadd.f32 %v2533_v46, %v2487_v10  ;;  %v2682_v26 = vadd.f32 %v2681_v14, %v2635_v49  ;;  %v2092_v29 = vpop.f32.mrf.mxu2  ;;  %v2117_v61 = vpop.f32.mrf.mxu3  ;;  %v2596_v10 = vmul.f32 %v5513_v1, %v5513_v1  ;;  %v2494_v14 = vmul.f32 %v5538_v21, %v5475_v55 }
 0x345   : > { %v2093_v58 = vadd.f32 %v5184_v8, %v2092_v29  ;;  %v5578_v34 = vadd.f32 %v5184_v8, %v2117_v61  ;;  %v2416_v53 = vpop.permute.xlu0 %2415  ;;  %v2496_v55 = vmul.f32 %v5566_v38, %v5547_v62 }
 0x346   : > { %v2535_v4 = vadd.f32 %v2534_v13, %v2488_v45  ;;  %v2683_v22 = vadd.f32 %v2682_v26, %v2636_v2  ;;  %v2597_v2 = vmul.f32 %v5547_v62, %v5547_v62  ;;  %v2643_v45 = vmul.f32 %v2595_v60, %v5538_v21 }
 0x347   : > { %2161 = vst [vmem:[%s5189_s22 + $0x110] sm:$0xff] %v2093_v58  ;;  %v2644_v20 = vmul.f32 %v2596_v10, %v5543_v32  ;;  %v2497_v1 = vmul.f32 %v5573_v41, %v2093_v58  ;;  %v2600_v32 = vmul.f32 %v5300_v59, %v5300_v59 }
 0x348   : > { %v2536_v30 = vadd.f32 %v2535_v4, %v2489_v31  ;;  %v2684_v36 = vadd.f32 %v2683_v22, %v2637_v33  ;;  %2171 = vst [vmem:[%s5189_s22 + $0x160] sm:$0xff] %v5578_v34  ;;  %v2598_v33 = vmul.f32 %v2093_v58, %v2093_v58  ;;  %v2645_v11 = vmul.f32 %v2597_v2, %v5566_v38 }
 0x34a   : > { %v2537_v27 = vadd.f32 %v2536_v30, %v2490_v7  ;;  %v2685_v57 = vadd.f32 %v2684_v36, %v2638_v50  ;;  %v2421_v50 = vpop.permute.xlu1 %2420  ;;  %v2646_v30 = vmul.f32 %v2598_v33, %v5573_v41  ;;  %v2426_v36 = vpop.permute.xlu2 %2425  ;;  %v2602_v41 = vmul.f32 %v5369_v6, %v5369_v6 }
 0x34c   : > { %v2686_v15 = vadd.f32 %v2685_v57, %v2639_v0  ;;  %v2538_v3 = vadd.f32 %v2537_v27, %v2491_v56  ;;  %v2094_v63 = vpop.f32.mrf.mxu2  ;;  %v2119_v9 = vpop.f32.mrf.mxu3  ;;  %v2499_v0 = vmul.f32 %v2406_v12, %v5300_v59  ;;  %v2501_v59 = vmul.f32 %v2416_v53, %v5369_v6 }
 0x34d   : > { %v2095_v17 = vadd.f32 %v5184_v8, %v2094_v63  ;;  %v5607_v52 = vadd.f32 %v5184_v8, %v2119_v9  ;;  %v2431_v57 = vpop.permute.xlu0 %2430  ;;  %v2649_v63 = vmul.f32 %v2601_v23, %v2411_v44  ;;  %v2503_v6 = vmul.f32 %v2426_v36, %v5440_v35 }
 0x34e   : > { %v2539_v54 = vadd.f32 %v2538_v3, %v2492_v16  ;;  %v2687_v48 = vadd.f32 %v2686_v15, %v2640_v18  ;;  %v2648_v18 = vmul.f32 %v2600_v32, %v2406_v12  ;;  %v2500_v16 = vmul.f32 %v2411_v44, %v5326_v42 }
 0x34f   : > { %2162 = vst [vmem:[%s5189_s22 + $0x118] sm:$0xff] %v2095_v17  ;;  %v2599_v19 = vmul.f32 %v2095_v17, %v2095_v17  ;;  %v2498_v38 = vmul.f32 %v5584_v5, %v2095_v17  ;;  %v2604_v12 = vmul.f32 %v5440_v35, %v5440_v35  ;;  %v2650_v42 = vmul.f32 %v2602_v41, %v2416_v53 }
 0x350   : > { %v2540_v46 = vadd.f32 %v2539_v54, %v2493_v25  ;;  %v2688_v49 = vadd.f32 %v2687_v48, %v2641_v39  ;;  %2172 = vst [vmem:[%s5189_s22 + $0x168] sm:$0xff] %v5607_v52  ;;  %v2603_v39 = vmul.f32 %v5410_v37, %v5410_v37  ;;  %v2502_v25 = vmul.f32 %v2421_v50, %v5410_v37 }
 0x351   : > { %v2647_v27 = vmul.f32 %v2599_v19, %v5584_v5  ;;  %v2606_v53 = vmul.f32 %v5516_v28, %v5516_v28 }
 0x352   : > { %v2541_v13 = vadd.f32 %v2540_v46, %v2494_v14  ;;  %v2689_v26 = vadd.f32 %v2688_v49, %v2642_v40  ;;  %v2436_v48 = vpop.permute.xlu1 %2435  ;;  %v2651_v44 = vmul.f32 %v2603_v39, %v2421_v50  ;;  %v2441_v14 = vpop.permute.xlu2 %2440  ;;  %v2652_v46 = vmul.f32 %v2604_v12, %v2426_v36 }
 0x353   : > { %v2504_v49 = vmul.f32 %v2431_v57, %v5478_v43 }
 0x354   : > { %v2542_v29 = vadd.f32 %v2541_v13, %v2495_v24  ;;  %v2690_v61 = vadd.f32 %v2689_v26, %v2643_v45  ;;  %v2122_v31 = vpop.f32.mrf.mxu3  ;;  %v2505_v13 = vmul.f32 %v2436_v48, %v5516_v28  ;;  %v2607_v26 = vmul.f32 %v5550_v51, %v5550_v51 }
 0x355   : > { %v5631_v4 = vadd.f32 %v5184_v8, %v2122_v31  ;;  %v2446_v45 = vpop.permute.xlu0 %2445  ;;  %v2609_v31 = vmul.f32 %v5607_v52, %v5607_v52 }
 0x356   : > { %v2543_v21 = vadd.f32 %v2542_v29, %v2496_v55  ;;  %v2691_v22 = vadd.f32 %v2690_v61, %v2644_v20  ;;  %v2608_v55 = vmul.f32 %v5578_v34, %v5578_v34  ;;  %v2654_v29 = vmul.f32 %v2606_v53, %v2436_v48 }
 0x357   : > { %2173 = vst [vmem:[%s5189_s22 + $0x170] sm:$0xff] %v5631_v4 }
 0x358   : > { %v2692_v62 = vadd.f32 %v2691_v22, %v2645_v11  ;;  %v2544_v7 = vadd.f32 %v2543_v21, %v2497_v1  ;;  %v2655_v11 = vmul.f32 %v2607_v26, %v2441_v14  ;;  %v2507_v21 = vmul.f32 %v2446_v45, %v5578_v34 }
 0x359   : > { %v2656_v19 = vmul.f32 %v2608_v55, %v2446_v45 }
 0x35a   : > { %v2693_v58 = vadd.f32 %v2692_v62, %v2646_v30  ;;  %v2545_v56 = vadd.f32 %v2544_v7, %v2498_v38  ;;  %v2451_v1 = vpop.permute.xlu1 %2450  ;;  %v2610_v7 = vmul.f32 %v5631_v4, %v5631_v4 }
 0x35b   : > { %v2508_v50 = vmul.f32 %v2451_v1, %v5607_v52  ;;  %v2657_v30 = vmul.f32 %v2609_v31, %v2451_v1 }
 0x35c   : > { %v2546_v47 = vadd.f32 %v2545_v56, %v2499_v0  ;;  %v2694_v15 = vadd.f32 %v2693_v58, %v2647_v27  ;;  %v2124_v3 = vpop.f32.mrf.mxu3 }
 0x35d   : > { %v2125_v9 = vadd.f32 %v5184_v8, %v2124_v3  ;;  %v2605_v8 = vmul.f32 %v5478_v43, %v5478_v43  ;;  %v2506_v43 = vmul.f32 %v2441_v14, %v5550_v51  ;;  %v2456_v51 = vpop.permute.xlu2 %2455  ;;  %v2461_v58 = vpop.permute.xlu0 %2460 }
 0x35e   : > { %v2547_v17 = vadd.f32 %v2546_v47, %v2500_v16  ;;  %v2695_v5 = vadd.f32 %v2694_v15, %v2648_v18  ;;  %v2509_v23 = vmul.f32 %v2456_v51, %v5631_v4  ;;  %v2658_v27 = vmul.f32 %v2610_v7, %v2456_v51 }
 0x35f   : > { %2174 = vst [vmem:[%s5189_s22 + $0x178] sm:$0xff] %v2125_v9  ;;  %v2653_v24 = vmul.f32 %v2605_v8, %v2431_v57  ;;  %v2611_v0 = vmul.f32 %v2125_v9, %v2125_v9  ;;  %v2510_v57 = vmul.f32 %v2461_v58, %v2125_v9 }
 0x360   : > { %v2548_v60 = vadd.f32 %v2547_v17, %v2501_v59  ;;  %v2696_v54 = vadd.f32 %v2695_v5, %v2649_v63 }
 0x361   : > { %v2659_v16 = vmul.f32 %v2611_v0, %v2461_v58 }
 0x362   : > { %v2549_v10 = vadd.f32 %v2548_v60, %v2502_v25  ;;  %v2697_v40 = vadd.f32 %v2696_v54, %v2650_v42 }
 0x364   : > { %v2698_v2 = vadd.f32 %v2697_v40, %v2651_v44  ;;  %v2550_v37 = vadd.f32 %v2549_v10, %v2503_v6 }
 0x366   : > { %v2551_v20 = vadd.f32 %v2550_v37, %v2504_v49  ;;  %v2699_v35 = vadd.f32 %v2698_v2, %v2652_v46 }
 0x368   : > { %v2552_v61 = vadd.f32 %v2551_v20, %v2505_v13  ;;  %v2700_v33 = vadd.f32 %v2699_v35, %v2653_v24 }
 0x36a   : > { %v2553_v28 = vadd.f32 %v2552_v61, %v2506_v43  ;;  %v2701_v22 = vadd.f32 %v2700_v33, %v2654_v29 }
 0x36c   : > { %v2554_v32 = vadd.f32 %v2553_v28, %v2507_v21  ;;  %v2702_v62 = vadd.f32 %v2701_v22, %v2655_v11 }
 0x36e   : > { %v2555_v38 = vadd.f32 %v2554_v32, %v2508_v50  ;;  %v2703_v36 = vadd.f32 %v2702_v62, %v2656_v19 }
 0x370   : > { %v2704_v34 = vadd.f32 %v2703_v36, %v2657_v30  ;;  %v2556_v56 = vadd.f32 %v2555_v38, %v2509_v23 }
 0x372   : > { %v2705_v18 = vadd.f32 %v2704_v34, %v2658_v27  ;;  %v2557_v52 = vadd.f32 %v2556_v56, %v2510_v57 }
 0x374   : > { %v2558_v41 = vrot.slane %v2557_v52, 4  ;;  %v2706_v47 = vadd.f32 %v2705_v18, %v2659_v16 }
 0x376   : > { %v2559_v15 = vadd.f32 %v2558_v41, %v2557_v52  ;;  %v2707_v3 = vrot.slane %v2706_v47, 4 }
 0x378   : > { %v2560_v63 = vrot.slane %v2559_v15, 2  ;;  %v2708_v59 = vadd.f32 %v2707_v3, %v2706_v47 }
 0x37a   : > { %v2561_v39 = vadd.f32 %v2560_v63, %v2559_v15  ;;  %v2709_v17 = vrot.slane %v2708_v59, 2 }
 0x37c   : > { %v2562_v5 = vrot.slane %v2561_v39, 1  ;;  %v2710_v4 = vadd.f32 %v2709_v17, %v2708_v59 }
 0x37e   : > { %v2711_v12 = vrot.slane %v2710_v4, 1  ;;  %v2563_v9 = vadd.f32 %v2562_v5, %v2561_v39 }
 0x380   : > { %v2712_v42 = vadd.f32 %v2711_v12, %v2710_v4 }
 0x382   : > { %v2714_v25 = vsel %vm2713_vm14, %v2563_v9, %v2712_v42 }
 0x383   : > { %2715 = vst [vmem:[%s456_s30] sm:$0x3] %v2714_v25 }
 0x384 PF: > { %s18_s26 = sadd.s32 1, %s3173_s26   ;;  %s6067_s24 = smov %s3169_s25 }
 0x385   : > { %p15_p5 = scmp.ge.s32.totalorder %s18_s26, 4   ;;  %s6068_s25 = smov %s6070_s27 }
 0x387   :  { %17 = sbr.rel (!%p15_p5) target bundleno = 2 (0x2), region = 92 }

</bundles_post_ra>
